<compile_context>
chip_gen: v6e
topology: v6e:2x2x1
jax: 0.10.0
libtpu: 0.0.40
codegen_flags: <defaults>
</compile_context>

<pallas_src>
import jax
import jax.numpy as jnp
from jax.experimental import pallas as pl
from jax.experimental.pallas import tpu as pltpu

BN_EPS = 1e-5
LANE = 128
MXU_DTYPE = jnp.bfloat16     # MXU operand dtype; accumulation stays f32.


def _round_up(x, m):
    return (x + m - 1) // m * m


def _full_spec(shape):
    """BlockSpec covering the whole array (single grid step)."""
    nd = len(shape)
    return pl.BlockSpec(shape, lambda i, _nd=nd: (0,) * _nd)


# ---------------------------------------------------------------------------
# The fused kernel: conv/BN/ReLU x3 + SpatialSoftArgmax + FC decoder.
# ---------------------------------------------------------------------------
def make_fused_kernel(nt, g, wa, grid_w, coutp, stages, inv_temp, use_tanh):
    """stages: tuple of (cin_rows, kernel_size, inv_valid_count) per stage."""

    def kernel(x_ref, w1_ref, w2_ref, w3_ref, b_ref, gm_ref, bt_ref,
               mask_ref, cx_ref, cy_ref, ms_ref, wx_ref, wy_ref, bfc_ref,
               o_ref, act_a, act_b, stack):
        w_refs = (w1_ref, w2_ref, w3_ref)

        # Zero the activation scratch once so shifted reads past the active
        # width WA always see zeros (keeps BN stats finite at masked posns).
        act_a[...] = jnp.zeros_like(act_a)
        act_b[...] = jnp.zeros_like(act_b)

        def conv_stage(sidx, src_ref, src_is_bf16, dst_ref):
            cin, k, inv_count = stages[sidx]
            nrows = k * k * cin

            # Build the shifted-channel stack (bf16), tap-major rows.
            for di in range(k):                       # static, unrolled
                for dj in range(k):
                    tap = di * k + dj
                    sh = di * grid_w + dj
                    v = src_ref[pl.ds(0, cin), pl.ds(sh, wa)]
                    if not src_is_bf16:
                        v = v.astype(MXU_DTYPE)
                    stack[pl.ds(tap * cin, cin), :] = v

            # One MXU matmul per stage: (coutp, K) x (K, WA) -> f32.
            acc = jnp.dot(w_refs[sidx][...], stack[pl.ds(0, nrows), :],
                          preferred_element_type=jnp.float32)
            acc = acc + b_ref[sidx]                   # conv bias, (coutp, 1)

            # BatchNorm2d (training mode): one-pass biased stats over the
            # valid positions of this stage only (mask is 0/1).
            m = mask_ref[pl.ds(sidx, 1), :]           # (1, WA)
            am = acc * m
            s1 = jnp.sum(am, axis=1, keepdims=True)
            s2 = jnp.sum(am * acc, axis=1, keepdims=True)
            mean = s1 * inv_count
            var = s2 * inv_count - mean * mean
            y = gm_ref[sidx] * ((acc - mean) * jax.lax.rsqrt(var + BN_EPS))
            y = y + bt_ref[sidx]
            y = jnp.maximum(y, 0.0) * m               # ReLU, zero invalid

            if dst_ref is None:
                return y
            dst_ref[:, pl.ds(0, wa)] = y
            return None

        conv_stage(0, x_ref, True, act_a)             # 7x7/s2 (as 4x4/s1 s2d)
        conv_stage(1, act_a, False, act_b)            # 5x5
        y3 = conv_stage(2, act_b, False, None)        # 5x5 -> (coutp, WA) f32

        # SpatialSoftArgmax + FC decoder, per image (lane-aligned G slices).
        mvalid = ms_ref[...] > 0.0                    # (1, G)
        cx = cx_ref[...]
        cy = cy_ref[...]
        for img in range(nt):                         # static, unrolled
            f = y3[:, img * g:(img + 1) * g]          # (coutp, G), 128-aligned
            z = jnp.where(mvalid, f * inv_temp, jnp.float32(-1e30))
            z = z - jnp.max(z, axis=-1, keepdims=True)
            e = jnp.exp(z)
            p = e / jnp.sum(e, axis=-1, keepdims=True)
            ex = jnp.sum(p * cx, axis=-1, keepdims=True)   # (coutp, 1)
            ey = jnp.sum(p * cy, axis=-1, keepdims=True)   # (coutp, 1)
            row = (jnp.sum(ex * wx_ref[...], axis=0, keepdims=True)
                   + jnp.sum(ey * wy_ref[...], axis=0, keepdims=True)
                   + bfc_ref[...])                         # (1, out_feat)
            out = jnp.tanh(row) if use_tanh else 1.0 / (1.0 + jnp.exp(-row))
            o_ref[pl.ds(img, 1), :] = out

    return kernel


# ---------------------------------------------------------------------------
# Host-side layout prep (cheap reshapes / tiny weight shuffles only).
# ---------------------------------------------------------------------------
def _space_to_depth_weights(w):
    """(Cout, Cin, 7, 7) stride-2 kernel -> exact (Cout, 4*Cin, 4, 4) stride-1."""
    cout, cin, kh, kw = w.shape
    wp = jnp.pad(w, ((0, 0), (0, 0), (0, 8 - kh), (0, 8 - kw)))
    wp = wp.reshape(cout, cin, 4, 2, 4, 2)            # [o, c, a, p, b, q]
    wp = wp.transpose(0, 1, 3, 5, 2, 4)               # [o, c, p, q, a, b]
    return wp.reshape(cout, 4 * cin, 4, 4)


def _space_to_depth_input(x4, hg, wg):
    """(NT, Cin, H, W) -> (4*Cin, NT*Hg*Wg); channel index = c*4 + p*2 + q."""
    nt, c, _, _ = x4.shape
    xs = x4.reshape(nt, c, hg, 2, wg, 2)              # [n, c, i, p, j, q]
    xs = xs.transpose(1, 3, 5, 0, 2, 4)               # [c, p, q, n, i, j]
    return xs.reshape(4 * c, nt * hg * wg)


def _fold_weight(wconv, cin_pad, cout_pad):
    """(Cout, Cin, k, k) -> (cout_pad, k*k*cin_pad) bf16; col = tap*cin_pad + c."""
    cout, cin, kh, kw = wconv.shape
    wp = jnp.pad(wconv, ((0, cout_pad - cout), (0, cin_pad - cin),
                         (0, 0), (0, 0)))
    wm = wp.transpose(0, 2, 3, 1).reshape(cout_pad, kh * kw * cin_pad)
    return wm.astype(MXU_DTYPE)


def _valid_mask(nt, hg, wg, hv, wv):
    row = jnp.arange(hg) < hv
    col = jnp.arange(wg) < wv
    m = (row[:, None] & col[None, :]).astype(jnp.float32)      # (Hg, Wg)
    return jnp.tile(m.reshape(1, hg * wg), (1, nt))             # (1, NT*Hg*Wg)


def _ssam_coords(hg, wg, hv, wv, normalize):
    # TODO(synk): SpatialSoftArgmax source not given; assumes keypoints are
    # (x, y) per channel, interleaved (x0, y0, x1, y1, ...) into the FC input.
    if normalize:
        xs = jnp.linspace(-1.0, 1.0, wv, dtype=jnp.float32)
        ys = jnp.linspace(-1.0, 1.0, hv, dtype=jnp.float32)
    else:
        xs = jnp.arange(wv, dtype=jnp.float32)
        ys = jnp.arange(hv, dtype=jnp.float32)
    cx = jnp.zeros((hg, wg), jnp.float32).at[:hv, :wv].set(
        jnp.broadcast_to(xs[None, :], (hv, wv)))
    cy = jnp.zeros((hg, wg), jnp.float32).at[:hv, :wv].set(
        jnp.broadcast_to(ys[:, None], (hv, wv)))
    mk = jnp.zeros((hg, wg), jnp.float32).at[:hv, :wv].set(1.0)
    gsz = hg * wg
    return cx.reshape(1, gsz), cy.reshape(1, gsz), mk.reshape(1, gsz)


# ---------------------------------------------------------------------------
# Full DeepSpatialAE forward (single fused pallas_call).
# ---------------------------------------------------------------------------
def deep_spatial_ae_forward(x, params, config):
    n, t, c, h, w = x.shape
    nt = n * t
    assert h % 2 == 0 and w % 2 == 0, "stride-2 conv1 path assumes even H, W"
    hg, wg = h // 2, w // 2               # shared spatial grid (post s2d)
    g = hg * wg
    wa = nt * g                           # active flattened-spatial width
    wz = _round_up(wa + 4 * wg + 4, LANE)  # + max 5x5 tap shift, lane aligned

    temperature = config["spatial"]["temperature"]
    normalize = config["spatial"]["normalize"]
    out_h = config["fc"]["out_img_height"]
    out_w = config["fc"]["out_img_width"]
    out_feat = out_h * out_w

    # Channel bookkeeping: pad every stage's Cout (and the s2d Cin) to a
    # multiple of 8 so BN/ReLU/stores run at full sublane occupancy.
    h0, h1 = config["conv"]["hidden_sizes"]
    c3 = config["conv"]["out_channels"]
    coutp = max(_round_up(h0, 8), _round_up(h1, 8), _round_up(c3, 8))
    cin0 = 4 * c
    cin0p = _round_up(cin0, 8)

    # Input: space-to-depth, channel pad, zero tail to WZ, cast to bf16.
    x4 = x.reshape(nt, c, h, w)
    xs = _space_to_depth_input(x4, hg, wg)
    xs = jnp.pad(xs, ((0, cin0p - cin0), (0, wz - wa))).astype(MXU_DTYPE)

    # Folded, padded, bf16 conv weights (contraction dim = kh*kw*Cin_pad).
    w1s = _space_to_depth_weights(params["conv1"]["w"])  # 7x7/s2 -> 4x4/s1
    w1m = _fold_weight(w1s, cin0p, coutp)
    w2m = _fold_weight(params["conv2"]["w"], coutp, coutp)
    w3m = _fold_weight(params["conv3"]["w"], coutp, coutp)

    def _pad_vec(v, fill):
        return jnp.pad(v, (0, coutp - v.shape[0]), constant_values=fill)

    keys = ("conv1", "conv2", "conv3")
    b_all = jnp.stack([_pad_vec(params[k]["b"], 0.0) for k in keys]
                      ).reshape(3, coutp, 1)
    gm_all = jnp.stack([_pad_vec(params[k]["gamma"], 1.0) for k in keys]
                       ).reshape(3, coutp, 1)
    bt_all = jnp.stack([_pad_vec(params[k]["beta"], 0.0) for k in keys]
                       ).reshape(3, coutp, 1)

    # Per-stage valid-region masks and BN counts (shrinking "valid" conv).
    ks = (4, 5, 5)
    hv, wv = hg, wg
    masks, inv_counts = [], []
    for k in ks:
        hv, wv = hv - k + 1, wv - k + 1
        masks.append(_valid_mask(nt, hg, wg, hv, wv))
        inv_counts.append(1.0 / float(nt * hv * wv))
    mask_all = jnp.concatenate(masks, axis=0)          # (3, WA)

    # SSAM coordinate grids / mask over the final valid region.
    cx, cy, mk = _ssam_coords(hg, wg, hv, wv, normalize)

    # FC decoder weights, de-interleaved into x- and y-coordinate columns.
    wfc = params["fc"]["w"]                            # torch (out, 2*C)
    wx = jnp.pad(jnp.transpose(wfc[:, 0::2]), ((0, coutp - c3), (0, 0)))
    wy = jnp.pad(jnp.transpose(wfc[:, 1::2]), ((0, coutp - c3), (0, 0)))
    bfc = params["fc"]["b"].reshape(1, out_feat)

    stage_spec = ((cin0p, 4, inv_counts[0]),
                  (coutp, 5, inv_counts[1]),
                  (coutp, 5, inv_counts[2]))
    max_rows = max(kk * kk * ci for ci, kk, _ in stage_spec)

    kernel = make_fused_kernel(nt, g, wa, wg, coutp, stage_spec,
                               1.0 / float(temperature), bool(normalize))

    inputs = (xs, w1m, w2m, w3m, b_all, gm_all, bt_all, mask_all,
              cx, cy, mk, wx, wy, bfc)
    rec = pl.pallas_call(
        kernel,
        grid=(1,),
        in_specs=[_full_spec(a.shape) for a in inputs],
        out_specs=_full_spec((nt, out_feat)),
        out_shape=jax.ShapeDtypeStruct((nt, out_feat), jnp.float32),
        scratch_shapes=[
            pltpu.VMEM((coutp, wz), jnp.float32),       # act ping
            pltpu.VMEM((coutp, wz), jnp.float32),       # act pong
            pltpu.VMEM((max_rows, wa), MXU_DTYPE),      # shifted-channel stack
        ],
        compiler_params=pltpu.CompilerParams(
            dimension_semantics=("arbitrary",)),
    )(*inputs)
    return rec.reshape(n, t, 1, out_h, out_w)


# ---------------------------------------------------------------------------
# Deterministic parameter init (synthetic; no checkpoint loading).
# TODO(synk): imagenet_init (torch.hub GoogLeNet checkpoint copy) is a weight
#             load with no Pallas equivalent; weights are synthetic here.
# ---------------------------------------------------------------------------
def init_params(key, config):
    c_in = config["conv"]["in_channels"]
    h0, h1 = config["conv"]["hidden_sizes"]
    c_out = config["conv"]["out_channels"]
    in_feat = config["fc"]["in_features"]
    out_feat = config["fc"]["out_img_height"] * config["fc"]["out_img_width"]
    ks = jax.random.split(key, 8)

    def conv_p(kk, co, ci, ksz):
        k1, k2 = jax.random.split(kk)
        return {
            "w": 0.1 * jax.random.normal(k1, (co, ci, ksz, ksz), jnp.float32),
            "b": 0.01 * jax.random.normal(k2, (co,), jnp.float32),
            "gamma": jnp.ones((co,), jnp.float32),
            "beta": jnp.zeros((co,), jnp.float32),
        }

    return {
        "conv1": conv_p(ks[0], h0, c_in, 7),
        "conv2": conv_p(ks[1], h1, h0, 5),
        "conv3": conv_p(ks[2], c_out, h1, 5),
        "fc": {
            "w": 0.1 * jax.random.normal(ks[3], (out_feat, in_feat), jnp.float32),
            "b": 0.01 * jax.random.normal(ks[4], (out_feat,), jnp.float32),
        },
    }


if __name__ == "__main__":
    config = {
        "conv": {"in_channels": 3, "hidden_sizes": [4, 8], "out_channels": 8,
                 "activation": "relu"},
        "spatial": {"temperature": 1.0, "normalize": True},
        "fc": {"in_features": 16, "out_img_height": 16, "out_img_width": 16},
    }
    assert config["conv"]["out_channels"] * 2 == config["fc"]["in_features"]

    key = jax.random.PRNGKey(0)
    k_params, k_x = jax.random.split(key)
    params = init_params(k_params, config)

    # Input: (N, T, C, H, W) = (2, 2, 3, 32, 32)
    x = jax.random.normal(k_x, (2, 2, 3, 32, 32), jnp.float32)

    fwd = jax.jit(lambda xx: deep_spatial_ae_forward(xx, params, config))
    rec = fwd(x)
    jax.block_until_ready(rec)

    expected_shape = (2, 2, 1, config["fc"]["out_img_height"],
                      config["fc"]["out_img_width"])
    assert rec.shape == expected_shape, rec.shape
    assert rec.dtype == jnp.float32
    assert bool(jnp.all(jnp.isfinite(rec)))
    print("KERNEL_OK")
</pallas_src>

<mosaic_0001>
module attributes {stable_mosaic.version = 11 : i64} {
  func.func @kernel(%arg0: i32, %arg1: memref<16x1152xbf16, #tpu.memory_space<vmem>>, %arg2: memref<8x256xbf16, #tpu.memory_space<vmem>>, %arg3: memref<8x200xbf16, #tpu.memory_space<vmem>>, %arg4: memref<8x200xbf16, #tpu.memory_space<vmem>>, %arg5: memref<3x8x1xf32, #tpu.memory_space<vmem>>, %arg6: memref<3x8x1xf32, #tpu.memory_space<vmem>>, %arg7: memref<3x8x1xf32, #tpu.memory_space<vmem>>, %arg8: memref<3x1024xf32, #tpu.memory_space<vmem>>, %arg9: memref<1x256xf32, #tpu.memory_space<vmem>>, %arg10: memref<1x256xf32, #tpu.memory_space<vmem>>, %arg11: memref<1x256xf32, #tpu.memory_space<vmem>>, %arg12: memref<8x256xf32, #tpu.memory_space<vmem>>, %arg13: memref<8x256xf32, #tpu.memory_space<vmem>>, %arg14: memref<1x256xf32, #tpu.memory_space<vmem>>, %arg15: memref<4x256xf32, #tpu.memory_space<vmem>>, %arg16: memref<8x1152xf32, #tpu.memory_space<vmem>>, %arg17: memref<8x1152xf32, #tpu.memory_space<vmem>>, %arg18: memref<256x1024xbf16, #tpu.memory_space<vmem>>) attributes {dimension_semantics = [#tpu.dimension_semantics<arbitrary>], iteration_bounds = array<i64: 1>, scalar_prefetch = 0 : i64, scratch_operands = 3 : i64, tpu.core_type = #tpu.core_type<tc>, window_params = [{pipeline_mode = #tpu.pipeline_mode<synchronous>, transform_indices = @transform_0, window_bounds = array<i64: 16, 1152>}, {pipeline_mode = #tpu.pipeline_mode<synchronous>, transform_indices = @transform_1, window_bounds = array<i64: 8, 256>}, {pipeline_mode = #tpu.pipeline_mode<synchronous>, transform_indices = @transform_2, window_bounds = array<i64: 8, 200>}, {pipeline_mode = #tpu.pipeline_mode<synchronous>, transform_indices = @transform_3, window_bounds = array<i64: 8, 200>}, {pipeline_mode = #tpu.pipeline_mode<synchronous>, transform_indices = @transform_4, window_bounds = array<i64: 3, 8, 1>}, {pipeline_mode = #tpu.pipeline_mode<synchronous>, transform_indices = @transform_5, window_bounds = array<i64: 3, 8, 1>}, {pipeline_mode = #tpu.pipeline_mode<synchronous>, transform_indices = @transform_6, window_bounds = array<i64: 3, 8, 1>}, {pipeline_mode = #tpu.pipeline_mode<synchronous>, transform_indices = @transform_7, window_bounds = array<i64: 3, 1024>}, {pipeline_mode = #tpu.pipeline_mode<synchronous>, transform_indices = @transform_8, window_bounds = array<i64: 1, 256>}, {pipeline_mode = #tpu.pipeline_mode<synchronous>, transform_indices = @transform_9, window_bounds = array<i64: 1, 256>}, {pipeline_mode = #tpu.pipeline_mode<synchronous>, transform_indices = @transform_10, window_bounds = array<i64: 1, 256>}, {pipeline_mode = #tpu.pipeline_mode<synchronous>, transform_indices = @transform_11, window_bounds = array<i64: 8, 256>}, {pipeline_mode = #tpu.pipeline_mode<synchronous>, transform_indices = @transform_12, window_bounds = array<i64: 8, 256>}, {pipeline_mode = #tpu.pipeline_mode<synchronous>, transform_indices = @transform_13, window_bounds = array<i64: 1, 256>}, {pipeline_mode = #tpu.pipeline_mode<synchronous>, transform_indices = @transform_14, window_bounds = array<i64: 4, 256>}]} {
    %cst = arith.constant 0.000000e+00 : f32
    %0 = vector.broadcast %cst : f32 to vector<8x1152xf32>
    %c0 = arith.constant 0 : index
    %c0_0 = arith.constant 0 : index
    %1 = vector.load %arg16[%c0, %c0_0] : memref<8x1152xf32, #tpu.memory_space<vmem>>, vector<8x1152xf32>
    tpu.vector_store %arg16[%c0, %c0_0], %0 {strides = array<i32>} : memref<8x1152xf32, #tpu.memory_space<vmem>>, vector<8x1152xf32>,
    %cst_1 = arith.constant 0.000000e+00 : f32
    %2 = vector.broadcast %cst_1 : f32 to vector<8x1152xf32>
    %c0_2 = arith.constant 0 : index
    %c0_3 = arith.constant 0 : index
    %3 = vector.load %arg17[%c0_2, %c0_3] : memref<8x1152xf32, #tpu.memory_space<vmem>>, vector<8x1152xf32>
    tpu.vector_store %arg17[%c0_2, %c0_3], %2 {strides = array<i32>} : memref<8x1152xf32, #tpu.memory_space<vmem>>, vector<8x1152xf32>,
    %c0_4 = arith.constant 0 : index
    %c0_5 = arith.constant 0 : index
    %4 = vector.load %arg1[%c0_4, %c0_5] : memref<16x1152xbf16, #tpu.memory_space<vmem>>, vector<16x1024xbf16>
    %c0_6 = arith.constant 0 : index
    %c0_7 = arith.constant 0 : index
    %5 = vector.load %arg18[%c0_6, %c0_7] : memref<256x1024xbf16, #tpu.memory_space<vmem>>, vector<16x1024xbf16>
    tpu.vector_store %arg18[%c0_6, %c0_7], %4 {strides = array<i32>} : memref<256x1024xbf16, #tpu.memory_space<vmem>>, vector<16x1024xbf16>,
    %c0_8 = arith.constant 0 : index
    %c1 = arith.constant 1 : index
    %6 = vector.load %arg1[%c0_8, %c1] : memref<16x1152xbf16, #tpu.memory_space<vmem>>, vector<16x1024xbf16>
    %c16 = arith.constant 16 : index
    %c0_9 = arith.constant 0 : index
    %7 = vector.load %arg18[%c16, %c0_9] : memref<256x1024xbf16, #tpu.memory_space<vmem>>, vector<16x1024xbf16>
    tpu.vector_store %arg18[%c16, %c0_9], %6 {strides = array<i32>} : memref<256x1024xbf16, #tpu.memory_space<vmem>>, vector<16x1024xbf16>,
    %c0_10 = arith.constant 0 : index
    %c2 = arith.constant 2 : index
    %8 = vector.load %arg1[%c0_10, %c2] : memref<16x1152xbf16, #tpu.memory_space<vmem>>, vector<16x1024xbf16>
    %c32 = arith.constant 32 : index
    %c0_11 = arith.constant 0 : index
    %9 = vector.load %arg18[%c32, %c0_11] : memref<256x1024xbf16, #tpu.memory_space<vmem>>, vector<16x1024xbf16>
    tpu.vector_store %arg18[%c32, %c0_11], %8 {strides = array<i32>} : memref<256x1024xbf16, #tpu.memory_space<vmem>>, vector<16x1024xbf16>,
    %c0_12 = arith.constant 0 : index
    %c3 = arith.constant 3 : index
    %10 = vector.load %arg1[%c0_12, %c3] : memref<16x1152xbf16, #tpu.memory_space<vmem>>, vector<16x1024xbf16>
    %c48 = arith.constant 48 : index
    %c0_13 = arith.constant 0 : index
    %11 = vector.load %arg18[%c48, %c0_13] : memref<256x1024xbf16, #tpu.memory_space<vmem>>, vector<16x1024xbf16>
    tpu.vector_store %arg18[%c48, %c0_13], %10 {strides = array<i32>} : memref<256x1024xbf16, #tpu.memory_space<vmem>>, vector<16x1024xbf16>,
    %c0_14 = arith.constant 0 : index
    %c16_15 = arith.constant 16 : index
    %12 = vector.load %arg1[%c0_14, %c16_15] : memref<16x1152xbf16, #tpu.memory_space<vmem>>, vector<16x1024xbf16>
    %c64 = arith.constant 64 : index
    %c0_16 = arith.constant 0 : index
    %13 = vector.load %arg18[%c64, %c0_16] : memref<256x1024xbf16, #tpu.memory_space<vmem>>, vector<16x1024xbf16>
    tpu.vector_store %arg18[%c64, %c0_16], %12 {strides = array<i32>} : memref<256x1024xbf16, #tpu.memory_space<vmem>>, vector<16x1024xbf16>,
    %c0_17 = arith.constant 0 : index
    %c17 = arith.constant 17 : index
    %14 = vector.load %arg1[%c0_17, %c17] : memref<16x1152xbf16, #tpu.memory_space<vmem>>, vector<16x1024xbf16>
    %c80 = arith.constant 80 : index
    %c0_18 = arith.constant 0 : index
    %15 = vector.load %arg18[%c80, %c0_18] : memref<256x1024xbf16, #tpu.memory_space<vmem>>, vector<16x1024xbf16>
    tpu.vector_store %arg18[%c80, %c0_18], %14 {strides = array<i32>} : memref<256x1024xbf16, #tpu.memory_space<vmem>>, vector<16x1024xbf16>,
    %c0_19 = arith.constant 0 : index
    %c18 = arith.constant 18 : index
    %16 = vector.load %arg1[%c0_19, %c18] : memref<16x1152xbf16, #tpu.memory_space<vmem>>, vector<16x1024xbf16>
    %c96 = arith.constant 96 : index
    %c0_20 = arith.constant 0 : index
    %17 = vector.load %arg18[%c96, %c0_20] : memref<256x1024xbf16, #tpu.memory_space<vmem>>, vector<16x1024xbf16>
    tpu.vector_store %arg18[%c96, %c0_20], %16 {strides = array<i32>} : memref<256x1024xbf16, #tpu.memory_space<vmem>>, vector<16x1024xbf16>,
    %c0_21 = arith.constant 0 : index
    %c19 = arith.constant 19 : index
    %18 = vector.load %arg1[%c0_21, %c19] : memref<16x1152xbf16, #tpu.memory_space<vmem>>, vector<16x1024xbf16>
    %c112 = arith.constant 112 : index
    %c0_22 = arith.constant 0 : index
    %19 = vector.load %arg18[%c112, %c0_22] : memref<256x1024xbf16, #tpu.memory_space<vmem>>, vector<16x1024xbf16>
    tpu.vector_store %arg18[%c112, %c0_22], %18 {strides = array<i32>} : memref<256x1024xbf16, #tpu.memory_space<vmem>>, vector<16x1024xbf16>,
    %c0_23 = arith.constant 0 : index
    %c32_24 = arith.constant 32 : index
    %20 = vector.load %arg1[%c0_23, %c32_24] : memref<16x1152xbf16, #tpu.memory_space<vmem>>, vector<16x1024xbf16>
    %c128 = arith.constant 128 : index
    %c0_25 = arith.constant 0 : index
    %21 = vector.load %arg18[%c128, %c0_25] : memref<256x1024xbf16, #tpu.memory_space<vmem>>, vector<16x1024xbf16>
    tpu.vector_store %arg18[%c128, %c0_25], %20 {strides = array<i32>} : memref<256x1024xbf16, #tpu.memory_space<vmem>>, vector<16x1024xbf16>,
    %c0_26 = arith.constant 0 : index
    %c33 = arith.constant 33 : index
    %22 = vector.load %arg1[%c0_26, %c33] : memref<16x1152xbf16, #tpu.memory_space<vmem>>, vector<16x1024xbf16>
    %c144 = arith.constant 144 : index
    %c0_27 = arith.constant 0 : index
    %23 = vector.load %arg18[%c144, %c0_27] : memref<256x1024xbf16, #tpu.memory_space<vmem>>, vector<16x1024xbf16>
    tpu.vector_store %arg18[%c144, %c0_27], %22 {strides = array<i32>} : memref<256x1024xbf16, #tpu.memory_space<vmem>>, vector<16x1024xbf16>,
    %c0_28 = arith.constant 0 : index
    %c34 = arith.constant 34 : index
    %24 = vector.load %arg1[%c0_28, %c34] : memref<16x1152xbf16, #tpu.memory_space<vmem>>, vector<16x1024xbf16>
    %c160 = arith.constant 160 : index
    %c0_29 = arith.constant 0 : index
    %25 = vector.load %arg18[%c160, %c0_29] : memref<256x1024xbf16, #tpu.memory_space<vmem>>, vector<16x1024xbf16>
    tpu.vector_store %arg18[%c160, %c0_29], %24 {strides = array<i32>} : memref<256x1024xbf16, #tpu.memory_space<vmem>>, vector<16x1024xbf16>,
    %c0_30 = arith.constant 0 : index
    %c35 = arith.constant 35 : index
    %26 = vector.load %arg1[%c0_30, %c35] : memref<16x1152xbf16, #tpu.memory_space<vmem>>, vector<16x1024xbf16>
    %c176 = arith.constant 176 : index
    %c0_31 = arith.constant 0 : index
    %27 = vector.load %arg18[%c176, %c0_31] : memref<256x1024xbf16, #tpu.memory_space<vmem>>, vector<16x1024xbf16>
    tpu.vector_store %arg18[%c176, %c0_31], %26 {strides = array<i32>} : memref<256x1024xbf16, #tpu.memory_space<vmem>>, vector<16x1024xbf16>,
    %c0_32 = arith.constant 0 : index
    %c48_33 = arith.constant 48 : index
    %28 = vector.load %arg1[%c0_32, %c48_33] : memref<16x1152xbf16, #tpu.memory_space<vmem>>, vector<16x1024xbf16>
    %c192 = arith.constant 192 : index
    %c0_34 = arith.constant 0 : index
    %29 = vector.load %arg18[%c192, %c0_34] : memref<256x1024xbf16, #tpu.memory_space<vmem>>, vector<16x1024xbf16>
    tpu.vector_store %arg18[%c192, %c0_34], %28 {strides = array<i32>} : memref<256x1024xbf16, #tpu.memory_space<vmem>>, vector<16x1024xbf16>,
    %c0_35 = arith.constant 0 : index
    %c49 = arith.constant 49 : index
    %30 = vector.load %arg1[%c0_35, %c49] : memref<16x1152xbf16, #tpu.memory_space<vmem>>, vector<16x1024xbf16>
    %c208 = arith.constant 208 : index
    %c0_36 = arith.constant 0 : index
    %31 = vector.load %arg18[%c208, %c0_36] : memref<256x1024xbf16, #tpu.memory_space<vmem>>, vector<16x1024xbf16>
    tpu.vector_store %arg18[%c208, %c0_36], %30 {strides = array<i32>} : memref<256x1024xbf16, #tpu.memory_space<vmem>>, vector<16x1024xbf16>,
    %c0_37 = arith.constant 0 : index
    %c50 = arith.constant 50 : index
    %32 = vector.load %arg1[%c0_37, %c50] : memref<16x1152xbf16, #tpu.memory_space<vmem>>, vector<16x1024xbf16>
    %c224 = arith.constant 224 : index
    %c0_38 = arith.constant 0 : index
    %33 = vector.load %arg18[%c224, %c0_38] : memref<256x1024xbf16, #tpu.memory_space<vmem>>, vector<16x1024xbf16>
    tpu.vector_store %arg18[%c224, %c0_38], %32 {strides = array<i32>} : memref<256x1024xbf16, #tpu.memory_space<vmem>>, vector<16x1024xbf16>,
    %c0_39 = arith.constant 0 : index
    %c51 = arith.constant 51 : index
    %34 = vector.load %arg1[%c0_39, %c51] : memref<16x1152xbf16, #tpu.memory_space<vmem>>, vector<16x1024xbf16>
    %c240 = arith.constant 240 : index
    %c0_40 = arith.constant 0 : index
    %35 = vector.load %arg18[%c240, %c0_40] : memref<256x1024xbf16, #tpu.memory_space<vmem>>, vector<16x1024xbf16>
    tpu.vector_store %arg18[%c240, %c0_40], %34 {strides = array<i32>} : memref<256x1024xbf16, #tpu.memory_space<vmem>>, vector<16x1024xbf16>,
    %c0_41 = arith.constant 0 : index
    %c0_42 = arith.constant 0 : index
    %36 = vector.load %arg2[%c0_41, %c0_42] : memref<8x256xbf16, #tpu.memory_space<vmem>>, vector<8x256xbf16>
    %c0_43 = arith.constant 0 : index
    %c0_44 = arith.constant 0 : index
    %37 = vector.load %arg18[%c0_43, %c0_44] : memref<256x1024xbf16, #tpu.memory_space<vmem>>, vector<256x1024xbf16>
    %cst_45 = arith.constant dense<0.000000e+00> : vector<8x1024xf32>
    %38 = tpu.matmul %36, %37, %cst_45 {dimension_numbers = #tpu.dot_dimension_numbers<[1], [0], [0], [1], [0, 0, 1, 1], [], []>} : vector<8x256xbf16>, vector<256x1024xbf16>, vector<8x1024xf32> -> vector<8x1024xf32>
    %c0_46 = arith.constant 0 : index
    %c0_47 = arith.constant 0 : index
    %c0_48 = arith.constant 0 : index
    %39 = vector.load %arg5[%c0_46, %c0_47, %c0_48] : memref<3x8x1xf32, #tpu.memory_space<vmem>>, vector<1x8x1xf32>
    %40 = vector.shape_cast %39 : vector<1x8x1xf32> to vector<8x1xf32>
    %41 = vector.broadcast %40 : vector<8x1xf32> to vector<8x1024xf32>
    %42 = arith.addf %38, %41 : vector<8x1024xf32>
    %c0_49 = arith.constant 0 : index
    %c0_50 = arith.constant 0 : index
    %43 = vector.load %arg8[%c0_49, %c0_50] : memref<3x1024xf32, #tpu.memory_space<vmem>>, vector<1x1024xf32>
    %44 = vector.broadcast %43 : vector<1x1024xf32> to vector<8x1024xf32>
    %45 = arith.mulf %42, %44 : vector<8x1024xf32>
    %cst_51 = arith.constant dense<0.000000e+00> : vector<8xf32>
    %46 = vector.multi_reduction <add>, %45, %cst_51 [1] : vector<8x1024xf32> to vector<8xf32>
    %47 = vector.shape_cast %46 : vector<8xf32> to vector<8x1xf32>
    %48 = arith.mulf %45, %42 : vector<8x1024xf32>
    %cst_52 = arith.constant dense<0.000000e+00> : vector<8xf32>
    %49 = vector.multi_reduction <add>, %48, %cst_52 [1] : vector<8x1024xf32> to vector<8xf32>
    %50 = vector.shape_cast %49 : vector<8xf32> to vector<8x1xf32>
    %cst_53 = arith.constant 1.479290e-03 : f32
    %51 = vector.broadcast %cst_53 : f32 to vector<8x1xf32>
    %52 = arith.mulf %47, %51 : vector<8x1xf32>
    %cst_54 = arith.constant 1.479290e-03 : f32
    %53 = vector.broadcast %cst_54 : f32 to vector<8x1xf32>
    %54 = arith.mulf %50, %53 : vector<8x1xf32>
    %55 = arith.mulf %52, %52 : vector<8x1xf32>
    %56 = arith.subf %54, %55 : vector<8x1xf32>
    %c0_55 = arith.constant 0 : index
    %c0_56 = arith.constant 0 : index
    %c0_57 = arith.constant 0 : index
    %57 = vector.load %arg6[%c0_55, %c0_56, %c0_57] : memref<3x8x1xf32, #tpu.memory_space<vmem>>, vector<1x8x1xf32>
    %58 = vector.shape_cast %57 : vector<1x8x1xf32> to vector<8x1xf32>
    %59 = vector.broadcast %52 : vector<8x1xf32> to vector<8x1024xf32>
    %60 = arith.subf %42, %59 : vector<8x1024xf32>
    %cst_58 = arith.constant 9.99999974E-6 : f32
    %61 = vector.broadcast %cst_58 : f32 to vector<8x1xf32>
    %62 = arith.addf %56, %61 : vector<8x1xf32>
    %63 = math.rsqrt %62 : vector<8x1xf32>
    %64 = vector.broadcast %63 : vector<8x1xf32> to vector<8x1024xf32>
    %65 = arith.mulf %60, %64 : vector<8x1024xf32>
    %66 = vector.broadcast %58 : vector<8x1xf32> to vector<8x1024xf32>
    %67 = arith.mulf %66, %65 : vector<8x1024xf32>
    %c0_59 = arith.constant 0 : index
    %c0_60 = arith.constant 0 : index
    %c0_61 = arith.constant 0 : index
    %68 = vector.load %arg7[%c0_59, %c0_60, %c0_61] : memref<3x8x1xf32, #tpu.memory_space<vmem>>, vector<1x8x1xf32>
    %69 = vector.shape_cast %68 : vector<1x8x1xf32> to vector<8x1xf32>
    %70 = vector.broadcast %69 : vector<8x1xf32> to vector<8x1024xf32>
    %71 = arith.addf %67, %70 : vector<8x1024xf32>
    %cst_62 = arith.constant 0.000000e+00 : f32
    %72 = vector.broadcast %cst_62 : f32 to vector<8x1024xf32>
    %73 = arith.maximumf %71, %72 : vector<8x1024xf32>
    %74 = vector.broadcast %43 : vector<1x1024xf32> to vector<8x1024xf32>
    %75 = arith.mulf %73, %74 : vector<8x1024xf32>
    %c0_63 = arith.constant 0 : index
    %c0_64 = arith.constant 0 : index
    %76 = vector.load %arg16[%c0_63, %c0_64] : memref<8x1152xf32, #tpu.memory_space<vmem>>, vector<8x1024xf32>
    tpu.vector_store %arg16[%c0_63, %c0_64], %75 {strides = array<i32>} : memref<8x1152xf32, #tpu.memory_space<vmem>>, vector<8x1024xf32>,
    %c0_65 = arith.constant 0 : index
    %c0_66 = arith.constant 0 : index
    %77 = vector.load %arg16[%c0_65, %c0_66] : memref<8x1152xf32, #tpu.memory_space<vmem>>, vector<8x1024xf32>
    %78 = arith.truncf %77 : vector<8x1024xf32> to vector<8x1024xbf16>
    %c0_67 = arith.constant 0 : index
    %c0_68 = arith.constant 0 : index
    %79 = vector.load %arg18[%c0_67, %c0_68] : memref<256x1024xbf16, #tpu.memory_space<vmem>>, vector<8x1024xbf16>
    tpu.vector_store %arg18[%c0_67, %c0_68], %78 {strides = array<i32>} : memref<256x1024xbf16, #tpu.memory_space<vmem>>, vector<8x1024xbf16>,
    %c0_69 = arith.constant 0 : index
    %c1_70 = arith.constant 1 : index
    %80 = vector.load %arg16[%c0_69, %c1_70] : memref<8x1152xf32, #tpu.memory_space<vmem>>, vector<8x1024xf32>
    %81 = arith.truncf %80 : vector<8x1024xf32> to vector<8x1024xbf16>
    %c8 = arith.constant 8 : index
    %c0_71 = arith.constant 0 : index
    %82 = vector.load %arg18[%c8, %c0_71] : memref<256x1024xbf16, #tpu.memory_space<vmem>>, vector<8x1024xbf16>
    tpu.vector_store %arg18[%c8, %c0_71], %81 {strides = array<i32>} : memref<256x1024xbf16, #tpu.memory_space<vmem>>, vector<8x1024xbf16>,
    %c0_72 = arith.constant 0 : index
    %c2_73 = arith.constant 2 : index
    %83 = vector.load %arg16[%c0_72, %c2_73] : memref<8x1152xf32, #tpu.memory_space<vmem>>, vector<8x1024xf32>
    %84 = arith.truncf %83 : vector<8x1024xf32> to vector<8x1024xbf16>
    %c16_74 = arith.constant 16 : index
    %c0_75 = arith.constant 0 : index
    %85 = vector.load %arg18[%c16_74, %c0_75] : memref<256x1024xbf16, #tpu.memory_space<vmem>>, vector<8x1024xbf16>
    tpu.vector_store %arg18[%c16_74, %c0_75], %84 {strides = array<i32>} : memref<256x1024xbf16, #tpu.memory_space<vmem>>, vector<8x1024xbf16>,
    %c0_76 = arith.constant 0 : index
    %c3_77 = arith.constant 3 : index
    %86 = vector.load %arg16[%c0_76, %c3_77] : memref<8x1152xf32, #tpu.memory_space<vmem>>, vector<8x1024xf32>
    %87 = arith.truncf %86 : vector<8x1024xf32> to vector<8x1024xbf16>
    %c24 = arith.constant 24 : index
    %c0_78 = arith.constant 0 : index
    %88 = vector.load %arg18[%c24, %c0_78] : memref<256x1024xbf16, #tpu.memory_space<vmem>>, vector<8x1024xbf16>
    tpu.vector_store %arg18[%c24, %c0_78], %87 {strides = array<i32>} : memref<256x1024xbf16, #tpu.memory_space<vmem>>, vector<8x1024xbf16>,
    %c0_79 = arith.constant 0 : index
    %c4 = arith.constant 4 : index
    %89 = vector.load %arg16[%c0_79, %c4] : memref<8x1152xf32, #tpu.memory_space<vmem>>, vector<8x1024xf32>
    %90 = arith.truncf %89 : vector<8x1024xf32> to vector<8x1024xbf16>
    %c32_80 = arith.constant 32 : index
    %c0_81 = arith.constant 0 : index
    %91 = vector.load %arg18[%c32_80, %c0_81] : memref<256x1024xbf16, #tpu.memory_space<vmem>>, vector<8x1024xbf16>
    tpu.vector_store %arg18[%c32_80, %c0_81], %90 {strides = array<i32>} : memref<256x1024xbf16, #tpu.memory_space<vmem>>, vector<8x1024xbf16>,
    %c0_82 = arith.constant 0 : index
    %c16_83 = arith.constant 16 : index
    %92 = vector.load %arg16[%c0_82, %c16_83] : memref<8x1152xf32, #tpu.memory_space<vmem>>, vector<8x1024xf32>
    %93 = arith.truncf %92 : vector<8x1024xf32> to vector<8x1024xbf16>
    %c40 = arith.constant 40 : index
    %c0_84 = arith.constant 0 : index
    %94 = vector.load %arg18[%c40, %c0_84] : memref<256x1024xbf16, #tpu.memory_space<vmem>>, vector<8x1024xbf16>
    tpu.vector_store %arg18[%c40, %c0_84], %93 {strides = array<i32>} : memref<256x1024xbf16, #tpu.memory_space<vmem>>, vector<8x1024xbf16>,
    %c0_85 = arith.constant 0 : index
    %c17_86 = arith.constant 17 : index
    %95 = vector.load %arg16[%c0_85, %c17_86] : memref<8x1152xf32, #tpu.memory_space<vmem>>, vector<8x1024xf32>
    %96 = arith.truncf %95 : vector<8x1024xf32> to vector<8x1024xbf16>
    %c48_87 = arith.constant 48 : index
    %c0_88 = arith.constant 0 : index
    %97 = vector.load %arg18[%c48_87, %c0_88] : memref<256x1024xbf16, #tpu.memory_space<vmem>>, vector<8x1024xbf16>
    tpu.vector_store %arg18[%c48_87, %c0_88], %96 {strides = array<i32>} : memref<256x1024xbf16, #tpu.memory_space<vmem>>, vector<8x1024xbf16>,
    %c0_89 = arith.constant 0 : index
    %c18_90 = arith.constant 18 : index
    %98 = vector.load %arg16[%c0_89, %c18_90] : memref<8x1152xf32, #tpu.memory_space<vmem>>, vector<8x1024xf32>
    %99 = arith.truncf %98 : vector<8x1024xf32> to vector<8x1024xbf16>
    %c56 = arith.constant 56 : index
    %c0_91 = arith.constant 0 : index
    %100 = vector.load %arg18[%c56, %c0_91] : memref<256x1024xbf16, #tpu.memory_space<vmem>>, vector<8x1024xbf16>
    tpu.vector_store %arg18[%c56, %c0_91], %99 {strides = array<i32>} : memref<256x1024xbf16, #tpu.memory_space<vmem>>, vector<8x1024xbf16>,
    %c0_92 = arith.constant 0 : index
    %c19_93 = arith.constant 19 : index
    %101 = vector.load %arg16[%c0_92, %c19_93] : memref<8x1152xf32, #tpu.memory_space<vmem>>, vector<8x1024xf32>
    %102 = arith.truncf %101 : vector<8x1024xf32> to vector<8x1024xbf16>
    %c64_94 = arith.constant 64 : index
    %c0_95 = arith.constant 0 : index
    %103 = vector.load %arg18[%c64_94, %c0_95] : memref<256x1024xbf16, #tpu.memory_space<vmem>>, vector<8x1024xbf16>
    tpu.vector_store %arg18[%c64_94, %c0_95], %102 {strides = array<i32>} : memref<256x1024xbf16, #tpu.memory_space<vmem>>, vector<8x1024xbf16>,
    %c0_96 = arith.constant 0 : index
    %c20 = arith.constant 20 : index
    %104 = vector.load %arg16[%c0_96, %c20] : memref<8x1152xf32, #tpu.memory_space<vmem>>, vector<8x1024xf32>
    %105 = arith.truncf %104 : vector<8x1024xf32> to vector<8x1024xbf16>
    %c72 = arith.constant 72 : index
    %c0_97 = arith.constant 0 : index
    %106 = vector.load %arg18[%c72, %c0_97] : memref<256x1024xbf16, #tpu.memory_space<vmem>>, vector<8x1024xbf16>
    tpu.vector_store %arg18[%c72, %c0_97], %105 {strides = array<i32>} : memref<256x1024xbf16, #tpu.memory_space<vmem>>, vector<8x1024xbf16>,
    %c0_98 = arith.constant 0 : index
    %c32_99 = arith.constant 32 : index
    %107 = vector.load %arg16[%c0_98, %c32_99] : memref<8x1152xf32, #tpu.memory_space<vmem>>, vector<8x1024xf32>
    %108 = arith.truncf %107 : vector<8x1024xf32> to vector<8x1024xbf16>
    %c80_100 = arith.constant 80 : index
    %c0_101 = arith.constant 0 : index
    %109 = vector.load %arg18[%c80_100, %c0_101] : memref<256x1024xbf16, #tpu.memory_space<vmem>>, vector<8x1024xbf16>
    tpu.vector_store %arg18[%c80_100, %c0_101], %108 {strides = array<i32>} : memref<256x1024xbf16, #tpu.memory_space<vmem>>, vector<8x1024xbf16>,
    %c0_102 = arith.constant 0 : index
    %c33_103 = arith.constant 33 : index
    %110 = vector.load %arg16[%c0_102, %c33_103] : memref<8x1152xf32, #tpu.memory_space<vmem>>, vector<8x1024xf32>
    %111 = arith.truncf %110 : vector<8x1024xf32> to vector<8x1024xbf16>
    %c88 = arith.constant 88 : index
    %c0_104 = arith.constant 0 : index
    %112 = vector.load %arg18[%c88, %c0_104] : memref<256x1024xbf16, #tpu.memory_space<vmem>>, vector<8x1024xbf16>
    tpu.vector_store %arg18[%c88, %c0_104], %111 {strides = array<i32>} : memref<256x1024xbf16, #tpu.memory_space<vmem>>, vector<8x1024xbf16>,
    %c0_105 = arith.constant 0 : index
    %c34_106 = arith.constant 34 : index
    %113 = vector.load %arg16[%c0_105, %c34_106] : memref<8x1152xf32, #tpu.memory_space<vmem>>, vector<8x1024xf32>
    %114 = arith.truncf %113 : vector<8x1024xf32> to vector<8x1024xbf16>
    %c96_107 = arith.constant 96 : index
    %c0_108 = arith.constant 0 : index
    %115 = vector.load %arg18[%c96_107, %c0_108] : memref<256x1024xbf16, #tpu.memory_space<vmem>>, vector<8x1024xbf16>
    tpu.vector_store %arg18[%c96_107, %c0_108], %114 {strides = array<i32>} : memref<256x1024xbf16, #tpu.memory_space<vmem>>, vector<8x1024xbf16>,
    %c0_109 = arith.constant 0 : index
    %c35_110 = arith.constant 35 : index
    %116 = vector.load %arg16[%c0_109, %c35_110] : memref<8x1152xf32, #tpu.memory_space<vmem>>, vector<8x1024xf32>
    %117 = arith.truncf %116 : vector<8x1024xf32> to vector<8x1024xbf16>
    %c104 = arith.constant 104 : index
    %c0_111 = arith.constant 0 : index
    %118 = vector.load %arg18[%c104, %c0_111] : memref<256x1024xbf16, #tpu.memory_space<vmem>>, vector<8x1024xbf16>
    tpu.vector_store %arg18[%c104, %c0_111], %117 {strides = array<i32>} : memref<256x1024xbf16, #tpu.memory_space<vmem>>, vector<8x1024xbf16>,
    %c0_112 = arith.constant 0 : index
    %c36 = arith.constant 36 : index
    %119 = vector.load %arg16[%c0_112, %c36] : memref<8x1152xf32, #tpu.memory_space<vmem>>, vector<8x1024xf32>
    %120 = arith.truncf %119 : vector<8x1024xf32> to vector<8x1024xbf16>
    %c112_113 = arith.constant 112 : index
    %c0_114 = arith.constant 0 : index
    %121 = vector.load %arg18[%c112_113, %c0_114] : memref<256x1024xbf16, #tpu.memory_space<vmem>>, vector<8x1024xbf16>
    tpu.vector_store %arg18[%c112_113, %c0_114], %120 {strides = array<i32>} : memref<256x1024xbf16, #tpu.memory_space<vmem>>, vector<8x1024xbf16>,
    %c0_115 = arith.constant 0 : index
    %c48_116 = arith.constant 48 : index
    %122 = vector.load %arg16[%c0_115, %c48_116] : memref<8x1152xf32, #tpu.memory_space<vmem>>, vector<8x1024xf32>
    %123 = arith.truncf %122 : vector<8x1024xf32> to vector<8x1024xbf16>
    %c120 = arith.constant 120 : index
    %c0_117 = arith.constant 0 : index
    %124 = vector.load %arg18[%c120, %c0_117] : memref<256x1024xbf16, #tpu.memory_space<vmem>>, vector<8x1024xbf16>
    tpu.vector_store %arg18[%c120, %c0_117], %123 {strides = array<i32>} : memref<256x1024xbf16, #tpu.memory_space<vmem>>, vector<8x1024xbf16>,
    %c0_118 = arith.constant 0 : index
    %c49_119 = arith.constant 49 : index
    %125 = vector.load %arg16[%c0_118, %c49_119] : memref<8x1152xf32, #tpu.memory_space<vmem>>, vector<8x1024xf32>
    %126 = arith.truncf %125 : vector<8x1024xf32> to vector<8x1024xbf16>
    %c128_120 = arith.constant 128 : index
    %c0_121 = arith.constant 0 : index
    %127 = vector.load %arg18[%c128_120, %c0_121] : memref<256x1024xbf16, #tpu.memory_space<vmem>>, vector<8x1024xbf16>
    tpu.vector_store %arg18[%c128_120, %c0_121], %126 {strides = array<i32>} : memref<256x1024xbf16, #tpu.memory_space<vmem>>, vector<8x1024xbf16>,
    %c0_122 = arith.constant 0 : index
    %c50_123 = arith.constant 50 : index
    %128 = vector.load %arg16[%c0_122, %c50_123] : memref<8x1152xf32, #tpu.memory_space<vmem>>, vector<8x1024xf32>
    %129 = arith.truncf %128 : vector<8x1024xf32> to vector<8x1024xbf16>
    %c136 = arith.constant 136 : index
    %c0_124 = arith.constant 0 : index
    %130 = vector.load %arg18[%c136, %c0_124] : memref<256x1024xbf16, #tpu.memory_space<vmem>>, vector<8x1024xbf16>
    tpu.vector_store %arg18[%c136, %c0_124], %129 {strides = array<i32>} : memref<256x1024xbf16, #tpu.memory_space<vmem>>, vector<8x1024xbf16>,
    %c0_125 = arith.constant 0 : index
    %c51_126 = arith.constant 51 : index
    %131 = vector.load %arg16[%c0_125, %c51_126] : memref<8x1152xf32, #tpu.memory_space<vmem>>, vector<8x1024xf32>
    %132 = arith.truncf %131 : vector<8x1024xf32> to vector<8x1024xbf16>
    %c144_127 = arith.constant 144 : index
    %c0_128 = arith.constant 0 : index
    %133 = vector.load %arg18[%c144_127, %c0_128] : memref<256x1024xbf16, #tpu.memory_space<vmem>>, vector<8x1024xbf16>
    tpu.vector_store %arg18[%c144_127, %c0_128], %132 {strides = array<i32>} : memref<256x1024xbf16, #tpu.memory_space<vmem>>, vector<8x1024xbf16>,
    %c0_129 = arith.constant 0 : index
    %c52 = arith.constant 52 : index
    %134 = vector.load %arg16[%c0_129, %c52] : memref<8x1152xf32, #tpu.memory_space<vmem>>, vector<8x1024xf32>
    %135 = arith.truncf %134 : vector<8x1024xf32> to vector<8x1024xbf16>
    %c152 = arith.constant 152 : index
    %c0_130 = arith.constant 0 : index
    %136 = vector.load %arg18[%c152, %c0_130] : memref<256x1024xbf16, #tpu.memory_space<vmem>>, vector<8x1024xbf16>
    tpu.vector_store %arg18[%c152, %c0_130], %135 {strides = array<i32>} : memref<256x1024xbf16, #tpu.memory_space<vmem>>, vector<8x1024xbf16>,
    %c0_131 = arith.constant 0 : index
    %c64_132 = arith.constant 64 : index
    %137 = vector.load %arg16[%c0_131, %c64_132] : memref<8x1152xf32, #tpu.memory_space<vmem>>, vector<8x1024xf32>
    %138 = arith.truncf %137 : vector<8x1024xf32> to vector<8x1024xbf16>
    %c160_133 = arith.constant 160 : index
    %c0_134 = arith.constant 0 : index
    %139 = vector.load %arg18[%c160_133, %c0_134] : memref<256x1024xbf16, #tpu.memory_space<vmem>>, vector<8x1024xbf16>
    tpu.vector_store %arg18[%c160_133, %c0_134], %138 {strides = array<i32>} : memref<256x1024xbf16, #tpu.memory_space<vmem>>, vector<8x1024xbf16>,
    %c0_135 = arith.constant 0 : index
    %c65 = arith.constant 65 : index
    %140 = vector.load %arg16[%c0_135, %c65] : memref<8x1152xf32, #tpu.memory_space<vmem>>, vector<8x1024xf32>
    %141 = arith.truncf %140 : vector<8x1024xf32> to vector<8x1024xbf16>
    %c168 = arith.constant 168 : index
    %c0_136 = arith.constant 0 : index
    %142 = vector.load %arg18[%c168, %c0_136] : memref<256x1024xbf16, #tpu.memory_space<vmem>>, vector<8x1024xbf16>
    tpu.vector_store %arg18[%c168, %c0_136], %141 {strides = array<i32>} : memref<256x1024xbf16, #tpu.memory_space<vmem>>, vector<8x1024xbf16>,
    %c0_137 = arith.constant 0 : index
    %c66 = arith.constant 66 : index
    %143 = vector.load %arg16[%c0_137, %c66] : memref<8x1152xf32, #tpu.memory_space<vmem>>, vector<8x1024xf32>
    %144 = arith.truncf %143 : vector<8x1024xf32> to vector<8x1024xbf16>
    %c176_138 = arith.constant 176 : index
    %c0_139 = arith.constant 0 : index
    %145 = vector.load %arg18[%c176_138, %c0_139] : memref<256x1024xbf16, #tpu.memory_space<vmem>>, vector<8x1024xbf16>
    tpu.vector_store %arg18[%c176_138, %c0_139], %144 {strides = array<i32>} : memref<256x1024xbf16, #tpu.memory_space<vmem>>, vector<8x1024xbf16>,
    %c0_140 = arith.constant 0 : index
    %c67 = arith.constant 67 : index
    %146 = vector.load %arg16[%c0_140, %c67] : memref<8x1152xf32, #tpu.memory_space<vmem>>, vector<8x1024xf32>
    %147 = arith.truncf %146 : vector<8x1024xf32> to vector<8x1024xbf16>
    %c184 = arith.constant 184 : index
    %c0_141 = arith.constant 0 : index
    %148 = vector.load %arg18[%c184, %c0_141] : memref<256x1024xbf16, #tpu.memory_space<vmem>>, vector<8x1024xbf16>
    tpu.vector_store %arg18[%c184, %c0_141], %147 {strides = array<i32>} : memref<256x1024xbf16, #tpu.memory_space<vmem>>, vector<8x1024xbf16>,
    %c0_142 = arith.constant 0 : index
    %c68 = arith.constant 68 : index
    %149 = vector.load %arg16[%c0_142, %c68] : memref<8x1152xf32, #tpu.memory_space<vmem>>, vector<8x1024xf32>
    %150 = arith.truncf %149 : vector<8x1024xf32> to vector<8x1024xbf16>
    %c192_143 = arith.constant 192 : index
    %c0_144 = arith.constant 0 : index
    %151 = vector.load %arg18[%c192_143, %c0_144] : memref<256x1024xbf16, #tpu.memory_space<vmem>>, vector<8x1024xbf16>
    tpu.vector_store %arg18[%c192_143, %c0_144], %150 {strides = array<i32>} : memref<256x1024xbf16, #tpu.memory_space<vmem>>, vector<8x1024xbf16>,
    %c0_145 = arith.constant 0 : index
    %c0_146 = arith.constant 0 : index
    %152 = vector.load %arg3[%c0_145, %c0_146] : memref<8x200xbf16, #tpu.memory_space<vmem>>, vector<8x200xbf16>
    %c0_147 = arith.constant 0 : index
    %c0_148 = arith.constant 0 : index
    %153 = vector.load %arg18[%c0_147, %c0_148] : memref<256x1024xbf16, #tpu.memory_space<vmem>>, vector<200x1024xbf16>
    %cst_149 = arith.constant dense<0.000000e+00> : vector<8x1024xf32>
    %154 = tpu.matmul %152, %153, %cst_149 {dimension_numbers = #tpu.dot_dimension_numbers<[1], [0], [0], [1], [0, 0, 1, 1], [], []>} : vector<8x200xbf16>, vector<200x1024xbf16>, vector<8x1024xf32> -> vector<8x1024xf32>
    %c1_150 = arith.constant 1 : index
    %c0_151 = arith.constant 0 : index
    %c0_152 = arith.constant 0 : index
    %155 = vector.load %arg5[%c1_150, %c0_151, %c0_152] : memref<3x8x1xf32, #tpu.memory_space<vmem>>, vector<1x8x1xf32>
    %156 = vector.shape_cast %155 : vector<1x8x1xf32> to vector<8x1xf32>
    %157 = vector.broadcast %156 : vector<8x1xf32> to vector<8x1024xf32>
    %158 = arith.addf %154, %157 : vector<8x1024xf32>
    %c1_153 = arith.constant 1 : index
    %c0_154 = arith.constant 0 : index
    %159 = vector.load %arg8[%c1_153, %c0_154] : memref<3x1024xf32, #tpu.memory_space<vmem>>, vector<1x1024xf32>
    %160 = vector.broadcast %159 : vector<1x1024xf32> to vector<8x1024xf32>
    %161 = arith.mulf %158, %160 : vector<8x1024xf32>
    %cst_155 = arith.constant dense<0.000000e+00> : vector<8xf32>
    %162 = vector.multi_reduction <add>, %161, %cst_155 [1] : vector<8x1024xf32> to vector<8xf32>
    %163 = vector.shape_cast %162 : vector<8xf32> to vector<8x1xf32>
    %164 = arith.mulf %161, %158 : vector<8x1024xf32>
    %cst_156 = arith.constant dense<0.000000e+00> : vector<8xf32>
    %165 = vector.multi_reduction <add>, %164, %cst_156 [1] : vector<8x1024xf32> to vector<8xf32>
    %166 = vector.shape_cast %165 : vector<8xf32> to vector<8x1xf32>
    %cst_157 = arith.constant 0.00308641978 : f32
    %167 = vector.broadcast %cst_157 : f32 to vector<8x1xf32>
    %168 = arith.mulf %163, %167 : vector<8x1xf32>
    %cst_158 = arith.constant 0.00308641978 : f32
    %169 = vector.broadcast %cst_158 : f32 to vector<8x1xf32>
    %170 = arith.mulf %166, %169 : vector<8x1xf32>
    %171 = arith.mulf %168, %168 : vector<8x1xf32>
    %172 = arith.subf %170, %171 : vector<8x1xf32>
    %c1_159 = arith.constant 1 : index
    %c0_160 = arith.constant 0 : index
    %c0_161 = arith.constant 0 : index
    %173 = vector.load %arg6[%c1_159, %c0_160, %c0_161] : memref<3x8x1xf32, #tpu.memory_space<vmem>>, vector<1x8x1xf32>
    %174 = vector.shape_cast %173 : vector<1x8x1xf32> to vector<8x1xf32>
    %175 = vector.broadcast %168 : vector<8x1xf32> to vector<8x1024xf32>
    %176 = arith.subf %158, %175 : vector<8x1024xf32>
    %cst_162 = arith.constant 9.99999974E-6 : f32
    %177 = vector.broadcast %cst_162 : f32 to vector<8x1xf32>
    %178 = arith.addf %172, %177 : vector<8x1xf32>
    %179 = math.rsqrt %178 : vector<8x1xf32>
    %180 = vector.broadcast %179 : vector<8x1xf32> to vector<8x1024xf32>
    %181 = arith.mulf %176, %180 : vector<8x1024xf32>
    %182 = vector.broadcast %174 : vector<8x1xf32> to vector<8x1024xf32>
    %183 = arith.mulf %182, %181 : vector<8x1024xf32>
    %c1_163 = arith.constant 1 : index
    %c0_164 = arith.constant 0 : index
    %c0_165 = arith.constant 0 : index
    %184 = vector.load %arg7[%c1_163, %c0_164, %c0_165] : memref<3x8x1xf32, #tpu.memory_space<vmem>>, vector<1x8x1xf32>
    %185 = vector.shape_cast %184 : vector<1x8x1xf32> to vector<8x1xf32>
    %186 = vector.broadcast %185 : vector<8x1xf32> to vector<8x1024xf32>
    %187 = arith.addf %183, %186 : vector<8x1024xf32>
    %cst_166 = arith.constant 0.000000e+00 : f32
    %188 = vector.broadcast %cst_166 : f32 to vector<8x1024xf32>
    %189 = arith.maximumf %187, %188 : vector<8x1024xf32>
    %190 = vector.broadcast %159 : vector<1x1024xf32> to vector<8x1024xf32>
    %191 = arith.mulf %189, %190 : vector<8x1024xf32>
    %c0_167 = arith.constant 0 : index
    %c0_168 = arith.constant 0 : index
    %192 = vector.load %arg17[%c0_167, %c0_168] : memref<8x1152xf32, #tpu.memory_space<vmem>>, vector<8x1024xf32>
    tpu.vector_store %arg17[%c0_167, %c0_168], %191 {strides = array<i32>} : memref<8x1152xf32, #tpu.memory_space<vmem>>, vector<8x1024xf32>,
    %c0_169 = arith.constant 0 : index
    %c0_170 = arith.constant 0 : index
    %193 = vector.load %arg17[%c0_169, %c0_170] : memref<8x1152xf32, #tpu.memory_space<vmem>>, vector<8x1024xf32>
    %194 = arith.truncf %193 : vector<8x1024xf32> to vector<8x1024xbf16>
    %c0_171 = arith.constant 0 : index
    %c0_172 = arith.constant 0 : index
    %195 = vector.load %arg18[%c0_171, %c0_172] : memref<256x1024xbf16, #tpu.memory_space<vmem>>, vector<8x1024xbf16>
    tpu.vector_store %arg18[%c0_171, %c0_172], %194 {strides = array<i32>} : memref<256x1024xbf16, #tpu.memory_space<vmem>>, vector<8x1024xbf16>,
    %c0_173 = arith.constant 0 : index
    %c1_174 = arith.constant 1 : index
    %196 = vector.load %arg17[%c0_173, %c1_174] : memref<8x1152xf32, #tpu.memory_space<vmem>>, vector<8x1024xf32>
    %197 = arith.truncf %196 : vector<8x1024xf32> to vector<8x1024xbf16>
    %c8_175 = arith.constant 8 : index
    %c0_176 = arith.constant 0 : index
    %198 = vector.load %arg18[%c8_175, %c0_176] : memref<256x1024xbf16, #tpu.memory_space<vmem>>, vector<8x1024xbf16>
    tpu.vector_store %arg18[%c8_175, %c0_176], %197 {strides = array<i32>} : memref<256x1024xbf16, #tpu.memory_space<vmem>>, vector<8x1024xbf16>,
    %c0_177 = arith.constant 0 : index
    %c2_178 = arith.constant 2 : index
    %199 = vector.load %arg17[%c0_177, %c2_178] : memref<8x1152xf32, #tpu.memory_space<vmem>>, vector<8x1024xf32>
    %200 = arith.truncf %199 : vector<8x1024xf32> to vector<8x1024xbf16>
    %c16_179 = arith.constant 16 : index
    %c0_180 = arith.constant 0 : index
    %201 = vector.load %arg18[%c16_179, %c0_180] : memref<256x1024xbf16, #tpu.memory_space<vmem>>, vector<8x1024xbf16>
    tpu.vector_store %arg18[%c16_179, %c0_180], %200 {strides = array<i32>} : memref<256x1024xbf16, #tpu.memory_space<vmem>>, vector<8x1024xbf16>,
    %c0_181 = arith.constant 0 : index
    %c3_182 = arith.constant 3 : index
    %202 = vector.load %arg17[%c0_181, %c3_182] : memref<8x1152xf32, #tpu.memory_space<vmem>>, vector<8x1024xf32>
    %203 = arith.truncf %202 : vector<8x1024xf32> to vector<8x1024xbf16>
    %c24_183 = arith.constant 24 : index
    %c0_184 = arith.constant 0 : index
    %204 = vector.load %arg18[%c24_183, %c0_184] : memref<256x1024xbf16, #tpu.memory_space<vmem>>, vector<8x1024xbf16>
    tpu.vector_store %arg18[%c24_183, %c0_184], %203 {strides = array<i32>} : memref<256x1024xbf16, #tpu.memory_space<vmem>>, vector<8x1024xbf16>,
    %c0_185 = arith.constant 0 : index
    %c4_186 = arith.constant 4 : index
    %205 = vector.load %arg17[%c0_185, %c4_186] : memref<8x1152xf32, #tpu.memory_space<vmem>>, vector<8x1024xf32>
    %206 = arith.truncf %205 : vector<8x1024xf32> to vector<8x1024xbf16>
    %c32_187 = arith.constant 32 : index
    %c0_188 = arith.constant 0 : index
    %207 = vector.load %arg18[%c32_187, %c0_188] : memref<256x1024xbf16, #tpu.memory_space<vmem>>, vector<8x1024xbf16>
    tpu.vector_store %arg18[%c32_187, %c0_188], %206 {strides = array<i32>} : memref<256x1024xbf16, #tpu.memory_space<vmem>>, vector<8x1024xbf16>,
    %c0_189 = arith.constant 0 : index
    %c16_190 = arith.constant 16 : index
    %208 = vector.load %arg17[%c0_189, %c16_190] : memref<8x1152xf32, #tpu.memory_space<vmem>>, vector<8x1024xf32>
    %209 = arith.truncf %208 : vector<8x1024xf32> to vector<8x1024xbf16>
    %c40_191 = arith.constant 40 : index
    %c0_192 = arith.constant 0 : index
    %210 = vector.load %arg18[%c40_191, %c0_192] : memref<256x1024xbf16, #tpu.memory_space<vmem>>, vector<8x1024xbf16>
    tpu.vector_store %arg18[%c40_191, %c0_192], %209 {strides = array<i32>} : memref<256x1024xbf16, #tpu.memory_space<vmem>>, vector<8x1024xbf16>,
    %c0_193 = arith.constant 0 : index
    %c17_194 = arith.constant 17 : index
    %211 = vector.load %arg17[%c0_193, %c17_194] : memref<8x1152xf32, #tpu.memory_space<vmem>>, vector<8x1024xf32>
    %212 = arith.truncf %211 : vector<8x1024xf32> to vector<8x1024xbf16>
    %c48_195 = arith.constant 48 : index
    %c0_196 = arith.constant 0 : index
    %213 = vector.load %arg18[%c48_195, %c0_196] : memref<256x1024xbf16, #tpu.memory_space<vmem>>, vector<8x1024xbf16>
    tpu.vector_store %arg18[%c48_195, %c0_196], %212 {strides = array<i32>} : memref<256x1024xbf16, #tpu.memory_space<vmem>>, vector<8x1024xbf16>,
    %c0_197 = arith.constant 0 : index
    %c18_198 = arith.constant 18 : index
    %214 = vector.load %arg17[%c0_197, %c18_198] : memref<8x1152xf32, #tpu.memory_space<vmem>>, vector<8x1024xf32>
    %215 = arith.truncf %214 : vector<8x1024xf32> to vector<8x1024xbf16>
    %c56_199 = arith.constant 56 : index
    %c0_200 = arith.constant 0 : index
    %216 = vector.load %arg18[%c56_199, %c0_200] : memref<256x1024xbf16, #tpu.memory_space<vmem>>, vector<8x1024xbf16>
    tpu.vector_store %arg18[%c56_199, %c0_200], %215 {strides = array<i32>} : memref<256x1024xbf16, #tpu.memory_space<vmem>>, vector<8x1024xbf16>,
    %c0_201 = arith.constant 0 : index
    %c19_202 = arith.constant 19 : index
    %217 = vector.load %arg17[%c0_201, %c19_202] : memref<8x1152xf32, #tpu.memory_space<vmem>>, vector<8x1024xf32>
    %218 = arith.truncf %217 : vector<8x1024xf32> to vector<8x1024xbf16>
    %c64_203 = arith.constant 64 : index
    %c0_204 = arith.constant 0 : index
    %219 = vector.load %arg18[%c64_203, %c0_204] : memref<256x1024xbf16, #tpu.memory_space<vmem>>, vector<8x1024xbf16>
    tpu.vector_store %arg18[%c64_203, %c0_204], %218 {strides = array<i32>} : memref<256x1024xbf16, #tpu.memory_space<vmem>>, vector<8x1024xbf16>,
    %c0_205 = arith.constant 0 : index
    %c20_206 = arith.constant 20 : index
    %220 = vector.load %arg17[%c0_205, %c20_206] : memref<8x1152xf32, #tpu.memory_space<vmem>>, vector<8x1024xf32>
    %221 = arith.truncf %220 : vector<8x1024xf32> to vector<8x1024xbf16>
    %c72_207 = arith.constant 72 : index
    %c0_208 = arith.constant 0 : index
    %222 = vector.load %arg18[%c72_207, %c0_208] : memref<256x1024xbf16, #tpu.memory_space<vmem>>, vector<8x1024xbf16>
    tpu.vector_store %arg18[%c72_207, %c0_208], %221 {strides = array<i32>} : memref<256x1024xbf16, #tpu.memory_space<vmem>>, vector<8x1024xbf16>,
    %c0_209 = arith.constant 0 : index
    %c32_210 = arith.constant 32 : index
    %223 = vector.load %arg17[%c0_209, %c32_210] : memref<8x1152xf32, #tpu.memory_space<vmem>>, vector<8x1024xf32>
    %224 = arith.truncf %223 : vector<8x1024xf32> to vector<8x1024xbf16>
    %c80_211 = arith.constant 80 : index
    %c0_212 = arith.constant 0 : index
    %225 = vector.load %arg18[%c80_211, %c0_212] : memref<256x1024xbf16, #tpu.memory_space<vmem>>, vector<8x1024xbf16>
    tpu.vector_store %arg18[%c80_211, %c0_212], %224 {strides = array<i32>} : memref<256x1024xbf16, #tpu.memory_space<vmem>>, vector<8x1024xbf16>,
    %c0_213 = arith.constant 0 : index
    %c33_214 = arith.constant 33 : index
    %226 = vector.load %arg17[%c0_213, %c33_214] : memref<8x1152xf32, #tpu.memory_space<vmem>>, vector<8x1024xf32>
    %227 = arith.truncf %226 : vector<8x1024xf32> to vector<8x1024xbf16>
    %c88_215 = arith.constant 88 : index
    %c0_216 = arith.constant 0 : index
    %228 = vector.load %arg18[%c88_215, %c0_216] : memref<256x1024xbf16, #tpu.memory_space<vmem>>, vector<8x1024xbf16>
    tpu.vector_store %arg18[%c88_215, %c0_216], %227 {strides = array<i32>} : memref<256x1024xbf16, #tpu.memory_space<vmem>>, vector<8x1024xbf16>,
    %c0_217 = arith.constant 0 : index
    %c34_218 = arith.constant 34 : index
    %229 = vector.load %arg17[%c0_217, %c34_218] : memref<8x1152xf32, #tpu.memory_space<vmem>>, vector<8x1024xf32>
    %230 = arith.truncf %229 : vector<8x1024xf32> to vector<8x1024xbf16>
    %c96_219 = arith.constant 96 : index
    %c0_220 = arith.constant 0 : index
    %231 = vector.load %arg18[%c96_219, %c0_220] : memref<256x1024xbf16, #tpu.memory_space<vmem>>, vector<8x1024xbf16>
    tpu.vector_store %arg18[%c96_219, %c0_220], %230 {strides = array<i32>} : memref<256x1024xbf16, #tpu.memory_space<vmem>>, vector<8x1024xbf16>,
    %c0_221 = arith.constant 0 : index
    %c35_222 = arith.constant 35 : index
    %232 = vector.load %arg17[%c0_221, %c35_222] : memref<8x1152xf32, #tpu.memory_space<vmem>>, vector<8x1024xf32>
    %233 = arith.truncf %232 : vector<8x1024xf32> to vector<8x1024xbf16>
    %c104_223 = arith.constant 104 : index
    %c0_224 = arith.constant 0 : index
    %234 = vector.load %arg18[%c104_223, %c0_224] : memref<256x1024xbf16, #tpu.memory_space<vmem>>, vector<8x1024xbf16>
    tpu.vector_store %arg18[%c104_223, %c0_224], %233 {strides = array<i32>} : memref<256x1024xbf16, #tpu.memory_space<vmem>>, vector<8x1024xbf16>,
    %c0_225 = arith.constant 0 : index
    %c36_226 = arith.constant 36 : index
    %235 = vector.load %arg17[%c0_225, %c36_226] : memref<8x1152xf32, #tpu.memory_space<vmem>>, vector<8x1024xf32>
    %236 = arith.truncf %235 : vector<8x1024xf32> to vector<8x1024xbf16>
    %c112_227 = arith.constant 112 : index
    %c0_228 = arith.constant 0 : index
    %237 = vector.load %arg18[%c112_227, %c0_228] : memref<256x1024xbf16, #tpu.memory_space<vmem>>, vector<8x1024xbf16>
    tpu.vector_store %arg18[%c112_227, %c0_228], %236 {strides = array<i32>} : memref<256x1024xbf16, #tpu.memory_space<vmem>>, vector<8x1024xbf16>,
    %c0_229 = arith.constant 0 : index
    %c48_230 = arith.constant 48 : index
    %238 = vector.load %arg17[%c0_229, %c48_230] : memref<8x1152xf32, #tpu.memory_space<vmem>>, vector<8x1024xf32>
    %239 = arith.truncf %238 : vector<8x1024xf32> to vector<8x1024xbf16>
    %c120_231 = arith.constant 120 : index
    %c0_232 = arith.constant 0 : index
    %240 = vector.load %arg18[%c120_231, %c0_232] : memref<256x1024xbf16, #tpu.memory_space<vmem>>, vector<8x1024xbf16>
    tpu.vector_store %arg18[%c120_231, %c0_232], %239 {strides = array<i32>} : memref<256x1024xbf16, #tpu.memory_space<vmem>>, vector<8x1024xbf16>,
    %c0_233 = arith.constant 0 : index
    %c49_234 = arith.constant 49 : index
    %241 = vector.load %arg17[%c0_233, %c49_234] : memref<8x1152xf32, #tpu.memory_space<vmem>>, vector<8x1024xf32>
    %242 = arith.truncf %241 : vector<8x1024xf32> to vector<8x1024xbf16>
    %c128_235 = arith.constant 128 : index
    %c0_236 = arith.constant 0 : index
    %243 = vector.load %arg18[%c128_235, %c0_236] : memref<256x1024xbf16, #tpu.memory_space<vmem>>, vector<8x1024xbf16>
    tpu.vector_store %arg18[%c128_235, %c0_236], %242 {strides = array<i32>} : memref<256x1024xbf16, #tpu.memory_space<vmem>>, vector<8x1024xbf16>,
    %c0_237 = arith.constant 0 : index
    %c50_238 = arith.constant 50 : index
    %244 = vector.load %arg17[%c0_237, %c50_238] : memref<8x1152xf32, #tpu.memory_space<vmem>>, vector<8x1024xf32>
    %245 = arith.truncf %244 : vector<8x1024xf32> to vector<8x1024xbf16>
    %c136_239 = arith.constant 136 : index
    %c0_240 = arith.constant 0 : index
    %246 = vector.load %arg18[%c136_239, %c0_240] : memref<256x1024xbf16, #tpu.memory_space<vmem>>, vector<8x1024xbf16>
    tpu.vector_store %arg18[%c136_239, %c0_240], %245 {strides = array<i32>} : memref<256x1024xbf16, #tpu.memory_space<vmem>>, vector<8x1024xbf16>,
    %c0_241 = arith.constant 0 : index
    %c51_242 = arith.constant 51 : index
    %247 = vector.load %arg17[%c0_241, %c51_242] : memref<8x1152xf32, #tpu.memory_space<vmem>>, vector<8x1024xf32>
    %248 = arith.truncf %247 : vector<8x1024xf32> to vector<8x1024xbf16>
    %c144_243 = arith.constant 144 : index
    %c0_244 = arith.constant 0 : index
    %249 = vector.load %arg18[%c144_243, %c0_244] : memref<256x1024xbf16, #tpu.memory_space<vmem>>, vector<8x1024xbf16>
    tpu.vector_store %arg18[%c144_243, %c0_244], %248 {strides = array<i32>} : memref<256x1024xbf16, #tpu.memory_space<vmem>>, vector<8x1024xbf16>,
    %c0_245 = arith.constant 0 : index
    %c52_246 = arith.constant 52 : index
    %250 = vector.load %arg17[%c0_245, %c52_246] : memref<8x1152xf32, #tpu.memory_space<vmem>>, vector<8x1024xf32>
    %251 = arith.truncf %250 : vector<8x1024xf32> to vector<8x1024xbf16>
    %c152_247 = arith.constant 152 : index
    %c0_248 = arith.constant 0 : index
    %252 = vector.load %arg18[%c152_247, %c0_248] : memref<256x1024xbf16, #tpu.memory_space<vmem>>, vector<8x1024xbf16>
    tpu.vector_store %arg18[%c152_247, %c0_248], %251 {strides = array<i32>} : memref<256x1024xbf16, #tpu.memory_space<vmem>>, vector<8x1024xbf16>,
    %c0_249 = arith.constant 0 : index
    %c64_250 = arith.constant 64 : index
    %253 = vector.load %arg17[%c0_249, %c64_250] : memref<8x1152xf32, #tpu.memory_space<vmem>>, vector<8x1024xf32>
    %254 = arith.truncf %253 : vector<8x1024xf32> to vector<8x1024xbf16>
    %c160_251 = arith.constant 160 : index
    %c0_252 = arith.constant 0 : index
    %255 = vector.load %arg18[%c160_251, %c0_252] : memref<256x1024xbf16, #tpu.memory_space<vmem>>, vector<8x1024xbf16>
    tpu.vector_store %arg18[%c160_251, %c0_252], %254 {strides = array<i32>} : memref<256x1024xbf16, #tpu.memory_space<vmem>>, vector<8x1024xbf16>,
    %c0_253 = arith.constant 0 : index
    %c65_254 = arith.constant 65 : index
    %256 = vector.load %arg17[%c0_253, %c65_254] : memref<8x1152xf32, #tpu.memory_space<vmem>>, vector<8x1024xf32>
    %257 = arith.truncf %256 : vector<8x1024xf32> to vector<8x1024xbf16>
    %c168_255 = arith.constant 168 : index
    %c0_256 = arith.constant 0 : index
    %258 = vector.load %arg18[%c168_255, %c0_256] : memref<256x1024xbf16, #tpu.memory_space<vmem>>, vector<8x1024xbf16>
    tpu.vector_store %arg18[%c168_255, %c0_256], %257 {strides = array<i32>} : memref<256x1024xbf16, #tpu.memory_space<vmem>>, vector<8x1024xbf16>,
    %c0_257 = arith.constant 0 : index
    %c66_258 = arith.constant 66 : index
    %259 = vector.load %arg17[%c0_257, %c66_258] : memref<8x1152xf32, #tpu.memory_space<vmem>>, vector<8x1024xf32>
    %260 = arith.truncf %259 : vector<8x1024xf32> to vector<8x1024xbf16>
    %c176_259 = arith.constant 176 : index
    %c0_260 = arith.constant 0 : index
    %261 = vector.load %arg18[%c176_259, %c0_260] : memref<256x1024xbf16, #tpu.memory_space<vmem>>, vector<8x1024xbf16>
    tpu.vector_store %arg18[%c176_259, %c0_260], %260 {strides = array<i32>} : memref<256x1024xbf16, #tpu.memory_space<vmem>>, vector<8x1024xbf16>,
    %c0_261 = arith.constant 0 : index
    %c67_262 = arith.constant 67 : index
    %262 = vector.load %arg17[%c0_261, %c67_262] : memref<8x1152xf32, #tpu.memory_space<vmem>>, vector<8x1024xf32>
    %263 = arith.truncf %262 : vector<8x1024xf32> to vector<8x1024xbf16>
    %c184_263 = arith.constant 184 : index
    %c0_264 = arith.constant 0 : index
    %264 = vector.load %arg18[%c184_263, %c0_264] : memref<256x1024xbf16, #tpu.memory_space<vmem>>, vector<8x1024xbf16>
    tpu.vector_store %arg18[%c184_263, %c0_264], %263 {strides = array<i32>} : memref<256x1024xbf16, #tpu.memory_space<vmem>>, vector<8x1024xbf16>,
    %c0_265 = arith.constant 0 : index
    %c68_266 = arith.constant 68 : index
    %265 = vector.load %arg17[%c0_265, %c68_266] : memref<8x1152xf32, #tpu.memory_space<vmem>>, vector<8x1024xf32>
    %266 = arith.truncf %265 : vector<8x1024xf32> to vector<8x1024xbf16>
    %c192_267 = arith.constant 192 : index
    %c0_268 = arith.constant 0 : index
    %267 = vector.load %arg18[%c192_267, %c0_268] : memref<256x1024xbf16, #tpu.memory_space<vmem>>, vector<8x1024xbf16>
    tpu.vector_store %arg18[%c192_267, %c0_268], %266 {strides = array<i32>} : memref<256x1024xbf16, #tpu.memory_space<vmem>>, vector<8x1024xbf16>,
    %c0_269 = arith.constant 0 : index
    %c0_270 = arith.constant 0 : index
    %268 = vector.load %arg4[%c0_269, %c0_270] : memref<8x200xbf16, #tpu.memory_space<vmem>>, vector<8x200xbf16>
    %c0_271 = arith.constant 0 : index
    %c0_272 = arith.constant 0 : index
    %269 = vector.load %arg18[%c0_271, %c0_272] : memref<256x1024xbf16, #tpu.memory_space<vmem>>, vector<200x1024xbf16>
    %cst_273 = arith.constant dense<0.000000e+00> : vector<8x1024xf32>
    %270 = tpu.matmul %268, %269, %cst_273 {dimension_numbers = #tpu.dot_dimension_numbers<[1], [0], [0], [1], [0, 0, 1, 1], [], []>} : vector<8x200xbf16>, vector<200x1024xbf16>, vector<8x1024xf32> -> vector<8x1024xf32>
    %c2_274 = arith.constant 2 : index
    %c0_275 = arith.constant 0 : index
    %c0_276 = arith.constant 0 : index
    %271 = vector.load %arg5[%c2_274, %c0_275, %c0_276] : memref<3x8x1xf32, #tpu.memory_space<vmem>>, vector<1x8x1xf32>
    %272 = vector.shape_cast %271 : vector<1x8x1xf32> to vector<8x1xf32>
    %273 = vector.broadcast %272 : vector<8x1xf32> to vector<8x1024xf32>
    %274 = arith.addf %270, %273 : vector<8x1024xf32>
    %c2_277 = arith.constant 2 : index
    %c0_278 = arith.constant 0 : index
    %275 = vector.load %arg8[%c2_277, %c0_278] : memref<3x1024xf32, #tpu.memory_space<vmem>>, vector<1x1024xf32>
    %276 = vector.broadcast %275 : vector<1x1024xf32> to vector<8x1024xf32>
    %277 = arith.mulf %274, %276 : vector<8x1024xf32>
    %cst_279 = arith.constant dense<0.000000e+00> : vector<8xf32>
    %278 = vector.multi_reduction <add>, %277, %cst_279 [1] : vector<8x1024xf32> to vector<8xf32>
    %279 = vector.shape_cast %278 : vector<8xf32> to vector<8x1xf32>
    %280 = arith.mulf %277, %274 : vector<8x1024xf32>
    %cst_280 = arith.constant dense<0.000000e+00> : vector<8xf32>
    %281 = vector.multi_reduction <add>, %280, %cst_280 [1] : vector<8x1024xf32> to vector<8xf32>
    %282 = vector.shape_cast %281 : vector<8xf32> to vector<8x1xf32>
    %cst_281 = arith.constant 0.00999999977 : f32
    %283 = vector.broadcast %cst_281 : f32 to vector<8x1xf32>
    %284 = arith.mulf %279, %283 : vector<8x1xf32>
    %cst_282 = arith.constant 0.00999999977 : f32
    %285 = vector.broadcast %cst_282 : f32 to vector<8x1xf32>
    %286 = arith.mulf %282, %285 : vector<8x1xf32>
    %287 = arith.mulf %284, %284 : vector<8x1xf32>
    %288 = arith.subf %286, %287 : vector<8x1xf32>
    %c2_283 = arith.constant 2 : index
    %c0_284 = arith.constant 0 : index
    %c0_285 = arith.constant 0 : index
    %289 = vector.load %arg6[%c2_283, %c0_284, %c0_285] : memref<3x8x1xf32, #tpu.memory_space<vmem>>, vector<1x8x1xf32>
    %290 = vector.shape_cast %289 : vector<1x8x1xf32> to vector<8x1xf32>
    %291 = vector.broadcast %284 : vector<8x1xf32> to vector<8x1024xf32>
    %292 = arith.subf %274, %291 : vector<8x1024xf32>
    %cst_286 = arith.constant 9.99999974E-6 : f32
    %293 = vector.broadcast %cst_286 : f32 to vector<8x1xf32>
    %294 = arith.addf %288, %293 : vector<8x1xf32>
    %295 = math.rsqrt %294 : vector<8x1xf32>
    %296 = vector.broadcast %295 : vector<8x1xf32> to vector<8x1024xf32>
    %297 = arith.mulf %292, %296 : vector<8x1024xf32>
    %298 = vector.broadcast %290 : vector<8x1xf32> to vector<8x1024xf32>
    %299 = arith.mulf %298, %297 : vector<8x1024xf32>
    %c2_287 = arith.constant 2 : index
    %c0_288 = arith.constant 0 : index
    %c0_289 = arith.constant 0 : index
    %300 = vector.load %arg7[%c2_287, %c0_288, %c0_289] : memref<3x8x1xf32, #tpu.memory_space<vmem>>, vector<1x8x1xf32>
    %301 = vector.shape_cast %300 : vector<1x8x1xf32> to vector<8x1xf32>
    %302 = vector.broadcast %301 : vector<8x1xf32> to vector<8x1024xf32>
    %303 = arith.addf %299, %302 : vector<8x1024xf32>
    %cst_290 = arith.constant 0.000000e+00 : f32
    %304 = vector.broadcast %cst_290 : f32 to vector<8x1024xf32>
    %305 = arith.maximumf %303, %304 : vector<8x1024xf32>
    %306 = vector.broadcast %275 : vector<1x1024xf32> to vector<8x1024xf32>
    %307 = arith.mulf %305, %306 : vector<8x1024xf32>
    %c0_291 = arith.constant 0 : index
    %c0_292 = arith.constant 0 : index
    %308 = vector.load %arg11[%c0_291, %c0_292] : memref<1x256xf32, #tpu.memory_space<vmem>>, vector<1x256xf32>
    %cst_293 = arith.constant 0.000000e+00 : f32
    %309 = vector.broadcast %cst_293 : f32 to vector<1x256xf32>
    %310 = arith.cmpf ogt, %308, %309 : vector<1x256xf32>
    %c0_294 = arith.constant 0 : index
    %c0_295 = arith.constant 0 : index
    %311 = vector.load %arg9[%c0_294, %c0_295] : memref<1x256xf32, #tpu.memory_space<vmem>>, vector<1x256xf32>
    %c0_296 = arith.constant 0 : index
    %c0_297 = arith.constant 0 : index
    %312 = vector.load %arg10[%c0_296, %c0_297] : memref<1x256xf32, #tpu.memory_space<vmem>>, vector<1x256xf32>
    %313 = vector.extract_strided_slice %307 {offsets = [0, 0], sizes = [8, 256], strides = [1, 1]} : vector<8x1024xf32> to vector<8x256xf32>
    %cst_298 = arith.constant 1.000000e+00 : f32
    %314 = vector.broadcast %cst_298 : f32 to vector<8x256xf32>
    %315 = arith.mulf %313, %314 : vector<8x256xf32>
    %cst_299 = arith.constant -1.000000e+30 : f32
    %316 = vector.shape_cast %310 : vector<1x256xi1> to vector<1x256xi1>
    %317 = vector.broadcast %316 : vector<1x256xi1> to vector<8x256xi1>
    %318 = vector.broadcast %cst_299 : f32 to vector<8x256xf32>
    %319 = arith.select %317, %315, %318 : vector<8x256xi1>, vector<8x256xf32>
    %cst_300 = arith.constant dense<0xFF800000> : vector<8xf32>
    %320 = vector.multi_reduction <maximumf>, %319, %cst_300 [1] : vector<8x256xf32> to vector<8xf32>
    %321 = vector.shape_cast %320 : vector<8xf32> to vector<8x1xf32>
    %322 = vector.broadcast %321 : vector<8x1xf32> to vector<8x256xf32>
    %323 = arith.subf %319, %322 : vector<8x256xf32>
    %324 = math.exp %323 : vector<8x256xf32>
    %cst_301 = arith.constant dense<0.000000e+00> : vector<8xf32>
    %325 = vector.multi_reduction <add>, %324, %cst_301 [1] : vector<8x256xf32> to vector<8xf32>
    %326 = vector.shape_cast %325 : vector<8xf32> to vector<8x1xf32>
    %327 = vector.broadcast %326 : vector<8x1xf32> to vector<8x256xf32>
    %328 = arith.divf %324, %327 : vector<8x256xf32>
    %329 = vector.broadcast %311 : vector<1x256xf32> to vector<8x256xf32>
    %330 = arith.mulf %328, %329 : vector<8x256xf32>
    %cst_302 = arith.constant dense<0.000000e+00> : vector<8xf32>
    %331 = vector.multi_reduction <add>, %330, %cst_302 [1] : vector<8x256xf32> to vector<8xf32>
    %332 = vector.shape_cast %331 : vector<8xf32> to vector<8x1xf32>
    %333 = vector.broadcast %312 : vector<1x256xf32> to vector<8x256xf32>
    %334 = arith.mulf %328, %333 : vector<8x256xf32>
    %cst_303 = arith.constant dense<0.000000e+00> : vector<8xf32>
    %335 = vector.multi_reduction <add>, %334, %cst_303 [1] : vector<8x256xf32> to vector<8xf32>
    %336 = vector.shape_cast %335 : vector<8xf32> to vector<8x1xf32>
    %c0_304 = arith.constant 0 : index
    %c0_305 = arith.constant 0 : index
    %337 = vector.load %arg12[%c0_304, %c0_305] : memref<8x256xf32, #tpu.memory_space<vmem>>, vector<8x256xf32>
    %338 = vector.broadcast %332 : vector<8x1xf32> to vector<8x256xf32>
    %339 = arith.mulf %338, %337 : vector<8x256xf32>
    %cst_306 = arith.constant dense<0.000000e+00> : vector<256xf32>
    %340 = vector.multi_reduction <add>, %339, %cst_306 [0] : vector<8x256xf32> to vector<256xf32>
    %341 = vector.shape_cast %340 : vector<256xf32> to vector<1x256xf32>
    %c0_307 = arith.constant 0 : index
    %c0_308 = arith.constant 0 : index
    %342 = vector.load %arg13[%c0_307, %c0_308] : memref<8x256xf32, #tpu.memory_space<vmem>>, vector<8x256xf32>
    %343 = vector.broadcast %336 : vector<8x1xf32> to vector<8x256xf32>
    %344 = arith.mulf %343, %342 : vector<8x256xf32>
    %cst_309 = arith.constant dense<0.000000e+00> : vector<256xf32>
    %345 = vector.multi_reduction <add>, %344, %cst_309 [0] : vector<8x256xf32> to vector<256xf32>
    %346 = vector.shape_cast %345 : vector<256xf32> to vector<1x256xf32>
    %347 = arith.addf %341, %346 : vector<1x256xf32>
    %c0_310 = arith.constant 0 : index
    %c0_311 = arith.constant 0 : index
    %348 = vector.load %arg14[%c0_310, %c0_311] : memref<1x256xf32, #tpu.memory_space<vmem>>, vector<1x256xf32>
    %349 = arith.addf %347, %348 : vector<1x256xf32>
    %350 = math.tanh %349 : vector<1x256xf32>
    %c0_312 = arith.constant 0 : index
    %c0_313 = arith.constant 0 : index
    %351 = vector.load %arg15[%c0_312, %c0_313] : memref<4x256xf32, #tpu.memory_space<vmem>>, vector<1x256xf32>
    tpu.vector_store %arg15[%c0_312, %c0_313], %350 {strides = array<i32>} : memref<4x256xf32, #tpu.memory_space<vmem>>, vector<1x256xf32>,
    %352 = vector.extract_strided_slice %307 {offsets = [0, 256], sizes = [8, 256], strides = [1, 1]} : vector<8x1024xf32> to vector<8x256xf32>
    %cst_314 = arith.constant 1.000000e+00 : f32
    %353 = vector.broadcast %cst_314 : f32 to vector<8x256xf32>
    %354 = arith.mulf %352, %353 : vector<8x256xf32>
    %cst_315 = arith.constant -1.000000e+30 : f32
    %355 = vector.shape_cast %310 : vector<1x256xi1> to vector<1x256xi1>
    %356 = vector.broadcast %355 : vector<1x256xi1> to vector<8x256xi1>
    %357 = vector.broadcast %cst_315 : f32 to vector<8x256xf32>
    %358 = arith.select %356, %354, %357 : vector<8x256xi1>, vector<8x256xf32>
    %cst_316 = arith.constant dense<0xFF800000> : vector<8xf32>
    %359 = vector.multi_reduction <maximumf>, %358, %cst_316 [1] : vector<8x256xf32> to vector<8xf32>
    %360 = vector.shape_cast %359 : vector<8xf32> to vector<8x1xf32>
    %361 = vector.broadcast %360 : vector<8x1xf32> to vector<8x256xf32>
    %362 = arith.subf %358, %361 : vector<8x256xf32>
    %363 = math.exp %362 : vector<8x256xf32>
    %cst_317 = arith.constant dense<0.000000e+00> : vector<8xf32>
    %364 = vector.multi_reduction <add>, %363, %cst_317 [1] : vector<8x256xf32> to vector<8xf32>
    %365 = vector.shape_cast %364 : vector<8xf32> to vector<8x1xf32>
    %366 = vector.broadcast %365 : vector<8x1xf32> to vector<8x256xf32>
    %367 = arith.divf %363, %366 : vector<8x256xf32>
    %368 = vector.broadcast %311 : vector<1x256xf32> to vector<8x256xf32>
    %369 = arith.mulf %367, %368 : vector<8x256xf32>
    %cst_318 = arith.constant dense<0.000000e+00> : vector<8xf32>
    %370 = vector.multi_reduction <add>, %369, %cst_318 [1] : vector<8x256xf32> to vector<8xf32>
    %371 = vector.shape_cast %370 : vector<8xf32> to vector<8x1xf32>
    %372 = vector.broadcast %312 : vector<1x256xf32> to vector<8x256xf32>
    %373 = arith.mulf %367, %372 : vector<8x256xf32>
    %cst_319 = arith.constant dense<0.000000e+00> : vector<8xf32>
    %374 = vector.multi_reduction <add>, %373, %cst_319 [1] : vector<8x256xf32> to vector<8xf32>
    %375 = vector.shape_cast %374 : vector<8xf32> to vector<8x1xf32>
    %c0_320 = arith.constant 0 : index
    %c0_321 = arith.constant 0 : index
    %376 = vector.load %arg12[%c0_320, %c0_321] : memref<8x256xf32, #tpu.memory_space<vmem>>, vector<8x256xf32>
    %377 = vector.broadcast %371 : vector<8x1xf32> to vector<8x256xf32>
    %378 = arith.mulf %377, %376 : vector<8x256xf32>
    %cst_322 = arith.constant dense<0.000000e+00> : vector<256xf32>
    %379 = vector.multi_reduction <add>, %378, %cst_322 [0] : vector<8x256xf32> to vector<256xf32>
    %380 = vector.shape_cast %379 : vector<256xf32> to vector<1x256xf32>
    %c0_323 = arith.constant 0 : index
    %c0_324 = arith.constant 0 : index
    %381 = vector.load %arg13[%c0_323, %c0_324] : memref<8x256xf32, #tpu.memory_space<vmem>>, vector<8x256xf32>
    %382 = vector.broadcast %375 : vector<8x1xf32> to vector<8x256xf32>
    %383 = arith.mulf %382, %381 : vector<8x256xf32>
    %cst_325 = arith.constant dense<0.000000e+00> : vector<256xf32>
    %384 = vector.multi_reduction <add>, %383, %cst_325 [0] : vector<8x256xf32> to vector<256xf32>
    %385 = vector.shape_cast %384 : vector<256xf32> to vector<1x256xf32>
    %386 = arith.addf %380, %385 : vector<1x256xf32>
    %c0_326 = arith.constant 0 : index
    %c0_327 = arith.constant 0 : index
    %387 = vector.load %arg14[%c0_326, %c0_327] : memref<1x256xf32, #tpu.memory_space<vmem>>, vector<1x256xf32>
    %388 = arith.addf %386, %387 : vector<1x256xf32>
    %389 = math.tanh %388 : vector<1x256xf32>
    %c1_328 = arith.constant 1 : index
    %c0_329 = arith.constant 0 : index
    %390 = vector.load %arg15[%c1_328, %c0_329] : memref<4x256xf32, #tpu.memory_space<vmem>>, vector<1x256xf32>
    tpu.vector_store %arg15[%c1_328, %c0_329], %389 {strides = array<i32>} : memref<4x256xf32, #tpu.memory_space<vmem>>, vector<1x256xf32>,
    %391 = vector.extract_strided_slice %307 {offsets = [0, 512], sizes = [8, 256], strides = [1, 1]} : vector<8x1024xf32> to vector<8x256xf32>
    %cst_330 = arith.constant 1.000000e+00 : f32
    %392 = vector.broadcast %cst_330 : f32 to vector<8x256xf32>
    %393 = arith.mulf %391, %392 : vector<8x256xf32>
    %cst_331 = arith.constant -1.000000e+30 : f32
    %394 = vector.shape_cast %310 : vector<1x256xi1> to vector<1x256xi1>
    %395 = vector.broadcast %394 : vector<1x256xi1> to vector<8x256xi1>
    %396 = vector.broadcast %cst_331 : f32 to vector<8x256xf32>
    %397 = arith.select %395, %393, %396 : vector<8x256xi1>, vector<8x256xf32>
    %cst_332 = arith.constant dense<0xFF800000> : vector<8xf32>
    %398 = vector.multi_reduction <maximumf>, %397, %cst_332 [1] : vector<8x256xf32> to vector<8xf32>
    %399 = vector.shape_cast %398 : vector<8xf32> to vector<8x1xf32>
    %400 = vector.broadcast %399 : vector<8x1xf32> to vector<8x256xf32>
    %401 = arith.subf %397, %400 : vector<8x256xf32>
    %402 = math.exp %401 : vector<8x256xf32>
    %cst_333 = arith.constant dense<0.000000e+00> : vector<8xf32>
    %403 = vector.multi_reduction <add>, %402, %cst_333 [1] : vector<8x256xf32> to vector<8xf32>
    %404 = vector.shape_cast %403 : vector<8xf32> to vector<8x1xf32>
    %405 = vector.broadcast %404 : vector<8x1xf32> to vector<8x256xf32>
    %406 = arith.divf %402, %405 : vector<8x256xf32>
    %407 = vector.broadcast %311 : vector<1x256xf32> to vector<8x256xf32>
    %408 = arith.mulf %406, %407 : vector<8x256xf32>
    %cst_334 = arith.constant dense<0.000000e+00> : vector<8xf32>
    %409 = vector.multi_reduction <add>, %408, %cst_334 [1] : vector<8x256xf32> to vector<8xf32>
    %410 = vector.shape_cast %409 : vector<8xf32> to vector<8x1xf32>
    %411 = vector.broadcast %312 : vector<1x256xf32> to vector<8x256xf32>
    %412 = arith.mulf %406, %411 : vector<8x256xf32>
    %cst_335 = arith.constant dense<0.000000e+00> : vector<8xf32>
    %413 = vector.multi_reduction <add>, %412, %cst_335 [1] : vector<8x256xf32> to vector<8xf32>
    %414 = vector.shape_cast %413 : vector<8xf32> to vector<8x1xf32>
    %c0_336 = arith.constant 0 : index
    %c0_337 = arith.constant 0 : index
    %415 = vector.load %arg12[%c0_336, %c0_337] : memref<8x256xf32, #tpu.memory_space<vmem>>, vector<8x256xf32>
    %416 = vector.broadcast %410 : vector<8x1xf32> to vector<8x256xf32>
    %417 = arith.mulf %416, %415 : vector<8x256xf32>
    %cst_338 = arith.constant dense<0.000000e+00> : vector<256xf32>
    %418 = vector.multi_reduction <add>, %417, %cst_338 [0] : vector<8x256xf32> to vector<256xf32>
    %419 = vector.shape_cast %418 : vector<256xf32> to vector<1x256xf32>
    %c0_339 = arith.constant 0 : index
    %c0_340 = arith.constant 0 : index
    %420 = vector.load %arg13[%c0_339, %c0_340] : memref<8x256xf32, #tpu.memory_space<vmem>>, vector<8x256xf32>
    %421 = vector.broadcast %414 : vector<8x1xf32> to vector<8x256xf32>
    %422 = arith.mulf %421, %420 : vector<8x256xf32>
    %cst_341 = arith.constant dense<0.000000e+00> : vector<256xf32>
    %423 = vector.multi_reduction <add>, %422, %cst_341 [0] : vector<8x256xf32> to vector<256xf32>
    %424 = vector.shape_cast %423 : vector<256xf32> to vector<1x256xf32>
    %425 = arith.addf %419, %424 : vector<1x256xf32>
    %c0_342 = arith.constant 0 : index
    %c0_343 = arith.constant 0 : index
    %426 = vector.load %arg14[%c0_342, %c0_343] : memref<1x256xf32, #tpu.memory_space<vmem>>, vector<1x256xf32>
    %427 = arith.addf %425, %426 : vector<1x256xf32>
    %428 = math.tanh %427 : vector<1x256xf32>
    %c2_344 = arith.constant 2 : index
    %c0_345 = arith.constant 0 : index
    %429 = vector.load %arg15[%c2_344, %c0_345] : memref<4x256xf32, #tpu.memory_space<vmem>>, vector<1x256xf32>
    tpu.vector_store %arg15[%c2_344, %c0_345], %428 {strides = array<i32>} : memref<4x256xf32, #tpu.memory_space<vmem>>, vector<1x256xf32>,
    %430 = vector.extract_strided_slice %307 {offsets = [0, 768], sizes = [8, 256], strides = [1, 1]} : vector<8x1024xf32> to vector<8x256xf32>
    %cst_346 = arith.constant 1.000000e+00 : f32
    %431 = vector.broadcast %cst_346 : f32 to vector<8x256xf32>
    %432 = arith.mulf %430, %431 : vector<8x256xf32>
    %cst_347 = arith.constant -1.000000e+30 : f32
    %433 = vector.shape_cast %310 : vector<1x256xi1> to vector<1x256xi1>
    %434 = vector.broadcast %433 : vector<1x256xi1> to vector<8x256xi1>
    %435 = vector.broadcast %cst_347 : f32 to vector<8x256xf32>
    %436 = arith.select %434, %432, %435 : vector<8x256xi1>, vector<8x256xf32>
    %cst_348 = arith.constant dense<0xFF800000> : vector<8xf32>
    %437 = vector.multi_reduction <maximumf>, %436, %cst_348 [1] : vector<8x256xf32> to vector<8xf32>
    %438 = vector.shape_cast %437 : vector<8xf32> to vector<8x1xf32>
    %439 = vector.broadcast %438 : vector<8x1xf32> to vector<8x256xf32>
    %440 = arith.subf %436, %439 : vector<8x256xf32>
    %441 = math.exp %440 : vector<8x256xf32>
    %cst_349 = arith.constant dense<0.000000e+00> : vector<8xf32>
    %442 = vector.multi_reduction <add>, %441, %cst_349 [1] : vector<8x256xf32> to vector<8xf32>
    %443 = vector.shape_cast %442 : vector<8xf32> to vector<8x1xf32>
    %444 = vector.broadcast %443 : vector<8x1xf32> to vector<8x256xf32>
    %445 = arith.divf %441, %444 : vector<8x256xf32>
    %446 = vector.broadcast %311 : vector<1x256xf32> to vector<8x256xf32>
    %447 = arith.mulf %445, %446 : vector<8x256xf32>
    %cst_350 = arith.constant dense<0.000000e+00> : vector<8xf32>
    %448 = vector.multi_reduction <add>, %447, %cst_350 [1] : vector<8x256xf32> to vector<8xf32>
    %449 = vector.shape_cast %448 : vector<8xf32> to vector<8x1xf32>
    %450 = vector.broadcast %312 : vector<1x256xf32> to vector<8x256xf32>
    %451 = arith.mulf %445, %450 : vector<8x256xf32>
    %cst_351 = arith.constant dense<0.000000e+00> : vector<8xf32>
    %452 = vector.multi_reduction <add>, %451, %cst_351 [1] : vector<8x256xf32> to vector<8xf32>
    %453 = vector.shape_cast %452 : vector<8xf32> to vector<8x1xf32>
    %c0_352 = arith.constant 0 : index
    %c0_353 = arith.constant 0 : index
    %454 = vector.load %arg12[%c0_352, %c0_353] : memref<8x256xf32, #tpu.memory_space<vmem>>, vector<8x256xf32>
    %455 = vector.broadcast %449 : vector<8x1xf32> to vector<8x256xf32>
    %456 = arith.mulf %455, %454 : vector<8x256xf32>
    %cst_354 = arith.constant dense<0.000000e+00> : vector<256xf32>
    %457 = vector.multi_reduction <add>, %456, %cst_354 [0] : vector<8x256xf32> to vector<256xf32>
    %458 = vector.shape_cast %457 : vector<256xf32> to vector<1x256xf32>
    %c0_355 = arith.constant 0 : index
    %c0_356 = arith.constant 0 : index
    %459 = vector.load %arg13[%c0_355, %c0_356] : memref<8x256xf32, #tpu.memory_space<vmem>>, vector<8x256xf32>
    %460 = vector.broadcast %453 : vector<8x1xf32> to vector<8x256xf32>
    %461 = arith.mulf %460, %459 : vector<8x256xf32>
    %cst_357 = arith.constant dense<0.000000e+00> : vector<256xf32>
    %462 = vector.multi_reduction <add>, %461, %cst_357 [0] : vector<8x256xf32> to vector<256xf32>
    %463 = vector.shape_cast %462 : vector<256xf32> to vector<1x256xf32>
    %464 = arith.addf %458, %463 : vector<1x256xf32>
    %c0_358 = arith.constant 0 : index
    %c0_359 = arith.constant 0 : index
    %465 = vector.load %arg14[%c0_358, %c0_359] : memref<1x256xf32, #tpu.memory_space<vmem>>, vector<1x256xf32>
    %466 = arith.addf %464, %465 : vector<1x256xf32>
    %467 = math.tanh %466 : vector<1x256xf32>
    %c3_360 = arith.constant 3 : index
    %c0_361 = arith.constant 0 : index
    %468 = vector.load %arg15[%c3_360, %c0_361] : memref<4x256xf32, #tpu.memory_space<vmem>>, vector<1x256xf32>
    tpu.vector_store %arg15[%c3_360, %c0_361], %467 {strides = array<i32>} : memref<4x256xf32, #tpu.memory_space<vmem>>, vector<1x256xf32>,
    return
  }
  func.func @transform_0(%arg0: i32) -> (i32, i32) {
    %c0_i32 = arith.constant 0 : i32
    %c0_i32_0 = arith.constant 0 : i32
    %c0_i32_1 = arith.constant 0 : i32
    return %c0_i32, %c0_i32_0 : i32, i32
  }
  func.func @transform_1(%arg0: i32) -> (i32, i32) {
    %c0_i32 = arith.constant 0 : i32
    %c0_i32_0 = arith.constant 0 : i32
    %c0_i32_1 = arith.constant 0 : i32
    return %c0_i32, %c0_i32_0 : i32, i32
  }
  func.func @transform_2(%arg0: i32) -> (i32, i32) {
    %c0_i32 = arith.constant 0 : i32
    %c0_i32_0 = arith.constant 0 : i32
    %c0_i32_1 = arith.constant 0 : i32
    return %c0_i32, %c0_i32_0 : i32, i32
  }
  func.func @transform_3(%arg0: i32) -> (i32, i32) {
    %c0_i32 = arith.constant 0 : i32
    %c0_i32_0 = arith.constant 0 : i32
    %c0_i32_1 = arith.constant 0 : i32
    return %c0_i32, %c0_i32_0 : i32, i32
  }
  func.func @transform_4(%arg0: i32) -> (i32, i32, i32) {
    %c0_i32 = arith.constant 0 : i32
    %c0_i32_0 = arith.constant 0 : i32
    %c0_i32_1 = arith.constant 0 : i32
    %c0_i32_2 = arith.constant 0 : i32
    return %c0_i32, %c0_i32_0, %c0_i32_1 : i32, i32, i32
  }
  func.func @transform_5(%arg0: i32) -> (i32, i32, i32) {
    %c0_i32 = arith.constant 0 : i32
    %c0_i32_0 = arith.constant 0 : i32
    %c0_i32_1 = arith.constant 0 : i32
    %c0_i32_2 = arith.constant 0 : i32
    return %c0_i32, %c0_i32_0, %c0_i32_1 : i32, i32, i32
  }
  func.func @transform_6(%arg0: i32) -> (i32, i32, i32) {
    %c0_i32 = arith.constant 0 : i32
    %c0_i32_0 = arith.constant 0 : i32
    %c0_i32_1 = arith.constant 0 : i32
    %c0_i32_2 = arith.constant 0 : i32
    return %c0_i32, %c0_i32_0, %c0_i32_1 : i32, i32, i32
  }
  func.func @transform_7(%arg0: i32) -> (i32, i32) {
    %c0_i32 = arith.constant 0 : i32
    %c0_i32_0 = arith.constant 0 : i32
    %c0_i32_1 = arith.constant 0 : i32
    return %c0_i32, %c0_i32_0 : i32, i32
  }
  func.func @transform_8(%arg0: i32) -> (i32, i32) {
    %c0_i32 = arith.constant 0 : i32
    %c0_i32_0 = arith.constant 0 : i32
    %c0_i32_1 = arith.constant 0 : i32
    return %c0_i32, %c0_i32_0 : i32, i32
  }
  func.func @transform_9(%arg0: i32) -> (i32, i32) {
    %c0_i32 = arith.constant 0 : i32
    %c0_i32_0 = arith.constant 0 : i32
    %c0_i32_1 = arith.constant 0 : i32
    return %c0_i32, %c0_i32_0 : i32, i32
  }
  func.func @transform_10(%arg0: i32) -> (i32, i32) {
    %c0_i32 = arith.constant 0 : i32
    %c0_i32_0 = arith.constant 0 : i32
    %c0_i32_1 = arith.constant 0 : i32
    return %c0_i32, %c0_i32_0 : i32, i32
  }
  func.func @transform_11(%arg0: i32) -> (i32, i32) {
    %c0_i32 = arith.constant 0 : i32
    %c0_i32_0 = arith.constant 0 : i32
    %c0_i32_1 = arith.constant 0 : i32
    return %c0_i32, %c0_i32_0 : i32, i32
  }
  func.func @transform_12(%arg0: i32) -> (i32, i32) {
    %c0_i32 = arith.constant 0 : i32
    %c0_i32_0 = arith.constant 0 : i32
    %c0_i32_1 = arith.constant 0 : i32
    return %c0_i32, %c0_i32_0 : i32, i32
  }
  func.func @transform_13(%arg0: i32) -> (i32, i32) {
    %c0_i32 = arith.constant 0 : i32
    %c0_i32_0 = arith.constant 0 : i32
    %c0_i32_1 = arith.constant 0 : i32
    return %c0_i32, %c0_i32_0 : i32, i32
  }
  func.func @transform_14(%arg0: i32) -> (i32, i32) {
    %c0_i32 = arith.constant 0 : i32
    %c0_i32_0 = arith.constant 0 : i32
    %c0_i32_1 = arith.constant 0 : i32
    return %c0_i32, %c0_i32_0 : i32, i32
  }
}

</mosaic_0001>

<bundles_post_ra>
// kernel: _lambda_.1
= control target key start
LH: loop header
LB: loop body
LE: loop exit
PB: predicated region body
PF: predicated region fallthrough
CT: control target
= control target key end

     0   :  { %s12605_s17 = smov 109   ;;  %s12589_s22 = smov 110   ;;  %vm132_vm0 = vcmask 1043456   ;;  %vm632_vm1 = vcmask 891904   ;;  %vm12672_vm2 = vcmask 900096   ;;  %vm12673_vm3 = vcmask 908288   ;;  %s12530_s0 = inlined_call_operand.vmem [shape: bf16[16,1152], index: 0, kind: input, shape index: {}]   ;;  %s12531_s1 = inlined_call_operand.vmem [shape: bf16[8,256], index: 1, kind: input, shape index: {}]   ;;  %s12532_s4 = inlined_call_operand.vmem [shape: f32[3,8,1], index: 4, kind: input, shape index: {}]   ;;  %s12533_s5 = inlined_call_operand.vmem [shape: f32[3,8,1], index: 5, kind: input, shape index: {}]   ;;  %s12534_s6 = inlined_call_operand.vmem [shape: f32[3,8,1], index: 6, kind: input, shape index: {}]   ;;  %s12535_s7 = inlined_call_operand.vmem [shape: f32[3,1024], index: 7, kind: input, shape index: {}]   ;;  %s12536_s2 = inlined_call_operand.vmem [shape: bf16[8,200], index: 2, kind: input, shape index: {}]   ;;  %s12537_s3 = inlined_call_operand.vmem [shape: bf16[8,200], index: 3, kind: input, shape index: {}]   ;;  %s12538_s10 = inlined_call_operand.vmem [shape: f32[1,256], index: 10, kind: input, shape index: {}]   ;;  %s12539_s8 = inlined_call_operand.vmem [shape: f32[1,256], index: 8, kind: input, shape index: {}]   ;;  %s12540_s9 = inlined_call_operand.vmem [shape: f32[1,256], index: 9, kind: input, shape index: {}]   ;;  %s12541_s11 = inlined_call_operand.vmem [shape: f32[8,256], index: 11, kind: input, shape index: {}]   ;;  %s12542_s12 = inlined_call_operand.vmem [shape: f32[8,256], index: 12, kind: input, shape index: {}]   ;;  %s12543_s13 = inlined_call_operand.vmem [shape: f32[1,256], index: 13, kind: input, shape index: {}]   ;;  %s12544_s14 = inlined_call_operand.vmem [shape: f32[4,256], index: 14, kind: output, shape index: {}]  }
   0x1   :  { %12703 = sst [smem:[#allocation19_spill]] %s12538_s10  ;;  %v9380_v0 = vld [vmem:[%s12530_s0 + $0x24] sm:$0xff]  ;;  %v9394_v2 = vld [vmem:[%s12530_s0 + $0x2c] sm:$0xff]  ;;  %v9416_v4 = vld [vmem:[%s12530_s0 + $0x34] sm:$0xff]  ;;  %s12602_s27 = smov 111   ;;  %vm12654_vm4 = vcmask 916480  }
   0x2   :  { %12704 = sst [smem:[#allocation20_spill]] %s12539_s8  ;;  %v9385_v1 = vld [vmem:[%s12530_s0] sm:$0xff]  ;;  %611 = vrot.lane.b32.xlu1 %v9380_v0, %s12605_s17  ;;  %v9399_v3 = vld [vmem:[%s12530_s0 + $0x8] sm:$0xff]  ;;  %v9421_v5 = vld [vmem:[%s12530_s0 + $0x10] sm:$0xff]  ;;  %s12583_s28 = smov 112   ;;  %vm12645_vm5 = vcmask 1022976  }
   0x3   :  { %12705 = sst [smem:[#allocation21_spill]] %s12540_s9  ;;  %601 = vrot.lane.b32.xlu0 %v9385_v1, %s12605_s17  ;;  %s12587_s29 = smov 125   ;;  %vm12642_vm6 = vcmask 1031168   ;;  %vm12641_vm7 = vcmask 1039360   ;;  %vm1296_vm8 = vcmask 629760   ;;  %vm12591_vm9 = vcmask 637952  }
   0x4   :  { %12706 = sst [smem:[#allocation22_spill]] %s12541_s11  ;;  %s12594_s30 = smov 126   ;;  %vm12600_vm10 = vcmask 646144   ;;  %vm1047_vm11 = vcmask 654336   ;;  %vm964_vm12 = vcmask 760832   ;;  %vm881_vm13 = vcmask 769024  }
   0x5   :  { %12707 = sst [smem:[#allocation23_spill]] %s12542_s12  ;;  %s12585_s15 = smov 127   ;;  %vm798_vm14 = vcmask 777216   ;;  %vm12617_vm15 = vcmask 785408  }
   0x6   :  { %12708 = sst [smem:[#allocation24_spill]] %s12543_s13  ;;  %613 = vrot.lane.b32.xlu1 %v9394_v2, %s12605_s17  ;;  %s12569_s16 = smov 77  }
   0x7   :  { %12709 = sst [smem:[#allocation25_spill]] %s12544_s14  ;;  %603 = vrot.lane.b32.xlu0 %v9399_v3, %s12605_s17  ;;  %s12556_s18 = smov 78  }
   0x8   :  { %s12560_s19 = smov 79   ;;  %s12615_s20 = smov 80  }
   0x9   :  { %s12547_s21 = smov 93   ;;  %s12545_s23 = smov 94  }
   0xa   :  { %520 = vrot.lane.b32.xlu1 %v9399_v3, %s12589_s22  ;;  %s12611_s24 = smov 95   ;;  %s12613_s25 = smov 96  }
   0xb   :  { %518 = vrot.lane.b32.xlu0 %v9385_v1, %s12589_s22  ;;  %s12598_s26 = smov 124   ;;  %s12754_s14 = smov 92  }
   0xc   :  { %s12758_s13 = smov 109   ;;  %s12760_s12 = smov 111  }
   0xd   :  { %s12830_s9 = smov 63   ;;  %s12831_s11 = smov 76  }
   0xe   :  { %530 = vrot.lane.b32.xlu1 %v9394_v2, %s12589_s22 }
   0xf   :  { %528 = vrot.lane.b32.xlu0 %v9380_v0, %s12589_s22 }
  0x12   :  { %615 = vrot.lane.b32.xlu1 %v9416_v4, %s12605_s17 }
  0x13   :  { %605 = vrot.lane.b32.xlu0 %v9421_v5, %s12605_s17 }
  0x16   :  { %437 = vrot.lane.b32.xlu1 %v9399_v3, %s12602_s27 }
  0x17   :  { %435 = vrot.lane.b32.xlu0 %v9385_v1, %s12602_s27 }
  0x1a   :  { %447 = vrot.lane.b32.xlu1 %v9394_v2, %s12602_s27 }
  0x1b   :  { %445 = vrot.lane.b32.xlu0 %v9380_v0, %s12602_s27 }
  0x1e   :  { %532 = vrot.lane.b32.xlu1 %v9416_v4, %s12589_s22 }
  0x1f   :  { %522 = vrot.lane.b32.xlu0 %v9421_v5, %s12589_s22 }
  0x22   :  { %354 = vrot.lane.b32.xlu1 %v9399_v3, %s12583_s28 }
  0x23   :  { %352 = vrot.lane.b32.xlu0 %v9385_v1, %s12583_s28 }
  0x26   :  { %364 = vrot.lane.b32.xlu1 %v9394_v2, %s12583_s28 }
  0x27   :  { %362 = vrot.lane.b32.xlu0 %v9380_v0, %s12583_s28 }
  0x2a   :  { %449 = vrot.lane.b32.xlu1 %v9416_v4, %s12602_s27 }
  0x2b   :  { %439 = vrot.lane.b32.xlu0 %v9421_v5, %s12602_s27 }
  0x2e   :  { %271 = vrot.lane.b32.xlu1 %v9399_v3, %s12587_s29 }
  0x2f   :  { %269 = vrot.lane.b32.xlu0 %v9385_v1, %s12587_s29 }
  0x32   :  { %281 = vrot.lane.b32.xlu1 %v9394_v2, %s12587_s29 }
  0x33   :  { %279 = vrot.lane.b32.xlu0 %v9380_v0, %s12587_s29 }
  0x36   :  { %366 = vrot.lane.b32.xlu1 %v9416_v4, %s12583_s28 }
  0x37   :  { %356 = vrot.lane.b32.xlu0 %v9421_v5, %s12583_s28 }
  0x3a   :  { %188 = vrot.lane.b32.xlu1 %v9399_v3, %s12594_s30 }
  0x3b   :  { %186 = vrot.lane.b32.xlu0 %v9385_v1, %s12594_s30 }
  0x3e   :  { %198 = vrot.lane.b32.xlu1 %v9394_v2, %s12594_s30 }
  0x3f   :  { %196 = vrot.lane.b32.xlu0 %v9380_v0, %s12594_s30 }
  0x42   :  { %283 = vrot.lane.b32.xlu1 %v9416_v4, %s12587_s29 }
  0x43   :  { %273 = vrot.lane.b32.xlu0 %v9421_v5, %s12587_s29 }
  0x46   :  { %104 = vrot.lane.b32.xlu1 %v9399_v3, %s12585_s15 }
  0x47   :  { %102 = vrot.lane.b32.xlu0 %v9385_v1, %s12585_s15 }
  0x4a   :  { %114 = vrot.lane.b32.xlu1 %v9394_v2, %s12585_s15 }
  0x4b   :  { %112 = vrot.lane.b32.xlu0 %v9380_v0, %s12585_s15 }
  0x4e   :  { %200 = vrot.lane.b32.xlu1 %v9416_v4, %s12594_s30 }
  0x4f   :  { %190 = vrot.lane.b32.xlu0 %v9421_v5, %s12594_s30 }
  0x52   :  { %116 = vrot.lane.b32.xlu1 %v9416_v4, %s12585_s15 }
  0x53   :  { %106 = vrot.lane.b32.xlu0 %v9421_v5, %s12585_s15 }
  0x56   :  { %1267 = vrot.lane.b32.xlu1 %v9399_v3, %s12569_s16 }
  0x57   :  { %1265 = vrot.lane.b32.xlu0 %v9385_v1, %s12569_s16 }
  0x5a   :  { %1277 = vrot.lane.b32.xlu1 %v9394_v2, %s12569_s16 }
  0x5b   :  { %1275 = vrot.lane.b32.xlu0 %v9380_v0, %s12569_s16 }
  0x5e   :  { %1184 = vrot.lane.b32.xlu1 %v9399_v3, %s12556_s18 }
  0x5f   :  { %1182 = vrot.lane.b32.xlu0 %v9385_v1, %s12556_s18 }
  0x62   :  { %1194 = vrot.lane.b32.xlu1 %v9394_v2, %s12556_s18 }
  0x63   :  { %1192 = vrot.lane.b32.xlu0 %v9380_v0, %s12556_s18 }
  0x66   :  { %1279 = vrot.lane.b32.xlu1 %v9416_v4, %s12569_s16 }
  0x67   :  { %1269 = vrot.lane.b32.xlu0 %v9421_v5, %s12569_s16 }
  0x6a   :  { %1101 = vrot.lane.b32.xlu1 %v9399_v3, %s12560_s19 }
  0x6b   :  { %1099 = vrot.lane.b32.xlu0 %v9385_v1, %s12560_s19 }
  0x6e   :  { %1111 = vrot.lane.b32.xlu1 %v9394_v2, %s12560_s19 }
  0x6f   :  { %1109 = vrot.lane.b32.xlu0 %v9380_v0, %s12560_s19 }
  0x72   :  { %1196 = vrot.lane.b32.xlu1 %v9416_v4, %s12556_s18 }
  0x73   :  { %1186 = vrot.lane.b32.xlu0 %v9421_v5, %s12556_s18 }
  0x74   :  { %v612_v6 = vpop.permute.xlu1 %611 }
  0x75   :  { %v602_v7 = vpop.permute.xlu0 %601  ;;  %v626_v10 = vrot.slane %v612_v6, 4 }
  0x76   :  { %1018 = vrot.lane.b32.xlu1 %v9399_v3, %s12615_s20  ;;  %v621_v11 = vrot.slane %v602_v7, 4 }
  0x77   :  { %1016 = vrot.lane.b32.xlu0 %v9385_v1, %s12615_s20 }
  0x78   :  { %v614_v8 = vpop.permute.xlu1 %613 }
  0x79   :  { %v604_v9 = vpop.permute.xlu0 %603  ;;  %v627_v12 = vrot.slane %v614_v8, 4 }
  0x7a   :  { %v622_v13 = vrot.slane %v604_v9, 4  ;;  %1028 = vrot.lane.b32.xlu1 %v9394_v2, %s12615_s20 }
  0x7b   :  { %1026 = vrot.lane.b32.xlu0 %v9380_v0, %s12615_s20  ;;  %v640_v15 = vsel %vm132_vm0, %v626_v10, %v627_v12 }
  0x7c   :  { %v631_v14 = vsel %vm132_vm0, %v621_v11, %v622_v13  ;;  %v9533_v16 = vpop.permute.xlu1 %520  ;;  %v641_v19 = vsel %vm632_vm1, %v612_v6, %v640_v15 }
  0x7d   :  { %v519_v17 = vpop.permute.xlu0 %518  ;;  %v633_v18 = vsel %vm632_vm1, %v602_v7, %v631_v14  ;;  %v539_v20 = vrot.slane %v9533_v16, 4 }
  0x7e   :  { %v538_v21 = vrot.slane %v519_v17, 4  ;;  %v8378_v22 = vcombine.high %v633_v18, %v641_v19  ;;  %v8377_v23 = vcombine.low %v633_v18, %v641_v19  ;;  %1113 = vrot.lane.b32.xlu1 %v9416_v4, %s12560_s19 }
  0x7f   :  { %1103 = vrot.lane.b32.xlu0 %v9421_v5, %s12560_s19 }
  0x80   :  { %2110 = vmatprep.subr.bf16.mxu0 %v8378_v22  ;;  %v9542_v24 = vpop.permute.xlu1 %530  ;;  %v548_v26 = vsel %vm132_vm0, %v538_v21, %v539_v20 }
  0x81   :  { %2111 = vmatpush1.bf16.msra.mxu0 %v8377_v23  ;;  %v529_v25 = vpop.permute.xlu0 %528  ;;  %v544_v27 = vrot.slane %v9542_v24, 4  ;;  %v550_v30 = vsel %vm12672_vm2, %v519_v17, %v548_v26 }
  0x82   :  { %v543_v28 = vrot.slane %v529_v25, 4  ;;  %935 = vrot.lane.b32.xlu1 %v9399_v3, %s12547_s21 }
  0x83   :  { %933 = vrot.lane.b32.xlu0 %v9385_v1, %s12547_s21 }
  0x84   :  { %v557_v29 = vsel %vm132_vm0, %v543_v28, %v544_v27  ;;  %v9555_v32 = vpop.permute.xlu1 %615 }
  0x85   :  { %v558_v31 = vsel %vm12672_vm2, %v529_v25, %v557_v29  ;;  %v9557_v33 = vpop.permute.xlu0 %605  ;;  %v628_v34 = vrot.slane %v9555_v32, 4 }
  0x86   :  { %v623_v35 = vrot.slane %v9557_v33, 4  ;;  %v8370_v36 = vcombine.high %v550_v30, %v558_v31  ;;  %v8369_v37 = vcombine.low %v550_v30, %v558_v31  ;;  %945 = vrot.lane.b32.xlu1 %v9394_v2, %s12547_s21 }
  0x87   :  { %943 = vrot.lane.b32.xlu0 %v9380_v0, %s12547_s21  ;;  %v642_v39 = vsel %vm132_vm0, %v627_v12, %v628_v34 }
  0x88   :  { %2112 = vmatprep.subr.bf16.mxu0 %v8370_v36  ;;  %v634_v38 = vsel %vm132_vm0, %v622_v13, %v623_v35  ;;  %v9571_v40 = vpop.permute.xlu1 %437  ;;  %v643_v43 = vsel %vm632_vm1, %v614_v8, %v642_v39 }
  0x89   :  { %2113 = vmatpush1.bf16.msra.mxu0 %v8369_v37  ;;  %v436_v41 = vpop.permute.xlu0 %435  ;;  %v635_v42 = vsel %vm632_vm1, %v604_v9, %v634_v38  ;;  %v456_v44 = vrot.slane %v9571_v40, 4 }
  0x8a   :  { %v455_v45 = vrot.slane %v436_v41, 4  ;;  %v8380_v46 = vcombine.high %v635_v42, %v643_v43  ;;  %v8379_v47 = vcombine.low %v635_v42, %v643_v43  ;;  %1030 = vrot.lane.b32.xlu1 %v9416_v4, %s12615_s20 }
  0x8b   :  { %1020 = vrot.lane.b32.xlu0 %v9421_v5, %s12615_s20 }
  0x8c   :  { %2151 = vmatprep.subr.bf16.mxu1 %v8380_v46  ;;  %v9580_v48 = vpop.permute.xlu1 %447  ;;  %v465_v50 = vsel %vm132_vm0, %v455_v45, %v456_v44 }
  0x8d   :  { %2152 = vmatpush1.bf16.msra.mxu1 %v8379_v47  ;;  %v446_v49 = vpop.permute.xlu0 %445  ;;  %v461_v51 = vrot.slane %v9580_v48, 4  ;;  %v467_v54 = vsel %vm12673_vm3, %v436_v41, %v465_v50 }
  0x8e   :  { %v460_v52 = vrot.slane %v446_v49, 4  ;;  %852 = vrot.lane.b32.xlu1 %v9399_v3, %s12545_s23 }
  0x8f   :  { %850 = vrot.lane.b32.xlu0 %v9385_v1, %s12545_s23 }
  0x90   :  { %v474_v53 = vsel %vm132_vm0, %v460_v52, %v461_v51  ;;  %v9593_v56 = vpop.permute.xlu1 %532  ;;  %v9684_v52 = vld [vmem:[%s12531_s1] sm:$0xff]  ;;  %s12592_s1 = smov 60  }
  0x91   :  { %v475_v55 = vsel %vm12673_vm3, %v446_v49, %v474_v53  ;;  %v9595_v57 = vpop.permute.xlu0 %522  ;;  %v545_v58 = vrot.slane %v9593_v56, 4 }
  0x92   :  { %v540_v59 = vrot.slane %v9595_v57, 4  ;;  %v8362_v60 = vcombine.high %v467_v54, %v475_v55  ;;  %v8361_v61 = vcombine.low %v467_v54, %v475_v55  ;;  %862 = vrot.lane.b32.xlu1 %v9394_v2, %s12545_s23 }
  0x93   :  { %860 = vrot.lane.b32.xlu0 %v9380_v0, %s12545_s23  ;;  %v559_v63 = vsel %vm132_vm0, %v544_v27, %v545_v58 }
  0x94   :  { %2114 = vmatprep.subr.bf16.mxu0 %v8362_v60  ;;  %v551_v62 = vsel %vm132_vm0, %v539_v20, %v540_v59  ;;  %v9611_v6 = vpop.permute.xlu1 %354  ;;  %v560_v9 = vsel %vm12672_vm2, %v9542_v24, %v559_v63 }
  0x95   :  { %2115 = vmatpush1.bf16.msra.mxu0 %v8361_v61  ;;  %v353_v7 = vpop.permute.xlu0 %352  ;;  %v552_v8 = vsel %vm12672_vm2, %v9533_v16, %v551_v62  ;;  %v373_v10 = vrot.slane %v9611_v6, 4  ;;  %v9694_v61 = vcombine.high %v9684_v52, %v9684_v52 }
  0x96   :  { %v372_v11 = vrot.slane %v353_v7, 4  ;;  %v8372_v12 = vcombine.high %v552_v8, %v560_v9  ;;  %v8371_v13 = vcombine.low %v552_v8, %v560_v9  ;;  %947 = vrot.lane.b32.xlu1 %v9416_v4, %s12547_s21 }
  0x97   :  { %937 = vrot.lane.b32.xlu0 %v9421_v5, %s12547_s21  ;;  %2142 = vmatprep.mubr.bf16.mxu0 %v9694_v61  ;;  %s12710_s21 = smov 93  }
  0x98   :  { %2153 = vmatprep.subr.bf16.mxu1 %v8372_v12  ;;  %v9622_v14 = vpop.permute.xlu1 %364  ;;  %v382_v16 = vsel %vm132_vm0, %v372_v11, %v373_v10  ;;  %2183 = vmatprep.mubr.bf16.mxu1 %v9694_v61 }
  0x99   :  { %2154 = vmatpush1.bf16.msra.mxu1 %v8371_v13  ;;  %v363_v15 = vpop.permute.xlu0 %362  ;;  %v378_v17 = vrot.slane %v9622_v14, 4  ;;  %v384_v20 = vsel %vm12654_vm4, %v353_v7, %v382_v16 }
  0x9a   :  { %v377_v18 = vrot.slane %v363_v15, 4  ;;  %769 = vrot.lane.b32.xlu1 %v9399_v3, %s12611_s24 }
  0x9b   :  { %767 = vrot.lane.b32.xlu0 %v9385_v1, %s12611_s24 }
  0x9c   :  { %v391_v19 = vsel %vm132_vm0, %v377_v18, %v378_v17  ;;  %v9635_v22 = vpop.permute.xlu1 %449 }
  0x9d   :  { %v392_v21 = vsel %vm12654_vm4, %v363_v15, %v391_v19  ;;  %v9637_v23 = vpop.permute.xlu0 %439  ;;  %v462_v24 = vrot.slane %v9635_v22, 4 }
  0x9e   :  { %v457_v25 = vrot.slane %v9637_v23, 4  ;;  %v8354_v26 = vcombine.high %v384_v20, %v392_v21  ;;  %v8353_v27 = vcombine.low %v384_v20, %v392_v21  ;;  %779 = vrot.lane.b32.xlu1 %v9394_v2, %s12611_s24 }
  0x9f   :  { %777 = vrot.lane.b32.xlu0 %v9380_v0, %s12611_s24  ;;  %v476_v29 = vsel %vm132_vm0, %v461_v51, %v462_v24 }
  0xa0   :  { %2116 = vmatprep.subr.bf16.mxu0 %v8354_v26  ;;  %v468_v28 = vsel %vm132_vm0, %v456_v44, %v457_v25  ;;  %v9653_v30 = vpop.permute.xlu1 %271  ;;  %v477_v37 = vsel %vm12673_vm3, %v9580_v48, %v476_v29 }
  0xa1   :  { %2117 = vmatpush1.bf16.msra.mxu0 %v8353_v27  ;;  %v270_v31 = vpop.permute.xlu0 %269  ;;  %v469_v36 = vsel %vm12673_vm3, %v9571_v40, %v468_v28  ;;  %v290_v38 = vrot.slane %v9653_v30, 4 }
  0xa2   :  { %v289_v39 = vrot.slane %v270_v31, 4  ;;  %v8364_v41 = vcombine.high %v469_v36, %v477_v37  ;;  %v8363_v42 = vcombine.low %v469_v36, %v477_v37  ;;  %864 = vrot.lane.b32.xlu1 %v9416_v4, %s12545_s23 }
  0xa3   :  { %854 = vrot.lane.b32.xlu0 %v9421_v5, %s12545_s23  ;;  %s12596_s23 = smov 108  }
  0xa4   :  { %2155 = vmatprep.subr.bf16.mxu1 %v8364_v41  ;;  %v9664_v43 = vpop.permute.xlu1 %281  ;;  %v299_v40 = vsel %vm132_vm0, %v289_v39, %v290_v38 }
  0xa5   :  { %2156 = vmatpush1.bf16.msra.mxu1 %v8363_v42  ;;  %v280_v44 = vpop.permute.xlu0 %279  ;;  %v295_v45 = vrot.slane %v9664_v43, 4  ;;  %v301_v48 = vsel %vm12645_vm5, %v270_v31, %v299_v40 }
  0xa6   :  { %v294_v46 = vrot.slane %v280_v44, 4  ;;  %686 = vrot.lane.b32.xlu1 %v9399_v3, %s12613_s25 }
  0xa7   :  { %684 = vrot.lane.b32.xlu0 %v9385_v1, %s12613_s25 }
  0xa8   :  { %v308_v47 = vsel %vm132_vm0, %v294_v46, %v295_v45  ;;  %v9677_v50 = vpop.permute.xlu1 %366 }
  0xa9   :  { %v309_v49 = vsel %vm12645_vm5, %v280_v44, %v308_v47  ;;  %v9679_v51 = vpop.permute.xlu0 %356  ;;  %v379_v53 = vrot.slane %v9677_v50, 4 }
  0xaa   :  { %v374_v54 = vrot.slane %v9679_v51, 4  ;;  %v8346_v55 = vcombine.high %v301_v48, %v309_v49  ;;  %v8345_v60 = vcombine.low %v301_v48, %v309_v49  ;;  %696 = vrot.lane.b32.xlu1 %v9394_v2, %s12613_s25 }
  0xab   :  { %694 = vrot.lane.b32.xlu0 %v9380_v0, %s12613_s25  ;;  %v393_v63 = vsel %vm132_vm0, %v378_v17, %v379_v53 }
  0xac   :  { %2118 = vmatprep.subr.bf16.mxu0 %v8346_v55  ;;  %v385_v62 = vsel %vm132_vm0, %v373_v10, %v374_v54  ;;  %v9704_v7 = vpop.permute.xlu1 %188  ;;  %v394_v11 = vsel %vm12654_vm4, %v9622_v14, %v393_v63  ;;  %v9725_v14 = vld [vmem:[%s12530_s0 + $0x18] sm:$0xff] }
  0xad   :  { %2119 = vmatpush1.bf16.msra.mxu0 %v8345_v60  ;;  %v187_v8 = vpop.permute.xlu0 %186  ;;  %v386_v9 = vsel %vm12654_vm4, %v9611_v6, %v385_v62  ;;  %v207_v12 = vrot.slane %v9704_v7, 4  ;;  %v9720_v6 = vld [vmem:[%s12530_s0 + $0x3c] sm:$0xff] }
  0xae   :  { %v206_v13 = vrot.slane %v187_v8, 4  ;;  %v8356_v10 = vcombine.high %v386_v9, %v394_v11  ;;  %v8355_v15 = vcombine.low %v386_v9, %v394_v11  ;;  %781 = vrot.lane.b32.xlu1 %v9416_v4, %s12611_s24 }
  0xaf   :  { %771 = vrot.lane.b32.xlu0 %v9421_v5, %s12611_s24 }
  0xb0   :  { %2157 = vmatprep.subr.bf16.mxu1 %v8356_v10  ;;  %v9727_v16 = vpop.permute.xlu1 %198  ;;  %v216_v18 = vsel %vm132_vm0, %v206_v13, %v207_v12  ;;  %v8322_v10 = vcombine.high %v9385_v1, %v9380_v0 }
  0xb1   :  { %2158 = vmatpush1.bf16.msra.mxu1 %v8355_v15  ;;  %v197_v17 = vpop.permute.xlu0 %196  ;;  %v212_v19 = vrot.slane %v9727_v16, 4  ;;  %v218_v26 = vsel %vm12642_vm6, %v187_v8, %v216_v18 }
  0xb2   :  { %v211_v20 = vrot.slane %v197_v17, 4  ;;  %617 = vrot.lane.b32.xlu1 %v9720_v6, %s12605_s17 }
  0xb3   :  { %607 = vrot.lane.b32.xlu0 %v9725_v14, %s12605_s17 }
  0xb4   :  { %v225_v21 = vsel %vm132_vm0, %v211_v20, %v212_v19  ;;  %v9740_v28 = vpop.permute.xlu1 %283 }
  0xb5   :  { %v226_v27 = vsel %vm12642_vm6, %v197_v17, %v225_v21  ;;  %v9742_v29 = vpop.permute.xlu0 %273  ;;  %v296_v31 = vrot.slane %v9740_v28, 4  ;;  %v507_v21 = vld [vmem:[%s12530_s0 + $0x44] sm:$0xf] }
  0xb6   :  { %v291_v36 = vrot.slane %v9742_v29, 4  ;;  %v8338_v37 = vcombine.high %v218_v26, %v226_v27  ;;  %v8337_v39 = vcombine.low %v218_v26, %v226_v27  ;;  %698 = vrot.lane.b32.xlu1 %v9416_v4, %s12613_s25  ;;  %v502_v26 = vld [vmem:[%s12530_s0 + $0x20] sm:$0xf] }
  0xb7   :  { %688 = vrot.lane.b32.xlu0 %v9421_v5, %s12613_s25  ;;  %v310_v42 = vsel %vm132_vm0, %v295_v45, %v296_v31 }
  0xb8   :  { %2120 = vmatprep.subr.bf16.mxu0 %v8338_v37  ;;  %v302_v41 = vsel %vm132_vm0, %v290_v38, %v291_v36  ;;  %v105_v44 = vpop.permute.xlu1 %104  ;;  %v311_v5 = vsel %vm12645_vm5, %v9664_v43, %v310_v42  ;;  %v590_v38 = vld [vmem:[%s12530_s0 + $0x44] sm:$0xf] }
  0xb9   :  { %2121 = vmatpush1.bf16.msra.mxu0 %v8337_v39  ;;  %v103_v40 = vpop.permute.xlu0 %102  ;;  %v303_v4 = vsel %vm12645_vm5, %v9653_v30, %v302_v41  ;;  %v123_v46 = vrot.slane %v105_v44, 4  ;;  %v585_v30 = vld [vmem:[%s12530_s0 + $0x20] sm:$0xf] }
  0xba   :  { %v122_v47 = vrot.slane %v103_v40, 4  ;;  %v8348_v48 = vcombine.high %v303_v4, %v311_v5  ;;  %v8347_v49 = vcombine.low %v303_v4, %v311_v5  ;;  %534 = vrot.lane.b32.xlu1 %v9720_v6, %s12589_s22  ;;  %v8321_v4 = vcombine.low %v9385_v1, %v9380_v0 }
  0xbb   :  { %524 = vrot.lane.b32.xlu0 %v9725_v14, %s12589_s22 }
  0xbc   :  { %2159 = vmatprep.subr.bf16.mxu1 %v8348_v48  ;;  %v115_v43 = vpop.permute.xlu1 %114  ;;  %v133_v55 = vsel %vm132_vm0, %v122_v47, %v123_v46 }
  0xbd   :  { %2160 = vmatpush1.bf16.msra.mxu1 %v8347_v49  ;;  %v113_v45 = vpop.permute.xlu0 %112  ;;  %v128_v60 = vrot.slane %v115_v43, 4  ;;  %v135_v8 = vsel %vm12641_vm7, %v103_v40, %v133_v55 }
  0xbe   :  { %v127_v62 = vrot.slane %v113_v45, 4  ;;  %619 = vrot.lane.b32.xlu1 %v590_v38, %s12605_s17  ;;  %v8324_v38 = vcombine.high %v9399_v3, %v9394_v2 }
  0xbf   :  { %609 = vrot.lane.b32.xlu0 %v585_v30, %s12605_s17 }
  0xc0   :  { %v142_v63 = vsel %vm132_vm0, %v127_v62, %v128_v60  ;;  %v9778_v11 = vpop.permute.xlu1 %200 }
  0xc1   :  { %v143_v9 = vsel %vm12641_vm7, %v113_v45, %v142_v63  ;;  %v9780_v13 = vpop.permute.xlu0 %190  ;;  %v12567_v15 = vrot.slane %v9778_v11, 4  ;;  %v8323_v63 = vcombine.low %v9399_v3, %v9394_v2 }
  0xc2   :  { %v208_v17 = vrot.slane %v9780_v13, 4  ;;  %v8330_v18 = vcombine.high %v135_v8, %v143_v9  ;;  %v8329_v20 = vcombine.low %v135_v8, %v143_v9  ;;  %451 = vrot.lane.b32.xlu1 %v9720_v6, %s12602_s27 }
  0xc3   :  { %441 = vrot.lane.b32.xlu0 %v9725_v14, %s12602_s27  ;;  %v227_v37 = vsel %vm132_vm0, %v212_v19, %v12567_v15 }
  0xc4   :  { %2122 = vmatprep.subr.bf16.mxu0 %v8330_v18  ;;  %v219_v27 = vsel %vm132_vm0, %v207_v12, %v208_v17  ;;  %v9804_v39 = vpop.permute.xlu1 %116  ;;  %v228_v40 = vsel %vm12642_vm6, %v9727_v16, %v227_v37 }
  0xc5   :  { %2123 = vmatpush1.bf16.msra.mxu0 %v8329_v20  ;;  %v9806_v41 = vpop.permute.xlu0 %106  ;;  %v220_v42 = vsel %vm12642_vm6, %v9704_v7, %v219_v27  ;;  %v12559_v12 = vrot.slane %v9804_v39, 4 }
  0xc6   :  { %v12566_v5 = vrot.slane %v9806_v41, 4  ;;  %v8340_v47 = vcombine.high %v220_v42, %v228_v40  ;;  %v8339_v19 = vcombine.low %v220_v42, %v228_v40  ;;  %2124 = vmatprep.subr.bf16.mxu0 %v8322_v10  ;;  %536 = vrot.lane.b32.xlu1 %v507_v21, %s12589_s22  ;;  %v341_v40 = vld [vmem:[%s12530_s0 + $0x44] sm:$0xf] }
  0xc7   :  { %526 = vrot.lane.b32.xlu0 %v502_v26, %s12589_s22  ;;  %v144_v0 = vsel %vm132_vm0, %v128_v60, %v12559_v12 }
  0xc8   :  { %2161 = vmatprep.subr.bf16.mxu1 %v8340_v47  ;;  %v136_v7 = vsel %vm132_vm0, %v123_v46, %v12566_v5  ;;  %v9824_v1 = vpop.permute.xlu1 %1267  ;;  %v145_v49 = vsel %vm12641_vm7, %v115_v43, %v144_v0  ;;  %v419_v43 = vld [vmem:[%s12530_s0 + $0x20] sm:$0xf] }
  0xc9   :  { %2162 = vmatpush1.bf16.msra.mxu1 %v8339_v19  ;;  %v1266_v16 = vpop.permute.xlu0 %1265  ;;  %v137_v48 = vsel %vm12641_vm7, %v105_v44, %v136_v7  ;;  %2125 = vmatpush1.bf16.msra.mxu0 %v8321_v4  ;;  %v1286_v30 = vrot.slane %v9824_v1, 4  ;;  %v424_v44 = vld [vmem:[%s12530_s0 + $0x44] sm:$0xf]  ;;  %v336_v4 = vld [vmem:[%s12530_s0 + $0x20] sm:$0xf] }
  0xca   :  { %v1285_v45 = vrot.slane %v1266_v16, 4  ;;  %v8332_v46 = vcombine.high %v137_v48, %v145_v49  ;;  %v8331_v55 = vcombine.low %v137_v48, %v145_v49  ;;  %368 = vrot.lane.b32.xlu1 %v9720_v6, %s12583_s28 }
  0xcb   :  { %358 = vrot.lane.b32.xlu0 %v9725_v14, %s12583_s28 }
  0xcc   :  { %2163 = vmatprep.subr.bf16.mxu1 %v8332_v46  ;;  %v1278_v60 = vpop.permute.xlu1 %1277  ;;  %v1295_v8 = vsel %vm132_vm0, %v1285_v45, %v1286_v30 }
  0xcd   :  { %2164 = vmatpush1.bf16.msra.mxu1 %v8331_v55  ;;  %v1276_v62 = vpop.permute.xlu0 %1275  ;;  %v1291_v9 = vrot.slane %v1278_v60, 4  ;;  %v1297_v20 = vsel %vm1296_vm8, %v1266_v16, %v1295_v8  ;;  %v253_v8 = vld [vmem:[%s12530_s0 + $0x20] sm:$0xf] }
  0xce   :  { %v1290_v10 = vrot.slane %v1276_v62, 4  ;;  %2165 = vmatprep.subr.bf16.mxu1 %v8324_v38  ;;  %453 = vrot.lane.b32.xlu1 %v424_v44, %s12602_s27 }
  0xcf   :  { %443 = vrot.lane.b32.xlu0 %v419_v43, %s12602_s27 }
  0xd0   :  { %v1304_v18 = vsel %vm132_vm0, %v1290_v10, %v1291_v9  ;;  %v9849_v26 = vpop.permute.xlu1 %1184 }
  0xd1   :  { %v1305_v21 = vsel %vm1296_vm8, %v1276_v62, %v1304_v18  ;;  %v1183_v27 = vpop.permute.xlu0 %1182  ;;  %2166 = vmatpush1.bf16.msra.mxu1 %v8323_v63  ;;  %v1203_v2 = vrot.slane %v9849_v26, 4  ;;  %v258_v63 = vld [vmem:[%s12530_s0 + $0x44] sm:$0xf] }
  0xd2   :  { %v1202_v3 = vrot.slane %v1183_v27, 4  ;;  %v8442_v37 = vcombine.high %v1297_v20, %v1305_v21  ;;  %v8441_v42 = vcombine.low %v1297_v20, %v1305_v21  ;;  %285 = vrot.lane.b32.xlu1 %v9720_v6, %s12587_s29 }
  0xd3   :  { %275 = vrot.lane.b32.xlu0 %v9725_v14, %s12587_s29 }
  0xd4   :  { %2126 = vmatprep.subr.bf16.mxu0 %v8442_v37  ;;  %v9862_v47 = vpop.permute.xlu1 %1194  ;;  %v1212_v7 = vsel %vm132_vm0, %v1202_v3, %v1203_v2 }
  0xd5   :  { %v1193_v19 = vpop.permute.xlu0 %1192  ;;  %2127 = vmatpush2.bf16.msra.mxu0 %v8441_v42  ;;  %v1208_v0 = vrot.slane %v9862_v47, 4  ;;  %v1214_v49 = vsel %vm12591_vm9, %v1183_v27, %v1212_v7 }
  0xd6   :  { %v1207_v16 = vrot.slane %v1193_v19, 4  ;;  %370 = vrot.lane.b32.xlu1 %v341_v40, %s12583_s28 }
  0xd7   :  { %360 = vrot.lane.b32.xlu0 %v336_v4, %s12583_s28 }
  0xd8   :  { %v1221_v48 = vsel %vm132_vm0, %v1207_v16, %v1208_v0  ;;  %v9873_v45 = vpop.permute.xlu1 %1279  ;;  %v175_v16 = vld [vmem:[%s12530_s0 + $0x44] sm:$0xf] }
  0xd9   :  { %v1222_v38 = vsel %vm12591_vm9, %v1193_v19, %v1221_v48  ;;  %v9875_v46 = vpop.permute.xlu0 %1269  ;;  %v12555_v55 = vrot.slane %v9873_v45, 4  ;;  %v170_v48 = vld [vmem:[%s12530_s0 + $0x20] sm:$0xf] }
  0xda   :  { %v12558_v44 = vrot.slane %v9875_v46, 4  ;;  %v8434_v43 = vcombine.high %v1214_v49, %v1222_v38  ;;  %v8433_v62 = vcombine.low %v1214_v49, %v1222_v38  ;;  %202 = vrot.lane.b32.xlu1 %v9720_v6, %s12594_s30 }
  0xdb   :  { %192 = vrot.lane.b32.xlu0 %v9725_v14, %s12594_s30  ;;  %v1306_v18 = vsel %vm132_vm0, %v1291_v9, %v12555_v55 }
  0xdc   :  { %2128 = vmatprep.subr.bf16.mxu0 %v8434_v43  ;;  %v1298_v10 = vsel %vm132_vm0, %v1286_v30, %v12558_v44  ;;  %v9895_v20 = vpop.permute.xlu1 %1101  ;;  %v1307_v3 = vsel %vm1296_vm8, %v1278_v60, %v1306_v18 }
  0xdd   :  { %v1100_v21 = vpop.permute.xlu0 %1099  ;;  %2129 = vmatpush2.bf16.msra.mxu0 %v8433_v62  ;;  %v1299_v27 = vsel %vm1296_vm8, %v9824_v1, %v1298_v10  ;;  %v1120_v37 = vrot.slane %v9895_v20, 4 }
  0xde   :  { %v1119_v42 = vrot.slane %v1100_v21, 4  ;;  %v8444_v40 = vcombine.high %v1299_v27, %v1307_v3  ;;  %v8443_v4 = vcombine.low %v1299_v27, %v1307_v3  ;;  %287 = vrot.lane.b32.xlu1 %v258_v63, %s12587_s29  ;;  %v86_v27 = vld [vmem:[%s12530_s0 + $0x20] sm:$0xf] }
  0xdf   :  { %277 = vrot.lane.b32.xlu0 %v253_v8, %s12587_s29 }
  0xe0   :  { %2167 = vmatprep.subr.bf16.mxu1 %v8444_v40  ;;  %v9903_v30 = vpop.permute.xlu1 %1111  ;;  %v1129_v1 = vsel %vm132_vm0, %v1119_v42, %v1120_v37 }
  0xe1   :  { %v1110_v9 = vpop.permute.xlu0 %1109  ;;  %2168 = vmatpush2.bf16.msra.mxu1 %v8443_v4  ;;  %v1125_v60 = vrot.slane %v9903_v30, 4  ;;  %v1131_v49 = vsel %vm12600_vm10, %v1100_v21, %v1129_v1  ;;  %v91_v21 = vld [vmem:[%s12530_s0 + $0x44] sm:$0xf] }
  0xe2   :  { %v1124_v19 = vrot.slane %v1110_v9, 4  ;;  %118 = vrot.lane.b32.xlu1 %v9720_v6, %s12585_s15 }
  0xe3   :  { %108 = vrot.lane.b32.xlu0 %v9725_v14, %s12585_s15 }
  0xe4   :  { %v1138_v7 = vsel %vm132_vm0, %v1124_v19, %v1125_v60  ;;  %v9922_v43 = vpop.permute.xlu1 %1196 }
  0xe5   :  { %v1139_v38 = vsel %vm12600_vm10, %v1110_v9, %v1138_v7  ;;  %v9924_v62 = vpop.permute.xlu0 %1186  ;;  %v12549_v63 = vrot.slane %v9922_v43, 4 }
  0xe6   :  { %v12554_v8 = vrot.slane %v9924_v62, 4  ;;  %v8426_v10 = vcombine.high %v1131_v49, %v1139_v38  ;;  %v8425_v18 = vcombine.low %v1131_v49, %v1139_v38  ;;  %204 = vrot.lane.b32.xlu1 %v175_v16, %s12594_s30 }
  0xe7   :  { %194 = vrot.lane.b32.xlu0 %v170_v48, %s12594_s30  ;;  %v1223_v42 = vsel %vm132_vm0, %v1208_v0, %v12549_v63 }
  0xe8   :  { %2130 = vmatprep.subr.bf16.mxu0 %v8426_v10  ;;  %v1215_v3 = vsel %vm132_vm0, %v1203_v2, %v12554_v8  ;;  %v9944_v40 = vpop.permute.xlu1 %1018  ;;  %v1224_v1 = vsel %vm12591_vm9, %v9862_v47, %v1223_v42 }
  0xe9   :  { %v1017_v4 = vpop.permute.xlu0 %1016  ;;  %2131 = vmatpush2.bf16.msra.mxu0 %v8425_v18  ;;  %v1216_v9 = vsel %vm12591_vm9, %v9849_v26, %v1215_v3  ;;  %v1037_v19 = vrot.slane %v9944_v40, 4 }
  0xea   :  { %v1036_v7 = vrot.slane %v1017_v4, 4  ;;  %v8436_v16 = vcombine.high %v1216_v9, %v1224_v1  ;;  %v8435_v48 = vcombine.low %v1216_v9, %v1224_v1  ;;  %120 = vrot.lane.b32.xlu1 %v91_v21, %s12585_s15 }
  0xeb   :  { %110 = vrot.lane.b32.xlu0 %v86_v27, %s12585_s15 }
  0xec   :  { %2169 = vmatprep.subr.bf16.mxu1 %v8436_v16  ;;  %v9953_v2 = vpop.permute.xlu1 %1028  ;;  %v1046_v26 = vsel %vm132_vm0, %v1036_v7, %v1037_v19  ;;  %v1249_v7 = vld [vmem:[%s12530_s0 + $0x20] sm:$0xf] }
  0xed   :  { %v1027_v0 = vpop.permute.xlu0 %1026  ;;  %2170 = vmatpush2.bf16.msra.mxu1 %v8435_v48  ;;  %v1042_v47 = vrot.slane %v9953_v2, 4  ;;  %v1048_v10 = vsel %vm1047_vm11, %v1017_v4, %v1046_v26  ;;  %v1254_v4 = vld [vmem:[%s12530_s0 + $0x44] sm:$0xf] }
  0xee   :  { %v1041_v49 = vrot.slane %v1027_v0, 4  ;;  %1281 = vrot.lane.b32.xlu1 %v9720_v6, %s12569_s16 }
  0xef   :  { %1271 = vrot.lane.b32.xlu0 %v9725_v14, %s12569_s16 }
  0xf0   :  { %v1055_v38 = vsel %vm132_vm0, %v1041_v49, %v1042_v47  ;;  %v9966_v21 = vpop.permute.xlu1 %1113 }
  0xf1   :  { %v1056_v18 = vsel %vm1047_vm11, %v1027_v0, %v1055_v38  ;;  %v9968_v27 = vpop.permute.xlu0 %1103  ;;  %v12550_v3 = vrot.slane %v9966_v21, 4 }
  0xf2   :  { %v12551_v42 = vrot.slane %v9968_v27, 4  ;;  %v8418_v9 = vcombine.high %v1048_v10, %v1056_v18  ;;  %v8417_v1 = vcombine.low %v1048_v10, %v1056_v18  ;;  %1198 = vrot.lane.b32.xlu1 %v9720_v6, %s12556_s18 }
  0xf3   :  { %1188 = vrot.lane.b32.xlu0 %v9725_v14, %s12556_s18  ;;  %v1140_v48 = vsel %vm132_vm0, %v1125_v60, %v12550_v3 }
  0xf4   :  { %2132 = vmatprep.subr.bf16.mxu0 %v8418_v9  ;;  %v1132_v16 = vsel %vm132_vm0, %v1120_v37, %v12551_v42  ;;  %v9990_v0 = vpop.permute.xlu1 %935  ;;  %v1141_v38 = vsel %vm12600_vm10, %v9903_v30, %v1140_v48 }
  0xf5   :  { %v934_v26 = vpop.permute.xlu0 %933  ;;  %2133 = vmatpush2.bf16.msra.mxu0 %v8417_v1  ;;  %v1133_v49 = vsel %vm12600_vm10, %v9895_v20, %v1132_v16  ;;  %v954_v10 = vrot.slane %v9990_v0, 4 }
  0xf6   :  { %v953_v18 = vrot.slane %v934_v26, 4  ;;  %v8428_v9 = vcombine.high %v1133_v49, %v1141_v38  ;;  %v8427_v63 = vcombine.low %v1133_v49, %v1141_v38  ;;  %1283 = vrot.lane.b32.xlu1 %v1254_v4, %s12569_s16 }
  0xf7   :  { %1273 = vrot.lane.b32.xlu0 %v1249_v7, %s12569_s16  ;;  %v1166_v7 = vld [vmem:[%s12530_s0 + $0x20] sm:$0xf]  ;;  %s12573_s16 = smov 64  }
  0xf8   :  { %2171 = vmatprep.subr.bf16.mxu1 %v8428_v9  ;;  %v9999_v37 = vpop.permute.xlu1 %945  ;;  %v963_v20 = vsel %vm132_vm0, %v953_v18, %v954_v10 }
  0xf9   :  { %v944_v60 = vpop.permute.xlu0 %943  ;;  %2172 = vmatpush2.bf16.msra.mxu1 %v8427_v63  ;;  %v959_v30 = vrot.slane %v9999_v37, 4  ;;  %v1171_v63 = vld [vmem:[%s12530_s0 + $0x44] sm:$0xf]  ;;  %v965_v16 = vsel %vm964_vm12, %v934_v26, %v963_v20 }
  0xfa   :  { %v958_v1 = vrot.slane %v944_v60, 4  ;;  %1115 = vrot.lane.b32.xlu1 %v9720_v6, %s12560_s19 }
  0xfb   :  { %1105 = vrot.lane.b32.xlu0 %v9725_v14, %s12560_s19 }
  0xfc   :  { %v972_v4 = vsel %vm132_vm0, %v958_v1, %v959_v30  ;;  %v10018_v49 = vpop.permute.xlu1 %1030 }
  0xfd   :  { %v973_v48 = vsel %vm964_vm12, %v944_v60, %v972_v4  ;;  %v10020_v38 = vpop.permute.xlu0 %1020  ;;  %v12552_v18 = vrot.slane %v10018_v49, 4 }
  0xfe   :  { %v12553_v9 = vrot.slane %v10020_v38, 4  ;;  %v8410_v1 = vcombine.high %v965_v16, %v973_v48  ;;  %v8409_v3 = vcombine.low %v965_v16, %v973_v48  ;;  %1200 = vrot.lane.b32.xlu1 %v1171_v63, %s12556_s18 }
  0xff   :  { %1190 = vrot.lane.b32.xlu0 %v1166_v7, %s12556_s18  ;;  %v1057_v60 = vsel %vm132_vm0, %v1042_v47, %v12552_v18  ;;  %s12711_s18 = smov 94  }
 0x100   :  { %2134 = vmatprep.subr.bf16.mxu0 %v8410_v1  ;;  %v1049_v26 = vsel %vm132_vm0, %v1037_v19, %v12553_v9  ;;  %v10034_v20 = vpop.permute.xlu1 %852  ;;  %v1058_v7 = vsel %vm1047_vm11, %v9953_v2, %v1057_v60  ;;  %v1088_v19 = vld [vmem:[%s12530_s0 + $0x44] sm:$0xf] }
 0x101   :  { %v851_v4 = vpop.permute.xlu0 %850  ;;  %2135 = vmatpush2.bf16.msra.mxu0 %v8409_v3  ;;  %v1050_v63 = vsel %vm1047_vm11, %v9944_v40, %v1049_v26  ;;  %v871_v16 = vrot.slane %v10034_v20, 4  ;;  %v1083_v40 = vld [vmem:[%s12530_s0 + $0x20] sm:$0xf] }
 0x102   :  { %v870_v48 = vrot.slane %v851_v4, 4  ;;  %v8420_v1 = vcombine.high %v1050_v63, %v1058_v7  ;;  %v8419_v42 = vcombine.low %v1050_v63, %v1058_v7  ;;  %1032 = vrot.lane.b32.xlu1 %v9720_v6, %s12615_s20 }
 0x103   :  { %1022 = vrot.lane.b32.xlu0 %v9725_v14, %s12615_s20 }
 0x104   :  { %2173 = vmatprep.subr.bf16.mxu1 %v8420_v1  ;;  %v10051_v2 = vpop.permute.xlu1 %862  ;;  %v880_v3 = vsel %vm132_vm0, %v870_v48, %v871_v16 }
 0x105   :  { %v861_v47 = vpop.permute.xlu0 %860  ;;  %2174 = vmatpush2.bf16.msra.mxu1 %v8419_v42  ;;  %v876_v26 = vrot.slane %v10051_v2, 4  ;;  %v882_v7 = vsel %vm881_vm13, %v851_v4, %v880_v3  ;;  %v1005_v4 = vld [vmem:[%s12530_s0 + $0x44] sm:$0xf] }
 0x106   :  { %v875_v60 = vrot.slane %v861_v47, 4  ;;  %1117 = vrot.lane.b32.xlu1 %v1088_v19, %s12560_s19  ;;  %v1000_v19 = vld [vmem:[%s12530_s0 + $0x20] sm:$0xf] }
 0x107   :  { %1107 = vrot.lane.b32.xlu0 %v1083_v40, %s12560_s19  ;;  %s12571_s19 = smov 62  }
 0x108   :  { %v889_v63 = vsel %vm132_vm0, %v875_v60, %v876_v26  ;;  %v10062_v18 = vpop.permute.xlu1 %947 }
 0x109   :  { %v890_v1 = vsel %vm881_vm13, %v861_v47, %v889_v63  ;;  %v10064_v42 = vpop.permute.xlu0 %937  ;;  %v12562_v9 = vrot.slane %v10062_v18, 4 }
 0x10a   :  { %v12563_v48 = vrot.slane %v10064_v42, 4  ;;  %v8402_v8 = vcombine.high %v882_v7, %v890_v1  ;;  %v8401_v55 = vcombine.low %v882_v7, %v890_v1  ;;  %949 = vrot.lane.b32.xlu1 %v9720_v6, %s12710_s21 }
 0x10b   :  { %939 = vrot.lane.b32.xlu0 %v9725_v14, %s12710_s21  ;;  %v974_v47 = vsel %vm132_vm0, %v959_v30, %v12562_v9 }
 0x10c   :  { %2136 = vmatprep.subr.bf16.mxu0 %v8402_v8  ;;  %v966_v40 = vsel %vm132_vm0, %v954_v10, %v12563_v48  ;;  %v10086_v3 = vpop.permute.xlu1 %769  ;;  %v975_v63 = vsel %vm964_vm12, %v9999_v37, %v974_v47 }
 0x10d   :  { %v768_v8 = vpop.permute.xlu0 %767  ;;  %2137 = vmatpush2.bf16.msra.mxu0 %v8401_v55  ;;  %v967_v60 = vsel %vm964_vm12, %v9990_v0, %v966_v40  ;;  %v788_v7 = vrot.slane %v10086_v3, 4 }
 0x10e   :  { %v787_v1 = vrot.slane %v768_v8, 4  ;;  %v8412_v44 = vcombine.high %v967_v60, %v975_v63  ;;  %v8411_v12 = vcombine.low %v967_v60, %v975_v63  ;;  %1034 = vrot.lane.b32.xlu1 %v1005_v4, %s12615_s20  ;;  %v917_v4 = vld [vmem:[%s12530_s0 + $0x20] sm:$0xf] }
 0x10f   :  { %1024 = vrot.lane.b32.xlu0 %v1000_v19, %s12615_s20 }
 0x110   :  { %2175 = vmatprep.subr.bf16.mxu1 %v8412_v44  ;;  %v10095_v10 = vpop.permute.xlu1 %779  ;;  %v797_v55 = vsel %vm132_vm0, %v787_v1, %v788_v7 }
 0x111   :  { %v778_v30 = vpop.permute.xlu0 %777  ;;  %2176 = vmatpush2.bf16.msra.mxu1 %v8411_v12  ;;  %v793_v0 = vrot.slane %v10095_v10, 4  ;;  %v922_v12 = vld [vmem:[%s12530_s0 + $0x44] sm:$0xf]  ;;  %v799_v19 = vsel %vm798_vm14, %v768_v8, %v797_v55 }
 0x112   :  { %v792_v37 = vrot.slane %v778_v30, 4  ;;  %866 = vrot.lane.b32.xlu1 %v9720_v6, %s12711_s18 }
 0x113   :  { %856 = vrot.lane.b32.xlu0 %v9725_v14, %s12711_s18 }
 0x114   :  { %v806_v44 = vsel %vm132_vm0, %v792_v37, %v793_v0  ;;  %v10114_v47 = vpop.permute.xlu1 %864 }
 0x115   :  { %v807_v40 = vsel %vm798_vm14, %v778_v30, %v806_v44  ;;  %v10116_v60 = vpop.permute.xlu0 %854  ;;  %v12564_v63 = vrot.slane %v10114_v47, 4 }
 0x116   :  { %v12565_v1 = vrot.slane %v10116_v60, 4  ;;  %v8394_v37 = vcombine.high %v799_v19, %v807_v40  ;;  %v8393_v9 = vcombine.low %v799_v19, %v807_v40  ;;  %951 = vrot.lane.b32.xlu1 %v922_v12, %s12710_s21 }
 0x117   :  { %941 = vrot.lane.b32.xlu0 %v917_v4, %s12710_s21  ;;  %v891_v30 = vsel %vm132_vm0, %v876_v26, %v12564_v63 }
 0x118   :  { %2138 = vmatprep.subr.bf16.mxu0 %v8394_v37  ;;  %v883_v8 = vsel %vm132_vm0, %v871_v16, %v12565_v1  ;;  %v10130_v55 = vpop.permute.xlu1 %686  ;;  %v892_v4 = vsel %vm881_vm13, %v10051_v2, %v891_v30 }
 0x119   :  { %v685_v44 = vpop.permute.xlu0 %684  ;;  %2139 = vmatpush2.bf16.msra.mxu0 %v8393_v9  ;;  %v884_v12 = vsel %vm881_vm13, %v10034_v20, %v883_v8  ;;  %v705_v19 = vrot.slane %v10130_v55, 4  ;;  %v839_v9 = vld [vmem:[%s12530_s0 + $0x44] sm:$0xf]  ;;  %v834_v20 = vld [vmem:[%s12530_s0 + $0x20] sm:$0xf] }
 0x11a   :  { %v704_v40 = vrot.slane %v685_v44, 4  ;;  %v8404_v37 = vcombine.high %v884_v12, %v892_v4  ;;  %v8403_v48 = vcombine.low %v884_v12, %v892_v4  ;;  %783 = vrot.lane.b32.xlu1 %v9720_v6, %s12611_s24 }
 0x11b   :  { %773 = vrot.lane.b32.xlu0 %v9725_v14, %s12611_s24 }
 0x11c   :  { %2177 = vmatprep.subr.bf16.mxu1 %v8404_v37  ;;  %v10147_v16 = vpop.permute.xlu1 %696  ;;  %v714_v26 = vsel %vm132_vm0, %v704_v40, %v705_v19 }
 0x11d   :  { %v695_v2 = vpop.permute.xlu0 %694  ;;  %2178 = vmatpush2.bf16.msra.mxu1 %v8403_v48  ;;  %v710_v8 = vrot.slane %v10147_v16, 4  ;;  %v716_v4 = vsel %vm12617_vm15, %v685_v44, %v714_v26  ;;  %v756_v44 = vld [vmem:[%s12530_s0 + $0x44] sm:$0xf] }
 0x11e   :  { %v709_v30 = vrot.slane %v695_v2, 4  ;;  %868 = vrot.lane.b32.xlu1 %v839_v9, %s12711_s18  ;;  %v751_v9 = vld [vmem:[%s12530_s0 + $0x20] sm:$0xf] }
 0x11f   :  { %858 = vrot.lane.b32.xlu0 %v834_v20, %s12711_s18 }
 0x120   :  { %v723_v12 = vsel %vm132_vm0, %v709_v30, %v710_v8  ;;  %v10158_v63 = vpop.permute.xlu1 %781 }
 0x121   :  { %v724_v37 = vsel %vm12617_vm15, %v695_v2, %v723_v12  ;;  %v10160_v48 = vpop.permute.xlu0 %771  ;;  %v794_v1 = vrot.slane %v10158_v63, 4 }
 0x122   :  { %v789_v40 = vrot.slane %v10160_v48, 4  ;;  %v8386_v5 = vcombine.high %v716_v4, %v724_v37  ;;  %v8385_v15 = vcombine.low %v716_v4, %v724_v37  ;;  %700 = vrot.lane.b32.xlu1 %v9720_v6, %s12613_s25  ;;  %v12568_v37 = vmov 0  }
 0x123   :  { %690 = vrot.lane.b32.xlu0 %v9725_v14, %s12613_s25  ;;  %v808_v6 = vsel %vm132_vm0, %v793_v0, %v794_v1  ;;  %v10184_v14 = vcombine.low %v9684_v52, %v9684_v52  ;;  %9212 = vset.pattern.permute.xlu1 %v12568_v37  ;;  %v673_v52 = vld [vmem:[%s12530_s0 + $0x44] sm:$0xf] }
 0x124   :  { %2140 = vmatprep.subr.bf16.mxu0 %v8386_v5  ;;  %v800_v20 = vsel %vm132_vm0, %v788_v7, %v789_v40  ;;  %v10186_v5 = vpop.permute.xlu1 %617  ;;  %v809_v30 = vsel %vm798_vm14, %v10095_v10, %v808_v6  ;;  %9211 = vset.pattern.permute.xlu0 %v12568_v37 }
 0x125   :  { %v10188_v2 = vpop.permute.xlu0 %607  ;;  %2141 = vmatpush2.bf16.msra.mxu0 %v8385_v15  ;;  %v801_v26 = vsel %vm798_vm14, %v10086_v3, %v800_v20  ;;  %v629_v7 = vrot.slane %v10186_v5, 4  ;;  %v668_v15 = vld [vmem:[%s12530_s0 + $0x20] sm:$0xf] }
 0x126   :  { %v624_v12 = vrot.slane %v10188_v2, 4  ;;  %v8396_v0 = vcombine.high %v801_v26, %v809_v30  ;;  %v8395_v4 = vcombine.low %v801_v26, %v809_v30  ;;  %785 = vrot.lane.b32.xlu1 %v756_v44, %s12611_s24 }
 0x127   :  { %775 = vrot.lane.b32.xlu0 %v751_v9, %s12611_s24  ;;  %v644_v10 = vsel %vm132_vm0, %v628_v34, %v629_v7 }
 0x128   :  { %2179 = vmatprep.subr.bf16.mxu1 %v8396_v0  ;;  %v636_v3 = vsel %vm132_vm0, %v623_v35, %v624_v12  ;;  %2143 = vmatmul.mubr.bf16.vlgmr.msra.gmra.mxu0 %v10184_v14  ;;  %v10213_v44 = vpop.permute.xlu1 %698  ;;  %v645_v6 = vsel %vm632_vm1, %v9555_v32, %v644_v10  ;;  %v1457_v0 = vld [vmem:[%s12532_s4] sm:$0xff] }
 0x129   :  { %v10215_v9 = vpop.permute.xlu0 %688  ;;  %2180 = vmatpush2.bf16.msra.mxu1 %v8395_v4  ;;  %v637_v20 = vsel %vm632_vm1, %v9557_v33, %v636_v3  ;;  %2224 = vmatprep.mubr.bf16.mxu0 %v9694_v61  ;;  %v711_v35 = vrot.slane %v10213_v44, 4  ;;  %v2354_v4 = vld [vmem:[%s12533_s5] sm:$0xff] }
 0x12a   :  { %v706_v26 = vrot.slane %v10215_v9, 4  ;;  %v8381_v34 = vcombine.low %v637_v20, %v645_v6  ;;  %v8382_v30 = vcombine.high %v637_v20, %v645_v6  ;;  %702 = vrot.lane.b32.xlu1 %v673_v52, %s12613_s25 }
 0x12b   :  { %692 = vrot.lane.b32.xlu0 %v668_v15, %s12613_s25  ;;  %v725_v32 = vsel %vm132_vm0, %v710_v8, %v711_v35 }
 0x12c   :  { %2192 = vmatprep.subr.bf16.mxu0 %v8382_v30  ;;  %v717_v33 = vsel %vm132_vm0, %v705_v19, %v706_v26  ;;  %v535_v52 = vpop.permute.xlu1 %534  ;;  %v726_v19 = vsel %vm12617_vm15, %v10147_v16, %v725_v32 }
 0x12d   :  { %v525_v15 = vpop.permute.xlu0 %524  ;;  %2193 = vmatpush1.bf16.msra.mxu0 %v8381_v34  ;;  %v718_v3 = vsel %vm12617_vm15, %v10130_v55, %v717_v33  ;;  %v546_v10 = vrot.slane %v535_v52, 4  ;;  %v2386_v55 = vld [vmem:[%s12534_s6] sm:$0xff] }
 0x12e   :  { %v541_v20 = vrot.slane %v525_v15, 4  ;;  %v8388_v8 = vcombine.high %v718_v3, %v726_v19  ;;  %v8387_v6 = vcombine.low %v718_v3, %v726_v19  ;;  %2375 = vperm.xlu1 %9212, %v2354_v4  }
 0x12f   :  { %1460 = vperm.xlu0 %9211, %v1457_v0   ;;  %v561_v34 = vsel %vm132_vm0, %v545_v58, %v546_v10 }
 0x130   :  { %2181 = vmatprep.subr.bf16.mxu1 %v8388_v8  ;;  %v553_v30 = vsel %vm132_vm0, %v540_v59, %v541_v20  ;;  %v620_v16 = vpop.permute.xlu1 %619  ;;  %v562_v0 = vsel %vm12672_vm2, %v9593_v56, %v561_v34 }
 0x131   :  { %v610_v33 = vpop.permute.xlu0 %609  ;;  %2182 = vmatpush2.bf16.msra.mxu1 %v8387_v6  ;;  %v554_v32 = vsel %vm12672_vm2, %v9595_v57, %v553_v30  ;;  %v630_v4 = vrot.slane %v620_v16, 4 }
 0x132   :  { %v625_v3 = vrot.slane %v610_v33, 4  ;;  %v8373_v59 = vcombine.low %v554_v32, %v562_v0  ;;  %v8374_v19 = vcombine.high %v554_v32, %v562_v0 }
 0x133   :  { %2389 = vperm.xlu0 %9211, %v2386_v55   ;;  %v646_v58 = vsel %vm132_vm0, %v629_v7, %v630_v4 }
 0x134   :  { %v638_v8 = vsel %vm132_vm0, %v624_v12, %v625_v3  ;;  %2194 = vmatprep.subr.bf16.mxu0 %v8374_v19  ;;  %2184 = vmatmul.mubr.bf16.vlgmr.msra.gmra.mxu1 %v10184_v14  ;;  %v452_v37 = vpop.permute.xlu1 %451  ;;  %v647_v56 = vsel %vm632_vm1, %v10186_v5, %v646_v58 }
 0x135   :  { %v442_v6 = vpop.permute.xlu0 %441  ;;  %2195 = vmatpush1.bf16.msra.mxu0 %v8373_v59  ;;  %v639_v57 = vsel %vm632_vm1, %v10188_v2, %v638_v8  ;;  %2265 = vmatprep.mubr.bf16.mxu1 %v9694_v61  ;;  %v463_v30 = vrot.slane %v452_v37, 4 }
 0x136   :  { %v458_v34 = vrot.slane %v442_v6, 4  ;;  %v8383_v55 = vcombine.low %v639_v57, %v647_v56  ;;  %v8384_v7 = vcombine.high %v639_v57, %v647_v56 }
 0x137   :  { %v478_v16 = vsel %vm132_vm0, %v462_v24, %v463_v30 }
 0x138   :  { %2233 = vmatprep.subr.bf16.mxu1 %v8384_v7  ;;  %v470_v12 = vsel %vm132_vm0, %v457_v25, %v458_v34  ;;  %v537_v33 = vpop.permute.xlu1 %536  ;;  %v479_v61 = vsel %vm12673_vm3, %v9635_v22, %v478_v16 }
 0x139   :  { %v527_v2 = vpop.permute.xlu0 %526  ;;  %2234 = vmatpush1.bf16.msra.mxu1 %v8383_v55  ;;  %v471_v5 = vsel %vm12673_vm3, %v9637_v23, %v470_v12  ;;  %v547_v32 = vrot.slane %v537_v33, 4 }
 0x13a   :  { %v542_v0 = vrot.slane %v527_v2, 4  ;;  %v8365_v4 = vcombine.low %v471_v5, %v479_v61  ;;  %v8366_v3 = vcombine.high %v471_v5, %v479_v61 }
 0x13b   :  { %v563_v59 = vsel %vm132_vm0, %v546_v10, %v547_v32 }
 0x13c   :  { %v555_v25 = vsel %vm132_vm0, %v541_v20, %v542_v0  ;;  %2196 = vmatprep.subr.bf16.mxu0 %v8366_v3  ;;  %v369_v19 = vpop.permute.xlu1 %368  ;;  %v564_v8 = vsel %vm12672_vm2, %v535_v52, %v563_v59 }
 0x13d   :  { %v359_v24 = vpop.permute.xlu0 %358  ;;  %2197 = vmatpush1.bf16.msra.mxu0 %v8365_v4  ;;  %v556_v58 = vsel %vm12672_vm2, %v525_v15, %v555_v25  ;;  %v380_v23 = vrot.slane %v369_v19, 4 }
 0x13e   :  { %v375_v57 = vrot.slane %v359_v24, 4  ;;  %v8375_v56 = vcombine.low %v556_v58, %v564_v8  ;;  %v8376_v22 = vcombine.high %v556_v58, %v564_v8 }
 0x13f   :  { %v395_v10 = vsel %vm132_vm0, %v379_v53, %v380_v23 }
 0x140   :  { %2235 = vmatprep.subr.bf16.mxu1 %v8376_v22  ;;  %v387_v55 = vsel %vm132_vm0, %v374_v54, %v375_v57  ;;  %v454_v20 = vpop.permute.xlu1 %453  ;;  %v396_v52 = vsel %vm12654_vm4, %v9677_v50, %v395_v10 }
 0x141   :  { %v444_v7 = vpop.permute.xlu0 %443  ;;  %2236 = vmatpush1.bf16.msra.mxu1 %v8375_v56  ;;  %v388_v15 = vsel %vm12654_vm4, %v9679_v51, %v387_v55  ;;  %v464_v12 = vrot.slane %v454_v20, 4 }
 0x142   :  { %v459_v16 = vrot.slane %v444_v7, 4  ;;  %v8357_v33 = vcombine.low %v388_v15, %v396_v52  ;;  %v8358_v2 = vcombine.high %v388_v15, %v396_v52 }
 0x143   :  { %v480_v5 = vsel %vm132_vm0, %v463_v30, %v464_v12 }
 0x144   :  { %v472_v54 = vsel %vm132_vm0, %v458_v34, %v459_v16  ;;  %2198 = vmatprep.subr.bf16.mxu0 %v8358_v2  ;;  %v286_v61 = vpop.permute.xlu1 %285  ;;  %v481_v0 = vsel %vm12673_vm3, %v452_v37, %v480_v5 }
 0x145   :  { %v276_v53 = vpop.permute.xlu0 %275  ;;  %2199 = vmatpush1.bf16.msra.mxu0 %v8357_v33  ;;  %v473_v32 = vsel %vm12673_vm3, %v442_v6, %v472_v54  ;;  %v297_v51 = vrot.slane %v286_v61, 4 }
 0x146   :  { %v292_v4 = vrot.slane %v276_v53, 4  ;;  %v8367_v3 = vcombine.low %v473_v32, %v481_v0  ;;  %v8368_v50 = vcombine.high %v473_v32, %v481_v0 }
 0x147   :  { %v312_v30 = vsel %vm132_vm0, %v296_v31, %v297_v51 }
 0x148   :  { %2237 = vmatprep.subr.bf16.mxu1 %v8368_v50  ;;  %v304_v59 = vsel %vm132_vm0, %v291_v36, %v292_v4  ;;  %v371_v34 = vpop.permute.xlu1 %370  ;;  %v313_v37 = vsel %vm12645_vm5, %v9740_v28, %v312_v30 }
 0x149   :  { %v361_v25 = vpop.permute.xlu0 %360  ;;  %2238 = vmatpush1.bf16.msra.mxu1 %v8367_v3  ;;  %v305_v6 = vsel %vm12645_vm5, %v9742_v29, %v304_v59  ;;  %v381_v58 = vrot.slane %v371_v34, 4 }
 0x14a   :  { %v376_v8 = vrot.slane %v361_v25, 4  ;;  %v8349_v56 = vcombine.low %v305_v6, %v313_v37  ;;  %v8350_v22 = vcombine.high %v305_v6, %v313_v37  ;;  %v12713_v6 = vrot.slane %v9806_v41, 4 }
 0x14b   :  { %v397_v55 = vsel %vm132_vm0, %v380_v23, %v381_v58  ;;  %v12712_v23 = vrot.slane %v9778_v11, 4 }
 0x14c   :  { %v389_v36 = vsel %vm132_vm0, %v375_v57, %v376_v8  ;;  %2200 = vmatprep.subr.bf16.mxu0 %v8350_v22  ;;  %v203_v10 = vpop.permute.xlu1 %202  ;;  %v398_v7 = vsel %vm12654_vm4, %v369_v19, %v397_v55 }
 0x14d   :  { %v193_v31 = vpop.permute.xlu0 %192  ;;  %2201 = vmatpush1.bf16.msra.mxu0 %v8349_v56  ;;  %v390_v20 = vsel %vm12654_vm4, %v359_v24, %v389_v36  ;;  %v214_v29 = vrot.slane %v203_v10, 4 }
 0x14e   :  { %v209_v15 = vrot.slane %v193_v31, 4  ;;  %v8359_v52 = vcombine.low %v390_v20, %v398_v7  ;;  %v8360_v28 = vcombine.high %v390_v20, %v398_v7  ;;  %v9221_v20 = vld [vmem:[%s12530_s0 + $0x14] ss:$36 sps:$4 sm:$0xff]  }
 0x14f   :  { %v229_v57 = vsel %vm132_vm0, %v12712_v23, %v214_v29  ;;  %v9219_v23 = vld [vmem:[%s12530_s0 + $0x10] ss:$36 sps:$4 sm:$0xff]  }
 0x150   :  { %2239 = vmatprep.subr.bf16.mxu1 %v8360_v28  ;;  %v221_v12 = vsel %vm132_vm0, %v208_v17, %v209_v15  ;;  %v288_v16 = vpop.permute.xlu1 %287  ;;  %v230_v19 = vsel %vm12642_vm6, %v9778_v11, %v229_v57 }
 0x151   :  { %v278_v33 = vpop.permute.xlu0 %277  ;;  %2240 = vmatpush1.bf16.msra.mxu1 %v8359_v52  ;;  %v222_v24 = vsel %vm12642_vm6, %v9780_v13, %v221_v12  ;;  %v298_v2 = vrot.slane %v288_v16, 4 }
 0x152   :  { %v293_v5 = vrot.slane %v278_v33, 4  ;;  %v8341_v54 = vcombine.low %v222_v24, %v230_v19  ;;  %v8342_v32 = vcombine.high %v222_v24, %v230_v19 }
 0x153   :  { %v314_v0 = vsel %vm132_vm0, %v297_v51, %v298_v2  ;;  %v12714_v51 = vrot.slane %v9804_v39, 4 }
 0x154   :  { %v306_v17 = vsel %vm132_vm0, %v292_v4, %v293_v5  ;;  %2202 = vmatprep.subr.bf16.mxu0 %v8342_v32  ;;  %v119_v3 = vpop.permute.xlu1 %118  ;;  %v315_v30 = vsel %vm12645_vm5, %v286_v61, %v314_v0 }
 0x155   :  { %v109_v50 = vpop.permute.xlu0 %108  ;;  %2203 = vmatpush1.bf16.msra.mxu0 %v8341_v54  ;;  %v307_v59 = vsel %vm12645_vm5, %v276_v53, %v306_v17  ;;  %v130_v13 = vrot.slane %v119_v3, 4  ;;  %v9224_v17 = vld [vmem:[%s12530_s0 + $0x1c] ss:$36 sps:$4 sm:$0xff]  }
 0x156   :  { %v125_v34 = vrot.slane %v109_v50, 4  ;;  %v8351_v25 = vcombine.low %v307_v59, %v315_v30  ;;  %v8352_v11 = vcombine.high %v307_v59, %v315_v30  ;;  %v12715_v59 = vrot.slane %v9875_v46, 4 }
 0x157   :  { %v146_v4 = vsel %vm132_vm0, %v12714_v51, %v130_v13 }
 0x158   :  { %2241 = vmatprep.subr.bf16.mxu1 %v8352_v11  ;;  %v138_v37 = vsel %vm132_vm0, %v12713_v6, %v125_v34  ;;  %v205_v58 = vpop.permute.xlu1 %204  ;;  %v147_v61 = vsel %vm12641_vm7, %v9804_v39, %v146_v4  ;;  %v9222_v6 = vld [vmem:[%s12530_s0 + $0x18] ss:$36 sps:$4 sm:$0xff]   ;;  %s12636_s0 = smov 92  }
 0x159   :  { %v195_v8 = vpop.permute.xlu0 %194  ;;  %2242 = vmatpush1.bf16.msra.mxu1 %v8351_v25  ;;  %v139_v53 = vsel %vm12641_vm7, %v9806_v41, %v138_v37  ;;  %v215_v56 = vrot.slane %v205_v58, 4 }
 0x15a   :  { %v210_v22 = vrot.slane %v195_v8, 4  ;;  %v8333_v55 = vcombine.low %v139_v53, %v147_v61  ;;  %v8334_v36 = vcombine.high %v139_v53, %v147_v61  ;;  %v12717_v8 = vrot.slane %v9924_v62, 4 }
 0x15b   :  { %v231_v7 = vsel %vm132_vm0, %v214_v29, %v215_v56  ;;  %v12718_v61 = vrot.slane %v9922_v43, 4 }
 0x15c   :  { %v223_v52 = vsel %vm132_vm0, %v209_v15, %v210_v22  ;;  %2204 = vmatprep.subr.bf16.mxu0 %v8334_v36  ;;  %v121_v28 = vpop.permute.xlu1 %120  ;;  %v232_v39 = vsel %vm12642_vm6, %v203_v10, %v231_v7 }
 0x15d   :  { %v111_v12 = vpop.permute.xlu0 %110  ;;  %2205 = vmatpush1.bf16.msra.mxu0 %v8333_v55  ;;  %v224_v41 = vsel %vm12642_vm6, %v193_v31, %v223_v52  ;;  %v131_v57 = vrot.slane %v121_v28, 4 }
 0x15e   :  { %v126_v16 = vrot.slane %v111_v12, 4  ;;  %v8343_v33 = vcombine.low %v224_v41, %v232_v39  ;;  %v8344_v24 = vcombine.high %v224_v41, %v232_v39  ;;  %2206 = vmatprep.subr.bf16.mxu0 %v9221_v20 }
 0x15f   :  { %v148_v29 = vsel %vm132_vm0, %v130_v13, %v131_v57  ;;  %v12716_v13 = vrot.slane %v9873_v45, 4 }
 0x160   :  { %v140_v15 = vsel %vm132_vm0, %v125_v34, %v126_v16  ;;  %2243 = vmatprep.subr.bf16.mxu1 %v8344_v24  ;;  %v1282_v19 = vpop.permute.xlu1 %1281  ;;  %v149_v10 = vsel %vm12641_vm7, %v119_v3, %v148_v29  ;;  %v12719_v24 = vrot.slane %v9968_v27, 4 }
 0x161   :  { %v1272_v2 = vpop.permute.xlu0 %1271  ;;  %2244 = vmatpush1.bf16.msra.mxu1 %v8343_v33  ;;  %v141_v31 = vsel %vm12641_vm7, %v109_v50, %v140_v15  ;;  %2207 = vmatpush1.bf16.msra.mxu0 %v9219_v23  ;;  %v1293_v5 = vrot.slane %v1282_v19, 4  ;;  %v12720_v15 = vrot.slane %v9966_v21, 4 }
 0x162   :  { %v1288_v54 = vrot.slane %v1272_v2, 4  ;;  %v8335_v32 = vcombine.low %v141_v31, %v149_v10  ;;  %v8336_v0 = vcombine.high %v141_v31, %v149_v10 }
 0x163   :  { %v1308_v50 = vsel %vm132_vm0, %v12716_v13, %v1293_v5 }
 0x164   :  { %2245 = vmatprep.subr.bf16.mxu1 %v8336_v0  ;;  %v1300_v30 = vsel %vm132_vm0, %v12715_v59, %v1288_v54  ;;  %v1199_v34 = vpop.permute.xlu1 %1198  ;;  %v1309_v11 = vsel %vm1296_vm8, %v9873_v45, %v1308_v50 }
 0x165   :  { %v1189_v3 = vpop.permute.xlu0 %1188  ;;  %2246 = vmatpush1.bf16.msra.mxu1 %v8335_v32  ;;  %v1301_v25 = vsel %vm1296_vm8, %v9875_v46, %v1300_v30  ;;  %v1210_v37 = vrot.slane %v1199_v34, 4 }
 0x166   :  { %v1205_v51 = vrot.slane %v1189_v3, 4  ;;  %v8445_v4 = vcombine.low %v1301_v25, %v1309_v11  ;;  %v8446_v58 = vcombine.high %v1301_v25, %v1309_v11  ;;  %2247 = vmatprep.subr.bf16.mxu1 %v9224_v17 }
 0x167   :  { %v1225_v46 = vsel %vm132_vm0, %v12718_v61, %v1210_v37 }
 0x168   :  { %2208 = vmatprep.subr.bf16.mxu0 %v8446_v58  ;;  %v1217_v53 = vsel %vm132_vm0, %v12717_v8, %v1205_v51  ;;  %v1284_v56 = vpop.permute.xlu1 %1283  ;;  %v1226_v55 = vsel %vm12591_vm9, %v9922_v43, %v1225_v46  ;;  %v12721_v58 = vrot.slane %v10020_v38, 4 }
 0x169   :  { %v1274_v45 = vpop.permute.xlu0 %1273  ;;  %2209 = vmatpush2.bf16.msra.mxu0 %v8445_v4  ;;  %v1218_v22 = vsel %vm12591_vm9, %v9924_v62, %v1217_v53  ;;  %2248 = vmatpush1.bf16.msra.mxu1 %v9222_v6  ;;  %v1294_v36 = vrot.slane %v1284_v56, 4 }
 0x16a   :  { %v1289_v20 = vrot.slane %v1274_v45, 4  ;;  %v8437_v7 = vcombine.low %v1218_v22, %v1226_v55  ;;  %v8438_v52 = vcombine.high %v1218_v22, %v1226_v55 }
 0x16b   :  { %v1310_v28 = vsel %vm132_vm0, %v1293_v5, %v1294_v36 }
 0x16c   :  { %v1302_v12 = vsel %vm132_vm0, %v1288_v54, %v1289_v20  ;;  %2210 = vmatprep.subr.bf16.mxu0 %v8438_v52  ;;  %v1116_v41 = vpop.permute.xlu1 %1115  ;;  %v1311_v62 = vsel %vm1296_vm8, %v1282_v19, %v1310_v28 }
 0x16d   :  { %v1106_v39 = vpop.permute.xlu0 %1105  ;;  %2211 = vmatpush2.bf16.msra.mxu0 %v8437_v7  ;;  %v1303_v23 = vsel %vm1296_vm8, %v1272_v2, %v1302_v12  ;;  %v1127_v57 = vrot.slane %v1116_v41, 4 }
 0x16e   :  { %v1122_v16 = vrot.slane %v1106_v39, 4  ;;  %v8447_v43 = vcombine.low %v1303_v23, %v1311_v62  ;;  %v8448_v33 = vcombine.high %v1303_v23, %v1311_v62  ;;  %v12578_v62 = vmov 0.0|0.0  }
 0x16f   :  { %v1142_v31 = vsel %vm132_vm0, %v12720_v15, %v1127_v57  ;;  %3528 = vrot.lane.b32.xlu1 %v12578_v62, %s12615_s20  ;;  %3455 = vrot.lane.b32.xlu0 %v12578_v62, %s12636_s0 }
 0x170   :  { %2249 = vmatprep.subr.bf16.mxu1 %v8448_v33  ;;  %v1134_v29 = vsel %vm132_vm0, %v12719_v24, %v1122_v16  ;;  %v1201_v10 = vpop.permute.xlu1 %1200  ;;  %v1143_v19 = vsel %vm12600_vm10, %v9966_v21, %v1142_v31 }
 0x171   :  { %v1191_v5 = vpop.permute.xlu0 %1190  ;;  %2250 = vmatpush2.bf16.msra.mxu1 %v8447_v43  ;;  %v1135_v2 = vsel %vm12600_vm10, %v9968_v27, %v1134_v29  ;;  %v1211_v54 = vrot.slane %v1201_v10, 4 }
 0x172   :  { %v1206_v32 = vrot.slane %v1191_v5, 4  ;;  %v8429_v0 = vcombine.low %v1135_v2, %v1143_v19  ;;  %v8430_v17 = vcombine.high %v1135_v2, %v1143_v19 }
 0x173   :  { %v1227_v59 = vsel %vm132_vm0, %v1210_v37, %v1211_v54  ;;  %v12722_v37 = vrot.slane %v10018_v49, 4  ;;  %3383 = vrot.lane.b32.xlu1 %v12578_v62, %s12710_s21  ;;  %3311 = vrot.lane.b32.xlu0 %v12578_v62, %s12711_s18 }
 0x174   :  { %v1219_v30 = vsel %vm132_vm0, %v1205_v51, %v1206_v32  ;;  %2212 = vmatprep.subr.bf16.mxu0 %v8430_v17  ;;  %v1033_v13 = vpop.permute.xlu1 %1032  ;;  %v1228_v11 = vsel %vm12591_vm9, %v1199_v34, %v1227_v59 }
 0x175   :  { %v1023_v50 = vpop.permute.xlu0 %1022  ;;  %2213 = vmatpush2.bf16.msra.mxu0 %v8429_v0  ;;  %v1220_v25 = vsel %vm12591_vm9, %v1189_v3, %v1219_v30  ;;  %v1044_v27 = vrot.slane %v1033_v13, 4  ;;  %vm3463_vm9 = vcmask 752640  }
 0x176   :  { %v1039_v6 = vrot.slane %v1023_v50, 4  ;;  %v8439_v4 = vcombine.low %v1220_v25, %v1228_v11  ;;  %v8440_v21 = vcombine.high %v1220_v25, %v1228_v11  ;;  %v12725_v25 = vrot.slane %v10116_v60, 4 }
 0x177   :  { %v1059_v51 = vsel %vm132_vm0, %v12722_v37, %v1044_v27  ;;  %3239 = vrot.lane.b32.xlu1 %v12578_v62, %s12611_s24  ;;  %3167 = vrot.lane.b32.xlu0 %v12578_v62, %s12613_s25 }
 0x178   :  { %2251 = vmatprep.subr.bf16.mxu1 %v8440_v21  ;;  %v1051_v8 = vsel %vm132_vm0, %v12721_v58, %v1039_v6  ;;  %v1118_v53 = vpop.permute.xlu1 %1117  ;;  %v1060_v34 = vsel %vm1047_vm11, %v10018_v49, %v1059_v51 }
 0x179   :  { %v1108_v61 = vpop.permute.xlu0 %1107  ;;  %2252 = vmatpush2.bf16.msra.mxu1 %v8439_v4  ;;  %v1052_v3 = vsel %vm1047_vm11, %v10020_v38, %v1051_v8  ;;  %v1128_v46 = vrot.slane %v1118_v53, 4 }
 0x17a   :  { %v1123_v56 = vrot.slane %v1108_v61, 4  ;;  %v8421_v45 = vcombine.low %v1052_v3, %v1060_v34  ;;  %v8422_v22 = vcombine.high %v1052_v3, %v1060_v34 }
 0x17b   :  { %v1144_v55 = vsel %vm132_vm0, %v1127_v57, %v1128_v46  ;;  %v12723_v57 = vrot.slane %v10064_v42, 4  ;;  %3094 = vrot.lane.b32.xlu1 %v12578_v62, %s12596_s23  ;;  %3022 = vrot.lane.b32.xlu0 %v12578_v62, %s12605_s17 }
 0x17c   :  { %v1136_v36 = vsel %vm132_vm0, %v1122_v16, %v1123_v56  ;;  %2214 = vmatprep.subr.bf16.mxu0 %v8422_v22  ;;  %v10401_v20 = vpop.permute.xlu1 %949  ;;  %v1145_v38 = vsel %vm12600_vm10, %v1116_v41, %v1144_v55  ;;  %v12724_v41 = vrot.slane %v10062_v18, 4 }
 0x17d   :  { %v940_v7 = vpop.permute.xlu0 %939  ;;  %2215 = vmatpush2.bf16.msra.mxu0 %v8421_v45  ;;  %v1137_v52 = vsel %vm12600_vm10, %v1106_v39, %v1136_v36  ;;  %v961_v28 = vrot.slane %v10401_v20, 4  ;;  %vm12601_vm10 = vcmask 588800  }
 0x17e   :  { %v956_v49 = vrot.slane %v940_v7, 4  ;;  %v8431_v12 = vcombine.low %v1137_v52, %v1145_v38  ;;  %v8432_v23 = vcombine.high %v1137_v52, %v1145_v38 }
 0x17f   :  { %v976_v16 = vsel %vm132_vm0, %v12724_v41, %v961_v28  ;;  %2950 = vrot.lane.b32.xlu1 %v12578_v62, %s12589_s22  ;;  %2878 = vrot.lane.b32.xlu0 %v12578_v62, %s12602_s27 }
 0x180   :  { %2253 = vmatprep.subr.bf16.mxu1 %v8432_v23  ;;  %v968_v39 = vsel %vm132_vm0, %v12723_v57, %v956_v49  ;;  %v1035_v43 = vpop.permute.xlu1 %1034  ;;  %v977_v29 = vsel %vm964_vm12, %v10062_v18, %v976_v16 }
 0x181   :  { %v1025_v33 = vpop.permute.xlu0 %1024  ;;  %2254 = vmatpush2.bf16.msra.mxu1 %v8431_v12  ;;  %v969_v24 = vsel %vm964_vm12, %v10064_v42, %v968_v39  ;;  %v1045_v15 = vrot.slane %v1035_v43, 4 }
 0x182   :  { %v1040_v31 = vrot.slane %v1025_v33, 4  ;;  %v8413_v10 = vcombine.low %v969_v24, %v977_v29  ;;  %v8414_v5 = vcombine.high %v969_v24, %v977_v29 }
 0x183   :  { %v1061_v2 = vsel %vm132_vm0, %v1044_v27, %v1045_v15  ;;  %2806 = vrot.lane.b32.xlu1 %v12578_v62, %s12583_s28  ;;  %2733 = vrot.lane.b32.xlu0 %v12578_v62, %s12598_s26 }
 0x184   :  { %v1053_v19 = vsel %vm132_vm0, %v1039_v6, %v1040_v31  ;;  %2216 = vmatprep.subr.bf16.mxu0 %v8414_v5  ;;  %v10426_v54 = vpop.permute.xlu1 %866  ;;  %v1062_v32 = vsel %vm1047_vm11, %v1033_v13, %v1061_v2 }
 0x185   :  { %v857_v42 = vpop.permute.xlu0 %856  ;;  %2217 = vmatpush2.bf16.msra.mxu0 %v8413_v10  ;;  %v1054_v18 = vsel %vm1047_vm11, %v1023_v50, %v1053_v19  ;;  %v878_v0 = vrot.slane %v10426_v54, 4  ;;  %v12726_v50 = vrot.slane %v10114_v47, 4 }
 0x186   :  { %v873_v17 = vrot.slane %v857_v42, 4  ;;  %v8423_v59 = vcombine.low %v1054_v18, %v1062_v32  ;;  %v8424_v30 = vcombine.high %v1054_v18, %v1062_v32 }
 0x187   :  { %v893_v13 = vsel %vm132_vm0, %v12726_v50, %v878_v0  ;;  %2589 = vrot.lane.b32.xlu1 %v12578_v62, %s12594_s30  ;;  %2661 = vrot.lane.b32.xlu0 %v12578_v62, %s12587_s29 }
 0x188   :  { %2255 = vmatprep.subr.bf16.mxu1 %v8424_v30  ;;  %v885_v11 = vsel %vm132_vm0, %v12725_v25, %v873_v17  ;;  %v952_v27 = vpop.permute.xlu1 %951  ;;  %v894_v21 = vsel %vm881_vm13, %v10114_v47, %v893_v13 }
 0x189   :  { %v942_v6 = vpop.permute.xlu0 %941  ;;  %2256 = vmatpush2.bf16.msra.mxu1 %v8423_v59  ;;  %v886_v4 = vsel %vm881_vm13, %v10116_v60, %v885_v11  ;;  %v962_v58 = vrot.slane %v952_v27, 4 }
 0x18a   :  { %v957_v8 = vrot.slane %v942_v6, 4  ;;  %v8405_v37 = vcombine.low %v886_v4, %v894_v21  ;;  %v8406_v51 = vcombine.high %v886_v4, %v894_v21 }
 0x18b   :  { %v978_v53 = vsel %vm132_vm0, %v961_v28, %v962_v58  ;;  %2517 = vrot.lane.b32.xlu1 %v12578_v62, %s12585_s15  ;;  %4035 = vrot.lane.b32.xlu0 %v12578_v62, %s12571_s19  ;;  %s12575_s19 = smov 61  }
 0x18c   :  { %v970_v61 = vsel %vm132_vm0, %v956_v49, %v957_v8  ;;  %2218 = vmatprep.subr.bf16.mxu0 %v8406_v51  ;;  %v10451_v60 = vpop.permute.xlu1 %783  ;;  %v979_v34 = vsel %vm964_vm12, %v10401_v20, %v978_v53 }
 0x18d   :  { %v774_v3 = vpop.permute.xlu0 %773  ;;  %2219 = vmatpush2.bf16.msra.mxu0 %v8405_v37  ;;  %v971_v47 = vsel %vm964_vm12, %v940_v7, %v970_v61  ;;  %v795_v46 = vrot.slane %v10451_v60, 4 }
 0x18e   :  { %v790_v56 = vrot.slane %v774_v3, 4  ;;  %v8415_v45 = vcombine.low %v971_v47, %v979_v34  ;;  %v8416_v22 = vcombine.high %v971_v47, %v979_v34 }
 0x18f   :  { %v810_v36 = vsel %vm132_vm0, %v794_v1, %v795_v46  ;;  %4181 = vrot.lane.b32.xlu1 %v12578_v62, %s12592_s1  ;;  %3889 = vrot.lane.b32.xlu0 %v12578_v62, %s12573_s16  ;;  %s12737_s16 = smov 62  }
 0x190   :  { %2257 = vmatprep.subr.bf16.mxu1 %v8416_v22  ;;  %v802_v55 = vsel %vm132_vm0, %v789_v40, %v790_v56  ;;  %v869_v20 = vpop.permute.xlu1 %868  ;;  %v811_v38 = vsel %vm798_vm14, %v10158_v63, %v810_v36 }
 0x191   :  { %v859_v7 = vpop.permute.xlu0 %858  ;;  %2258 = vmatpush2.bf16.msra.mxu1 %v8415_v45  ;;  %v803_v52 = vsel %vm798_vm14, %v10160_v48, %v802_v55  ;;  %v879_v28 = vrot.slane %v869_v20, 4 }
 0x192   :  { %v874_v49 = vrot.slane %v859_v7, 4  ;;  %v8397_v12 = vcombine.low %v803_v52, %v811_v38  ;;  %v8398_v23 = vcombine.high %v803_v52, %v811_v38 }
 0x193   :  { %v895_v1 = vsel %vm132_vm0, %v878_v0, %v879_v28  ;;  %4108 = vrot.lane.b32.xlu1 %v12578_v62, %s12575_s19  ;;  %s12738_s19 = smov 61  }
 0x194   :  { %v887_v40 = vsel %vm132_vm0, %v873_v17, %v874_v49  ;;  %2220 = vmatprep.subr.bf16.mxu0 %v8398_v23  ;;  %v701_v48 = vpop.permute.xlu1 %700  ;;  %v896_v39 = vsel %vm881_vm13, %v10426_v54, %v895_v1 }
 0x195   :  { %v691_v57 = vpop.permute.xlu0 %690  ;;  %2221 = vmatpush2.bf16.msra.mxu0 %v8397_v12  ;;  %v888_v63 = vsel %vm881_vm13, %v857_v42, %v887_v40  ;;  %v712_v41 = vrot.slane %v701_v48, 4 }
 0x196   :  { %v707_v16 = vrot.slane %v691_v57, 4  ;;  %v8407_v43 = vcombine.low %v888_v63, %v896_v39  ;;  %v8408_v33 = vcombine.high %v888_v63, %v896_v39 }
 0x197   :  { %v727_v29 = vsel %vm132_vm0, %v711_v35, %v712_v41 }
 0x198   :  { %2259 = vmatprep.subr.bf16.mxu1 %v8408_v33  ;;  %v719_v24 = vsel %vm132_vm0, %v706_v26, %v707_v16  ;;  %v786_v15 = vpop.permute.xlu1 %785  ;;  %v728_v5 = vsel %vm12617_vm15, %v10213_v44, %v727_v29 }
 0x199   :  { %v776_v31 = vpop.permute.xlu0 %775  ;;  %2260 = vmatpush2.bf16.msra.mxu1 %v8407_v43  ;;  %v720_v10 = vsel %vm12617_vm15, %v10215_v9, %v719_v24  ;;  %v796_v2 = vrot.slane %v786_v15, 4 }
 0x19a   :  { %v791_v19 = vrot.slane %v776_v31, 4  ;;  %v8389_v54 = vcombine.low %v720_v10, %v728_v5  ;;  %v8390_v42 = vcombine.high %v720_v10, %v728_v5 }
 0x19b   :  { %v812_v35 = vsel %vm132_vm0, %v795_v46, %v796_v2 }
 0x19c   :  { %v804_v26 = vsel %vm132_vm0, %v790_v56, %v791_v19  ;;  %2222 = vmatprep.subr.bf16.mxu0 %v8390_v42  ;;  %v703_v9 = vpop.permute.xlu1 %702  ;;  %v813_v32 = vsel %vm798_vm14, %v10451_v60, %v812_v35  ;;  %v12577_v60 = vlaneseq }
 0x19d   :  { %v693_v18 = vpop.permute.xlu0 %692  ;;  %2223 = vmatpush2.bf16.msra.mxu0 %v8389_v54  ;;  %v805_v44 = vsel %vm798_vm14, %v774_v3, %v804_v26  ;;  %v713_v0 = vrot.slane %v703_v9, 4 }
 0x19e   :  { %v708_v17 = vrot.slane %v693_v18, 4  ;;  %v8399_v59 = vcombine.low %v805_v44, %v813_v32  ;;  %v8400_v30 = vcombine.high %v805_v44, %v813_v32  ;;  %v10516_v3 = vshrl.u32 %v12577_v60, 7 }
 0x19f   :  { %v729_v25 = vsel %vm132_vm0, %v712_v41, %v713_v0 }
 0x1a0   :  { %v721_v11 = vsel %vm132_vm0, %v707_v16, %v708_v17  ;;  %2225 = vmatmul.mubr.bf16.vlgmr.msra.gmra.mxu0 %v10184_v14  ;;  %2261 = vmatprep.subr.bf16.mxu1 %v8400_v30  ;;  %v730_v13 = vsel %vm12617_vm15, %v701_v48, %v729_v25  ;;  %12727 = vst [vmem:[#allocation5_spill] sm:$0xff] %v10516_v3  ;;  %v10519_v47 = vsub.s32 0, %v10516_v3  ;;  %v10522_v34 = vsub.s32 1, %v10516_v3 }
 0x1a1   :  { %2262 = vmatpush2.bf16.msra.mxu1 %v8399_v59  ;;  %v722_v50 = vsel %vm12617_vm15, %v691_v57, %v721_v11  ;;  %v10528_v56 = vsub.s32 2, %v10516_v3  ;;  %v10541_v20 = vsub.s32 3, %v10516_v3  ;;  %v10556_v12 = vsub.s32 4, %v10516_v3 }
 0x1a2   :  { %v8391_v27 = vcombine.low %v722_v50, %v730_v13  ;;  %v8392_v6 = vcombine.high %v722_v50, %v730_v13  ;;  %12728 = vst [vmem:[#allocation6_spill] sm:$0xff] %v10519_v47  ;;  %12729 = vst [vmem:[#allocation7_spill] sm:$0xff] %v10522_v34  ;;  %v10565_v63 = vsub.s32 5, %v10516_v3  ;;  %v10579_v10 = vsub.s32 6, %v10516_v3 }
 0x1a3   :  { %12730 = vst [vmem:[#allocation8_spill] sm:$0xff] %v10528_v56  ;;  %12731 = vst [vmem:[#allocation9_spill] sm:$0xff] %v10541_v20  ;;  %v10590_v18 = vsub.s32 7, %v10516_v3 }
 0x1a4   :  { %2263 = vmatprep.subr.bf16.mxu1 %v8392_v6  ;;  %12732 = vst [vmem:[#allocation10_spill] sm:$0xff] %v10556_v12  ;;  %12733 = vst [vmem:[#allocation11_spill] sm:$0xff] %v10565_v63 }
 0x1a5   :  { %2264 = vmatpush2.bf16.msra.mxu1 %v8391_v27  ;;  %12734 = vst [vmem:[#allocation12_spill] sm:$0xff] %v10579_v10  ;;  %12735 = vst [vmem:[#allocation13_spill] sm:$0xff] %v10590_v18 }
 0x1a8   :  { %2266 = vmatmul.mubr.bf16.vlgmr.msra.gmra.mxu1 %v10184_v14  ;;  %v2274_v14 = vld [vmem:[%s12535_s7] ss:$4 sm:$0xff] }
 0x1a9   :  { %v10535_v55 = vrot.slane %v2274_v14, %v10519_v47  ;;  %v10538_v36 = vrot.slane %v2274_v14, %v10522_v34  ;;  %v10546_v52 = vrot.slane %v2274_v14, %v10528_v56  ;;  %v10553_v49 = vrot.slane %v2274_v14, %v10541_v20 }
 0x1aa   :  { %v1461_v46 = vpop.permute.xlu0 %1460  ;;  %v10571_v43 = vrot.slane %v2274_v14, %v10556_v12  ;;  %v10576_v15 = vrot.slane %v2274_v14, %v10565_v63  ;;  %v10593_v17 = vrot.slane %v2274_v14, %v10579_v10  ;;  %v10599_v50 = vrot.slane %v2274_v14, %v10590_v18 }
 0x1e8   :  { %v2144_v4 = vpop.f32.mrf.mxu0 }
 0x1e9   :  { %v10530_v45 = vadd.f32 %v2144_v4, %v1461_v46 }
 0x1ea   :  { %v2146_v21 = vpop.f32.mrf.mxu0 }
 0x1eb   :  { %v10532_v22 = vadd.f32 %v2146_v21, %v1461_v46  ;;  %v2316_v38 = vmul.f32 %v10535_v55, %v10530_v45 }
 0x1ec   :  { %v2148_v58 = vpop.f32.mrf.mxu0 }
 0x1ed   :  { %v2317_v28 = vmul.f32 %v10538_v36, %v10532_v22  ;;  %v2333_v1 = vmul.f32 %v2316_v38, %v10530_v45 }
 0x1ee   :  { %v2149_v8 = vpop.f32.mrf.mxu0 }
 0x1ef   :  { %v2334_v40 = vmul.f32 %v2317_v28, %v10532_v22  ;;  %v2324_v57 = vadd.f32 %v2317_v28, %v2316_v38 }
 0x1f1   :  { %v2341_v41 = vadd.f32 %v2334_v40, %v2333_v1  ;;  %v10607_v40 = vpop.permute.xlu0 %2389 }
 0x1f4   :  { %v2185_v37 = vpop.f32.mrf.mxu1 }
 0x1f5   :  { %v10543_v7 = vadd.f32 %v2185_v37, %v1461_v46 }
 0x1f6   :  { %v2187_v51 = vpop.f32.mrf.mxu1 }
 0x1f7   :  { %v2318_v23 = vmul.f32 %v10546_v52, %v10543_v7  ;;  %v10562_v48 = vadd.f32 %v2187_v51, %v1461_v46 }
 0x1f8   :  { %v2189_v53 = vpop.f32.mrf.mxu1 }
 0x1f9   :  { %v2335_v39 = vmul.f32 %v2318_v23, %v10543_v7  ;;  %v2319_v16 = vmul.f32 %v10553_v49, %v10562_v48  ;;  %v2325_v24 = vadd.f32 %v2324_v57, %v2318_v23  ;;  %v2376_v23 = vpop.permute.xlu1 %2375  ;;  %v10611_v57 = vpop.permute.xlu0 %3455 }
 0x1fa   :  { %v2190_v61 = vpop.f32.mrf.mxu1 }
 0x1fb   :  { %v2342_v5 = vadd.f32 %v2341_v41, %v2335_v39  ;;  %v2336_v2 = vmul.f32 %v2319_v16, %v10562_v48  ;;  %v2326_v35 = vadd.f32 %v2325_v24, %v2319_v16 }
 0x1fd   :  { %v2343_v32 = vadd.f32 %v2342_v5, %v2336_v2  ;;  %v10605_v1 = vpop.permute.xlu1 %3528  ;;  %v10615_v41 = vpop.permute.xlu0 %3311 }
 0x260   :  { %v2226_v33 = vpop.f32.mrf.mxu0 }
 0x261   :  { %v10573_v29 = vadd.f32 %v2226_v33, %v1461_v46  ;;  %v10619_v33 = vpop.permute.xlu0 %3167 }
 0x262   :  { %v2228_v31 = vpop.f32.mrf.mxu0 }
 0x263   :  { %v2320_v19 = vmul.f32 %v10571_v43, %v10573_v29  ;;  %v10584_v54 = vadd.f32 %v2228_v31, %v1461_v46 }
 0x264   :  { %v2230_v42 = vpop.f32.mrf.mxu0 }
 0x265   :  { %v2337_v26 = vmul.f32 %v2320_v19, %v10573_v29  ;;  %v2321_v9 = vmul.f32 %v10576_v15, %v10584_v54  ;;  %v2327_v0 = vadd.f32 %v2326_v35, %v2320_v19  ;;  %v10623_v31 = vpop.permute.xlu0 %3022 }
 0x266   :  { %v2231_v44 = vpop.f32.mrf.mxu0 }
 0x267   :  { %v2344_v30 = vadd.f32 %v2343_v32, %v2337_v26  ;;  %v2338_v25 = vmul.f32 %v2321_v9, %v10584_v54  ;;  %v2328_v27 = vadd.f32 %v2327_v0, %v2321_v9 }
 0x268   :  { %v2267_v59 = vpop.f32.mrf.mxu1 }
 0x269   :  { %v10596_v11 = vadd.f32 %v2267_v59, %v1461_v46  ;;  %v2345_v58 = vadd.f32 %v2344_v30, %v2338_v25  ;;  %v10627_v2 = vpop.permute.xlu0 %2878 }
 0x26a   :  { %v2269_v13 = vpop.f32.mrf.mxu1 }
 0x26b   :  { %v2322_v6 = vmul.f32 %v10593_v17, %v10596_v11  ;;  %v2270_v4 = vadd.f32 %v2269_v13, %v1461_v46  ;;  %v10609_v46 = vpop.permute.xlu1 %3383 }
 0x26c   :  { %v2271_v21 = vpop.f32.mrf.mxu1 }
 0x26d   :  { %v2339_v8 = vmul.f32 %v2322_v6, %v10596_v11  ;;  %v2323_v37 = vmul.f32 %v10599_v50, %v2270_v4  ;;  %v2329_v51 = vadd.f32 %v2328_v27, %v2322_v6  ;;  %v10631_v42 = vpop.permute.xlu0 %2733 }
 0x26e   :  { %v2272_v53 = vpop.f32.mrf.mxu1 }
 0x26f   :  { %v2340_v61 = vmul.f32 %v2323_v37, %v2270_v4  ;;  %v2330_v38 = vadd.f32 %v2329_v51, %v2323_v37  ;;  %v2346_v28 = vadd.f32 %v2345_v58, %v2339_v8  ;;  %v10613_v39 = vpop.permute.xlu1 %3239 }
 0x271   :  { %2331 = vadd.xlane.f32.xlu1 %v2330_v38  ;;  %v2347_v14 = vadd.f32 %v2346_v28, %v2340_v61  ;;  %v10635_v26 = vpop.permute.xlu0 %2661 }
 0x273   :  { %2348 = vadd.xlane.f32.xlu0 %v2347_v14  ;;  %v10617_v16 = vpop.permute.xlu1 %3094 }
 0x275   :  { %v10639_v44 = vpop.permute.xlu0 %4035 }
 0x277   :  { %v10621_v24 = vpop.permute.xlu1 %2950 }
 0x279   :  { %v10643_v0 = vpop.permute.xlu0 %3889 }
 0x27a   :  { %12736 = vst [vmem:[#allocation14_spill] sm:$0xff] %v10643_v0 }
 0x27b   :  { %v10625_v5 = vpop.permute.xlu1 %2806 }
 0x27f   :  { %v10629_v19 = vpop.permute.xlu1 %2589 }
 0x283   :  { %v10633_v35 = vpop.permute.xlu1 %2517 }
 0x287   :  { %v10637_v9 = vpop.permute.xlu1 %4181 }
 0x28b   :  { %v10641_v32 = vpop.permute.xlu1 %4108 }
 0x2fa   :  { %v2332_v59 = vpop.xlane.xlu1 %2331 }
 0x2fb   :  { %v2350_v30 = vmul.f32 0.00147929, %v2332_v59 }
 0x2fc   :  { %v2349_v25 = vpop.xlane.xlu0 %2348 }
 0x2fd   :  { %v2351_v13 = vmul.f32 0.00147929, %v2349_v25  ;;  %v2352_v27 = vmul.f32 %v2350_v30, %v2350_v30  ;;  %v2355_v58 = vsub.f32 %v10530_v45, %v2350_v30  ;;  %v2356_v8 = vsub.f32 %v10532_v22, %v2350_v30 }
 0x2fe   :  { %v2357_v37 = vsub.f32 %v10543_v7, %v2350_v30  ;;  %v2358_v51 = vsub.f32 %v10562_v48, %v2350_v30  ;;  %v2359_v61 = vsub.f32 %v10573_v29, %v2350_v30  ;;  %v2360_v38 = vsub.f32 %v10584_v54, %v2350_v30 }
 0x2ff   :  { %v2353_v6 = vsub.f32 %v2351_v13, %v2352_v27  ;;  %v2361_v28 = vsub.f32 %v10596_v11, %v2350_v30  ;;  %v2362_v14 = vsub.f32 %v2270_v4, %v2350_v30 }
 0x301   :  { %v2363_v21 = vadd.f32 1e-05, %v2353_v6 }
 0x303   :  { %9229 = vrsqrt.f32 %v2363_v21 }
 0x310   :  { %v9230_v53 = vpop.eup %9229 }
 0x311   :  { %v2365_v59 = vmul.f32 %v9230_v53, %v2355_v58  ;;  %v2366_v25 = vmul.f32 %v9230_v53, %v2356_v8  ;;  %v2367_v13 = vmul.f32 %v9230_v53, %v2357_v37  ;;  %v2368_v27 = vmul.f32 %v9230_v53, %v2358_v51 }
 0x312   :  { %v2369_v6 = vmul.f32 %v9230_v53, %v2359_v61  ;;  %v2370_v45 = vmul.f32 %v9230_v53, %v2360_v38  ;;  %v2371_v21 = vmul.f32 %v9230_v53, %v2361_v28  ;;  %v2372_v22 = vmul.f32 %v9230_v53, %v2362_v14 }
 0x313   :  { %v2378_v60 = vmul.f32 %v2376_v23, %v2365_v59  ;;  %v2379_v7 = vmul.f32 %v2376_v23, %v2366_v25  ;;  %v2380_v62 = vmul.f32 %v2376_v23, %v2367_v13  ;;  %v2381_v48 = vmul.f32 %v2376_v23, %v2368_v27 }
 0x314   :  { %v2384_v3 = vmul.f32 %v2376_v23, %v2371_v21  ;;  %v2385_v18 = vmul.f32 %v2376_v23, %v2372_v22  ;;  %v2382_v30 = vmul.f32 %v2376_v23, %v2369_v6  ;;  %v2383_v58 = vmul.f32 %v2376_v23, %v2370_v45 }
 0x315   :  { %v2392_v29 = vadd.f32 %v10607_v40, %v2378_v60  ;;  %v2393_v54 = vadd.f32 %v10607_v40, %v2379_v7  ;;  %v2394_v11 = vadd.f32 %v10607_v40, %v2380_v62  ;;  %v2395_v4 = vadd.f32 %v10607_v40, %v2381_v48 }
 0x316   :  { %v2398_v8 = vadd.f32 %v10607_v40, %v2384_v3  ;;  %v2399_v37 = vadd.f32 %v10607_v40, %v2385_v18  ;;  %v2396_v62 = vadd.f32 %v10607_v40, %v2382_v30  ;;  %v2397_v3 = vadd.f32 %v10607_v40, %v2383_v58 }
 0x317   :  { %v2400_v51 = vmax.f32 %v2392_v29, 0.0  ;;  %v2401_v53 = vmax.f32 %v2393_v54, 0.0  ;;  %v2402_v61 = vmax.f32 %v2394_v11, 0.0  ;;  %v2403_v38 = vmax.f32 %v2395_v4, 0.0 }
 0x318   :  { %v2406_v28 = vmax.f32 %v2398_v8, 0.0  ;;  %v2407_v14 = vmax.f32 %v2399_v37, 0.0 }
 0x319   :  { %v2408_v60 = vmul.f32 %v2400_v51, %v10535_v55  ;;  %v2409_v59 = vmul.f32 %v2401_v53, %v10538_v36  ;;  %v2410_v18 = vmul.f32 %v2402_v61, %v10546_v52  ;;  %v2411_v13 = vmul.f32 %v2403_v38, %v10553_v49 }
 0x31a   :  { %v2414_v25 = vmul.f32 %v2406_v28, %v10593_v17  ;;  %v2415_v23 = vmul.f32 %v2407_v14, %v10599_v50  ;;  %v2404_v55 = vmax.f32 %v2396_v62, 0.0  ;;  %v2405_v36 = vmax.f32 %v2397_v3, 0.0 }
 0x31b   :  { %v10666_v27 = vpack.c.bf16 %v2409_v59, %v2408_v60  ;;  %v10674_v17 = vpack.c.bf16 %v2411_v13, %v2410_v18  ;;  %v10822_v59 = vld [vmem:[%s12536_s2] sm:$0xff]  ;;  %s12743_s2 = smov 124  }
 0x31c   :  { %v10668_v6 = vpack.c.bf16 %v2415_v23, %v2414_v25  ;;  %v2412_v52 = vmul.f32 %v2404_v55, %v10571_v43  ;;  %v2413_v49 = vmul.f32 %v2405_v36, %v10576_v15  ;;  %v10831_v3 = vcombine.high %v10822_v59, %v10822_v59 }
 0x31d   :  { %3520 = vrot.lane.b32.xlu0 %v10666_v27, %s12615_s20  ;;  %3447 = vrot.lane.b32.xlu1 %v10666_v27, %s12636_s0 }
 0x31e   :  { %v10686_v50 = vpack.c.bf16 %v2413_v49, %v2412_v52  ;;  %8681 = vmatprep.mubr.msk.bf16.mxu0 %vm12601_vm10, %v10831_v3  ;;  %8683 = vmatprep.mubr.msk.bf16.mxu1 %vm12601_vm10, %v10831_v3  ;;  %vm3102_vm10 = vcmask 883712  }
 0x321   :  { %3303 = vrot.lane.b32.xlu0 %v10666_v27, %s12711_s18  ;;  %3449 = vrot.lane.b32.xlu1 %v10674_v17, %s12636_s0 }
 0x325   :  { %3375 = vrot.lane.b32.xlu0 %v10666_v27, %s12710_s21  ;;  %3522 = vrot.lane.b32.xlu1 %v10674_v17, %s12615_s20 }
 0x329   :  { %3451 = vrot.lane.b32.xlu0 %v10686_v50, %s12636_s0  ;;  %3305 = vrot.lane.b32.xlu1 %v10674_v17, %s12711_s18 }
 0x32d   :  { %3159 = vrot.lane.b32.xlu0 %v10666_v27, %s12613_s25  ;;  %3377 = vrot.lane.b32.xlu1 %v10674_v17, %s12710_s21 }
 0x331   :  { %3231 = vrot.lane.b32.xlu0 %v10666_v27, %s12611_s24  ;;  %3524 = vrot.lane.b32.xlu1 %v10686_v50, %s12615_s20 }
 0x335   :  { %3307 = vrot.lane.b32.xlu0 %v10686_v50, %s12711_s18  ;;  %3161 = vrot.lane.b32.xlu1 %v10674_v17, %s12613_s25 }
 0x339   :  { %3014 = vrot.lane.b32.xlu0 %v10666_v27, %s12605_s17  ;;  %3233 = vrot.lane.b32.xlu1 %v10674_v17, %s12611_s24 }
 0x33d   :  { %3086 = vrot.lane.b32.xlu0 %v10666_v27, %s12596_s23  ;;  %3379 = vrot.lane.b32.xlu1 %v10686_v50, %s12710_s21 }
 0x341   :  { %3163 = vrot.lane.b32.xlu0 %v10686_v50, %s12613_s25  ;;  %3016 = vrot.lane.b32.xlu1 %v10674_v17, %s12605_s17 }
 0x345   :  { %2870 = vrot.lane.b32.xlu0 %v10666_v27, %s12602_s27  ;;  %3088 = vrot.lane.b32.xlu1 %v10674_v17, %s12596_s23 }
 0x349   :  { %2942 = vrot.lane.b32.xlu0 %v10666_v27, %s12589_s22  ;;  %3235 = vrot.lane.b32.xlu1 %v10686_v50, %s12611_s24 }
 0x34d   :  { %3018 = vrot.lane.b32.xlu0 %v10686_v50, %s12605_s17  ;;  %2872 = vrot.lane.b32.xlu1 %v10674_v17, %s12602_s27 }
 0x351   :  { %2725 = vrot.lane.b32.xlu0 %v10666_v27, %s12598_s26  ;;  %2944 = vrot.lane.b32.xlu1 %v10674_v17, %s12589_s22 }
 0x355   :  { %2798 = vrot.lane.b32.xlu0 %v10666_v27, %s12583_s28  ;;  %3090 = vrot.lane.b32.xlu1 %v10686_v50, %s12596_s23  ;;  %s12744_s23 = smov 108  }
 0x359   :  { %2874 = vrot.lane.b32.xlu0 %v10686_v50, %s12602_s27  ;;  %2727 = vrot.lane.b32.xlu1 %v10674_v17, %s12598_s26 }
 0x35d   :  { %2581 = vrot.lane.b32.xlu0 %v10666_v27, %s12594_s30  ;;  %2800 = vrot.lane.b32.xlu1 %v10674_v17, %s12583_s28 }
 0x361   :  { %2653 = vrot.lane.b32.xlu0 %v10666_v27, %s12587_s29  ;;  %2946 = vrot.lane.b32.xlu1 %v10686_v50, %s12589_s22  ;;  %s12628_s22 = smov 76  }
 0x365   :  { %2729 = vrot.lane.b32.xlu0 %v10686_v50, %s12598_s26  ;;  %2583 = vrot.lane.b32.xlu1 %v10674_v17, %s12594_s30  ;;  %s12745_s26 = smov 126  }
 0x369   :  { %2509 = vrot.lane.b32.xlu0 %v10666_v27, %s12585_s15  ;;  %2655 = vrot.lane.b32.xlu1 %v10674_v17, %s12587_s29 }
 0x36d   :  { %2585 = vrot.lane.b32.xlu0 %v10686_v50, %s12594_s30  ;;  %2802 = vrot.lane.b32.xlu1 %v10686_v50, %s12583_s28  ;;  %s12739_s28 = smov 64   ;;  %s12742_s30 = smov 78  }
 0x371   :  { %2513 = vrot.lane.b32.xlu0 %v10686_v50, %s12585_s15  ;;  %2511 = vrot.lane.b32.xlu1 %v10674_v17, %s12585_s15  ;;  %s12630_s15 = smov 63  }
 0x375   :  { %4175 = vrot.lane.b32.xlu0 %v10674_v17, %s12592_s1  ;;  %2657 = vrot.lane.b32.xlu1 %v10686_v50, %s12587_s29  ;;  %s12740_s29 = smov 77  }
 0x379   :  { %4029 = vrot.lane.b32.xlu0 %v10674_v17, %s12737_s16  ;;  %4173 = vrot.lane.b32.xlu1 %v10666_v27, %s12592_s1 }
 0x37d   :  { %4102 = vrot.lane.b32.xlu0 %v10674_v17, %s12738_s19  ;;  %4027 = vrot.lane.b32.xlu1 %v10666_v27, %s12737_s16 }
 0x381   :  { %3881 = vrot.lane.b32.xlu0 %v10666_v27, %s12739_s28  ;;  %4100 = vrot.lane.b32.xlu1 %v10666_v27, %s12738_s19 }
 0x385   :  { %3954 = vrot.lane.b32.xlu0 %v10666_v27, %s12630_s15  ;;  %4177 = vrot.lane.b32.xlu1 %v10686_v50, %s12592_s1  ;;  %s12741_s1 = smov 79  }
 0x389   :  { %4031 = vrot.lane.b32.xlu0 %v10686_v50, %s12737_s16  ;;  %3883 = vrot.lane.b32.xlu1 %v10674_v17, %s12739_s28 }
 0x38d   :  { %3736 = vrot.lane.b32.xlu0 %v10666_v27, %s12740_s29  ;;  %3956 = vrot.lane.b32.xlu1 %v10674_v17, %s12630_s15 }
 0x38f   :  { %v3521_v43 = vpop.permute.xlu0 %3520  ;;  %v3448_v15 = vpop.permute.xlu1 %3447 }
 0x390   :  { %v3457_v22 = vrot.slane %v3448_v15, 4  ;;  %v3530_v29 = vrot.slane %v3521_v43, 4 }
 0x391   :  { %3808 = vrot.lane.b32.xlu0 %v10666_v27, %s12628_s22  ;;  %4104 = vrot.lane.b32.xlu1 %v10686_v50, %s12738_s19 }
 0x393   :  { %v3304_v40 = vpop.permute.xlu0 %3303  ;;  %v3450_v45 = vpop.permute.xlu1 %3449 }
 0x394   :  { %v3458_v21 = vrot.slane %v3450_v45, 4  ;;  %v3313_v38 = vrot.slane %v3304_v40, 4 }
 0x395   :  { %3885 = vrot.lane.b32.xlu0 %v10686_v50, %s12739_s28  ;;  %3738 = vrot.lane.b32.xlu1 %v10674_v17, %s12740_s29 }
 0x396   :  { %v3462_v11 = vsel %vm132_vm0, %v3457_v22, %v3458_v21 }
 0x397   :  { %v3376_v7 = vpop.permute.xlu0 %3375  ;;  %v3523_v48 = vpop.permute.xlu1 %3522  ;;  %v3464_v8 = vsel %vm3463_vm9, %v3448_v15, %v3462_v11 }
 0x398   :  { %v3531_v54 = vrot.slane %v3523_v48, 4  ;;  %v3385_v28 = vrot.slane %v3376_v7, 4 }
 0x399   :  { %3592 = vrot.lane.b32.xlu0 %v10666_v27, %s12741_s1  ;;  %3810 = vrot.lane.b32.xlu1 %v10674_v17, %s12628_s22 }
 0x39a   :  { %v3535_v4 = vsel %vm132_vm0, %v3530_v29, %v3531_v54 }
 0x39b   :  { %v10806_v30 = vpop.permute.xlu0 %3451  ;;  %v10808_v58 = vpop.permute.xlu1 %3305  ;;  %v3536_v37 = vsel %vm1047_vm11, %v3521_v43, %v3535_v4 }
 0x39c   :  { %v3314_v51 = vrot.slane %v10808_v58, 4  ;;  %v8632_v53 = vcombine.low %v3464_v8, %v3536_v37  ;;  %v8633_v61 = vcombine.high %v3464_v8, %v3536_v37  ;;  %v12620_v62 = vrot.slane %v10806_v30, 4 }
 0x39d   :  { %3664 = vrot.lane.b32.xlu0 %v10666_v27, %s12742_s30  ;;  %3958 = vrot.lane.b32.xlu1 %v10686_v50, %s12630_s15 }
 0x39e   :  { %4848 = vmatprep.subr.bf16.mxu0 %v8633_v61  ;;  %v3318_v23 = vsel %vm132_vm0, %v3313_v38, %v3314_v51  ;;  %v3465_v22 = vsel %vm132_vm0, %v3458_v21, %v12620_v62 }
 0x39f   :  { %v3160_v14 = vpop.permute.xlu0 %3159  ;;  %4849 = vmatpush1.bf16.msra.mxu0 %v8632_v53  ;;  %v10817_v60 = vpop.permute.xlu1 %3377  ;;  %v3319_v36 = vsel %vm881_vm13, %v3304_v40, %v3318_v23  ;;  %v3466_v11 = vsel %vm3463_vm9, %v3450_v45, %v3465_v22 }
 0x3a0   :  { %v3386_v25 = vrot.slane %v10817_v60, 4 }
 0x3a1   :  { %3740 = vrot.lane.b32.xlu0 %v10686_v50, %s12740_s29  ;;  %3594 = vrot.lane.b32.xlu1 %v10674_v17, %s12741_s1 }
 0x3a2   :  { %v3390_v18 = vsel %vm132_vm0, %v3385_v28, %v3386_v25 }
 0x3a3   :  { %v3232_v13 = vpop.permute.xlu0 %3231  ;;  %v10842_v55 = vpop.permute.xlu1 %3524  ;;  %v3391_v52 = vsel %vm964_vm12, %v3376_v7, %v3390_v18 }
 0x3a4   :  { %v12610_v49 = vrot.slane %v10842_v55, 4  ;;  %v8624_v43 = vcombine.low %v3319_v36, %v3391_v52  ;;  %v8625_v15 = vcombine.high %v3319_v36, %v3391_v52  ;;  %v3241_v38 = vrot.slane %v3232_v13, 4 }
 0x3a5   :  { %3453 = vrot.lane.b32.xlu0 %v10668_v6, %s12636_s0  ;;  %3666 = vrot.lane.b32.xlu1 %v10674_v17, %s12742_s30  ;;  %s12755_s0 = smov 80  }
 0x3a6   :  { %4850 = vmatprep.subr.bf16.mxu0 %v8625_v15  ;;  %v3537_v40 = vsel %vm132_vm0, %v3531_v54, %v12610_v49  ;;  %v3169_v54 = vrot.slane %v3160_v14, 4 }
 0x3a7   :  { %v10857_v7 = vpop.permute.xlu0 %3307  ;;  %4851 = vmatpush1.bf16.msra.mxu0 %v8624_v43  ;;  %v10859_v29 = vpop.permute.xlu1 %3161  ;;  %v3538_v21 = vsel %vm1047_vm11, %v3523_v48, %v3537_v40 }
 0x3a8   :  { %v3170_v4 = vrot.slane %v10859_v29, 4  ;;  %v8634_v8 = vcombine.low %v3466_v11, %v3538_v21  ;;  %v8635_v37 = vcombine.high %v3466_v11, %v3538_v21  ;;  %v12609_v45 = vrot.slane %v10857_v7, 4 }
 0x3a9   :  { %3596 = vrot.lane.b32.xlu0 %v10686_v50, %s12741_s1  ;;  %3812 = vrot.lane.b32.xlu1 %v10686_v50, %s12628_s22 }
 0x3aa   :  { %4889 = vmatprep.subr.bf16.mxu1 %v8635_v37  ;;  %v3174_v48 = vsel %vm132_vm0, %v3169_v54, %v3170_v4  ;;  %v3320_v11 = vsel %vm132_vm0, %v3314_v51, %v12609_v45 }
 0x3ab   :  { %v3015_v53 = vpop.permute.xlu0 %3014  ;;  %4890 = vmatpush1.bf16.msra.mxu1 %v8634_v8  ;;  %v3234_v61 = vpop.permute.xlu1 %3233  ;;  %v3175_v52 = vsel %vm12617_vm15, %v3160_v14, %v3174_v48  ;;  %v3321_v8 = vsel %vm881_vm13, %v10808_v58, %v3320_v11 }
 0x3ac   :  { %v3242_v28 = vrot.slane %v3234_v61, 4 }
 0x3ad   :  { %3309 = vrot.lane.b32.xlu0 %v10668_v6, %s12711_s18  ;;  %3526 = vrot.lane.b32.xlu1 %v10668_v6, %s12615_s20  ;;  %s12751_s20 = smov 60  }
 0x3ae   :  { %v3246_v23 = vsel %vm132_vm0, %v3241_v38, %v3242_v28 }
 0x3af   :  { %v3087_v18 = vpop.permute.xlu0 %3086  ;;  %v10875_v36 = vpop.permute.xlu1 %3379  ;;  %v3247_v43 = vsel %vm798_vm14, %v3232_v13, %v3246_v23 }
 0x3b0   :  { %v12608_v15 = vrot.slane %v10875_v36, 4  ;;  %v8616_v22 = vcombine.low %v3175_v52, %v3247_v43  ;;  %v8617_v40 = vcombine.high %v3175_v52, %v3247_v43  ;;  %v3096_v58 = vrot.slane %v3087_v18, 4 }
 0x3b1   :  { %3165 = vrot.lane.b32.xlu0 %v10668_v6, %s12613_s25  ;;  %3668 = vrot.lane.b32.xlu1 %v10686_v50, %s12742_s30  ;;  %s12750_s25 = smov 125  }
 0x3b2   :  { %4852 = vmatprep.subr.bf16.mxu0 %v8617_v40  ;;  %v3392_v14 = vsel %vm132_vm0, %v3386_v25, %v12608_v15  ;;  %v3024_v25 = vrot.slane %v3015_v53, 4 }
 0x3b3   :  { %v10892_v13 = vpop.permute.xlu0 %3163  ;;  %4853 = vmatpush1.bf16.msra.mxu0 %v8616_v22  ;;  %v10894_v21 = vpop.permute.xlu1 %3016  ;;  %v3393_v51 = vsel %vm964_vm12, %v10817_v60, %v3392_v14 }
 0x3b4   :  { %v3025_v37 = vrot.slane %v10894_v21, 4  ;;  %v8626_v54 = vcombine.low %v3321_v8, %v3393_v51  ;;  %v8627_v38 = vcombine.high %v3321_v8, %v3393_v51  ;;  %v12607_v52 = vrot.slane %v10892_v13, 4 }
 0x3b5   :  { %3020 = vrot.lane.b32.xlu0 %v10668_v6, %s12605_s17  ;;  %3381 = vrot.lane.b32.xlu1 %v10668_v6, %s12710_s21  ;;  %s12748_s17 = smov 112  }
 0x3b6   :  { %4891 = vmatprep.subr.bf16.mxu1 %v8627_v38  ;;  %v3029_v43 = vsel %vm132_vm0, %v3024_v25, %v3025_v37  ;;  %v3176_v25 = vsel %vm132_vm0, %v3170_v4, %v12607_v52 }
 0x3b7   :  { %v2871_v48 = vpop.permute.xlu0 %2870  ;;  %4892 = vmatpush1.bf16.msra.mxu1 %v8626_v54  ;;  %v3089_v23 = vpop.permute.xlu1 %3088  ;;  %v3030_v14 = vsel %vm632_vm1, %v3015_v53, %v3029_v43  ;;  %v3177_v43 = vsel %vm12617_vm15, %v10859_v29, %v3176_v25  ;;  %vm12639_vm15 = vcmask 1014784  }
 0x3b8   :  { %v3097_v60 = vrot.slane %v3089_v23, 4 }
 0x3b9   :  { %2876 = vrot.lane.b32.xlu0 %v10668_v6, %s12602_s27  ;;  %3237 = vrot.lane.b32.xlu1 %v10668_v6, %s12611_s24  ;;  %s12746_s27 = smov 110   ;;  %s12749_s24 = smov 127  }
 0x3ba   :  { %v3101_v22 = vsel %vm132_vm0, %v3096_v58, %v3097_v60 }
 0x3bb   :  { %v2943_v40 = vpop.permute.xlu0 %2942  ;;  %v10912_v11 = vpop.permute.xlu1 %3235  ;;  %v3103_v8 = vsel %vm3102_vm10, %v3087_v18, %v3101_v22 }
 0x3bc   :  { %v12604_v51 = vrot.slane %v10912_v11, 4  ;;  %v8608_v54 = vcombine.low %v3030_v14, %v3103_v8  ;;  %v8609_v38 = vcombine.high %v3030_v14, %v3103_v8 }
 0x3bd   :  { %2731 = vrot.lane.b32.xlu0 %v10668_v6, %s12743_s2  ;;  %3092 = vrot.lane.b32.xlu1 %v10668_v6, %s12744_s23 }
 0x3be   :  { %4854 = vmatprep.subr.bf16.mxu0 %v8609_v38  ;;  %v3248_v53 = vsel %vm132_vm0, %v3242_v28, %v12604_v51  ;;  %v2880_v28 = vrot.slane %v2871_v48, 4  ;;  %v2952_v51 = vrot.slane %v2943_v40, 4 }
 0x3bf   :  { %v10927_v18 = vpop.permute.xlu0 %3018  ;;  %4855 = vmatpush1.bf16.msra.mxu0 %v8608_v54  ;;  %v10929_v58 = vpop.permute.xlu1 %2872  ;;  %v3249_v4 = vsel %vm798_vm14, %v3234_v61, %v3248_v53  ;;  %v12747_v53 = vmov 0.0|0.0  }
 0x3c0   :  { %v2881_v22 = vrot.slane %v10929_v58, 4  ;;  %v8618_v14 = vcombine.low %v3177_v43, %v3249_v4  ;;  %v8619_v8 = vcombine.high %v3177_v43, %v3249_v4  ;;  %v12619_v29 = vrot.slane %v10927_v18, 4 }
 0x3c1   :  { %2587 = vrot.lane.b32.xlu0 %v10668_v6, %s12745_s26  ;;  %2948 = vrot.lane.b32.xlu1 %v10668_v6, %s12746_s27 }
 0x3c2   :  { %4893 = vmatprep.subr.bf16.mxu1 %v8619_v8  ;;  %v2885_v61 = vsel %vm132_vm0, %v2880_v28, %v2881_v22  ;;  %v3031_v28 = vsel %vm132_vm0, %v3025_v37, %v12619_v29 }
 0x3c3   :  { %v2726_v54 = vpop.permute.xlu0 %2725  ;;  %4894 = vmatpush1.bf16.msra.mxu1 %v8618_v14  ;;  %v2945_v38 = vpop.permute.xlu1 %2944  ;;  %v2886_v14 = vsel %vm12673_vm3, %v2871_v48, %v2885_v61  ;;  %v3032_v61 = vsel %vm632_vm1, %v10894_v21, %v3031_v28 }
 0x3c4   :  { %v2953_v25 = vrot.slane %v2945_v38, 4 }
 0x3c5   :  { %3744 = vrot.lane.b32.xlu0 %v12747_v53, %s12740_s29  ;;  %2804 = vrot.lane.b32.xlu1 %v10668_v6, %s12748_s17 }
 0x3c6   :  { %v2957_v43 = vsel %vm132_vm0, %v2952_v51, %v2953_v25 }
 0x3c7   :  { %v2799_v4 = vpop.permute.xlu0 %2798  ;;  %v10946_v52 = vpop.permute.xlu1 %3090  ;;  %v2958_v8 = vsel %vm12672_vm2, %v2943_v40, %v2957_v43 }
 0x3c8   :  { %v12618_v15 = vrot.slane %v10946_v52, 4  ;;  %v8600_v45 = vcombine.low %v2886_v14, %v2958_v8  ;;  %v8601_v49 = vcombine.high %v2886_v14, %v2958_v8  ;;  %v2808_v21 = vrot.slane %v2799_v4, 4 }
 0x3c9   :  { %2515 = vrot.lane.b32.xlu0 %v10668_v6, %s12749_s24  ;;  %2659 = vrot.lane.b32.xlu1 %v10668_v6, %s12750_s25 }
 0x3ca   :  { %4856 = vmatprep.subr.bf16.mxu0 %v8601_v49  ;;  %v3104_v48 = vsel %vm132_vm0, %v3097_v60, %v12618_v15  ;;  %v2735_v49 = vrot.slane %v2726_v54, 4 }
 0x3cb   :  { %v10961_v40 = vpop.permute.xlu0 %2874  ;;  %4857 = vmatpush1.bf16.msra.mxu0 %v8600_v45  ;;  %v10963_v51 = vpop.permute.xlu1 %2727  ;;  %v3105_v37 = vsel %vm3102_vm10, %v3089_v23, %v3104_v48 }
 0x3cc   :  { %v2736_v43 = vrot.slane %v10963_v51, 4  ;;  %v8610_v14 = vcombine.low %v3032_v61, %v3105_v37  ;;  %v8611_v8 = vcombine.high %v3032_v61, %v3105_v37 }
 0x3cd   :  { %4179 = vrot.lane.b32.xlu0 %v10668_v6, %s12751_s20  ;;  %3962 = vrot.lane.b32.xlu1 %v12747_v53, %s12630_s15 }
 0x3ce   :  { %4895 = vmatprep.subr.bf16.mxu1 %v8611_v8  ;;  %v2740_v48 = vsel %vm132_vm0, %v2735_v49, %v2736_v43  ;;  %v12752_v49 = vrot.slane %v10961_v40, 4 }
 0x3cf   :  { %v2582_v45 = vpop.permute.xlu0 %2581  ;;  %4896 = vmatpush1.bf16.msra.mxu1 %v8610_v14  ;;  %v10973_v60 = vpop.permute.xlu1 %2800  ;;  %v2742_v8 = vsel %vm12639_vm15, %v2726_v54, %v2740_v48 }
 0x3d0   :  { %v2809_v28 = vrot.slane %v10973_v60, 4  ;;  %v2887_v10 = vsel %vm132_vm0, %v2881_v22, %v12752_v49 }
 0x3d1   :  { %4106 = vrot.lane.b32.xlu0 %v10668_v6, %s12738_s19  ;;  %3816 = vrot.lane.b32.xlu1 %v12747_v53, %s12628_s22 }
 0x3d2   :  { %v2813_v61 = vsel %vm132_vm0, %v2808_v21, %v2809_v28 }
 0x3d3   :  { %v2654_v37 = vpop.permute.xlu0 %2653  ;;  %v10983_v14 = vpop.permute.xlu1 %2946  ;;  %v2814_v15 = vsel %vm12654_vm4, %v2799_v4, %v2813_v61 }
 0x3d4   :  { %v12623_v29 = vrot.slane %v10983_v14, 4  ;;  %v8592_v62 = vcombine.low %v2742_v8, %v2814_v15  ;;  %v8593_v23 = vcombine.high %v2742_v8, %v2814_v15  ;;  %v2888_v15 = vsel %vm12673_vm3, %v10929_v58, %v2887_v10 }
 0x3d5   :  { %3887 = vrot.lane.b32.xlu0 %v10668_v6, %s12739_s28  ;;  %4033 = vrot.lane.b32.xlu1 %v10668_v6, %s12737_s16  ;;  %v2663_v49 = vrot.slane %v2654_v37, 4 }
 0x3d6   :  { %4858 = vmatprep.subr.bf16.mxu0 %v8593_v23  ;;  %v2959_v54 = vsel %vm132_vm0, %v2953_v25, %v12623_v29  ;;  %v2591_v25 = vrot.slane %v2582_v45, 4 }
 0x3d7   :  { %v10998_v4 = vpop.permute.xlu0 %2729  ;;  %4859 = vmatpush1.bf16.msra.mxu0 %v8592_v62  ;;  %v11000_v21 = vpop.permute.xlu1 %2583  ;;  %v2960_v22 = vsel %vm12672_vm2, %v2945_v38, %v2959_v54 }
 0x3d8   :  { %v2592_v48 = vrot.slane %v11000_v21, 4  ;;  %v8602_v61 = vcombine.low %v2888_v15, %v2960_v22  ;;  %v8603_v8 = vcombine.high %v2888_v15, %v2960_v22  ;;  %v12753_v63 = vrot.slane %v10998_v4, 4 }
 0x3d9   :  { %3742 = vrot.lane.b32.xlu0 %v10668_v6, %s12740_s29  ;;  %3960 = vrot.lane.b32.xlu1 %v10668_v6, %s12630_s15  ;;  %s12757_s15 = smov 95  }
 0x3da   :  { %4897 = vmatprep.subr.bf16.mxu1 %v8603_v8  ;;  %v2596_v38 = vsel %vm132_vm0, %v2591_v25, %v2592_v48  ;;  %v2743_v12 = vsel %vm132_vm0, %v2736_v43, %v12753_v63 }
 0x3db   :  { %v2510_v62 = vpop.permute.xlu0 %2509  ;;  %4898 = vmatpush1.bf16.msra.mxu1 %v8602_v61  ;;  %v2656_v23 = vpop.permute.xlu1 %2655  ;;  %v2597_v61 = vsel %vm12642_vm6, %v2582_v45, %v2596_v38  ;;  %v8573_v45 = vld [vmem:[%s12532_s4 + $0x8] sm:$0xff]  ;;  %v2744_v43 = vsel %vm12639_vm15, %v10963_v51, %v2743_v12  ;;  %vm12646_vm15 = vcmask 490496  }
 0x3dc   :  { %v2664_v58 = vrot.slane %v2656_v23, 4  ;;  %v8690_v12 = vld [vmem:[%s12534_s6 + $0x8] sm:$0xff] }
 0x3dd   :  { %3598 = vrot.lane.b32.xlu0 %v10668_v6, %s12741_s1  ;;  %3814 = vrot.lane.b32.xlu1 %v10668_v6, %s12628_s22  ;;  %s12756_s22 = smov 96  }
 0x3de   :  { %v2668_v54 = vsel %vm132_vm0, %v2663_v49, %v2664_v58  ;;  %v2519_v49 = vrot.slane %v2510_v62, 4 }
 0x3df   :  { %v11017_v15 = vpop.permute.xlu0 %2585  ;;  %v11019_v22 = vpop.permute.xlu1 %2802  ;;  %v2669_v8 = vsel %vm12645_vm5, %v2654_v37, %v2668_v54 }
 0x3e0   :  { %v12650_v29 = vrot.slane %v11019_v22, 4  ;;  %v8584_v10 = vcombine.low %v2597_v61, %v2669_v8  ;;  %v8585_v25 = vcombine.high %v2597_v61, %v2669_v8  ;;  %v12649_v38 = vrot.slane %v11017_v15, 4 }
 0x3e1   :  { %3600 = vrot.lane.b32.xlu0 %v12747_v53, %s12741_s1  ;;  %3670 = vrot.lane.b32.xlu1 %v10668_v6, %s12742_s30 }
 0x3e2   :  { %4860 = vmatprep.subr.bf16.mxu0 %v8585_v25  ;;  %v2815_v37 = vsel %vm132_vm0, %v2809_v28, %v12650_v29  ;;  %v8689_v28 = vld [vmem:[%s12533_s5 + $0x8] sm:$0xff] }
 0x3e3   :  { %v11038_v54 = vpop.permute.xlu0 %2513  ;;  %4861 = vmatpush1.bf16.msra.mxu0 %v8584_v10  ;;  %v2512_v63 = vpop.permute.xlu1 %2511  ;;  %v2816_v61 = vsel %vm12654_vm4, %v10973_v60, %v2815_v37  ;;  %vm3824_vm4 = vcmask 621568  }
 0x3e4   :  { %v12640_v8 = vrot.slane %v11038_v54, 4  ;;  %v2520_v25 = vrot.slane %v2512_v63, 4  ;;  %v8594_v20 = vcombine.low %v2744_v43, %v2816_v61  ;;  %v8595_v56 = vcombine.high %v2744_v43, %v2816_v61 }
 0x3e5   :  { %4310 = vperm.xlu0 %9211, %v8573_v45   ;;  %3672 = vrot.lane.b32.xlu1 %v12747_v53, %s12742_s30  ;;  %v2598_v61 = vsel %vm132_vm0, %v2592_v48, %v12649_v38 }
 0x3e6   :  { %4899 = vmatprep.subr.bf16.mxu1 %v8595_v56  ;;  %v2524_v51 = vsel %vm132_vm0, %v2519_v49, %v2520_v25  ;;  %v2526_v56 = vsel %vm132_vm0, %v2520_v25, %v12640_v8  ;;  %v2599_v8 = vsel %vm12642_vm6, %v11000_v21, %v2598_v61  ;;  %vm4116_vm6 = vcmask 498688  }
 0x3e7   :  { %v11054_v60 = vpop.permute.xlu0 %4175  ;;  %4900 = vmatpush1.bf16.msra.mxu1 %v8594_v20  ;;  %v11056_v10 = vpop.permute.xlu1 %2657  ;;  %v2525_v45 = vsel %vm12641_vm7, %v2510_v62, %v2524_v51  ;;  %v2527_v49 = vsel %vm12641_vm7, %v2512_v63, %v2526_v56  ;;  %vm4043_vm7 = vcmask 506880  }
 0x3e8   :  { %v12648_v37 = vrot.slane %v11056_v10, 4  ;;  %v8576_v43 = vcombine.low %v10666_v27, %v2525_v45  ;;  %v8577_v20 = vcombine.high %v10666_v27, %v2525_v45  ;;  %v8579_v63 = vcombine.high %v10674_v17, %v2527_v49 }
 0x3e9   :  { %5115 = vperm.xlu0 %9211, %v8689_v28   ;;  %5130 = vperm.xlu1 %9212, %v8690_v12   ;;  %v4184_v28 = vrot.slane %v11054_v60, 4 }
 0x3ea   :  { %v2670_v62 = vsel %vm132_vm0, %v2664_v58, %v12648_v37  ;;  %4862 = vmatprep.subr.bf16.mxu0 %v8577_v20  ;;  %v8578_v20 = vcombine.low %v10674_v17, %v2527_v49 }
 0x3eb   :  { %v11072_v25 = vpop.permute.xlu0 %4029  ;;  %v4174_v51 = vpop.permute.xlu1 %4173  ;;  %v2671_v48 = vsel %vm12645_vm5, %v2656_v23, %v2670_v62  ;;  %4863 = vmatpush1.bf16.msra.mxu0 %v8576_v43  ;;  %vm12664_vm5 = vcmask 523264  }
 0x3ec   :  { %v4183_v27 = vrot.slane %v4174_v51, 4  ;;  %v8586_v12 = vcombine.low %v2599_v8, %v2671_v48  ;;  %v8587_v45 = vcombine.high %v2599_v8, %v2671_v48  ;;  %v4038_v62 = vrot.slane %v11072_v25, 4 }
 0x3ed   :  { %6194 = vrot.lane.b32.xlu1 %v12747_v53, %s12754_s14  ;;  %6266 = vrot.lane.b32.xlu0 %v12747_v53, %s12755_s0 }
 0x3ee   :  { %v4188_v58 = vsel %vm132_vm0, %v4183_v27, %v4184_v28  ;;  %4901 = vmatprep.subr.bf16.mxu1 %v8587_v45 }
 0x3ef   :  { %v4190_v21 = vsel %vm12646_vm15, %v4174_v51, %v4188_v58  ;;  %v11085_v23 = vpop.permute.xlu0 %4102  ;;  %4902 = vmatpush1.bf16.msra.mxu1 %v8586_v12  ;;  %v4028_v56 = vpop.permute.xlu1 %4027 }
 0x3f0   :  { %v8672_v43 = vcombine.low %v4190_v21, %v4190_v21  ;;  %v8673_v61 = vcombine.high %v4190_v21, %v4190_v21  ;;  %v4037_v8 = vrot.slane %v4028_v56, 4  ;;  %4903 = vmatprep.subr.bf16.mxu1 %v8579_v63  ;;  %v4111_v12 = vrot.slane %v11085_v23, 4 }
 0x3f1   :  { %6050 = vrot.lane.b32.xlu1 %v12747_v53, %s12711_s18  ;;  %6122 = vrot.lane.b32.xlu0 %v12747_v53, %s12710_s21 }
 0x3f2   :  { %8680 = vmatprep.subr.msk.bf16.mxu0 %vm132_vm0, %v8673_v61  ;;  %v4825_v51 = vsel %vm132_vm0, %v8672_v43, 0  ;;  %v4042_v17 = vsel %vm132_vm0, %v4037_v8, %v4038_v62 }
 0x3f3   :  { %v3882_v48 = vpop.permute.xlu0 %3881  ;;  %4871 = vmatpush2.bf16.msra.mxu0 %v4825_v51  ;;  %4904 = vmatpush1.bf16.msra.mxu1 %v8578_v20  ;;  %v4101_v27 = vpop.permute.xlu1 %4100  ;;  %v4044_v58 = vsel %vm4043_vm7, %v4028_v56, %v4042_v17 }
 0x3f4   :  { %v4110_v49 = vrot.slane %v4101_v27, 4 }
 0x3f5   :  { %5906 = vrot.lane.b32.xlu1 %v12747_v53, %s12756_s22  ;;  %5978 = vrot.lane.b32.xlu0 %v12747_v53, %s12757_s15 }
 0x3f6   :  { %v4115_v45 = vsel %vm132_vm0, %v4110_v49, %v4111_v12 }
 0x3f7   :  { %v4117_v63 = vsel %vm4116_vm6, %v4101_v27, %v4115_v45  ;;  %v3955_v21 = vpop.permute.xlu0 %3954  ;;  %v11104_v43 = vpop.permute.xlu1 %4177 }
 0x3f8   :  { %v8664_v61 = vcombine.low %v4044_v58, %v4117_v63  ;;  %v12647_v8 = vrot.slane %v11104_v43, 4  ;;  %v8665_v20 = vcombine.high %v4044_v58, %v4117_v63 }
 0x3f9   :  { %5762 = vrot.lane.b32.xlu1 %v12747_v53, %s12758_s13  ;;  %5834 = vrot.lane.b32.xlu0 %v12747_v53, %s12744_s23 }
 0x3fa   :  { %v4191_v51 = vsel %vm132_vm0, %v4184_v28, %v12647_v8  ;;  %4872 = vmatprep.subr.bf16.mxu0 %v8665_v20  ;;  %v3891_v28 = vrot.slane %v3882_v48, 4 }
 0x3fb   :  { %v11114_v56 = vpop.permute.xlu0 %4031  ;;  %4873 = vmatpush2.bf16.msra.mxu0 %v8664_v61  ;;  %v11116_v27 = vpop.permute.xlu1 %3883  ;;  %v4192_v17 = vsel %vm12646_vm15, %v11054_v60, %v4191_v51  ;;  %vm12665_vm15 = vcmask 515072   ;;  %v3964_v60 = vrot.slane %v3955_v21, 4 }
 0x3fc   :  { %12759 = vst [vmem:[#allocation15_spill] sm:$0xff] %v11114_v56  ;;  %v12653_v49 = vrot.slane %v11116_v27, 4  ;;  %v8675_v45 = vcombine.high %v4192_v17, %v4192_v17  ;;  %v8674_v58 = vcombine.low %v4192_v17, %v4192_v17 }
 0x3fd   :  { %5618 = vrot.lane.b32.xlu1 %v12747_v53, %s12760_s12  ;;  %5690 = vrot.lane.b32.xlu0 %v12747_v53, %s12746_s27 }
 0x3fe   :  { %8682 = vmatprep.subr.msk.bf16.mxu1 %vm132_vm0, %v8675_v45  ;;  %v4831_v63 = vsel %vm132_vm0, %v8674_v58, 0  ;;  %v3896_v8 = vsel %vm132_vm0, %v3891_v28, %v12653_v49  ;;  %v12762_v28 = vrot.slane %v11114_v56, 4  ;;  %v12766_v56 = vrot.slane %v11116_v27, 4 }
 0x3ff   :  { %v3737_v61 = vpop.permute.xlu0 %3736  ;;  %4912 = vmatpush2.bf16.msra.mxu1 %v4831_v63  ;;  %v3957_v20 = vpop.permute.xlu1 %3956  ;;  %v3898_v37 = vsel %vm12664_vm5, %v3882_v48, %v3896_v8 }
 0x400   :  { %v3965_v17 = vrot.slane %v3957_v20, 4  ;;  %v4045_v49 = vsel %vm132_vm0, %v4038_v62, %v12762_v28 }
 0x401   :  { %5474 = vrot.lane.b32.xlu1 %v12747_v53, %s12743_s2  ;;  %5546 = vrot.lane.b32.xlu0 %v12747_v53, %s12748_s17 }
 0x402   :  { %v3969_v45 = vsel %vm132_vm0, %v3964_v60, %v3965_v17 }
 0x403   :  { %v3809_v58 = vpop.permute.xlu0 %3808  ;;  %v11136_v63 = vpop.permute.xlu1 %4104  ;;  %v3971_v38 = vsel %vm12665_vm15, %v3955_v21, %v3969_v45 }
 0x404   :  { %12761 = vst [vmem:[#allocation16_spill] sm:$0xff] %v11136_v63  ;;  %v12655_v29 = vrot.slane %v11136_v63, 4  ;;  %v8656_v51 = vcombine.low %v3898_v37, %v3971_v38  ;;  %v8657_v47 = vcombine.high %v3898_v37, %v3971_v38  ;;  %v4046_v38 = vsel %vm4043_vm7, %v11072_v25, %v4045_v49 }
 0x405   :  { %5402 = vrot.lane.b32.xlu1 %v12747_v53, %s12750_s25  ;;  %5330 = vrot.lane.b32.xlu0 %v12747_v53, %s12745_s26  ;;  %v3818_v25 = vrot.slane %v3809_v58, 4 }
 0x406   :  { %4874 = vmatprep.subr.bf16.mxu0 %v8657_v47  ;;  %v4118_v48 = vsel %vm132_vm0, %v4111_v12, %v12655_v29  ;;  %v3746_v47 = vrot.slane %v3737_v61, 4 }
 0x407   :  { %v11151_v21 = vpop.permute.xlu0 %3885  ;;  %4875 = vmatpush2.bf16.msra.mxu0 %v8656_v51  ;;  %v11153_v8 = vpop.permute.xlu1 %3738  ;;  %v4119_v37 = vsel %vm4116_vm6, %v11085_v23, %v4118_v48 }
 0x408   :  { %12763 = vst [vmem:[#allocation17_spill] sm:$0xff] %v11151_v21  ;;  %v3747_v62 = vrot.slane %v11153_v8, 4  ;;  %v8666_v60 = vcombine.low %v4046_v38, %v4119_v37  ;;  %v8667_v45 = vcombine.high %v4046_v38, %v4119_v37 }
 0x409   :  { %6770 = vrot.lane.b32.xlu1 %v12747_v53, %s12737_s16  ;;  %5258 = vrot.lane.b32.xlu0 %v12747_v53, %s12749_s24 }
 0x40a   :  { %4913 = vmatprep.subr.bf16.mxu1 %v8667_v45  ;;  %v3751_v28 = vsel %vm132_vm0, %v3746_v47, %v3747_v62  ;;  %v12765_v47 = vrot.slane %v11151_v21, 4 }
 0x40b   :  { %v3593_v12 = vpop.permute.xlu0 %3592  ;;  %4914 = vmatpush2.bf16.msra.mxu1 %v8666_v60  ;;  %v3811_v51 = vpop.permute.xlu1 %3810  ;;  %v3752_v60 = vsel %vm1296_vm8, %v3737_v61, %v3751_v28 }
 0x40c   :  { %v3819_v23 = vrot.slane %v3811_v51, 4  ;;  %v3899_v0 = vsel %vm132_vm0, %v12766_v56, %v12765_v47  ;;  %v3602_v47 = vrot.slane %v3593_v12, 4 }
 0x40d   :  { %6626 = vrot.lane.b32.xlu1 %v12747_v53, %s12739_s28  ;;  %6914 = vrot.lane.b32.xlu0 %v12747_v53, %s12751_s20  ;;  %v3900_v28 = vsel %vm12664_vm5, %v11116_v27, %v3899_v0  ;;  %vm12767_vm5 = vcmask 646144  }
 0x40e   :  { %v3823_v48 = vsel %vm132_vm0, %v3818_v25, %v3819_v23 }
 0x40f   :  { %v3665_v38 = vpop.permute.xlu0 %3664  ;;  %v11171_v37 = vpop.permute.xlu1 %3958  ;;  %v3825_v45 = vsel %vm3824_vm4, %v3809_v58, %v3823_v48 }
 0x410   :  { %12764 = vst [vmem:[#allocation18_spill] sm:$0xff] %v11171_v37  ;;  %v12660_v29 = vrot.slane %v11171_v37, 4  ;;  %v8648_v49 = vcombine.low %v3752_v60, %v3825_v45  ;;  %v8649_v34 = vcombine.high %v3752_v60, %v3825_v45 }
 0x411   :  { %6842 = vrot.lane.b32.xlu0 %v12747_v53, %s12738_s19 }
 0x412   :  { %4876 = vmatprep.subr.bf16.mxu0 %v8649_v34  ;;  %v3972_v61 = vsel %vm132_vm0, %v3965_v17, %v12660_v29  ;;  %v3674_v29 = vrot.slane %v3665_v38, 4 }
 0x413   :  { %v11186_v25 = vpop.permute.xlu0 %3740  ;;  %4877 = vmatpush2.bf16.msra.mxu0 %v8648_v49  ;;  %v11188_v58 = vpop.permute.xlu1 %3594  ;;  %v3973_v48 = vsel %vm12665_vm15, %v3957_v20, %v3972_v61  ;;  %vm12768_vm15 = vcmask 637952  }
 0x414   :  { %v3603_v56 = vrot.slane %v11188_v58, 4  ;;  %v8658_v60 = vcombine.low %v3900_v28, %v3973_v48  ;;  %v8659_v45 = vcombine.high %v3900_v28, %v3973_v48  ;;  %v12670_v49 = vrot.slane %v11186_v25, 4 }
 0x416   :  { %4915 = vmatprep.subr.bf16.mxu1 %v8659_v45  ;;  %v3607_v37 = vsel %vm132_vm0, %v3602_v47, %v3603_v56  ;;  %v3753_v47 = vsel %vm132_vm0, %v3747_v62, %v12670_v49  ;;  %v12769_v62 = vrot.slane %v10806_v30, 4 }
 0x417   :  { %v11194_v34 = vpop.permute.xlu0 %3453  ;;  %4916 = vmatpush2.bf16.msra.mxu1 %v8658_v60  ;;  %v3667_v17 = vpop.permute.xlu1 %3666  ;;  %v3608_v28 = vsel %vm12767_vm5, %v3593_v12, %v3607_v37  ;;  %v3754_v37 = vsel %vm1296_vm8, %v11153_v8, %v3753_v47  ;;  %vm12771_vm5 = vcmask 588800  }
 0x418   :  { %v3675_v53 = vrot.slane %v3667_v17, 4  ;;  %v3460_v27 = vrot.slane %v11194_v34, 4 }
 0x41a   :  { %v3679_v0 = vsel %vm132_vm0, %v3674_v29, %v3675_v53  ;;  %v11212_v29 = vcombine.low %v10822_v59, %v10822_v59 }
 0x41b   :  { %v11200_v20 = vpop.permute.xlu0 %3596  ;;  %v11202_v61 = vpop.permute.xlu1 %3812  ;;  %v3680_v48 = vsel %vm12768_vm15, %v3665_v38, %v3679_v0  ;;  %vm12772_vm15 = vcmask 646144  }
 0x41c   :  { %v12671_v60 = vrot.slane %v11202_v61, 4  ;;  %v8640_v45 = vcombine.low %v3608_v28, %v3680_v48  ;;  %v8641_v21 = vcombine.high %v3608_v28, %v3680_v48  ;;  %v3604_v59 = vrot.slane %v11200_v20, 4 }
 0x41e   :  { %4878 = vmatprep.subr.bf16.mxu0 %v8641_v21  ;;  %v3826_v63 = vsel %vm132_vm0, %v3819_v23, %v12671_v60  ;;  %v3467_v21 = vsel %vm132_vm0, %v12769_v62, %v3460_v27  ;;  %v3534_v23 = vrot.slane %v10605_v1, 4  ;;  %v3389_v60 = vrot.slane %v10609_v46, 4 }
 0x41f   :  { %v11217_v12 = vpop.permute.xlu0 %3309  ;;  %4879 = vmatpush2.bf16.msra.mxu0 %v8640_v45  ;;  %v3527_v38 = vpop.permute.xlu1 %3526  ;;  %v3827_v0 = vsel %vm3824_vm4, %v3811_v51, %v3826_v63  ;;  %v12770_v45 = vrot.slane %v10842_v55, 4  ;;  %v3461_v63 = vrot.slane %v10611_v57, 4  ;;  %v3609_v57 = vsel %vm132_vm0, %v3603_v56, %v3604_v59 }
 0x420   :  { %v3533_v28 = vrot.slane %v3527_v38, 4  ;;  %v8650_v48 = vcombine.low %v3754_v37, %v3827_v0  ;;  %v8651_v49 = vcombine.high %v3754_v37, %v3827_v0  ;;  %v3316_v51 = vrot.slane %v11217_v12, 4 }
 0x421   :  { %v3468_v37 = vsel %vm3463_vm9, %v10806_v30, %v3467_v21  ;;  %v3317_v30 = vrot.slane %v10615_v41, 4  ;;  %v3469_v21 = vsel %vm132_vm0, %v3460_v27, %v3461_v63  ;;  %v12774_v46 = vrot.slane %v10857_v7, 4 }
 0x422   :  { %4881 = vmatmul.mubr.bf16.vlgmr.msra.gmra.mxu0 %v11212_v29  ;;  %4917 = vmatprep.subr.bf16.mxu1 %v8651_v49  ;;  %v3539_v8 = vsel %vm132_vm0, %v12770_v45, %v3533_v28  ;;  %v3541_v49 = vsel %vm132_vm0, %v3533_v28, %v3534_v23 }
 0x423   :  { %v11233_v47 = vpop.permute.xlu0 %3165  ;;  %4918 = vmatpush2.bf16.msra.mxu1 %v8650_v48  ;;  %v11235_v62 = vpop.permute.xlu1 %3668  ;;  %v3540_v1 = vsel %vm1047_vm11, %v10842_v55, %v3539_v8  ;;  %8685 = vmatprep.mubr.msk.bf16.mxu0 %vm12771_vm5, %v10831_v3  ;;  %v3542_v28 = vsel %vm1047_vm11, %v3527_v38, %v3541_v49  ;;  %v3610_v8 = vsel %vm12772_vm15, %v11188_v58, %v3609_v57  ;;  %vm12773_vm5 = vcmask 637952  }
 0x424   :  { %v3676_v0 = vrot.slane %v11235_v62, 4  ;;  %v8636_v45 = vcombine.low %v3468_v37, %v3540_v1  ;;  %v8637_v48 = vcombine.high %v3468_v37, %v3540_v1  ;;  %v3322_v41 = vsel %vm132_vm0, %v12774_v46, %v3316_v51 }
 0x425   :  { %v3172_v27 = vrot.slane %v11233_v47, 4  ;;  %v3245_v38 = vrot.slane %v10613_v39, 4  ;;  %v3173_v49 = vrot.slane %v10619_v33, 4  ;;  %v3324_v58 = vsel %vm132_vm0, %v3316_v51, %v3317_v30 }
 0x426   :  { %v3681_v55 = vsel %vm132_vm0, %v3675_v53, %v3676_v0  ;;  %4930 = vmatprep.subr.bf16.mxu0 %v8637_v48  ;;  %v3470_v48 = vsel %vm3463_vm9, %v11194_v34, %v3469_v21  ;;  %v3028_v46 = vrot.slane %v10623_v31, 4  ;;  %v3323_v34 = vsel %vm881_vm13, %v10857_v7, %v3322_v41 }
 0x427   :  { %v11255_v23 = vpop.permute.xlu0 %3020  ;;  %v3382_v56 = vpop.permute.xlu1 %3381  ;;  %v3682_v37 = vsel %vm12773_vm5, %v3667_v17, %v3681_v55  ;;  %4931 = vmatpush1.bf16.msra.mxu0 %v8636_v45  ;;  %v8639_v57 = vcombine.high %v3470_v48, %v3542_v28  ;;  %v12775_v55 = vrot.slane %v10875_v36, 4  ;;  %v3180_v7 = vsel %vm132_vm0, %v3172_v27, %v3173_v49 }
 0x428   :  { %v3388_v63 = vrot.slane %v3382_v56, 4  ;;  %v8642_v53 = vcombine.low %v3610_v8, %v3682_v37  ;;  %v8643_v1 = vcombine.high %v3610_v8, %v3682_v37  ;;  %v3027_v51 = vrot.slane %v11255_v23, 4 }
 0x429   :  { %v12776_v37 = vrot.slane %v10892_v13, 4  ;;  %vm12778_vm15 = vcmask 785408  }
 0x42a   :  { %v3396_v17 = vsel %vm132_vm0, %v3388_v63, %v3389_v60  ;;  %4919 = vmatprep.subr.bf16.mxu1 %v8643_v1  ;;  %v3394_v45 = vsel %vm132_vm0, %v12775_v55, %v3388_v63  ;;  %v3325_v63 = vsel %vm881_vm13, %v11217_v12, %v3324_v58  ;;  %v2884_v55 = vrot.slane %v10627_v2, 4  ;;  %vm12780_vm5 = vmmov %vm12778_vm15 }
 0x42b   :  { %v3397_v8 = vsel %vm964_vm12, %v3382_v56, %v3396_v17  ;;  %v11275_v39 = vpop.permute.xlu0 %2876  ;;  %4920 = vmatpush2.bf16.msra.mxu1 %v8642_v53  ;;  %v3238_v33 = vpop.permute.xlu1 %3237  ;;  %v3395_v60 = vsel %vm964_vm12, %v10875_v36, %v3394_v45  ;;  %v3178_v31 = vsel %vm132_vm0, %v12776_v37, %v3172_v27  ;;  %v3100_v56 = vrot.slane %v10617_v16, 4 }
 0x42c   :  { %v3244_v30 = vrot.slane %v3238_v33, 4  ;;  %4971 = vmatprep.subr.bf16.mxu1 %v8639_v57  ;;  %v8628_v21 = vcombine.low %v3323_v34, %v3395_v60  ;;  %v8638_v53 = vcombine.low %v3470_v48, %v3542_v28  ;;  %v8629_v1 = vcombine.high %v3323_v34, %v3395_v60 }
 0x42d   :  { %v8631_v41 = vcombine.high %v3325_v63, %v3397_v8  ;;  %v12777_v17 = vrot.slane %v10912_v11, 4  ;;  %v3179_v28 = vsel %vm12778_vm15, %v10892_v13, %v3178_v31  ;;  %v12779_v2 = vrot.slane %v10927_v18, 4 }
 0x42e   :  { %v3252_v36 = vsel %vm132_vm0, %v3244_v30, %v3245_v38  ;;  %4922 = vmatmul.mubr.bf16.vlgmr.msra.gmra.mxu1 %v11212_v29  ;;  %4932 = vmatprep.subr.bf16.mxu0 %v8629_v1  ;;  %v2883_v38 = vrot.slane %v11275_v39, 4  ;;  %v3181_v34 = vsel %vm12780_vm5, %v11233_v47, %v3180_v7  ;;  %v8630_v60 = vcombine.low %v3325_v63, %v3397_v8 }
 0x42f   :  { %v3250_v57 = vsel %vm132_vm0, %v12777_v17, %v3244_v30  ;;  %v3253_v16 = vsel %vm798_vm14, %v3238_v33, %v3252_v36  ;;  %v11296_v45 = vpop.permute.xlu0 %2731  ;;  %4972 = vmatpush1.bf16.msra.mxu1 %v8638_v53  ;;  %v3093_v12 = vpop.permute.xlu1 %3092  ;;  %4933 = vmatpush1.bf16.msra.mxu0 %v8628_v21  ;;  %v3033_v58 = vsel %vm132_vm0, %v12779_v2, %v3027_v51  ;;  %v2956_v33 = vrot.slane %v10621_v24, 4 }
 0x430   :  { %v3251_v27 = vsel %vm798_vm14, %v10912_v11, %v3250_v57  ;;  %v3099_v49 = vrot.slane %v3093_v12, 4  ;;  %4973 = vmatprep.subr.bf16.mxu1 %v8631_v41  ;;  %vm12781_vm15 = vcmask 588800   ;;  %v3035_v11 = vsel %vm132_vm0, %v3027_v51, %v3028_v46 }
 0x431   :  { %v8620_v48 = vcombine.low %v3179_v28, %v3251_v27  ;;  %v8621_v13 = vcombine.high %v3179_v28, %v3251_v27  ;;  %8687 = vmatprep.mubr.msk.bf16.mxu1 %vm12781_vm15, %v10831_v3  ;;  %v8623_v21 = vcombine.high %v3181_v34, %v3253_v16  ;;  %v12782_v37 = vrot.slane %v10946_v52, 4 }
 0x432   :  { %v3108_v30 = vsel %vm132_vm0, %v3099_v49, %v3100_v56  ;;  %v2739_v53 = vrot.slane %v10631_v42, 4  ;;  %v3034_v3 = vsel %vm632_vm1, %v10927_v18, %v3033_v58  ;;  %v2738_v51 = vrot.slane %v11296_v45, 4 }
 0x433   :  { %v3106_v31 = vsel %vm132_vm0, %v12782_v37, %v3099_v49  ;;  %v3109_v24 = vsel %vm3102_vm10, %v3093_v12, %v3108_v30  ;;  %4934 = vmatprep.subr.bf16.mxu0 %v8621_v13  ;;  %v11318_v47 = vpop.permute.xlu0 %2587  ;;  %4974 = vmatpush1.bf16.msra.mxu1 %v8630_v60  ;;  %v2949_v8 = vpop.permute.xlu1 %2948  ;;  %v12783_v42 = vrot.slane %v10961_v40, 4  ;;  %v3036_v7 = vsel %vm632_vm1, %v11255_v23, %v3035_v11 }
 0x434   :  { %v3107_v46 = vsel %vm3102_vm10, %v10946_v52, %v3106_v31  ;;  %4935 = vmatpush1.bf16.msra.mxu0 %v8620_v48  ;;  %v2955_v56 = vrot.slane %v2949_v8, 4  ;;  %4975 = vmatprep.subr.bf16.mxu1 %v8623_v21  ;;  %v2891_v36 = vsel %vm132_vm0, %v2883_v38, %v2884_v55  ;;  %v8622_v41 = vcombine.low %v3181_v34, %v3253_v16 }
 0x435   :  { %v8612_v63 = vcombine.low %v3034_v3, %v3107_v46  ;;  %v2889_v1 = vsel %vm132_vm0, %v12783_v42, %v2883_v38  ;;  %v8613_v18 = vcombine.high %v3034_v3, %v3107_v46  ;;  %v2812_v17 = vrot.slane %v10625_v5, 4 }
 0x436   :  { %v2963_v52 = vsel %vm132_vm0, %v2955_v56, %v2956_v33  ;;  %v8615_v57 = vcombine.high %v3036_v7, %v3109_v24  ;;  %v12784_v12 = vrot.slane %v10983_v14, 4  ;;  %v2667_v27 = vrot.slane %v10635_v26, 4 }
 0x437   :  { %v2964_v49 = vsel %vm12672_vm2, %v2949_v8, %v2963_v52  ;;  %4936 = vmatprep.subr.bf16.mxu0 %v8613_v18  ;;  %v11338_v48 = vpop.permute.xlu0 %3744  ;;  %4976 = vmatpush1.bf16.msra.mxu1 %v8622_v41  ;;  %v2805_v23 = vpop.permute.xlu1 %2804  ;;  %v2890_v55 = vsel %vm12673_vm3, %v10961_v40, %v2889_v1  ;;  %v2892_v16 = vsel %vm12673_vm3, %v11275_v39, %v2891_v36  ;;  %v12785_v2 = vrot.slane %v10998_v4, 4 }
 0x438   :  { %v2961_v28 = vsel %vm132_vm0, %v12784_v12, %v2955_v56  ;;  %4937 = vmatpush1.bf16.msra.mxu0 %v8612_v63  ;;  %v2811_v38 = vrot.slane %v2805_v23, 4  ;;  %4977 = vmatprep.subr.bf16.mxu1 %v8615_v57  ;;  %v2747_v33 = vsel %vm132_vm0, %v2738_v51, %v2739_v53  ;;  %v8614_v34 = vcombine.low %v3036_v7, %v3109_v24 }
 0x439   :  { %v2962_v5 = vsel %vm12672_vm2, %v10983_v14, %v2961_v28  ;;  %v2745_v58 = vsel %vm132_vm0, %v12785_v2, %v2738_v51  ;;  %v2594_v60 = vrot.slane %v11318_v47, 4  ;;  %v2595_v13 = vrot.slane %v10629_v19, 4 }
 0x43a   :  { %v8604_v26 = vcombine.low %v2890_v55, %v2962_v5  ;;  %v8605_v40 = vcombine.high %v2890_v55, %v2962_v5  ;;  %v2819_v14 = vsel %vm132_vm0, %v2811_v38, %v2812_v17  ;;  %v8607_v11 = vcombine.high %v2892_v16, %v2964_v49 }
 0x43b   :  { %v12786_v39 = vrot.slane %v11019_v22, 4  ;;  %v2523_v21 = vrot.slane %v10633_v35, 4  ;;  %vm12787_vm5 = vcmask 916480   ;;  %v2516_v31 = vpop.permute.xlu0 %2515  ;;  %4978 = vmatpush1.bf16.msra.mxu1 %v8614_v34  ;;  %v2660_v53 = vpop.permute.xlu1 %2659  ;;  %vm12788_vm15 = vcmask 1014784  }
 0x43c   :  { %v2820_v37 = vsel %vm12787_vm5, %v2805_v23, %v2819_v14  ;;  %4938 = vmatprep.subr.bf16.mxu0 %v8605_v40  ;;  %v2746_v24 = vsel %vm12788_vm15, %v10998_v4, %v2745_v58  ;;  %vm12789_vm2 = vmmov %vm12787_vm5  ;;  %v2522_v3 = vrot.slane %v2516_v31, 4  ;;  %v2666_v46 = vrot.slane %v2660_v53, 4  ;;  %4979 = vmatprep.subr.bf16.mxu1 %v8607_v11 }
 0x43d   :  { %v2817_v30 = vsel %vm132_vm0, %v12786_v39, %v2811_v38  ;;  %vm12790_vm3 = vmmov %vm12788_vm15  ;;  %4939 = vmatpush1.bf16.msra.mxu0 %v8604_v26  ;;  %v2602_v51 = vsel %vm132_vm0, %v2594_v60, %v2595_v13  ;;  %v8606_v56 = vcombine.low %v2892_v16, %v2964_v49  ;;  %v12791_v42 = vrot.slane %v11017_v15, 4 }
 0x43e   :  { %v2818_v19 = vsel %vm12789_vm2, %v11019_v22, %v2817_v30  ;;  %v2748_v8 = vsel %vm12790_vm3, %v11296_v45, %v2747_v33  ;;  %v2674_v4 = vsel %vm132_vm0, %v2666_v46, %v2667_v27  ;;  %v12792_v22 = vrot.slane %v11056_v10, 4 }
 0x43f   :  { %v8596_v35 = vcombine.low %v2746_v24, %v2818_v19  ;;  %v8597_v63 = vcombine.high %v2746_v24, %v2818_v19  ;;  %v2600_v1 = vsel %vm132_vm0, %v12791_v42, %v2594_v60  ;;  %v8599_v7 = vcombine.high %v2748_v8, %v2820_v37  ;;  %v4180_v52 = vpop.permute.xlu0 %4179  ;;  %4980 = vmatpush1.bf16.msra.mxu1 %v8606_v56  ;;  %v11377_v57 = vpop.permute.xlu1 %3962  ;;  %v12803_v24 = vld [vmem:[#allocation16_spill] sm:$0xff] }
 0x440   :  { %v2672_v45 = vsel %vm132_vm0, %v12792_v22, %v2666_v46  ;;  %v12793_v36 = vrot.slane %v11038_v54, 4  ;;  %v4187_v18 = vrot.slane %v10637_v9, 4  ;;  %vm12794_vm2 = vcmask 1022976  }
 0x441   :  { %v2675_v17 = vsel %vm12794_vm2, %v2660_v53, %v2674_v4  ;;  %4940 = vmatprep.subr.bf16.mxu0 %v8597_v63  ;;  %vm12795_vm3 = vmmov %vm12794_vm2  ;;  %vm12796_vm5 = vcmask 1031168   ;;  %v2530_v27 = vsel %vm132_vm0, %v2522_v3, %v2523_v21  ;;  %v4186_v49 = vrot.slane %v4180_v52, 4  ;;  %4981 = vmatprep.subr.bf16.mxu1 %v8599_v7  ;;  %v12806_v63 = vld [vmem:[#allocation15_spill] sm:$0xff] }
 0x442   :  { %v2528_v41 = vsel %vm132_vm0, %v12793_v36, %v2522_v3  ;;  %v2673_v12 = vsel %vm12795_vm3, %v11056_v10, %v2672_v45  ;;  %v2603_v28 = vsel %vm12796_vm5, %v11318_v47, %v2602_v51  ;;  %4941 = vmatpush1.bf16.msra.mxu0 %v8596_v35  ;;  %vm12797_vm15 = vmmov %vm12796_vm5  ;;  %v8598_v23 = vcombine.low %v2748_v8, %v2820_v37 }
 0x443   :  { %v2601_v9 = vsel %vm12797_vm15, %v11017_v15, %v2600_v1  ;;  %vm12798_vm2 = vcmask 1039360   ;;  %v12799_v38 = vrot.slane %v11104_v43, 4  ;;  %v8591_v26 = vcombine.high %v2603_v28, %v2675_v17  ;;  %v4107_v58 = vpop.permute.xlu0 %4106  ;;  %v11393_v33 = vpop.permute.xlu1 %3816 }
 0x444   :  { %v8588_v55 = vcombine.low %v2601_v9, %v2673_v12  ;;  %v8589_v5 = vcombine.high %v2601_v9, %v2673_v12  ;;  %v2529_v16 = vsel %vm12798_vm2, %v11038_v54, %v2528_v41  ;;  %vm12800_vm3 = vmmov %vm12798_vm2  ;;  %v4195_v2 = vsel %vm132_vm0, %v4186_v49, %v4187_v18  ;;  %4982 = vmatpush1.bf16.msra.mxu1 %v8598_v23 }
 0x445   :  { %v4193_v10 = vsel %vm132_vm0, %v12799_v38, %v4186_v49  ;;  %v2531_v47 = vsel %vm12800_vm3, %v2516_v31, %v2530_v27  ;;  %v8581_v15 = vcombine.high %v10686_v50, %v2529_v16  ;;  %v4113_v34 = vrot.slane %v4107_v58, 4  ;;  %4983 = vmatprep.subr.bf16.mxu1 %v8591_v26 }
 0x446   :  { %4942 = vmatprep.subr.bf16.mxu0 %v8589_v5  ;;  %vm12801_vm5 = vcmask 490496   ;;  %v8590_v60 = vcombine.low %v2603_v28, %v2675_v17  ;;  %v8580_v13 = vcombine.low %v10686_v50, %v2529_v16  ;;  %v8583_v14 = vcombine.high %v10668_v6, %v2531_v47  ;;  %v12805_v50 = vld [vmem:[#allocation14_spill] sm:$0xff] }
 0x447   :  { %4943 = vmatpush1.bf16.msra.mxu0 %v8588_v55  ;;  %v4194_v54 = vsel %vm12801_vm5, %v11104_v43, %v4193_v10  ;;  %vm12802_vm15 = vmmov %vm12801_vm5  ;;  %v4041_v11 = vrot.slane %v10639_v44, 4  ;;  %v3888_v39 = vpop.permute.xlu0 %3887  ;;  %v4034_v30 = vpop.permute.xlu1 %4033  ;;  %v4114_v31 = vrot.slane %v10641_v32, 4  ;;  %v12804_v19 = vrot.slane %v12803_v24, 4  ;;  %v12810_v16 = vld [vmem:[#allocation18_spill] sm:$0xff] }
 0x448   :  { %4944 = vmatprep.subr.bf16.mxu0 %v8581_v15  ;;  %v4196_v40 = vsel %vm12802_vm15, %v4180_v52, %v4195_v2  ;;  %4984 = vmatpush1.bf16.msra.mxu1 %v8590_v60  ;;  %v8677_v21 = vcombine.high %v4194_v54, %v4194_v54  ;;  %v8676_v37 = vcombine.low %v4194_v54, %v4194_v54  ;;  %v3894_v53 = vrot.slane %v3888_v39, 4  ;;  %v12808_v52 = vld [vmem:[#allocation17_spill] sm:$0xff] }
 0x449   :  { %v4040_v43 = vrot.slane %v4034_v30, 4  ;;  %4985 = vmatprep.subr.bf16.mxu1 %v8583_v14  ;;  %v4120_v8 = vsel %vm132_vm0, %v12804_v19, %v4113_v34  ;;  %v3895_v3 = vrot.slane %v12805_v50, 4  ;;  %v8582_v46 = vcombine.low %v10668_v6, %v2531_v47 }
 0x44a   :  { %v8678_v44 = vcombine.low %v4196_v40, %v4196_v40  ;;  %v3968_v35 = vrot.slane %v11377_v57, 4  ;;  %v8679_v51 = vcombine.high %v4196_v40, %v4196_v40  ;;  %v4122_v32 = vsel %vm132_vm0, %v4113_v34, %v4114_v31 }
 0x44b   :  { %4945 = vmatpush1.bf16.msra.mxu0 %v8580_v13  ;;  %v4049_v56 = vsel %vm132_vm0, %v4040_v43, %v4041_v11  ;;  %v12807_v42 = vrot.slane %v12806_v63, 4  ;;  %v3743_v7 = vpop.permute.xlu0 %3742  ;;  %v4837_v22 = vsel %vm132_vm0, %v8676_v37, 0  ;;  %v3961_v6 = vpop.permute.xlu1 %3960  ;;  %v4121_v36 = vsel %vm4116_vm6, %v12803_v24, %v4120_v8 }
 0x44c   :  { %8684 = vmatprep.subr.msk.bf16.mxu0 %vm132_vm0, %v8677_v21  ;;  %v4050_v4 = vsel %vm4043_vm7, %v4034_v30, %v4049_v56  ;;  %4986 = vmatpush1.bf16.msra.mxu1 %v8582_v46  ;;  %v3749_v41 = vrot.slane %v3743_v7, 4  ;;  %v3967_v18 = vrot.slane %v3961_v6, 4  ;;  %v12809_v57 = vrot.slane %v12808_v52, 4 }
 0x44d   :  { %v4047_v1 = vsel %vm132_vm0, %v12807_v42, %v4040_v43  ;;  %8686 = vmatprep.subr.msk.bf16.mxu1 %vm132_vm0, %v8679_v51  ;;  %v3750_v28 = vrot.slane %v11338_v48, 4  ;;  %v4123_v27 = vsel %vm4116_vm6, %v4107_v58, %v4122_v32  ;;  %v4843_v9 = vsel %vm132_vm0, %v8678_v44, 0 }
 0x44e   :  { %v4048_v45 = vsel %vm4043_vm7, %v12806_v63, %v4047_v1  ;;  %v3901_v12 = vsel %vm132_vm0, %v12809_v57, %v3894_v53  ;;  %v3903_v23 = vsel %vm132_vm0, %v3894_v53, %v3895_v3  ;;  %v3976_v55 = vsel %vm132_vm0, %v3967_v18, %v3968_v35 }
 0x44f   :  { %4953 = vmatpush2.bf16.msra.mxu0 %v4837_v22  ;;  %v8668_v17 = vcombine.low %v4048_v45, %v4121_v36  ;;  %v8669_v49 = vcombine.high %v4048_v45, %v4121_v36  ;;  %v8671_v5 = vcombine.high %v4050_v4, %v4123_v27  ;;  %v12811_v38 = vrot.slane %v12810_v16, 4  ;;  %v3599_v48 = vpop.permute.xlu0 %3598  ;;  %v3815_v2 = vpop.permute.xlu1 %3814 }
 0x450   :  { %v3822_v26 = vrot.slane %v11393_v33, 4  ;;  %vm12812_vm2 = vcmask 515072   ;;  %4994 = vmatpush2.bf16.msra.mxu1 %v4843_v9  ;;  %vm12813_vm3 = vcmask 523264   ;;  %v3605_v34 = vrot.slane %v3599_v48, 4 }
 0x451   :  { %v3974_v10 = vsel %vm132_vm0, %v12811_v38, %v3967_v18  ;;  %v3977_v47 = vsel %vm12812_vm2, %v3961_v6, %v3976_v55  ;;  %4954 = vmatprep.subr.bf16.mxu0 %v8669_v49  ;;  %v3902_v58 = vsel %vm12813_vm3, %v12808_v52, %v3901_v12  ;;  %vm12814_vm5 = vmmov %vm12812_vm2  ;;  %v3821_v54 = vrot.slane %v3815_v2, 4  ;;  %4995 = vmatprep.subr.bf16.mxu1 %v8671_v5  ;;  %v8688_v49 = vld [vmem:[%s12535_s7 + $0x1] ss:$4 sm:$0xff] }
 0x452   :  { %v3975_v15 = vsel %vm12814_vm5, %v12810_v16, %v3974_v10  ;;  %v12815_v40 = vrot.slane %v11186_v25, 4  ;;  %vm12816_vm15 = vmmov %vm12813_vm3  ;;  %v8670_v14 = vcombine.low %v4050_v4, %v4123_v27  ;;  %v3757_v30 = vsel %vm132_vm0, %v3749_v41, %v3750_v28  ;;  %v12824_v10 = vld [vmem:[#allocation8_spill] sm:$0xff] }
 0x453   :  { %4955 = vmatpush2.bf16.msra.mxu0 %v8668_v17  ;;  %v8660_v60 = vcombine.low %v3902_v58, %v3975_v15  ;;  %v3904_v13 = vsel %vm12816_vm15, %v3888_v39, %v3903_v23  ;;  %v8661_v11 = vcombine.high %v3902_v58, %v3975_v15  ;;  %v3830_v21 = vsel %vm132_vm0, %v3821_v54, %v3822_v26  ;;  %v3601_v24 = vpop.permute.xlu0 %3600  ;;  %v3671_v19 = vpop.permute.xlu1 %3670  ;;  %v12822_v23 = vld [vmem:[#allocation7_spill] sm:$0xff]  ;;  %v12825_v15 = vld [vmem:[#allocation9_spill] sm:$0xff] }
 0x454   :  { %v3755_v33 = vsel %vm132_vm0, %v12815_v40, %v3749_v41  ;;  %v8663_v37 = vcombine.high %v3904_v13, %v3977_v47  ;;  %v12817_v31 = vrot.slane %v11202_v61, 4  ;;  %v3831_v43 = vsel %vm3824_vm4, %v3815_v2, %v3830_v21  ;;  %4996 = vmatpush2.bf16.msra.mxu1 %v8670_v14 }
 0x455   :  { %4956 = vmatprep.subr.bf16.mxu0 %v8661_v11  ;;  %v3756_v39 = vsel %vm1296_vm8, %v11186_v25, %v3755_v33  ;;  %v3606_v50 = vrot.slane %v3601_v24, 4  ;;  %v3677_v3 = vrot.slane %v3671_v19, 4  ;;  %v3611_v44 = vsel %vm132_vm0, %v3604_v59, %v3605_v34  ;;  %v12827_v24 = vld [vmem:[#allocation11_spill] sm:$0xff] }
 0x456   :  { %v3828_v53 = vsel %vm132_vm0, %v12817_v31, %v3821_v54  ;;  %4997 = vmatprep.subr.bf16.mxu1 %v8663_v37  ;;  %v3758_v35 = vsel %vm1296_vm8, %v3743_v7, %v3757_v30  ;;  %v8662_v51 = vcombine.low %v3904_v13, %v3977_v47  ;;  %vm12818_vm2 = vcmask 646144   ;;  %v12826_v30 = vld [vmem:[#allocation10_spill] sm:$0xff] }
 0x457   :  { %v3829_v8 = vsel %vm3824_vm4, %v11202_v61, %v3828_v53  ;;  %4957 = vmatpush2.bf16.msra.mxu0 %v8660_v60  ;;  %v8655_v56 = vcombine.high %v3758_v35, %v3831_v43  ;;  %v3683_v25 = vsel %vm132_vm0, %v3676_v0, %v3677_v3  ;;  %v3673_v61 = vpop.permute.xlu1 %3672  ;;  %v3612_v63 = vsel %vm12818_vm2, %v11200_v20, %v3611_v44  ;;  %vm12820_vm5 = vmmov %vm12818_vm2 }
 0x458   :  { %v8652_v46 = vcombine.low %v3756_v39, %v3829_v8  ;;  %v8653_v32 = vcombine.high %v3756_v39, %v3829_v8  ;;  %4998 = vmatpush2.bf16.msra.mxu1 %v8662_v51  ;;  %vm12819_vm3 = vcmask 637952   ;;  %v3613_v59 = vsel %vm132_vm0, %v3605_v34, %v3606_v50  ;;  %v12828_v8 = vld [vmem:[#allocation12_spill] sm:$0xff] }
 0x459   :  { %v3684_v42 = vsel %vm12819_vm3, %v11235_v62, %v3683_v25  ;;  %v3678_v1 = vrot.slane %v3673_v61, 4  ;;  %4999 = vmatprep.subr.bf16.mxu1 %v8655_v56  ;;  %v8654_v22 = vcombine.low %v3758_v35, %v3831_v43  ;;  %v3614_v0 = vsel %vm12820_vm5, %v3599_v48, %v3613_v59  ;;  %vm12821_vm15 = vmmov %vm12819_vm3  ;;  %v12829_v56 = vld [vmem:[#allocation13_spill] sm:$0xff] }
 0x45a   :  { %4958 = vmatprep.subr.bf16.mxu0 %v8653_v32  ;;  %v8644_v4 = vcombine.low %v3612_v63, %v3684_v42  ;;  %v8645_v7 = vcombine.high %v3612_v63, %v3684_v42  ;;  %v11476_v55 = vrot.slane %v8688_v49, %v12822_v23  ;;  %v11486_v26 = vrot.slane %v8688_v49, %v12824_v10 }
 0x45b   :  { %4959 = vmatpush2.bf16.msra.mxu0 %v8652_v46  ;;  %v3685_v6 = vsel %vm132_vm0, %v3677_v3, %v3678_v1  ;;  %v11497_v34 = vrot.slane %v8688_v49, %v12825_v15  ;;  %v11505_v21 = vrot.slane %v8688_v49, %v12826_v30  ;;  %v11514_v50 = vrot.slane %v8688_v49, %v12828_v8 }
 0x45c   :  { %4960 = vmatprep.subr.bf16.mxu0 %v8645_v7  ;;  %5000 = vmatpush2.bf16.msra.mxu1 %v8654_v22  ;;  %v3686_v45 = vsel %vm12821_vm15, %v3671_v19, %v3685_v6  ;;  %v11511_v19 = vrot.slane %v8688_v49, %v12827_v24  ;;  %v11523_v25 = vrot.slane %v8688_v49, %v12829_v56  ;;  %vm12832_vm2 = vcmask 588800  }
 0x45d   :  { %v8646_v20 = vcombine.low %v3614_v0, %v3686_v45  ;;  %v8647_v36 = vcombine.high %v3614_v0, %v3686_v45  ;;  %vm12833_vm3 = vmmov %vm12832_vm2  ;;  %vm12834_vm5 = vcmask 785408  }
 0x45e   :  { %vm12835_vm15 = vmmov %vm12834_vm5 }
 0x45f   :  { %4961 = vmatpush2.bf16.msra.mxu0 %v8644_v4  ;;  %5001 = vmatprep.subr.bf16.mxu1 %v8647_v36 }
 0x460   :  { %5002 = vmatpush2.bf16.msra.mxu1 %v8646_v20  ;;  %v4311_v27 = vpop.permute.xlu0 %4310 }
 0x462   :  { %4963 = vmatmul.mubr.bf16.vlgmr.msra.gmra.mxu0 %v11212_v29 }
 0x463   :  { %5004 = vmatmul.mubr.bf16.vlgmr.msra.gmra.mxu1 %v11212_v29  ;;  %v12823_v29 = vld [vmem:[#allocation6_spill] sm:$0xff] }
 0x464   :  { %v11481_v16 = vrot.slane %v8688_v49, %v12823_v29  ;;  %v11533_v49 = vpop.permute.xlu0 %5115 }
 0x4e2   :  { %v4882_v62 = vpop.f32.mrf.mxu0 }
 0x4e3   :  { %v11478_v5 = vadd.f32 %v4882_v62, %v4311_v27 }
 0x4e4   :  { %v4884_v41 = vpop.f32.mrf.mxu0 }
 0x4e5   :  { %v11473_v9 = vadd.f32 %v4884_v41, %v4311_v27  ;;  %v5055_v48 = vmul.f32 %v11481_v16, %v11478_v5 }
 0x4e6   :  { %v4886_v18 = vpop.f32.mrf.mxu0 }
 0x4e7   :  { %v5056_v47 = vmul.f32 %v11476_v55, %v11473_v9  ;;  %v5072_v60 = vmul.f32 %v5055_v48, %v11478_v5 }
 0x4e8   :  { %v4887_v17 = vpop.f32.mrf.mxu0 }
 0x4e9   :  { %v5073_v54 = vmul.f32 %v5056_v47, %v11473_v9  ;;  %v5063_v40 = vadd.f32 %v5056_v47, %v5055_v48  ;;  %v11537_v47 = vpop.permute.xlu0 %6266 }
 0x4eb   :  { %v5080_v14 = vadd.f32 %v5073_v54, %v5072_v60 }
 0x4ee   :  { %v4923_v52 = vpop.f32.mrf.mxu1 }
 0x4ef   :  { %v11483_v38 = vadd.f32 %v4923_v52, %v4311_v27 }
 0x4f0   :  { %v4925_v57 = vpop.f32.mrf.mxu1 }
 0x4f1   :  { %v5057_v2 = vmul.f32 %v11486_v26, %v11483_v38  ;;  %v11494_v58 = vadd.f32 %v4925_v57, %v4311_v27 }
 0x4f2   :  { %v4927_v12 = vpop.f32.mrf.mxu1 }
 0x4f3   :  { %v5074_v33 = vmul.f32 %v5057_v2, %v11483_v38  ;;  %v5058_v13 = vmul.f32 %v11497_v34, %v11494_v58  ;;  %v5064_v11 = vadd.f32 %v5063_v40, %v5057_v2  ;;  %v11541_v2 = vpop.permute.xlu0 %6122 }
 0x4f4   :  { %v4928_v28 = vpop.f32.mrf.mxu1 }
 0x4f5   :  { %v5081_v31 = vadd.f32 %v5080_v14, %v5074_v33  ;;  %v5075_v53 = vmul.f32 %v5058_v13, %v11494_v58  ;;  %v5065_v3 = vadd.f32 %v5064_v11, %v5058_v13 }
 0x4f7   :  { %v5082_v61 = vadd.f32 %v5081_v31, %v5075_v53  ;;  %v11545_v60 = vpop.permute.xlu0 %5978 }
 0x4fb   :  { %v11549_v33 = vpop.permute.xlu0 %5834 }
 0x4ff   :  { %v11553_v14 = vpop.permute.xlu0 %5690 }
 0x522   :  { %v4964_v37 = vpop.f32.mrf.mxu0 }
 0x523   :  { %v11508_v43 = vadd.f32 %v4964_v37, %v4311_v27  ;;  %v5005_v35 = vpop.f32.mrf.mxu1  ;;  %v11557_v37 = vpop.permute.xlu0 %5546 }
 0x524   :  { %v4966_v39 = vpop.f32.mrf.mxu0  ;;  %v11520_v32 = vadd.f32 %v5005_v35, %v4311_v27 }
 0x525   :  { %v5059_v46 = vmul.f32 %v11505_v21, %v11508_v43  ;;  %v11518_v44 = vadd.f32 %v4966_v39, %v4311_v27  ;;  %v5007_v1 = vpop.f32.mrf.mxu1 }
 0x526   :  { %v4968_v51 = vpop.f32.mrf.mxu0  ;;  %v5061_v4 = vmul.f32 %v11514_v50, %v11520_v32  ;;  %v5008_v22 = vadd.f32 %v5007_v1, %v4311_v27  ;;  %v11535_v27 = vpop.permute.xlu1 %5130 }
 0x527   :  { %v5066_v63 = vadd.f32 %v5065_v3, %v5059_v46  ;;  %v5076_v42 = vmul.f32 %v5059_v46, %v11508_v43  ;;  %v5060_v59 = vmul.f32 %v11511_v19, %v11518_v44  ;;  %v5009_v20 = vpop.f32.mrf.mxu1  ;;  %v11561_v53 = vpop.permute.xlu0 %5330 }
 0x528   :  { %v4969_v7 = vpop.f32.mrf.mxu0  ;;  %v5078_v36 = vmul.f32 %v5061_v4, %v11520_v32  ;;  %v5062_v62 = vmul.f32 %v11523_v25, %v5008_v22 }
 0x529   :  { %v5083_v6 = vadd.f32 %v5082_v61, %v5076_v42  ;;  %v5067_v0 = vadd.f32 %v5066_v63, %v5060_v59  ;;  %v5077_v45 = vmul.f32 %v5060_v59, %v11518_v44  ;;  %v5010_v18 = vpop.f32.mrf.mxu1 }
 0x52a   :  { %v5079_v52 = vmul.f32 %v5062_v62, %v5008_v22  ;;  %v11539_v48 = vpop.permute.xlu1 %6194 }
 0x52b   :  { %v5084_v41 = vadd.f32 %v5083_v6, %v5077_v45  ;;  %v5068_v17 = vadd.f32 %v5067_v0, %v5061_v4  ;;  %v11565_v3 = vpop.permute.xlu0 %5258 }
 0x52d   :  { %v5069_v57 = vadd.f32 %v5068_v17, %v5062_v62  ;;  %v5085_v12 = vadd.f32 %v5084_v41, %v5078_v36 }
 0x52e   :  { %v11543_v54 = vpop.permute.xlu1 %6050 }
 0x52f   :  { %5070 = vadd.xlane.f32.xlu1 %v5069_v57  ;;  %v5086_v28 = vadd.f32 %v5085_v12, %v5079_v52  ;;  %v11569_v35 = vpop.permute.xlu0 %6914 }
 0x531   :  { %5087 = vadd.xlane.f32.xlu0 %v5086_v28 }
 0x532   :  { %v11547_v40 = vpop.permute.xlu1 %5906 }
 0x533   :  { %v11573_v61 = vpop.permute.xlu0 %6842 }
 0x536   :  { %v11551_v13 = vpop.permute.xlu1 %5762 }
 0x53a   :  { %v11555_v11 = vpop.permute.xlu1 %5618 }
 0x53e   :  { %v11559_v31 = vpop.permute.xlu1 %5474 }
 0x542   :  { %v11563_v39 = vpop.permute.xlu1 %5402 }
 0x546   :  { %v11567_v46 = vpop.permute.xlu1 %6770 }
 0x54a   :  { %v11571_v51 = vpop.permute.xlu1 %6626 }
 0x5b8   :  { %v5071_v63 = vpop.xlane.xlu1 %5070 }
 0x5b9   :  { %v5089_v42 = vmul.f32 0.0030864198, %v5071_v63 }
 0x5ba   :  { %v5088_v59 = vpop.xlane.xlu0 %5087 }
 0x5bb   :  { %v5090_v1 = vmul.f32 0.0030864198, %v5088_v59  ;;  %v5091_v4 = vmul.f32 %v5089_v42, %v5089_v42  ;;  %v5095_v0 = vsub.f32 %v11478_v5, %v5089_v42  ;;  %v5096_v45 = vsub.f32 %v11473_v9, %v5089_v42 }
 0x5bc   :  { %v5097_v20 = vsub.f32 %v11483_v38, %v5089_v42  ;;  %v5098_v36 = vsub.f32 %v11494_v58, %v5089_v42  ;;  %v5101_v41 = vsub.f32 %v11520_v32, %v5089_v42  ;;  %v5102_v18 = vsub.f32 %v5008_v22, %v5089_v42 }
 0x5bd   :  { %v5092_v7 = vsub.f32 %v5090_v1, %v5091_v4  ;;  %v5099_v58 = vsub.f32 %v11508_v43, %v5089_v42  ;;  %v5100_v1 = vsub.f32 %v11518_v44, %v5089_v42 }
 0x5bf   :  { %v5103_v6 = vadd.f32 1e-05, %v5092_v7 }
 0x5c1   :  { %9231 = vrsqrt.f32 %v5103_v6 }
 0x5ce   :  { %v9232_v62 = vpop.eup %9231 }
 0x5cf   :  { %v5105_v17 = vmul.f32 %v9232_v62, %v5095_v0  ;;  %v5106_v52 = vmul.f32 %v9232_v62, %v5096_v45  ;;  %v5107_v57 = vmul.f32 %v9232_v62, %v5097_v20  ;;  %v5108_v12 = vmul.f32 %v9232_v62, %v5098_v36 }
 0x5d0   :  { %v5111_v28 = vmul.f32 %v9232_v62, %v5101_v41  ;;  %v5112_v63 = vmul.f32 %v9232_v62, %v5102_v18  ;;  %v5109_v45 = vmul.f32 %v9232_v62, %v5099_v58  ;;  %v5110_v20 = vmul.f32 %v9232_v62, %v5100_v1 }
 0x5d1   :  { %v5118_v59 = vmul.f32 %v11533_v49, %v5105_v17  ;;  %v5119_v5 = vmul.f32 %v11533_v49, %v5106_v52  ;;  %v5120_v9 = vmul.f32 %v11533_v49, %v5107_v57  ;;  %v5121_v38 = vmul.f32 %v11533_v49, %v5108_v12 }
 0x5d2   :  { %v5124_v32 = vmul.f32 %v11533_v49, %v5111_v28  ;;  %v5125_v22 = vmul.f32 %v11533_v49, %v5112_v63 }
 0x5d3   :  { %v5133_v4 = vadd.f32 %v11535_v27, %v5118_v59  ;;  %v5134_v7 = vadd.f32 %v11535_v27, %v5119_v5  ;;  %v5135_v6 = vadd.f32 %v11535_v27, %v5120_v9  ;;  %v5136_v0 = vadd.f32 %v11535_v27, %v5121_v38 }
 0x5d4   :  { %v5139_v36 = vadd.f32 %v11535_v27, %v5124_v32  ;;  %v5140_v43 = vadd.f32 %v11535_v27, %v5125_v22  ;;  %v5122_v5 = vmul.f32 %v11533_v49, %v5109_v45  ;;  %v5123_v9 = vmul.f32 %v11533_v49, %v5110_v20 }
 0x5d5   :  { %v5141_v41 = vmax.f32 %v5133_v4, 0.0  ;;  %v5142_v44 = vmax.f32 %v5134_v7, 0.0  ;;  %v5143_v42 = vmax.f32 %v5135_v6, 0.0  ;;  %v5144_v18 = vmax.f32 %v5136_v0, 0.0 }
 0x5d6   :  { %v5147_v17 = vmax.f32 %v5139_v36, 0.0  ;;  %v5148_v52 = vmax.f32 %v5140_v43, 0.0 }
 0x5d7   :  { %v5149_v57 = vmul.f32 %v5141_v41, %v11481_v16  ;;  %v5150_v12 = vmul.f32 %v5142_v44, %v11476_v55  ;;  %v5151_v28 = vmul.f32 %v5143_v42, %v11486_v26  ;;  %v5152_v63 = vmul.f32 %v5144_v18, %v11497_v34 }
 0x5d8   :  { %v5155_v62 = vmul.f32 %v5147_v17, %v11514_v50  ;;  %v5156_v59 = vmul.f32 %v5148_v52, %v11523_v25  ;;  %v5137_v55 = vadd.f32 %v11535_v27, %v5122_v5  ;;  %v5138_v16 = vadd.f32 %v11535_v27, %v5123_v9 }
 0x5d9   :  { %v11602_v38 = vpack.c.bf16 %v5150_v12, %v5149_v57  ;;  %v11604_v58 = vpack.c.bf16 %v5152_v63, %v5151_v28  ;;  %v11754_v12 = vld [vmem:[%s12537_s3] sm:$0xff] }
 0x5da   :  { %v11606_v1 = vpack.c.bf16 %v5156_v59, %v5155_v62  ;;  %v5145_v26 = vmax.f32 %v5137_v55, 0.0  ;;  %v5146_v34 = vmax.f32 %v5138_v16, 0.0  ;;  %v11762_v59 = vcombine.high %v11754_v12, %v11754_v12 }
 0x5db   :  { %6188 = vrot.lane.b32.xlu0 %v11604_v58, %s12754_s14  ;;  %6186 = vrot.lane.b32.xlu1 %v11602_v38, %s12754_s14 }
 0x5dc   :  { %v5153_v50 = vmul.f32 %v5145_v26, %v11505_v21  ;;  %v5154_v25 = vmul.f32 %v5146_v34, %v11511_v19  ;;  %8923 = vmatprep.mubr.msk.bf16.mxu0 %vm12832_vm2, %v11762_v59  ;;  %8925 = vmatprep.mubr.msk.bf16.mxu1 %vm12833_vm3, %v11762_v59  ;;  %vm12836_vm2 = vcmask 908288   ;;  %vm12837_vm3 = vcmask 900096  }
 0x5de   :  { %v11628_v49 = vpack.c.bf16 %v5154_v25, %v5153_v50 }
 0x5df   :  { %6260 = vrot.lane.b32.xlu0 %v11604_v58, %s12755_s0  ;;  %6258 = vrot.lane.b32.xlu1 %v11602_v38, %s12755_s0 }
 0x5e3   :  { %6044 = vrot.lane.b32.xlu0 %v11604_v58, %s12711_s18  ;;  %6042 = vrot.lane.b32.xlu1 %v11602_v38, %s12711_s18 }
 0x5e7   :  { %6116 = vrot.lane.b32.xlu0 %v11604_v58, %s12710_s21  ;;  %6114 = vrot.lane.b32.xlu1 %v11602_v38, %s12710_s21 }
 0x5eb   :  { %6262 = vrot.lane.b32.xlu0 %v11628_v49, %s12755_s0  ;;  %6190 = vrot.lane.b32.xlu1 %v11628_v49, %s12754_s14 }
 0x5ef   :  { %5900 = vrot.lane.b32.xlu0 %v11604_v58, %s12756_s22  ;;  %5898 = vrot.lane.b32.xlu1 %v11602_v38, %s12756_s22 }
 0x5f3   :  { %5972 = vrot.lane.b32.xlu0 %v11604_v58, %s12757_s15  ;;  %5970 = vrot.lane.b32.xlu1 %v11602_v38, %s12757_s15 }
 0x5f7   :  { %6118 = vrot.lane.b32.xlu0 %v11628_v49, %s12710_s21  ;;  %6046 = vrot.lane.b32.xlu1 %v11628_v49, %s12711_s18 }
 0x5fb   :  { %5756 = vrot.lane.b32.xlu0 %v11604_v58, %s12758_s13  ;;  %5754 = vrot.lane.b32.xlu1 %v11602_v38, %s12758_s13 }
 0x5ff   :  { %5828 = vrot.lane.b32.xlu0 %v11604_v58, %s12744_s23  ;;  %5826 = vrot.lane.b32.xlu1 %v11602_v38, %s12744_s23 }
 0x603   :  { %5974 = vrot.lane.b32.xlu0 %v11628_v49, %s12757_s15  ;;  %5902 = vrot.lane.b32.xlu1 %v11628_v49, %s12756_s22 }
 0x607   :  { %5612 = vrot.lane.b32.xlu0 %v11604_v58, %s12760_s12  ;;  %5610 = vrot.lane.b32.xlu1 %v11602_v38, %s12760_s12 }
 0x60b   :  { %5684 = vrot.lane.b32.xlu0 %v11604_v58, %s12746_s27  ;;  %5682 = vrot.lane.b32.xlu1 %v11602_v38, %s12746_s27 }
 0x60f   :  { %5830 = vrot.lane.b32.xlu0 %v11628_v49, %s12744_s23  ;;  %5758 = vrot.lane.b32.xlu1 %v11628_v49, %s12758_s13 }
 0x613   :  { %5468 = vrot.lane.b32.xlu0 %v11604_v58, %s12743_s2  ;;  %5466 = vrot.lane.b32.xlu1 %v11602_v38, %s12743_s2 }
 0x617   :  { %5540 = vrot.lane.b32.xlu0 %v11604_v58, %s12748_s17  ;;  %5538 = vrot.lane.b32.xlu1 %v11602_v38, %s12748_s17 }
 0x61b   :  { %5686 = vrot.lane.b32.xlu0 %v11628_v49, %s12746_s27  ;;  %5614 = vrot.lane.b32.xlu1 %v11628_v49, %s12760_s12 }
 0x61f   :  { %5324 = vrot.lane.b32.xlu0 %v11604_v58, %s12745_s26  ;;  %5322 = vrot.lane.b32.xlu1 %v11602_v38, %s12745_s26 }
 0x623   :  { %5396 = vrot.lane.b32.xlu0 %v11604_v58, %s12750_s25  ;;  %5394 = vrot.lane.b32.xlu1 %v11602_v38, %s12750_s25 }
 0x627   :  { %5542 = vrot.lane.b32.xlu0 %v11628_v49, %s12748_s17  ;;  %5470 = vrot.lane.b32.xlu1 %v11628_v49, %s12743_s2 }
 0x62b   :  { %5252 = vrot.lane.b32.xlu0 %v11604_v58, %s12749_s24  ;;  %5250 = vrot.lane.b32.xlu1 %v11602_v38, %s12749_s24 }
 0x62f   :  { %5398 = vrot.lane.b32.xlu0 %v11628_v49, %s12750_s25  ;;  %5326 = vrot.lane.b32.xlu1 %v11628_v49, %s12745_s26 }
 0x633   :  { %6906 = vrot.lane.b32.xlu0 %v11602_v38, %s12751_s20  ;;  %5254 = vrot.lane.b32.xlu1 %v11628_v49, %s12749_s24 }
 0x637   :  { %6762 = vrot.lane.b32.xlu0 %v11602_v38, %s12737_s16  ;;  %6908 = vrot.lane.b32.xlu1 %v11604_v58, %s12751_s20 }
 0x63b   :  { %6834 = vrot.lane.b32.xlu0 %v11602_v38, %s12738_s19  ;;  %6764 = vrot.lane.b32.xlu1 %v11604_v58, %s12737_s16 }
 0x63f   :  { %6910 = vrot.lane.b32.xlu0 %v11628_v49, %s12751_s20  ;;  %6836 = vrot.lane.b32.xlu1 %v11604_v58, %s12738_s19 }
 0x643   :  { %6620 = vrot.lane.b32.xlu0 %v11604_v58, %s12739_s28  ;;  %6618 = vrot.lane.b32.xlu1 %v11602_v38, %s12739_s28 }
 0x647   :  { %6692 = vrot.lane.b32.xlu0 %v11604_v58, %s12830_s9  ;;  %6690 = vrot.lane.b32.xlu1 %v11602_v38, %s12830_s9 }
 0x64b   :  { %6838 = vrot.lane.b32.xlu0 %v11628_v49, %s12738_s19  ;;  %6766 = vrot.lane.b32.xlu1 %v11628_v49, %s12737_s16 }
 0x64d   :  { %v6189_v21 = vpop.permute.xlu0 %6188  ;;  %v6187_v19 = vpop.permute.xlu1 %6186 }
 0x64e   :  { %v6197_v27 = vrot.slane %v6189_v21, 4  ;;  %v6196_v32 = vrot.slane %v6187_v19, 4 }
 0x64f   :  { %6476 = vrot.lane.b32.xlu0 %v11604_v58, %s12740_s29  ;;  %6474 = vrot.lane.b32.xlu1 %v11602_v38, %s12740_s29 }
 0x650   :  { %v6201_v7 = vsel %vm132_vm0, %v6196_v32, %v6197_v27 }
 0x651   :  { %v6261_v22 = vpop.permute.xlu0 %6260  ;;  %v6259_v4 = vpop.permute.xlu1 %6258  ;;  %v6202_v20 = vsel %vm3463_vm9, %v6187_v19, %v6201_v7 }
 0x652   :  { %v6269_v6 = vrot.slane %v6261_v22, 4  ;;  %v6268_v0 = vrot.slane %v6259_v4, 4 }
 0x653   :  { %6548 = vrot.lane.b32.xlu0 %v11604_v58, %s12831_s11  ;;  %6546 = vrot.lane.b32.xlu1 %v11602_v38, %s12831_s11 }
 0x654   :  { %v6273_v45 = vsel %vm132_vm0, %v6268_v0, %v6269_v6 }
 0x655   :  { %v6274_v36 = vsel %vm1047_vm11, %v6259_v4, %v6273_v45  ;;  %v11742_v43 = vpop.permute.xlu0 %6044  ;;  %v6043_v41 = vpop.permute.xlu1 %6042 }
 0x656   :  { %v8874_v44 = vcombine.low %v6202_v20, %v6274_v36  ;;  %v6053_v42 = vrot.slane %v11742_v43, 4  ;;  %v6052_v18 = vrot.slane %v6043_v41, 4  ;;  %v8875_v17 = vcombine.high %v6202_v20, %v6274_v36 }
 0x657   :  { %6694 = vrot.lane.b32.xlu0 %v11628_v49, %s12830_s9  ;;  %6622 = vrot.lane.b32.xlu1 %v11628_v49, %s12739_s28 }
 0x658   :  { %7578 = vmatprep.subr.bf16.mxu0 %v8875_v17  ;;  %v6057_v28 = vsel %vm132_vm0, %v6052_v18, %v6053_v42 }
 0x659   :  { %v11749_v52 = vpop.permute.xlu0 %6116  ;;  %7579 = vmatpush1.bf16.msra.mxu0 %v8874_v44  ;;  %v6115_v57 = vpop.permute.xlu1 %6114  ;;  %v6058_v9 = vsel %vm881_vm13, %v6043_v41, %v6057_v28 }
 0x65a   :  { %v6125_v63 = vrot.slane %v11749_v52, 4  ;;  %v6124_v62 = vrot.slane %v6115_v57, 4 }
 0x65b   :  { %6332 = vrot.lane.b32.xlu0 %v11604_v58, %s12741_s1  ;;  %6330 = vrot.lane.b32.xlu1 %v11602_v38, %s12741_s1 }
 0x65c   :  { %v6129_v5 = vsel %vm132_vm0, %v6124_v62, %v6125_v63 }
 0x65d   :  { %v6130_v55 = vsel %vm964_vm12, %v6115_v57, %v6129_v5  ;;  %v11775_v16 = vpop.permute.xlu0 %6262  ;;  %v11777_v26 = vpop.permute.xlu1 %6190 }
 0x65e   :  { %v8866_v34 = vcombine.low %v6058_v9, %v6130_v55  ;;  %v12682_v50 = vrot.slane %v11775_v16, 4  ;;  %v12679_v25 = vrot.slane %v11777_v26, 4  ;;  %v8867_v19 = vcombine.high %v6058_v9, %v6130_v55 }
 0x65f   :  { %6404 = vrot.lane.b32.xlu0 %v11604_v58, %s12742_s30  ;;  %6402 = vrot.lane.b32.xlu1 %v11602_v38, %s12742_s30 }
 0x660   :  { %7580 = vmatprep.subr.bf16.mxu0 %v8867_v19  ;;  %v6203_v32 = vsel %vm132_vm0, %v6197_v27, %v12679_v25  ;;  %v6275_v4 = vsel %vm132_vm0, %v6269_v6, %v12682_v50 }
 0x661   :  { %v11791_v7 = vpop.permute.xlu0 %5900  ;;  %7581 = vmatpush1.bf16.msra.mxu0 %v8866_v34  ;;  %v5899_v0 = vpop.permute.xlu1 %5898  ;;  %v6204_v45 = vsel %vm3463_vm9, %v6189_v21, %v6203_v32  ;;  %v6276_v20 = vsel %vm1047_vm11, %v6261_v22, %v6275_v4 }
 0x662   :  { %v5909_v36 = vrot.slane %v11791_v7, 4  ;;  %v5908_v41 = vrot.slane %v5899_v0, 4  ;;  %v8876_v44 = vcombine.low %v6204_v45, %v6276_v20  ;;  %v8877_v18 = vcombine.high %v6204_v45, %v6276_v20 }
 0x663   :  { %6550 = vrot.lane.b32.xlu0 %v11628_v49, %s12831_s11  ;;  %6478 = vrot.lane.b32.xlu1 %v11628_v49, %s12740_s29 }
 0x664   :  { %7619 = vmatprep.subr.bf16.mxu1 %v8877_v18  ;;  %v5913_v17 = vsel %vm132_vm0, %v5908_v41, %v5909_v36 }
 0x665   :  { %v5973_v27 = vpop.permute.xlu0 %5972  ;;  %7620 = vmatpush1.bf16.msra.mxu1 %v8876_v44  ;;  %v5971_v6 = vpop.permute.xlu1 %5970  ;;  %v5914_v28 = vsel %vm12834_vm5, %v5899_v0, %v5913_v17  ;;  %vm12839_vm5 = vcmask 1014784  }
 0x666   :  { %v5981_v21 = vrot.slane %v5973_v27, 4  ;;  %v5980_v57 = vrot.slane %v5971_v6, 4 }
 0x667   :  { %6264 = vrot.lane.b32.xlu0 %v11606_v1, %s12755_s0  ;;  %6192 = vrot.lane.b32.xlu1 %v11606_v1, %s12754_s14 }
 0x668   :  { %v5985_v22 = vsel %vm132_vm0, %v5980_v57, %v5981_v21 }
 0x669   :  { %v5986_v62 = vsel %vm798_vm14, %v5971_v6, %v5985_v22  ;;  %v11808_v5 = vpop.permute.xlu0 %6118  ;;  %v11810_v9 = vpop.permute.xlu1 %6046 }
 0x66a   :  { %v8858_v55 = vcombine.low %v5914_v28, %v5986_v62  ;;  %v12678_v34 = vrot.slane %v11808_v5, 4  ;;  %v12677_v19 = vrot.slane %v11810_v9, 4  ;;  %v8859_v32 = vcombine.high %v5914_v28, %v5986_v62 }
 0x66b   :  { %6406 = vrot.lane.b32.xlu0 %v11628_v49, %s12742_s30  ;;  %6334 = vrot.lane.b32.xlu1 %v11628_v49, %s12741_s1 }
 0x66c   :  { %7582 = vmatprep.subr.bf16.mxu0 %v8859_v32  ;;  %v6059_v4 = vsel %vm132_vm0, %v6053_v42, %v12677_v19  ;;  %v6131_v0 = vsel %vm132_vm0, %v6125_v63, %v12678_v34 }
 0x66d   :  { %v11826_v45 = vpop.permute.xlu0 %5756  ;;  %7583 = vmatpush1.bf16.msra.mxu0 %v8858_v55  ;;  %v5755_v20 = vpop.permute.xlu1 %5754  ;;  %v6060_v41 = vsel %vm881_vm13, %v11742_v43, %v6059_v4  ;;  %v6132_v44 = vsel %vm964_vm12, %v11749_v52, %v6131_v0 }
 0x66e   :  { %v5765_v18 = vrot.slane %v11826_v45, 4  ;;  %v5764_v6 = vrot.slane %v5755_v20, 4  ;;  %v8868_v17 = vcombine.low %v6060_v41, %v6132_v44  ;;  %v8869_v57 = vcombine.high %v6060_v41, %v6132_v44 }
 0x66f   :  { %6120 = vrot.lane.b32.xlu0 %v11606_v1, %s12710_s21  ;;  %6048 = vrot.lane.b32.xlu1 %v11606_v1, %s12711_s18 }
 0x670   :  { %7621 = vmatprep.subr.bf16.mxu1 %v8869_v57  ;;  %v5769_v43 = vsel %vm132_vm0, %v5764_v6, %v5765_v18 }
 0x671   :  { %v5829_v42 = vpop.permute.xlu0 %5828  ;;  %7622 = vmatpush1.bf16.msra.mxu1 %v8868_v17  ;;  %v5827_v63 = vpop.permute.xlu1 %5826  ;;  %v5770_v62 = vsel %vm632_vm1, %v5755_v20, %v5769_v43 }
 0x672   :  { %v5837_v22 = vrot.slane %v5829_v42, 4  ;;  %v5836_v28 = vrot.slane %v5827_v63, 4 }
 0x673   :  { %5976 = vrot.lane.b32.xlu0 %v11606_v1, %s12757_s15  ;;  %5904 = vrot.lane.b32.xlu1 %v11606_v1, %s12756_s22 }
 0x674   :  { %v5841_v52 = vsel %vm132_vm0, %v5836_v28, %v5837_v22 }
 0x675   :  { %v5842_v55 = vsel %vm3102_vm10, %v5827_v63, %v5841_v52  ;;  %v11845_v32 = vpop.permute.xlu0 %5974  ;;  %v11847_v4 = vpop.permute.xlu1 %5902 }
 0x676   :  { %v8850_v0 = vcombine.low %v5770_v62, %v5842_v55  ;;  %v12676_v41 = vrot.slane %v11845_v32, 4  ;;  %v12675_v44 = vrot.slane %v11847_v4, 4  ;;  %v8851_v6 = vcombine.high %v5770_v62, %v5842_v55 }
 0x677   :  { %5832 = vrot.lane.b32.xlu0 %v11606_v1, %s12744_s23  ;;  %5760 = vrot.lane.b32.xlu1 %v11606_v1, %s12758_s13 }
 0x678   :  { %7584 = vmatprep.subr.bf16.mxu0 %v8851_v6  ;;  %v5915_v20 = vsel %vm132_vm0, %v5909_v36, %v12675_v44  ;;  %v5987_v17 = vsel %vm132_vm0, %v5981_v21, %v12676_v41 }
 0x679   :  { %v11861_v57 = vpop.permute.xlu0 %5612  ;;  %7585 = vmatpush1.bf16.msra.mxu0 %v8850_v0  ;;  %v5611_v63 = vpop.permute.xlu1 %5610  ;;  %v5916_v43 = vsel %vm12835_vm15, %v11791_v7, %v5915_v20  ;;  %v5988_v28 = vsel %vm798_vm14, %v5973_v27, %v5987_v17  ;;  %vm12840_vm15 = vcmask 916480  }
 0x67a   :  { %v5621_v52 = vrot.slane %v11861_v57, 4  ;;  %v5620_v62 = vrot.slane %v5611_v63, 4  ;;  %v8860_v55 = vcombine.low %v5916_v43, %v5988_v28  ;;  %v8861_v6 = vcombine.high %v5916_v43, %v5988_v28 }
 0x67b   :  { %5688 = vrot.lane.b32.xlu0 %v11606_v1, %s12746_s27  ;;  %5616 = vrot.lane.b32.xlu1 %v11606_v1, %s12760_s12 }
 0x67c   :  { %7623 = vmatprep.subr.bf16.mxu1 %v8861_v6  ;;  %v5625_v0 = vsel %vm132_vm0, %v5620_v62, %v5621_v52 }
 0x67d   :  { %v5685_v36 = vpop.permute.xlu0 %5684  ;;  %7624 = vmatpush1.bf16.msra.mxu1 %v8860_v55  ;;  %v5683_v21 = vpop.permute.xlu1 %5682  ;;  %v5626_v17 = vsel %vm12836_vm2, %v5611_v63, %v5625_v0 }
 0x67e   :  { %v5693_v7 = vrot.slane %v5685_v36, 4  ;;  %v5692_v20 = vrot.slane %v5683_v21, 4 }
 0x67f   :  { %5544 = vrot.lane.b32.xlu0 %v11606_v1, %s12748_s17  ;;  %5472 = vrot.lane.b32.xlu1 %v11606_v1, %s12743_s2  ;;  %s12938_s17 = sld [smem:[#allocation25_spill]] }
 0x680   :  { %v5697_v27 = vsel %vm132_vm0, %v5692_v20, %v5693_v7 }
 0x681   :  { %v5698_v43 = vsel %vm12837_vm3, %v5683_v21, %v5697_v27  ;;  %v11879_v28 = vpop.permute.xlu0 %5830  ;;  %v11881_v55 = vpop.permute.xlu1 %5758 }
 0x682   :  { %v8842_v6 = vcombine.low %v5626_v17, %v5698_v43  ;;  %v8843_v62 = vcombine.high %v5626_v17, %v5698_v43  ;;  %v12681_v44 = vrot.slane %v11879_v28, 4  ;;  %v12680_v41 = vrot.slane %v11881_v55, 4 }
 0x683   :  { %5400 = vrot.lane.b32.xlu0 %v11606_v1, %s12750_s25  ;;  %5328 = vrot.lane.b32.xlu1 %v11606_v1, %s12745_s26  ;;  %s12930_s25 = sld [smem:[#allocation21_spill]] }
 0x684   :  { %v5843_v63 = vsel %vm132_vm0, %v5837_v22, %v12681_v44  ;;  %v5771_v21 = vsel %vm132_vm0, %v5765_v18, %v12680_v41  ;;  %7586 = vmatprep.subr.bf16.mxu0 %v8843_v62  ;;  %v12838_v22 = vmov 0.0|0.0   ;;  %s12932_s26 = sld [smem:[#allocation23_spill]] }
 0x685   :  { %v11895_v0 = vpop.permute.xlu0 %5468  ;;  %7587 = vmatpush1.bf16.msra.mxu0 %v8842_v6  ;;  %v5467_v20 = vpop.permute.xlu1 %5466  ;;  %v5772_v27 = vsel %vm632_vm1, %v11826_v45, %v5771_v21  ;;  %v5844_v17 = vsel %vm3102_vm10, %v5829_v42, %v5843_v63 }
 0x686   :  { %v5477_v43 = vrot.slane %v11895_v0, 4  ;;  %v5476_v19 = vrot.slane %v5467_v20, 4  ;;  %v8852_v34 = vcombine.low %v5772_v27, %v5844_v17  ;;  %v8853_v25 = vcombine.high %v5772_v27, %v5844_v17 }
 0x687   :  { %6698 = vrot.lane.b32.xlu0 %v12838_v22, %s12830_s9  ;;  %6482 = vrot.lane.b32.xlu1 %v12838_v22, %s12740_s29 }
 0x688   :  { %7625 = vmatprep.subr.bf16.mxu1 %v8853_v25  ;;  %v5481_v62 = vsel %vm132_vm0, %v5476_v19, %v5477_v43 }
 0x689   :  { %v5541_v18 = vpop.permute.xlu0 %5540  ;;  %7626 = vmatpush1.bf16.msra.mxu1 %v8852_v34  ;;  %v5539_v6 = vpop.permute.xlu1 %5538  ;;  %v5482_v63 = vsel %vm12839_vm5, %v5467_v20, %v5481_v62  ;;  %vm12841_vm5 = vcmask 1031168  }
 0x68a   :  { %v5549_v45 = vrot.slane %v5541_v18, 4  ;;  %v5548_v21 = vrot.slane %v5539_v6, 4 }
 0x68b   :  { %6554 = vrot.lane.b32.xlu0 %v12838_v22, %s12831_s11  ;;  %5256 = vrot.lane.b32.xlu1 %v11606_v1, %s12749_s24 }
 0x68c   :  { %v5553_v42 = vsel %vm132_vm0, %v5548_v21, %v5549_v45 }
 0x68d   :  { %v5554_v27 = vsel %vm12840_vm15, %v5539_v6, %v5553_v42  ;;  %v11913_v25 = vpop.permute.xlu0 %5686  ;;  %v11915_v34 = vpop.permute.xlu1 %5614  ;;  %vm12842_vm15 = vcmask 1022976  }
 0x68e   :  { %v8834_v17 = vcombine.low %v5482_v63, %v5554_v27  ;;  %v8835_v19 = vcombine.high %v5482_v63, %v5554_v27  ;;  %v12684_v41 = vrot.slane %v11913_v25, 4  ;;  %v12683_v44 = vrot.slane %v11915_v34, 4 }
 0x68f   :  { %6768 = vrot.lane.b32.xlu0 %v11606_v1, %s12737_s16  ;;  %6912 = vrot.lane.b32.xlu1 %v11606_v1, %s12751_s20 }
 0x690   :  { %v5699_v20 = vsel %vm132_vm0, %v5693_v7, %v12684_v41  ;;  %v5627_v6 = vsel %vm132_vm0, %v5621_v52, %v12683_v44  ;;  %7588 = vmatprep.subr.bf16.mxu0 %v8835_v19 }
 0x691   :  { %v11929_v62 = vpop.permute.xlu0 %5324  ;;  %7589 = vmatpush1.bf16.msra.mxu0 %v8834_v17  ;;  %v5323_v21 = vpop.permute.xlu1 %5322  ;;  %v5628_v42 = vsel %vm12836_vm2, %v11861_v57, %v5627_v6  ;;  %v5700_v63 = vsel %vm12837_vm3, %v5685_v36, %v5699_v20  ;;  %vm12843_vm2 = vcmask 1014784   ;;  %vm12844_vm3 = vcmask 916480  }
 0x692   :  { %v5333_v27 = vrot.slane %v11929_v62, 4  ;;  %v5332_v50 = vrot.slane %v5323_v21, 4  ;;  %v8844_v56 = vcombine.low %v5628_v42, %v5700_v63  ;;  %v8845_v24 = vcombine.high %v5628_v42, %v5700_v63 }
 0x693   :  { %6696 = vrot.lane.b32.xlu0 %v11606_v1, %s12830_s9  ;;  %6840 = vrot.lane.b32.xlu1 %v11606_v1, %s12738_s19  ;;  %s12933_s9 = sld [smem:[#allocation24_spill]] }
 0x694   :  { %7627 = vmatprep.subr.bf16.mxu1 %v8845_v24  ;;  %v5337_v17 = vsel %vm132_vm0, %v5332_v50, %v5333_v27 }
 0x695   :  { %v5397_v52 = vpop.permute.xlu0 %5396  ;;  %7628 = vmatpush1.bf16.msra.mxu1 %v8844_v56  ;;  %v5395_v7 = vpop.permute.xlu1 %5394  ;;  %v5338_v20 = vsel %vm12841_vm5, %v5323_v21, %v5337_v17  ;;  %vm12845_vm5 = vcmask 1039360  }
 0x696   :  { %v5405_v57 = vrot.slane %v5397_v52, 4  ;;  %v5404_v19 = vrot.slane %v5395_v7, 4 }
 0x697   :  { %6552 = vrot.lane.b32.xlu0 %v11606_v1, %s12831_s11  ;;  %6624 = vrot.lane.b32.xlu1 %v11606_v1, %s12739_s28 }
 0x698   :  { %v5409_v36 = vsel %vm132_vm0, %v5404_v19, %v5405_v57 }
 0x699   :  { %v5410_v6 = vsel %vm12842_vm15, %v5395_v7, %v5409_v36  ;;  %v11947_v24 = vpop.permute.xlu0 %5542  ;;  %v11949_v56 = vpop.permute.xlu1 %5470  ;;  %vm12846_vm15 = vcmask 1031168  }
 0x69a   :  { %v8826_v42 = vcombine.low %v5338_v20, %v5410_v6  ;;  %v8827_v50 = vcombine.high %v5338_v20, %v5410_v6  ;;  %v12689_v63 = vrot.slane %v11947_v24, 4  ;;  %v12688_v44 = vrot.slane %v11949_v56, 4 }
 0x69b   :  { %6408 = vrot.lane.b32.xlu0 %v11606_v1, %s12742_s30  ;;  %6480 = vrot.lane.b32.xlu1 %v11606_v1, %s12740_s29  ;;  %s12923_s29 = sld [smem:[#allocation19_spill]] }
 0x69c   :  { %v5555_v21 = vsel %vm132_vm0, %v5549_v45, %v12689_v63  ;;  %v5483_v7 = vsel %vm132_vm0, %v5477_v43, %v12688_v44  ;;  %7590 = vmatprep.subr.bf16.mxu0 %v8827_v50 }
 0x69d   :  { %v5253_v17 = vpop.permute.xlu0 %5252  ;;  %7591 = vmatpush1.bf16.msra.mxu0 %v8826_v42  ;;  %v5251_v19 = vpop.permute.xlu1 %5250  ;;  %v5484_v36 = vsel %vm12843_vm2, %v11895_v0, %v5483_v7  ;;  %v5556_v20 = vsel %vm12844_vm3, %v5541_v18, %v5555_v21  ;;  %vm12847_vm2 = vcmask 1022976   ;;  %vm12848_vm3 = vmmov %vm12845_vm5 }
 0x69e   :  { %v5261_v6 = vrot.slane %v5253_v17, 4  ;;  %v5260_v41 = vrot.slane %v5251_v19, 4  ;;  %v8836_v8 = vcombine.low %v5484_v36, %v5556_v20  ;;  %v8837_v30 = vcombine.high %v5484_v36, %v5556_v20 }
 0x69f   :  { %6410 = vrot.lane.b32.xlu0 %v12838_v22, %s12742_s30  ;;  %6336 = vrot.lane.b32.xlu1 %v11606_v1, %s12741_s1  ;;  %s12929_s30 = sld [smem:[#allocation20_spill]] }
 0x6a0   :  { %v5265_v43 = vsel %vm132_vm0, %v5260_v41, %v5261_v6  ;;  %7629 = vmatprep.subr.bf16.mxu1 %v8837_v30 }
 0x6a1   :  { %v5266_v45 = vsel %vm12845_vm5, %v5251_v19, %v5265_v43  ;;  %v11972_v42 = vpop.permute.xlu0 %5398  ;;  %7630 = vmatpush1.bf16.msra.mxu1 %v8836_v8  ;;  %v11974_v0 = vpop.permute.xlu1 %5326  ;;  %vm12849_vm5 = vcmask 490496  }
 0x6a2   :  { %v8818_v18 = vcombine.low %v11602_v38, %v5266_v45  ;;  %v8819_v50 = vcombine.high %v11602_v38, %v5266_v45  ;;  %v12686_v21 = vrot.slane %v11972_v42, 4  ;;  %v12685_v7 = vrot.slane %v11974_v0, 4  ;;  %v8815_v38 = vld [vmem:[%s12532_s4 + $0x10] sm:$0xff] }
 0x6a3   :  { %6338 = vrot.lane.b32.xlu1 %v12838_v22, %s12741_s1  ;;  %s12931_s1 = sld [smem:[#allocation22_spill]] }
 0x6a4   :  { %v5411_v30 = vsel %vm132_vm0, %v5405_v57, %v12686_v21  ;;  %v5339_v8 = vsel %vm132_vm0, %v5333_v27, %v12685_v7  ;;  %7592 = vmatprep.subr.bf16.mxu0 %v8819_v50 }
 0x6a5   :  { %v6907_v41 = vpop.permute.xlu0 %6906  ;;  %7593 = vmatpush1.bf16.msra.mxu0 %v8818_v18  ;;  %v11991_v19 = vpop.permute.xlu1 %5254  ;;  %v5340_v22 = vsel %vm12846_vm15, %v11929_v62, %v5339_v8  ;;  %v5412_v36 = vsel %vm12847_vm2, %v5397_v52, %v5411_v30  ;;  %vm12850_vm15 = vmmov %vm12849_vm5  ;;  %vm12851_vm2 = vcmask 523264  }
 0x6a6   :  { %v12687_v57 = vrot.slane %v11991_v19, 4  ;;  %v8828_v20 = vcombine.low %v5340_v22, %v5412_v36  ;;  %v8829_v43 = vcombine.high %v5340_v22, %v5412_v36  ;;  %v6916_v7 = vrot.slane %v6907_v41, 4 }
 0x6a7   :  { %7042 = vperm.xlu1 %9212, %v8815_v38  }
 0x6a8   :  { %v5267_v27 = vsel %vm132_vm0, %v5261_v6, %v12687_v57  ;;  %7631 = vmatprep.subr.bf16.mxu1 %v8829_v43 }
 0x6a9   :  { %v6763_v45 = vpop.permute.xlu0 %6762  ;;  %7632 = vmatpush1.bf16.msra.mxu1 %v8828_v20  ;;  %v6909_v18 = vpop.permute.xlu1 %6908  ;;  %v5268_v50 = vsel %vm12848_vm3, %v5253_v17, %v5267_v27  ;;  %vm12852_vm3 = vcmask 515072  }
 0x6aa   :  { %v6917_v21 = vrot.slane %v6909_v18, 4  ;;  %v8820_v62 = vcombine.low %v11604_v58, %v5268_v50  ;;  %v8821_v52 = vcombine.high %v11604_v58, %v5268_v50  ;;  %v6772_v43 = vrot.slane %v6763_v45, 4 }
 0x6ac   :  { %v6921_v30 = vsel %vm132_vm0, %v6916_v7, %v6917_v21  ;;  %7633 = vmatprep.subr.bf16.mxu1 %v8821_v52 }
 0x6ad   :  { %v6835_v8 = vpop.permute.xlu0 %6834  ;;  %7634 = vmatpush1.bf16.msra.mxu1 %v8820_v62  ;;  %v6765_v38 = vpop.permute.xlu1 %6764  ;;  %v6922_v6 = vsel %vm12849_vm5, %v6907_v41, %v6921_v30  ;;  %vm12855_vm5 = vmmov %vm12851_vm2 }
 0x6ae   :  { %v6773_v22 = vrot.slane %v6765_v38, 4  ;;  %v8915_v36 = vcombine.high %v6922_v6, %v6922_v6  ;;  %v8914_v20 = vcombine.low %v6922_v6, %v6922_v6  ;;  %v6844_v50 = vrot.slane %v6835_v8, 4 }
 0x6b0   :  { %8922 = vmatprep.subr.msk.bf16.mxu0 %vm132_vm0, %v8915_v36  ;;  %v7555_v17 = vsel %vm132_vm0, %v8914_v20, 0  ;;  %v6777_v7 = vsel %vm132_vm0, %v6772_v43, %v6773_v22 }
 0x6b1   :  { %v12007_v27 = vpop.permute.xlu0 %6910  ;;  %7601 = vmatpush2.bf16.msra.mxu0 %v7555_v17  ;;  %v6837_v58 = vpop.permute.xlu1 %6836  ;;  %v6778_v20 = vsel %vm4043_vm7, %v6763_v45, %v6777_v7 }
 0x6b2   :  { %v12690_v62 = vrot.slane %v12007_v27, 4  ;;  %v6845_v52 = vrot.slane %v6837_v58, 4 }
 0x6b4   :  { %v6923_v41 = vsel %vm132_vm0, %v6917_v21, %v12690_v62  ;;  %v6849_v30 = vsel %vm132_vm0, %v6844_v50, %v6845_v52 }
 0x6b5   :  { %v12015_v6 = vpop.permute.xlu0 %6620  ;;  %v6619_v36 = vpop.permute.xlu1 %6618  ;;  %v6850_v17 = vsel %vm4116_vm6, %v6835_v8, %v6849_v30  ;;  %v6924_v57 = vsel %vm12850_vm15, %v6909_v18, %v6923_v41  ;;  %vm12856_vm15 = vmmov %vm12852_vm3 }
 0x6b6   :  { %v6629_v43 = vrot.slane %v12015_v6, 4  ;;  %v6628_v44 = vrot.slane %v6619_v36, 4  ;;  %v8906_v63 = vcombine.low %v6778_v20, %v6850_v17  ;;  %v8907_v15 = vcombine.high %v6778_v20, %v6850_v17 }
 0x6b7   :  { %v8917_v10 = vcombine.high %v6924_v57, %v6924_v57  ;;  %v8916_v29 = vcombine.low %v6924_v57, %v6924_v57 }
 0x6b8   :  { %7602 = vmatprep.subr.bf16.mxu0 %v8907_v15  ;;  %v6633_v45 = vsel %vm132_vm0, %v6628_v44, %v6629_v43 }
 0x6b9   :  { %8924 = vmatprep.subr.msk.bf16.mxu1 %vm132_vm0, %v8917_v10  ;;  %v6693_v21 = vpop.permute.xlu0 %6692  ;;  %7603 = vmatpush2.bf16.msra.mxu0 %v8906_v63  ;;  %v7561_v50 = vsel %vm132_vm0, %v8916_v29, 0  ;;  %v6691_v62 = vpop.permute.xlu1 %6690  ;;  %v6634_v41 = vsel %vm12851_vm2, %v6619_v36, %v6633_v45  ;;  %vm12857_vm2 = vcmask 646144  }
 0x6ba   :  { %v6701_v8 = vrot.slane %v6693_v21, 4  ;;  %7642 = vmatpush2.bf16.msra.mxu1 %v7561_v50  ;;  %v6700_v18 = vrot.slane %v6691_v62, 4 }
 0x6bc   :  { %v6705_v7 = vsel %vm132_vm0, %v6700_v18, %v6701_v8 }
 0x6bd   :  { %v6706_v30 = vsel %vm12852_vm3, %v6691_v62, %v6705_v7  ;;  %v12027_v57 = vpop.permute.xlu0 %6838  ;;  %v12029_v15 = vpop.permute.xlu1 %6766  ;;  %vm12858_vm3 = vcmask 637952  }
 0x6be   :  { %12853 = vst [vmem:[#allocation16_spill] sm:$0xff] %v12027_v57  ;;  %v8898_v10 = vcombine.low %v6634_v41, %v6706_v30  ;;  %v8899_v63 = vcombine.high %v6634_v41, %v6706_v30  ;;  %v12691_v29 = vrot.slane %v12027_v57, 4  ;;  %v12694_v20 = vrot.slane %v12029_v15, 4 }
 0x6c0   :  { %v6851_v44 = vsel %vm132_vm0, %v6845_v52, %v12691_v29  ;;  %v6779_v36 = vsel %vm132_vm0, %v6773_v22, %v12694_v20  ;;  %7604 = vmatprep.subr.bf16.mxu0 %v8899_v63 }
 0x6c1   :  { %v6477_v62 = vpop.permute.xlu0 %6476  ;;  %7605 = vmatpush2.bf16.msra.mxu0 %v8898_v10  ;;  %v6475_v17 = vpop.permute.xlu1 %6474  ;;  %v6780_v50 = vsel %vm4043_vm7, %v6765_v38, %v6779_v36  ;;  %v6852_v45 = vsel %vm4116_vm6, %v6837_v58, %v6851_v44 }
 0x6c2   :  { %v6485_v18 = vrot.slane %v6477_v62, 4  ;;  %v6484_v7 = vrot.slane %v6475_v17, 4  ;;  %v8908_v41 = vcombine.low %v6780_v50, %v6852_v45  ;;  %v8909_v30 = vcombine.high %v6780_v50, %v6852_v45 }
 0x6c4   :  { %7643 = vmatprep.subr.bf16.mxu1 %v8909_v30  ;;  %v6489_v29 = vsel %vm132_vm0, %v6484_v7, %v6485_v18 }
 0x6c5   :  { %v6549_v23 = vpop.permute.xlu0 %6548  ;;  %7644 = vmatpush2.bf16.msra.mxu1 %v8908_v41  ;;  %v6547_v52 = vpop.permute.xlu1 %6546  ;;  %v6490_v10 = vsel %vm1296_vm8, %v6475_v17, %v6489_v29 }
 0x6c6   :  { %v6557_v57 = vrot.slane %v6549_v23, 4  ;;  %v6556_v22 = vrot.slane %v6547_v52, 4 }
 0x6c8   :  { %v6561_v63 = vsel %vm132_vm0, %v6556_v22, %v6557_v57 }
 0x6c9   :  { %v6562_v38 = vsel %vm3824_vm4, %v6547_v52, %v6561_v63  ;;  %v12045_v36 = vpop.permute.xlu0 %6694  ;;  %v12047_v58 = vpop.permute.xlu1 %6622 }
 0x6ca   :  { %12854 = vst [vmem:[#allocation14_spill] sm:$0xff] %v12047_v58  ;;  %v8890_v44 = vcombine.low %v6490_v10, %v6562_v38  ;;  %v8891_v50 = vcombine.high %v6490_v10, %v6562_v38  ;;  %v12695_v45 = vrot.slane %v12045_v36, 4  ;;  %v12696_v41 = vrot.slane %v12047_v58, 4 }
 0x6cc   :  { %v6707_v7 = vsel %vm132_vm0, %v6701_v8, %v12695_v45  ;;  %v6635_v29 = vsel %vm132_vm0, %v6629_v43, %v12696_v41  ;;  %7606 = vmatprep.subr.bf16.mxu0 %v8891_v50 }
 0x6cd   :  { %v12057_v17 = vpop.permute.xlu0 %6332  ;;  %7607 = vmatpush2.bf16.msra.mxu0 %v8890_v44  ;;  %v6331_v30 = vpop.permute.xlu1 %6330  ;;  %v6636_v52 = vsel %vm12855_vm5, %v12015_v6, %v6635_v29  ;;  %v6708_v22 = vsel %vm12856_vm15, %v6693_v21, %v6707_v7  ;;  %vm12862_vm5 = vcmask 588800   ;;  %vm12863_vm15 = vmmov %vm12857_vm2 }
 0x6ce   :  { %v6341_v63 = vrot.slane %v12057_v17, 4  ;;  %v6340_v10 = vrot.slane %v6331_v30, 4  ;;  %v8900_v38 = vcombine.low %v6636_v52, %v6708_v22  ;;  %v8901_v20 = vcombine.high %v6636_v52, %v6708_v22 }
 0x6d0   :  { %7645 = vmatprep.subr.bf16.mxu1 %v8901_v20  ;;  %v6345_v43 = vsel %vm132_vm0, %v6340_v10, %v6341_v63 }
 0x6d1   :  { %v6405_v8 = vpop.permute.xlu0 %6404  ;;  %7646 = vmatpush2.bf16.msra.mxu1 %v8900_v38  ;;  %v6403_v45 = vpop.permute.xlu1 %6402  ;;  %v6346_v58 = vsel %vm12857_vm2, %v6331_v30, %v6345_v43  ;;  %vm12877_vm2 = vcmask 908288  }
 0x6d2   :  { %v6413_v50 = vrot.slane %v6405_v8, 4  ;;  %v6412_v41 = vrot.slane %v6403_v45, 4 }
 0x6d4   :  { %v6417_v44 = vsel %vm132_vm0, %v6412_v41, %v6413_v50 }
 0x6d5   :  { %v6418_v6 = vsel %vm12858_vm3, %v6403_v45, %v6417_v44  ;;  %v12067_v21 = vpop.permute.xlu0 %6550  ;;  %v12069_v7 = vpop.permute.xlu1 %6478  ;;  %v12081_v45 = vcombine.low %v11754_v12, %v11754_v12 }
 0x6d6   :  { %12859 = vst [vmem:[#allocation15_spill] sm:$0xff] %v12067_v21  ;;  %v8882_v29 = vcombine.low %v6346_v58, %v6418_v6  ;;  %v8883_v52 = vcombine.high %v6346_v58, %v6418_v6  ;;  %v12701_v20 = vrot.slane %v12067_v21, 4  ;;  %v12702_v22 = vrot.slane %v12069_v7, 4 }
 0x6d8   :  { %v6563_v10 = vsel %vm132_vm0, %v6557_v57, %v12701_v20  ;;  %v6491_v41 = vsel %vm132_vm0, %v6485_v18, %v12702_v22  ;;  %7608 = vmatprep.subr.bf16.mxu0 %v8883_v52  ;;  %v6200_v20 = vrot.slane %v11539_v48, 4  ;;  %v6272_v18 = vrot.slane %v11537_v47, 4 }
 0x6d9   :  { %v6265_v30 = vpop.permute.xlu0 %6264  ;;  %7609 = vmatpush2.bf16.msra.mxu0 %v8882_v29  ;;  %v6193_v58 = vpop.permute.xlu1 %6192  ;;  %v6492_v38 = vsel %vm1296_vm8, %v6477_v62, %v6491_v41  ;;  %v6564_v43 = vsel %vm3824_vm4, %v6549_v23, %v6563_v10  ;;  %v12860_v52 = vrot.slane %v11775_v16, 4  ;;  %v12861_v22 = vrot.slane %v11777_v26, 4 }
 0x6da   :  { %v6271_v44 = vrot.slane %v6265_v30, 4  ;;  %v6199_v6 = vrot.slane %v6193_v58, 4  ;;  %v8892_v21 = vcombine.low %v6492_v38, %v6564_v43  ;;  %v8893_v57 = vcombine.high %v6492_v38, %v6564_v43 }
 0x6dc   :  { %v6277_v12 = vsel %vm132_vm0, %v12860_v52, %v6271_v44  ;;  %v6205_v29 = vsel %vm132_vm0, %v12861_v22, %v6199_v6  ;;  %7611 = vmatmul.mubr.bf16.vlgmr.msra.gmra.mxu0 %v12081_v45  ;;  %v6279_v23 = vsel %vm132_vm0, %v6271_v44, %v6272_v18  ;;  %v6207_v62 = vsel %vm132_vm0, %v6199_v6, %v6200_v20 }
 0x6dd   :  { %7647 = vmatprep.subr.bf16.mxu1 %v8893_v57  ;;  %v12096_v10 = vpop.permute.xlu0 %6406  ;;  %v12098_v48 = vpop.permute.xlu1 %6334  ;;  %v6206_v47 = vsel %vm3463_vm9, %v11777_v26, %v6205_v29  ;;  %v6278_v41 = vsel %vm1047_vm11, %v11775_v16, %v6277_v12  ;;  %8927 = vmatprep.mubr.msk.bf16.mxu0 %vm12862_vm5, %v11762_v59  ;;  %v6280_v44 = vsel %vm1047_vm11, %v6265_v30, %v6279_v23  ;;  %v6128_v57 = vrot.slane %v11541_v2, 4  ;;  %vm12864_vm11 = vmmov %vm12858_vm3 }
 0x6de   :  { %v6414_v38 = vrot.slane %v12096_v10, 4  ;;  %7648 = vmatpush2.bf16.msra.mxu1 %v8892_v21  ;;  %v6342_v22 = vrot.slane %v12098_v48, 4  ;;  %v8878_v20 = vcombine.low %v6206_v47, %v6278_v41  ;;  %v8879_v43 = vcombine.high %v6206_v47, %v6278_v41 }
 0x6df   :  { %v6208_v6 = vsel %vm3463_vm9, %v6193_v58, %v6207_v62  ;;  %v6056_v21 = vrot.slane %v11543_v54, 4  ;;  %v12866_v47 = vrot.slane %v11810_v9, 4  ;;  %vm12869_vm9 = vcmask 785408  }
 0x6e0   :  { %v6419_v26 = vsel %vm132_vm0, %v6413_v50, %v6414_v38  ;;  %v6347_v16 = vsel %vm132_vm0, %v6341_v63, %v6342_v22  ;;  %7660 = vmatprep.subr.bf16.mxu0 %v8879_v43  ;;  %v8881_v62 = vcombine.high %v6208_v6, %v6280_v44  ;;  %v12865_v63 = vrot.slane %v11808_v5, 4 }
 0x6e1   :  { %v6121_v18 = vpop.permute.xlu0 %6120  ;;  %v6049_v52 = vpop.permute.xlu1 %6048  ;;  %v6348_v30 = vsel %vm12863_vm15, %v12057_v17, %v6347_v16  ;;  %v6420_v58 = vsel %vm12864_vm11, %v6405_v8, %v6419_v26  ;;  %7661 = vmatpush1.bf16.msra.mxu0 %v8878_v20  ;;  %vm12882_vm3 = vcmask 916480  }
 0x6e2   :  { %v6127_v12 = vrot.slane %v6121_v18, 4  ;;  %v6055_v29 = vrot.slane %v6049_v52, 4  ;;  %v8884_v50 = vcombine.low %v6348_v30, %v6420_v58  ;;  %v8885_v23 = vcombine.high %v6348_v30, %v6420_v58  ;;  %vm12885_vm11 = vmmov %vm12882_vm3 }
 0x6e3   :  { %v5912_v30 = vrot.slane %v11547_v40, 4  ;;  %v5984_v58 = vrot.slane %v11545_v60, 4  ;;  %v5768_v60 = vrot.slane %v11551_v13, 4 }
 0x6e4   :  { %v6133_v54 = vsel %vm132_vm0, %v12865_v63, %v6127_v12  ;;  %v6135_v2 = vsel %vm132_vm0, %v6127_v12, %v6128_v57  ;;  %v6061_v41 = vsel %vm132_vm0, %v12866_v47, %v6055_v29  ;;  %v6063_v17 = vsel %vm132_vm0, %v6055_v29, %v6056_v21  ;;  %7649 = vmatprep.subr.bf16.mxu1 %v8885_v23 }
 0x6e5   :  { %v6136_v8 = vsel %vm964_vm12, %v6121_v18, %v6135_v2  ;;  %v6064_v20 = vsel %vm881_vm13, %v6049_v52, %v6063_v17  ;;  %v5977_v43 = vpop.permute.xlu0 %5976  ;;  %7650 = vmatpush2.bf16.msra.mxu1 %v8884_v50  ;;  %v5905_v26 = vpop.permute.xlu1 %5904  ;;  %v6062_v16 = vsel %vm881_vm13, %v11810_v9, %v6061_v41  ;;  %v6134_v57 = vsel %vm964_vm12, %v11808_v5, %v6133_v54  ;;  %vm12870_vm12 = vmmov %vm12869_vm9 }
 0x6e6   :  { %v5983_v12 = vrot.slane %v5977_v43, 4  ;;  %v5911_v21 = vrot.slane %v5905_v26, 4  ;;  %7701 = vmatprep.subr.bf16.mxu1 %v8881_v62  ;;  %v8880_v29 = vcombine.low %v6208_v6, %v6280_v44  ;;  %v8873_v18 = vcombine.high %v6064_v20, %v6136_v8  ;;  %vm12871_vm13 = vmmov %vm12862_vm5 }
 0x6e7   :  { %v8870_v23 = vcombine.low %v6062_v16, %v6134_v57  ;;  %v8871_v52 = vcombine.high %v6062_v16, %v6134_v57  ;;  %v12867_v50 = vrot.slane %v11845_v32, 4  ;;  %v12868_v2 = vrot.slane %v11847_v4, 4 }
 0x6e8   :  { %v5991_v9 = vsel %vm132_vm0, %v5983_v12, %v5984_v58  ;;  %v5919_v40 = vsel %vm132_vm0, %v5911_v21, %v5912_v30  ;;  %7652 = vmatmul.mubr.bf16.vlgmr.msra.gmra.mxu1 %v12081_v45  ;;  %v5840_v47 = vrot.slane %v11549_v33, 4  ;;  %v8872_v57 = vcombine.low %v6064_v20, %v6136_v8 }
 0x6e9   :  { %v5989_v63 = vsel %vm132_vm0, %v12867_v50, %v5983_v12  ;;  %v5917_v5 = vsel %vm132_vm0, %v12868_v2, %v5911_v21  ;;  %v5992_v44 = vsel %vm798_vm14, %v5977_v43, %v5991_v9  ;;  %v5920_v6 = vsel %vm12869_vm9, %v5905_v26, %v5919_v40  ;;  %7662 = vmatprep.subr.bf16.mxu0 %v8871_v52  ;;  %v5833_v62 = vpop.permute.xlu0 %5832  ;;  %v5761_v54 = vpop.permute.xlu1 %5760 }
 0x6ea   :  { %7702 = vmatpush1.bf16.msra.mxu1 %v8880_v29  ;;  %v5839_v41 = vrot.slane %v5833_v62, 4  ;;  %7663 = vmatpush1.bf16.msra.mxu0 %v8870_v23  ;;  %v5767_v17 = vrot.slane %v5761_v54, 4  ;;  %v5918_v16 = vsel %vm12870_vm12, %v11847_v4, %v5917_v5  ;;  %v8865_v30 = vcombine.high %v5920_v6, %v5992_v44 }
 0x6eb   :  { %7703 = vmatprep.subr.bf16.mxu1 %v8873_v18  ;;  %v5990_v13 = vsel %vm798_vm14, %v11845_v32, %v5989_v63  ;;  %8929 = vmatprep.mubr.msk.bf16.mxu1 %vm12871_vm13, %v11762_v59  ;;  %v12872_v43 = vrot.slane %v11879_v28, 4  ;;  %v12873_v58 = vrot.slane %v11881_v55, 4  ;;  %v5624_v18 = vrot.slane %v11555_v11, 4 }
 0x6ec   :  { %v5847_v33 = vsel %vm132_vm0, %v5839_v41, %v5840_v47  ;;  %v5775_v4 = vsel %vm132_vm0, %v5767_v17, %v5768_v60  ;;  %v8862_v32 = vcombine.low %v5918_v16, %v5990_v13  ;;  %v8863_v21 = vcombine.high %v5918_v16, %v5990_v13 }
 0x6ed   :  { %v5845_v26 = vsel %vm132_vm0, %v12872_v43, %v5839_v41  ;;  %v5773_v12 = vsel %vm132_vm0, %v12873_v58, %v5767_v17  ;;  %v5848_v8 = vsel %vm3102_vm10, %v5833_v62, %v5847_v33  ;;  %v5776_v20 = vsel %vm632_vm1, %v5761_v54, %v5775_v4  ;;  %v5689_v29 = vpop.permute.xlu0 %5688  ;;  %v5617_v59 = vpop.permute.xlu1 %5616 }
 0x6ee   :  { %7704 = vmatpush1.bf16.msra.mxu1 %v8872_v57  ;;  %v5696_v23 = vrot.slane %v11553_v14, 4  ;;  %v5695_v52 = vrot.slane %v5689_v29, 4  ;;  %v5623_v50 = vrot.slane %v5617_v59, 4  ;;  %v8864_v63 = vcombine.low %v5920_v6, %v5992_v44  ;;  %7664 = vmatprep.subr.bf16.mxu0 %v8863_v21 }
 0x6ef   :  { %7705 = vmatprep.subr.bf16.mxu1 %v8865_v30  ;;  %v8857_v9 = vcombine.high %v5776_v20, %v5848_v8  ;;  %v5774_v2 = vsel %vm632_vm1, %v11881_v55, %v5773_v12  ;;  %v5846_v5 = vsel %vm3102_vm10, %v11879_v28, %v5845_v26  ;;  %v12874_v40 = vrot.slane %v11913_v25, 4  ;;  %7665 = vmatpush1.bf16.msra.mxu0 %v8862_v32  ;;  %vm12878_vm1 = vmmov %vm12877_vm2 }
 0x6f0   :  { %v5703_v11 = vsel %vm132_vm0, %v5695_v52, %v5696_v23  ;;  %v12875_v14 = vrot.slane %v11915_v34, 4  ;;  %v5631_v44 = vsel %vm132_vm0, %v5623_v50, %v5624_v18  ;;  %vm12876_vm14 = vcmask 900096  }
 0x6f1   :  { %v5701_v60 = vsel %vm132_vm0, %v12874_v40, %v5695_v52  ;;  %v5704_v6 = vsel %vm12876_vm14, %v5689_v29, %v5703_v11  ;;  %v5632_v55 = vsel %vm12877_vm2, %v5617_v59, %v5631_v44  ;;  %v8854_v54 = vcombine.low %v5774_v2, %v5846_v5  ;;  %v5545_v28 = vpop.permute.xlu0 %5544  ;;  %v5473_v41 = vpop.permute.xlu1 %5472  ;;  %vm12879_vm10 = vmmov %vm12876_vm14 }
 0x6f2   :  { %v5629_v62 = vsel %vm132_vm0, %v12875_v14, %v5623_v50  ;;  %v8855_v47 = vcombine.high %v5774_v2, %v5846_v5  ;;  %7706 = vmatpush1.bf16.msra.mxu1 %v8864_v63  ;;  %v5480_v17 = vrot.slane %v11559_v31, 4  ;;  %v5552_v16 = vrot.slane %v11557_v37, 4 }
 0x6f3   :  { %v5551_v57 = vrot.slane %v5545_v28, 4  ;;  %v5479_v30 = vrot.slane %v5473_v41, 4  ;;  %7707 = vmatprep.subr.bf16.mxu1 %v8857_v9  ;;  %v8856_v13 = vcombine.low %v5776_v20, %v5848_v8  ;;  %v8849_v43 = vcombine.high %v5632_v55, %v5704_v6 }
 0x6f4   :  { %7666 = vmatprep.subr.bf16.mxu0 %v8855_v47  ;;  %v5630_v26 = vsel %vm12878_vm1, %v11915_v34, %v5629_v62  ;;  %v5702_v33 = vsel %vm12879_vm10, %v11913_v25, %v5701_v60  ;;  %v12880_v58 = vrot.slane %v11947_v24, 4  ;;  %v12881_v37 = vrot.slane %v11949_v56, 4 }
 0x6f5   :  { %v5559_v31 = vsel %vm132_vm0, %v5551_v57, %v5552_v16  ;;  %7667 = vmatpush1.bf16.msra.mxu0 %v8854_v54  ;;  %v5487_v8 = vsel %vm132_vm0, %v5479_v30, %v5480_v17  ;;  %vm12883_vm5 = vcmask 1014784   ;;  %v8846_v32 = vcombine.low %v5630_v26, %v5702_v33  ;;  %v5401_v25 = vpop.permute.xlu0 %5400  ;;  %v5329_v29 = vpop.permute.xlu1 %5328 }
 0x6f6   :  { %v5557_v12 = vsel %vm132_vm0, %v12880_v58, %v5551_v57  ;;  %v5485_v4 = vsel %vm132_vm0, %v12881_v37, %v5479_v30  ;;  %v5560_v20 = vsel %vm12882_vm3, %v5545_v28, %v5559_v31  ;;  %v5488_v34 = vsel %vm12883_vm5, %v5473_v41, %v5487_v8  ;;  %7708 = vmatpush1.bf16.msra.mxu1 %v8856_v13  ;;  %vm12884_vm15 = vmmov %vm12883_vm5 }
 0x6f7   :  { %v8847_v21 = vcombine.high %v5630_v26, %v5702_v33  ;;  %v5408_v59 = vrot.slane %v11563_v39, 4  ;;  %v5336_v18 = vrot.slane %v11561_v53, 4  ;;  %v5407_v23 = vrot.slane %v5401_v25, 4  ;;  %7709 = vmatprep.subr.bf16.mxu1 %v8849_v43 }
 0x6f8   :  { %v5335_v52 = vrot.slane %v5329_v29, 4  ;;  %v8848_v50 = vcombine.low %v5632_v55, %v5704_v6  ;;  %v8841_v63 = vcombine.high %v5488_v34, %v5560_v20  ;;  %v5486_v9 = vsel %vm12884_vm15, %v11949_v56, %v5485_v4 }
 0x6f9   :  { %7668 = vmatprep.subr.bf16.mxu0 %v8847_v21  ;;  %v5558_v2 = vsel %vm12885_vm11, %v11947_v24, %v5557_v12  ;;  %v12886_v5 = vrot.slane %v11972_v42, 4  ;;  %v5415_v39 = vsel %vm132_vm0, %v5407_v23, %v5408_v59  ;;  %v12887_v53 = vrot.slane %v11974_v0, 4  ;;  %v12214_v24 = vpop.permute.xlu0 %6698  ;;  %v12216_v6 = vpop.permute.xlu1 %6482 }
 0x6fa   :  { %7669 = vmatpush1.bf16.msra.mxu0 %v8846_v32  ;;  %v5343_v11 = vsel %vm132_vm0, %v5335_v52, %v5336_v18  ;;  %vm12888_vm9 = vcmask 1022976   ;;  %vm12889_vm12 = vcmask 1031168   ;;  %v8838_v62 = vcombine.low %v5486_v9, %v5558_v2  ;;  %7710 = vmatpush1.bf16.msra.mxu1 %v8848_v50 }
 0x6fb   :  { %v5413_v40 = vsel %vm132_vm0, %v12886_v5, %v5407_v23  ;;  %v5341_v60 = vsel %vm132_vm0, %v12887_v53, %v5335_v52  ;;  %v5416_v14 = vsel %vm12888_vm9, %v5401_v25, %v5415_v39  ;;  %v5344_v56 = vsel %vm12889_vm12, %v5329_v29, %v5343_v11  ;;  %7711 = vmatprep.subr.bf16.mxu1 %v8841_v63  ;;  %vm12890_vm13 = vmmov %vm12889_vm12 }
 0x6fc   :  { %v8839_v44 = vcombine.high %v5486_v9, %v5558_v2  ;;  %v8840_v55 = vcombine.low %v5488_v34, %v5560_v20  ;;  %v5342_v54 = vsel %vm12890_vm13, %v11974_v0, %v5341_v60  ;;  %vm12891_vm14 = vmmov %vm12888_vm9  ;;  %v8833_v28 = vcombine.high %v5344_v56, %v5416_v14  ;;  %v12899_v60 = vld [vmem:[#allocation16_spill] sm:$0xff] }
 0x6fd   :  { %v5414_v47 = vsel %vm12891_vm14, %v11972_v42, %v5413_v40  ;;  %v12222_v16 = vpop.permute.xlu0 %6554  ;;  %v5257_v57 = vpop.permute.xlu1 %5256  ;;  %v5264_v30 = vrot.slane %v11565_v3, 4  ;;  %v8832_v43 = vcombine.low %v5344_v56, %v5416_v14  ;;  %v12892_v0 = vrot.slane %v11991_v19, 4 }
 0x6fe   :  { %7670 = vmatprep.subr.bf16.mxu0 %v8839_v44  ;;  %v8830_v41 = vcombine.low %v5342_v54, %v5414_v47  ;;  %v8831_v17 = vcombine.high %v5342_v54, %v5414_v47  ;;  %7712 = vmatpush1.bf16.msra.mxu1 %v8840_v55  ;;  %v5263_v13 = vrot.slane %v5257_v57, 4  ;;  %v6920_v33 = vrot.slane %v11569_v35, 4 }
 0x6ff   :  { %7671 = vmatpush1.bf16.msra.mxu0 %v8838_v62  ;;  %7713 = vmatprep.subr.bf16.mxu1 %v8833_v28  ;;  %vm12893_vm2 = vcmask 1039360   ;;  %v6776_v34 = vrot.slane %v11567_v46, 4  ;;  %v6632_v21 = vrot.slane %v11571_v51, 4  ;;  %v12895_v25 = vrot.slane %v12007_v27, 4 }
 0x700   :  { %7672 = vmatprep.subr.bf16.mxu0 %v8831_v17  ;;  %v5269_v26 = vsel %vm132_vm0, %v12892_v0, %v5263_v13  ;;  %v5271_v42 = vsel %vm132_vm0, %v5263_v13, %v5264_v30  ;;  %vm12894_vm1 = vmmov %vm12893_vm2  ;;  %v6848_v59 = vrot.slane %v11573_v61, 4  ;;  %vm12896_vm10 = vcmask 490496  }
 0x701   :  { %v5272_v58 = vsel %vm12893_vm2, %v5257_v57, %v5271_v42  ;;  %v6769_v12 = vpop.permute.xlu0 %6768  ;;  %v6913_v31 = vpop.permute.xlu1 %6912  ;;  %v5270_v3 = vsel %vm12894_vm1, %v11991_v19, %v5269_v26  ;;  %vm12897_vm3 = vmmov %vm12896_vm10  ;;  %v6704_v9 = vrot.slane %v12214_v24, 4  ;;  %v6560_v61 = vrot.slane %v12222_v16, 4  ;;  %v12903_v42 = vld [vmem:[#allocation14_spill] sm:$0xff] }
 0x702   :  { %7714 = vmatpush1.bf16.msra.mxu1 %v8832_v43  ;;  %v8824_v37 = vcombine.low %v11606_v1, %v5272_v58  ;;  %v8825_v4 = vcombine.high %v11606_v1, %v5272_v58  ;;  %v6775_v8 = vrot.slane %v6769_v12, 4  ;;  %v6919_v20 = vrot.slane %v6913_v31, 4 }
 0x703   :  { %7673 = vmatpush1.bf16.msra.mxu0 %v8830_v41  ;;  %v8822_v32 = vcombine.low %v11628_v49, %v5270_v3  ;;  %v8823_v35 = vcombine.high %v11628_v49, %v5270_v3  ;;  %v12898_v40 = vrot.slane %v12029_v15, 4  ;;  %v12900_v11 = vrot.slane %v12899_v60, 4 }
 0x704   :  { %v6925_v29 = vsel %vm132_vm0, %v12895_v25, %v6919_v20  ;;  %v6927_v19 = vsel %vm132_vm0, %v6919_v20, %v6920_v33  ;;  %7715 = vmatprep.subr.bf16.mxu1 %v8825_v4  ;;  %v6783_v1 = vsel %vm132_vm0, %v6775_v8, %v6776_v34  ;;  %v6488_v16 = vrot.slane %v12216_v6, 4 }
 0x705   :  { %v6928_v18 = vsel %vm12896_vm10, %v6913_v31, %v6927_v19  ;;  %7674 = vmatprep.subr.bf16.mxu0 %v8823_v35  ;;  %v6697_v46 = vpop.permute.xlu0 %6696  ;;  %v6841_v23 = vpop.permute.xlu1 %6840  ;;  %v6926_v51 = vsel %vm12897_vm3, %v12007_v27, %v6925_v29  ;;  %v6781_v39 = vsel %vm132_vm0, %v12898_v40, %v6775_v8  ;;  %v6784_v53 = vsel %vm4043_vm7, %v6769_v12, %v6783_v1  ;;  %v12905_v12 = vld [vmem:[#allocation15_spill] sm:$0xff] }
 0x706   :  { %7716 = vmatpush1.bf16.msra.mxu1 %v8824_v37  ;;  %v8920_v49 = vcombine.low %v6928_v18, %v6928_v18  ;;  %v8921_v52 = vcombine.high %v6928_v18, %v6928_v18  ;;  %v6703_v50 = vrot.slane %v6697_v46, 4  ;;  %v6847_v63 = vrot.slane %v6841_v23, 4 }
 0x707   :  { %7675 = vmatpush1.bf16.msra.mxu0 %v8822_v32  ;;  %v8919_v2 = vcombine.high %v6926_v51, %v6926_v51  ;;  %v8918_v5 = vcombine.low %v6926_v51, %v6926_v51  ;;  %v12901_v57 = vrot.slane %v12045_v36, 4  ;;  %v6782_v13 = vsel %vm4043_vm7, %v12029_v15, %v6781_v39 }
 0x708   :  { %v6853_v27 = vsel %vm132_vm0, %v12900_v11, %v6847_v63  ;;  %v6855_v14 = vsel %vm132_vm0, %v6847_v63, %v6848_v59  ;;  %8928 = vmatprep.subr.msk.bf16.mxu1 %vm132_vm0, %v8921_v52  ;;  %v6711_v56 = vsel %vm132_vm0, %v6703_v50, %v6704_v9  ;;  %v7573_v55 = vsel %vm132_vm0, %v8920_v49, 0 }
 0x709   :  { %v6856_v62 = vsel %vm4116_vm6, %v6841_v23, %v6855_v14  ;;  %8926 = vmatprep.subr.msk.bf16.mxu0 %vm132_vm0, %v8919_v2  ;;  %v6553_v44 = vpop.permute.xlu0 %6552  ;;  %v7567_v24 = vsel %vm132_vm0, %v8918_v5, 0  ;;  %v6625_v54 = vpop.permute.xlu1 %6624  ;;  %v6709_v30 = vsel %vm132_vm0, %v12901_v57, %v6703_v50  ;;  %v6854_v43 = vsel %vm4116_vm6, %v12899_v60, %v6853_v27 }
 0x70a   :  { %v8912_v47 = vcombine.low %v6784_v53, %v6856_v62  ;;  %v8913_v28 = vcombine.high %v6784_v53, %v6856_v62  ;;  %v6559_v41 = vrot.slane %v6553_v44, 4  ;;  %7724 = vmatpush2.bf16.msra.mxu1 %v7573_v55  ;;  %v6631_v17 = vrot.slane %v6625_v54, 4 }
 0x70b   :  { %7683 = vmatpush2.bf16.msra.mxu0 %v7567_v24  ;;  %vm12902_vm5 = vcmask 515072   ;;  %v12904_v33 = vrot.slane %v12903_v42, 4  ;;  %v12906_v31 = vrot.slane %v12905_v12, 4  ;;  %vm12907_vm15 = vcmask 523264  }
 0x70c   :  { %v6712_v0 = vsel %vm12902_vm5, %v6697_v46, %v6711_v56  ;;  %v6567_v26 = vsel %vm132_vm0, %v6559_v41, %v6560_v61  ;;  %v6639_v6 = vsel %vm132_vm0, %v6631_v17, %v6632_v21  ;;  %7725 = vmatprep.subr.bf16.mxu1 %v8913_v28  ;;  %v8910_v37 = vcombine.low %v6782_v13, %v6854_v43  ;;  %vm12908_vm6 = vmmov %vm12907_vm15 }
 0x70d   :  { %v6637_v58 = vsel %vm132_vm0, %v12904_v33, %v6631_v17  ;;  %v6565_v3 = vsel %vm132_vm0, %v12906_v31, %v6559_v41  ;;  %v6640_v15 = vsel %vm12907_vm15, %v6625_v54, %v6639_v6  ;;  %v8911_v4 = vcombine.high %v6782_v13, %v6854_v43  ;;  %v6409_v8 = vpop.permute.xlu0 %6408  ;;  %v6481_v20 = vpop.permute.xlu1 %6480  ;;  %vm12909_vm7 = vmmov %vm12902_vm5  ;;  %v12915_v43 = vld [vmem:[#allocation7_spill] sm:$0xff] }
 0x70e   :  { %v8904_v34 = vcombine.low %v6640_v15, %v6712_v0  ;;  %v8905_v32 = vcombine.high %v6640_v15, %v6712_v0  ;;  %v6415_v35 = vrot.slane %v6409_v8, 4  ;;  %7726 = vmatpush2.bf16.msra.mxu1 %v8912_v47  ;;  %v6487_v25 = vrot.slane %v6481_v20, 4 }
 0x70f   :  { %v6568_v29 = vsel %vm3824_vm4, %v6553_v44, %v6567_v26  ;;  %7684 = vmatprep.subr.bf16.mxu0 %v8911_v4  ;;  %v6638_v21 = vsel %vm12908_vm6, %v12903_v42, %v6637_v58  ;;  %v6710_v19 = vsel %vm12909_vm7, %v12045_v36, %v6709_v30  ;;  %v12910_v59 = vrot.slane %v12069_v7, 4  ;;  %v8930_v30 = vld [vmem:[%s12535_s7 + $0x2] ss:$4 sm:$0xff] }
 0x710   :  { %7685 = vmatpush2.bf16.msra.mxu0 %v8910_v37  ;;  %v6495_v18 = vsel %vm132_vm0, %v6487_v25, %v6488_v16  ;;  %v8902_v46 = vcombine.low %v6638_v21, %v6710_v19  ;;  %v6566_v23 = vsel %vm3824_vm4, %v12905_v12, %v6565_v3  ;;  %v6421_v51 = vsel %vm132_vm0, %v6414_v38, %v6415_v35  ;;  %v12917_v58 = vld [vmem:[#allocation8_spill] sm:$0xff]  ;;  %v12918_v37 = vld [vmem:[#allocation9_spill] sm:$0xff] }
 0x711   :  { %v6493_v1 = vsel %vm132_vm0, %v12910_v59, %v6487_v25  ;;  %v6496_v49 = vsel %vm1296_vm8, %v6481_v20, %v6495_v18  ;;  %v8903_v52 = vcombine.high %v6638_v21, %v6710_v19  ;;  %7727 = vmatprep.subr.bf16.mxu1 %v8905_v32  ;;  %v6411_v36 = vpop.permute.xlu0 %6410  ;;  %v6337_v50 = vpop.permute.xlu1 %6336  ;;  %vm12911_vm4 = vcmask 646144   ;;  %v12919_v21 = vld [vmem:[#allocation10_spill] sm:$0xff] }
 0x712   :  { %v6494_v63 = vsel %vm1296_vm8, %v12069_v7, %v6493_v1  ;;  %v8896_v9 = vcombine.low %v6496_v49, %v6568_v29  ;;  %v8897_v61 = vcombine.high %v6496_v49, %v6568_v29  ;;  %v6416_v2 = vrot.slane %v6411_v36, 4  ;;  %7728 = vmatpush2.bf16.msra.mxu1 %v8904_v34  ;;  %vm12913_vm11 = vmmov %vm12911_vm4  ;;  %v12920_v1 = vld [vmem:[#allocation12_spill] sm:$0xff]  ;;  %v12921_v49 = vld [vmem:[#allocation11_spill] sm:$0xff] }
 0x713   :  { %v6343_v5 = vrot.slane %v6337_v50, 4  ;;  %7686 = vmatprep.subr.bf16.mxu0 %v8903_v52  ;;  %v8895_v40 = vcombine.high %v6494_v63, %v6566_v23  ;;  %v8894_v39 = vcombine.low %v6494_v63, %v6566_v23  ;;  %vm12912_vm8 = vcmask 637952  }
 0x714   :  { %7687 = vmatpush2.bf16.msra.mxu0 %v8902_v46  ;;  %7729 = vmatprep.subr.bf16.mxu1 %v8897_v61  ;;  %v6422_v7 = vsel %vm12912_vm8, %v12096_v10, %v6421_v51  ;;  %v6423_v11 = vsel %vm132_vm0, %v6415_v35, %v6416_v2  ;;  %vm12914_vm9 = vmmov %vm12912_vm8  ;;  %v12318_v0 = vrot.slane %v8930_v30, %v12915_v43 }
 0x715   :  { %v6349_v38 = vsel %vm132_vm0, %v6342_v22, %v6343_v5  ;;  %7688 = vmatprep.subr.bf16.mxu0 %v8895_v40  ;;  %v6339_v53 = vpop.permute.xlu1 %6338  ;;  %v6424_v44 = vsel %vm12914_vm9, %v6409_v8, %v6423_v11  ;;  %v12328_v6 = vrot.slane %v8930_v30, %v12917_v58  ;;  %v12339_v4 = vrot.slane %v8930_v30, %v12918_v37 }
 0x716   :  { %v6350_v60 = vsel %vm12911_vm4, %v12098_v48, %v6349_v38  ;;  %7730 = vmatpush2.bf16.msra.mxu1 %v8896_v9  ;;  %v6344_v27 = vrot.slane %v6339_v53, 4  ;;  %v12347_v19 = vrot.slane %v8930_v30, %v12919_v21  ;;  %v12350_v18 = vrot.slane %v8930_v30, %v12920_v1  ;;  %v12922_v9 = vld [vmem:[#allocation13_spill] sm:$0xff] }
 0x717   :  { %v8887_v14 = vcombine.high %v6350_v60, %v6422_v7  ;;  %v8886_v62 = vcombine.low %v6350_v60, %v6422_v7  ;;  %v12356_v52 = vrot.slane %v8930_v30, %v12921_v49  ;;  %v12361_v61 = vrot.slane %v8930_v30, %v12922_v9 }
 0x718   :  { %7689 = vmatpush2.bf16.msra.mxu0 %v8894_v39  ;;  %v6351_v56 = vsel %vm132_vm0, %v6343_v5, %v6344_v27 }
 0x719   :  { %7690 = vmatprep.subr.bf16.mxu0 %v8887_v14  ;;  %v6352_v22 = vsel %vm12913_vm11, %v6337_v50, %v6351_v56 }
 0x71a   :  { %v8888_v24 = vcombine.low %v6352_v22, %v6424_v44  ;;  %v8889_v55 = vcombine.high %v6352_v22, %v6424_v44 }
 0x71c   :  { %7691 = vmatpush2.bf16.msra.mxu0 %v8886_v62  ;;  %7731 = vmatprep.subr.bf16.mxu1 %v8889_v55 }
 0x71d   :  { %7732 = vmatpush2.bf16.msra.mxu1 %v8888_v24 }
 0x71f   :  { %7693 = vmatmul.mubr.bf16.vlgmr.msra.gmra.mxu0 %v12081_v45 }
 0x720   :  { %7734 = vmatmul.mubr.bf16.vlgmr.msra.gmra.mxu1 %v12081_v45  ;;  %v12916_v45 = vld [vmem:[#allocation6_spill] sm:$0xff] }
 0x721   :  { %v12323_v42 = vrot.slane %v8930_v30, %v12916_v45  ;;  %v8931_v30 = vld [vmem:[%s12533_s5 + $0x10] sm:$0xff] }
 0x722   :  { %v7043_v57 = vpop.permute.xlu1 %7042 }
 0x79c   :  { %v7612_v10 = vpop.f32.mrf.mxu0 }
 0x79d   :  { %v12320_v26 = vadd.f32 %v7612_v10, %v7043_v57 }
 0x79e   :  { %v7614_v48 = vpop.f32.mrf.mxu0 }
 0x79f   :  { %v12315_v13 = vadd.f32 %v7614_v48, %v7043_v57  ;;  %v7785_v31 = vmul.f32 %v12323_v42, %v12320_v26 }
 0x7a0   :  { %v7616_v54 = vpop.f32.mrf.mxu0 }
 0x7a1   :  { %v7786_v12 = vmul.f32 %v12318_v0, %v12315_v13  ;;  %v7802_v20 = vmul.f32 %v7785_v31, %v12320_v26 }
 0x7a2   :  { %v7617_v47 = vpop.f32.mrf.mxu0 }
 0x7a3   :  { %v7803_v8 = vmul.f32 %v7786_v12, %v12315_v13  ;;  %v7793_v34 = vadd.f32 %v7786_v12, %v7785_v31 }
 0x7a5   :  { %v7810_v25 = vadd.f32 %v7803_v8, %v7802_v20 }
 0x7a8   :  { %v7653_v28 = vpop.f32.mrf.mxu1 }
 0x7a9   :  { %v12325_v33 = vadd.f32 %v7653_v28, %v7043_v57 }
 0x7aa   :  { %v7655_v41 = vpop.f32.mrf.mxu1 }
 0x7ab   :  { %v7787_v3 = vmul.f32 %v12328_v6, %v12325_v33  ;;  %v12336_v15 = vadd.f32 %v7655_v41, %v7043_v57 }
 0x7ac   :  { %v7657_v17 = vpop.f32.mrf.mxu1 }
 0x7ad   :  { %v7804_v32 = vmul.f32 %v7787_v3, %v12325_v33  ;;  %v7788_v35 = vmul.f32 %v12339_v4, %v12336_v15  ;;  %v7794_v29 = vadd.f32 %v7793_v34, %v7787_v3  ;;  %v7887_v34 = vld [vmem:[%s12923_s29] sm:$0x3] }
 0x7ae   :  { %v7658_v16 = vpop.f32.mrf.mxu1  ;;  %vm7888_vm0 = vcmp.gt.f32.partialorder %v7887_v34, 0.0 }
 0x7af   :  { %v7811_v46 = vadd.f32 %v7810_v25, %v7804_v32  ;;  %v7805_v23 = vmul.f32 %v7788_v35, %v12336_v15  ;;  %v7795_v2 = vadd.f32 %v7794_v29, %v7788_v35  ;;  %v12924_v32 = vmov 0  }
 0x7b0   :  { %v7891_v35 = vsel %vm7888_vm0, 1, %v12924_v32 }
 0x7b1   :  { %v7812_v7 = vadd.f32 %v7811_v46, %v7805_v23  ;;  %v7895_v25 = vrot.slane %v7891_v35, %v12916_v45  ;;  %v7899_v29 = vrot.slane %v7891_v35, %v12915_v43 }
 0x7b3   :  { %vm12389_vm12 = vcmp.eq.s32.totalorder %v7895_v25, 1  ;;  %vm12393_vm13 = vcmp.eq.s32.totalorder %v7899_v29, 1 }
 0x7df   :  { %v7694_v59 = vpop.f32.mrf.mxu0 }
 0x7e0   :  { %v12353_v51 = vadd.f32 %v7694_v59, %v7043_v57  ;;  %v7735_v36 = vpop.f32.mrf.mxu1 }
 0x7e1   :  { %v7696_v50 = vpop.f32.mrf.mxu0  ;;  %v12358_v63 = vadd.f32 %v7735_v36, %v7043_v57 }
 0x7e2   :  { %v7789_v5 = vmul.f32 %v12347_v19, %v12353_v51  ;;  %v7697_v40 = vadd.f32 %v7696_v50, %v7043_v57  ;;  %v7737_v38 = vpop.f32.mrf.mxu1 }
 0x7e3   :  { %v7698_v39 = vpop.f32.mrf.mxu0  ;;  %v7791_v53 = vmul.f32 %v12350_v18, %v12358_v63  ;;  %v7738_v60 = vadd.f32 %v7737_v38, %v7043_v57  ;;  %v8932_v57 = vld [vmem:[%s12534_s6 + $0x10] sm:$0xff] }
 0x7e4   :  { %v7796_v11 = vadd.f32 %v7795_v2, %v7789_v5  ;;  %v7806_v27 = vmul.f32 %v7789_v5, %v12353_v51  ;;  %v7790_v14 = vmul.f32 %v12356_v52, %v7697_v40  ;;  %v7739_v56 = vpop.f32.mrf.mxu1 }
 0x7e5   :  { %v7699_v62 = vpop.f32.mrf.mxu0  ;;  %v7792_v22 = vmul.f32 %v12361_v61, %v7738_v60  ;;  %v7808_v10 = vmul.f32 %v7791_v53, %v12358_v63 }
 0x7e6   :  { %v7813_v44 = vadd.f32 %v7812_v7, %v7806_v27  ;;  %v7797_v24 = vadd.f32 %v7796_v11, %v7790_v14  ;;  %v7807_v55 = vmul.f32 %v7790_v14, %v7697_v40  ;;  %v7740_v48 = vpop.f32.mrf.mxu1 }
 0x7e7   :  { %v7809_v47 = vmul.f32 %v7792_v22, %v7738_v60 }
 0x7e8   :  { %v7814_v54 = vadd.f32 %v7813_v44, %v7807_v55  ;;  %v7798_v28 = vadd.f32 %v7797_v24, %v7791_v53 }
 0x7ea   :  { %v7799_v41 = vadd.f32 %v7798_v28, %v7792_v22  ;;  %v7815_v17 = vadd.f32 %v7814_v54, %v7808_v10 }
 0x7ec   :  { %7800 = vadd.xlane.f32.xlu0 %v7799_v41  ;;  %v7816_v16 = vadd.f32 %v7815_v17, %v7809_v47 }
 0x7ee   :  { %7817 = vadd.xlane.f32.xlu1 %v7816_v16  ;;  %v7889_v16 = vld [vmem:[%s12929_s30] sm:$0x3] }
 0x7ff   :  { %7860 = vperm.xlu1 %9212, %v8932_v57   ;;  %v7890_v57 = vld [vmem:[%s12930_s25] sm:$0x3] }
 0x802   :  { %7845 = vperm.xlu0 %9211, %v8931_v30  }
 0x875   :  { %v7801_v58 = vpop.xlane.xlu0 %7800 }
 0x876   :  { %v7819_v12 = vmul.f32 0.01, %v7801_v58 }
 0x877   :  { %v7818_v31 = vpop.xlane.xlu1 %7817 }
 0x878   :  { %v7820_v3 = vmul.f32 0.01, %v7818_v31  ;;  %v7821_v37 = vmul.f32 %v7819_v12, %v7819_v12  ;;  %v7827_v21 = vsub.f32 %v12325_v33, %v7819_v12  ;;  %v7828_v59 = vsub.f32 %v12336_v15, %v7819_v12 }
 0x879   :  { %v7825_v1 = vsub.f32 %v12320_v26, %v7819_v12  ;;  %v7826_v46 = vsub.f32 %v12315_v13, %v7819_v12  ;;  %v7829_v49 = vsub.f32 %v12353_v51, %v7819_v12  ;;  %v7830_v36 = vsub.f32 %v7697_v40, %v7819_v12 }
 0x87a   :  { %v7822_v8 = vsub.f32 %v7820_v3, %v7821_v37  ;;  %v7831_v50 = vsub.f32 %v12358_v63, %v7819_v12  ;;  %v7832_v9 = vsub.f32 %v7738_v60, %v7819_v12 }
 0x87b   :  { %v7861_v56 = vpop.permute.xlu1 %7860 }
 0x87c   :  { %v7833_v20 = vadd.f32 1e-05, %v7822_v8 }
 0x87d   :  { %v7846_v53 = vpop.permute.xlu0 %7845 }
 0x87e   :  { %9233 = vrsqrt.f32 %v7833_v20 }
 0x88b   :  { %v9234_v23 = vpop.eup %9233 }
 0x88c   :  { %v7837_v2 = vmul.f32 %v9234_v23, %v7827_v21  ;;  %v7838_v5 = vmul.f32 %v9234_v23, %v7828_v59  ;;  %v7835_v38 = vmul.f32 %v9234_v23, %v7825_v1  ;;  %v7836_v39 = vmul.f32 %v9234_v23, %v7826_v46 }
 0x88d   :  { %v7839_v7 = vmul.f32 %v9234_v23, %v7829_v49  ;;  %v7840_v33 = vmul.f32 %v9234_v23, %v7830_v36  ;;  %v7841_v11 = vmul.f32 %v9234_v23, %v7831_v50  ;;  %v7842_v15 = vmul.f32 %v9234_v23, %v7832_v9 }
 0x88e   :  { %v7850_v27 = vmul.f32 %v7846_v53, %v7837_v2  ;;  %v7851_v26 = vmul.f32 %v7846_v53, %v7838_v5  ;;  %v7848_v14 = vmul.f32 %v7846_v53, %v7835_v38  ;;  %v7849_v13 = vmul.f32 %v7846_v53, %v7836_v39 }
 0x88f   :  { %v7852_v62 = vmul.f32 %v7846_v53, %v7839_v7  ;;  %v7853_v51 = vmul.f32 %v7846_v53, %v7840_v33  ;;  %v7854_v40 = vmul.f32 %v7846_v53, %v7841_v11  ;;  %v7855_v22 = vmul.f32 %v7846_v53, %v7842_v15 }
 0x890   :  { %v7865_v63 = vadd.f32 %v7861_v56, %v7850_v27  ;;  %v7866_v60 = vadd.f32 %v7861_v56, %v7851_v26  ;;  %v7863_v44 = vadd.f32 %v7861_v56, %v7848_v14  ;;  %v7864_v24 = vadd.f32 %v7861_v56, %v7849_v13 }
 0x891   :  { %v7867_v55 = vadd.f32 %v7861_v56, %v7852_v62  ;;  %v7868_v10 = vadd.f32 %v7861_v56, %v7853_v51  ;;  %v7869_v48 = vadd.f32 %v7861_v56, %v7854_v40  ;;  %v7870_v54 = vadd.f32 %v7861_v56, %v7855_v22 }
 0x892   :  { %v7873_v47 = vmax.f32 %v7865_v63, 0.0  ;;  %v7874_v28 = vmax.f32 %v7866_v60, 0.0  ;;  %v7871_v41 = vmax.f32 %v7863_v44, 0.0  ;;  %v7872_v17 = vmax.f32 %v7864_v24, 0.0 }
 0x893   :  { %v7875_v30 = vmax.f32 %v7867_v55, 0.0  ;;  %v7876_v58 = vmax.f32 %v7868_v10, 0.0  ;;  %v7877_v34 = vmax.f32 %v7869_v48, 0.0  ;;  %v7878_v32 = vmax.f32 %v7870_v54, 0.0 }
 0x894   :  { %v7881_v12 = vmul.f32 %v7873_v47, %v12328_v6  ;;  %v7882_v31 = vmul.f32 %v7874_v28, %v12339_v4  ;;  %v7879_v3 = vmul.f32 %v7871_v41, %v12323_v42  ;;  %v7880_v37 = vmul.f32 %v7872_v17, %v12318_v0 }
 0x895   :  { %v7883_v8 = vmul.f32 %v7875_v30, %v12347_v19  ;;  %v7884_v20 = vmul.f32 %v7876_v58, %v12356_v52  ;;  %v7885_v29 = vmul.f32 %v7877_v34, %v12350_v18  ;;  %v7886_v21 = vmul.f32 %v7878_v32, %v12361_v61 }
 0x896   :  { %v8024_v35 = vsel %vm12389_vm12, %v7881_v12, -1e+30  ;;  %v8025_v25 = vsel %vm12393_vm13, %v7882_v31, -1e+30  ;;  %v7902_v6 = vsel %vm12389_vm12, %v7879_v3, -1e+30  ;;  %v7923_v58 = vrot.slane %v7889_v16, %v12916_v45 }
 0x897   :  { %v8026_v4 = vmax.f32 %v8024_v35, %v8025_v25  ;;  %v7903_v42 = vsel %vm12393_vm13, %v7880_v37, -1e+30  ;;  %v8121_v19 = vsel %vm12389_vm12, %v7883_v8, -1e+30  ;;  %v8122_v52 = vsel %vm12393_vm13, %v7884_v20, -1e+30 }
 0x898   :  { %v7904_v0 = vmax.f32 %v7902_v6, %v7903_v42  ;;  %v8123_v59 = vmax.f32 %v8121_v19, %v8122_v52  ;;  %v8218_v1 = vsel %vm12389_vm12, %v7885_v29, -1e+30  ;;  %v8219_v46 = vsel %vm12393_vm13, %v7886_v21, -1e+30 }
 0x899   :  { %8027 = vmax.xlane.f32.xlu1 %v8026_v4  ;;  %v8220_v23 = vmax.f32 %v8218_v1, %v8219_v46  ;;  %v7927_v12 = vrot.slane %v7889_v16, %v12915_v43  ;;  %v7939_v31 = vrot.slane %v7890_v57, %v12916_v45  ;;  %v7943_v3 = vrot.slane %v7890_v57, %v12915_v43 }
 0x89a   :  { %7905 = vmax.xlane.f32.xlu0 %v7904_v0 }
 0x89e   :  { %8124 = vmax.xlane.f32.xlu0 %v8123_v59 }
 0x8a2   :  { %8221 = vmax.xlane.f32.xlu0 %v8220_v23 }
 0x922   :  { %v8028_v49 = vpop.xlane.xlu1 %8027 }
 0x923   :  { %v8029_v36 = vsub.f32 %v8024_v35, %v8028_v49  ;;  %v8030_v50 = vsub.f32 %v8025_v25, %v8028_v49  ;;  %v7906_v9 = vpop.xlane.xlu0 %7905 }
 0x924   :  { %v7907_v2 = vsub.f32 %v7902_v6, %v7906_v9  ;;  %v7908_v5 = vsub.f32 %v7903_v42, %v7906_v9 }
 0x925   :  { %v8031_v18 = vmul.f32 1.442695, %v8029_v36  ;;  %v8033_v38 = vmul.f32 1.442695, %v8030_v50 }
 0x926   :  { %v7909_v61 = vmul.f32 1.442695, %v7907_v2  ;;  %v7911_v39 = vmul.f32 1.442695, %v7908_v5 }
 0x927   :  { %9235 = vpow2.f32 %v8031_v18  ;;  %v8125_v53 = vpop.xlane.xlu0 %8124 }
 0x928   :  { %9237 = vpow2.f32 %v8033_v38  ;;  %v8126_v7 = vsub.f32 %v8121_v19, %v8125_v53  ;;  %v8127_v33 = vsub.f32 %v8122_v52, %v8125_v53 }
 0x929   :  { %9239 = vpow2.f32 %v7909_v61 }
 0x92a   :  { %9241 = vpow2.f32 %v7911_v39  ;;  %v8128_v11 = vmul.f32 1.442695, %v8126_v7  ;;  %v8130_v15 = vmul.f32 1.442695, %v8127_v33 }
 0x92b   :  { %v8222_v27 = vpop.xlane.xlu0 %8221 }
 0x92c   :  { %9243 = vpow2.f32 %v8128_v11  ;;  %v8223_v26 = vsub.f32 %v8218_v1, %v8222_v27  ;;  %v8224_v14 = vsub.f32 %v8219_v46, %v8222_v27 }
 0x92d   :  { %9245 = vpow2.f32 %v8130_v15 }
 0x92e   :  { %v8225_v13 = vmul.f32 1.442695, %v8223_v26  ;;  %v8227_v56 = vmul.f32 1.442695, %v8224_v14  ;;  %v12434_v26 = vld [vmem:[%s12931_s1] sm:$0xff]  ;;  %v12439_v14 = vld [vmem:[%s12931_s1 + $0x8] sm:$0xff] }
 0x930   :  { %9247 = vpow2.f32 %v8225_v13  ;;  %v12444_v13 = vld [vmem:[%s12932_s26] sm:$0xff] }
 0x931   :  { %9249 = vpow2.f32 %v8227_v56  ;;  %v12449_v56 = vld [vmem:[%s12932_s26 + $0x8] sm:$0xff] }
 0x934   :  { %v9236_v62 = vpop.eup %9235 }
 0x935   :  { %v9238_v51 = vpop.eup %9237 }
 0x936   :  { %v9240_v40 = vpop.eup %9239  ;;  %v8035_v22 = vadd.f32 %v9238_v51, %v9236_v62 }
 0x937   :  { %v9242_v63 = vpop.eup %9241 }
 0x938   :  { %8036 = vadd.xlane.f32.xlu0 %v8035_v22  ;;  %v7913_v60 = vadd.f32 %v9242_v63, %v9240_v40 }
 0x939   :  { %v9244_v44 = vpop.eup %9243 }
 0x93a   :  { %v9246_v24 = vpop.eup %9245  ;;  %7914 = vadd.xlane.f32.xlu1 %v7913_v60 }
 0x93b   :  { %v8132_v55 = vadd.f32 %v9246_v24, %v9244_v44 }
 0x93d   :  { %v9248_v10 = vpop.eup %9247 }
 0x93e   :  { %v9250_v48 = vpop.eup %9249  ;;  %8133 = vadd.xlane.f32.xlu1 %v8132_v55  ;;  %v9301_v55 = vmov 1966171168  }
 0x93f   :  { %v8229_v54 = vadd.f32 %v9250_v48, %v9248_v10 }
 0x941   :  { %8230 = vadd.xlane.f32.xlu0 %v8229_v54 }
 0x9c1   :  { %v8037_v47 = vpop.xlane.xlu0 %8036 }
 0x9c2   :  { %9251 = vrcp.f32 %v8037_v47 }
 0x9c3   :  { %v7915_v28 = vpop.xlane.xlu1 %7914 }
 0x9c4   :  { %9253 = vrcp.f32 %v7915_v28 }
 0x9c7   :  { %v8134_v41 = vpop.xlane.xlu1 %8133 }
 0x9c8   :  { %9255 = vrcp.f32 %v8134_v41 }
 0x9ca   :  { %v8231_v17 = vpop.xlane.xlu0 %8230 }
 0x9cb   :  { %9257 = vrcp.f32 %v8231_v17 }
 0x9cf   :  { %v9252_v30 = vpop.eup %9251 }
 0x9d0   :  { %v8039_v8 = vmul.f32 %v9252_v30, %v9236_v62  ;;  %v8040_v20 = vmul.f32 %v9252_v30, %v9238_v51 }
 0x9d1   :  { %v9254_v37 = vpop.eup %9253 }
 0x9d2   :  { %v7917_v34 = vmul.f32 %v9254_v37, %v9240_v40  ;;  %v7918_v32 = vmul.f32 %v9254_v37, %v9242_v63  ;;  %v8046_v0 = vmul.f32 %v8039_v8, %v7939_v31  ;;  %v8047_v19 = vmul.f32 %v8040_v20, %v7943_v3  ;;  %v12456_v63 = vld [vmem:[%s12933_s9] sm:$0x3] }
 0x9d3   :  { %v8041_v52 = vmul.f32 %v8039_v8, %v7923_v58  ;;  %v8042_v29 = vmul.f32 %v8040_v20, %v7927_v12  ;;  %v7990_v41 = vrot.slane %v12456_v63, %v12916_v45  ;;  %v7994_v17 = vrot.slane %v12456_v63, %v12915_v43 }
 0x9d4   :  { %v7930_v35 = vmul.f32 %v7923_v58, %v7917_v34  ;;  %v7931_v25 = vmul.f32 %v7927_v12, %v7918_v32  ;;  %v7946_v6 = vmul.f32 %v7939_v31, %v7917_v34  ;;  %v7947_v4 = vmul.f32 %v7943_v3, %v7918_v32 }
 0x9d5   :  { %v9256_v42 = vpop.eup %9255  ;;  %v8048_v2 = vadd.f32 %v8047_v19, %v8046_v0  ;;  %v8043_v5 = vadd.f32 %v8042_v29, %v8041_v52 }
 0x9d6   :  { %v7932_v21 = vadd.f32 %v7931_v25, %v7930_v35  ;;  %v7948_v59 = vadd.f32 %v7947_v4, %v7946_v6  ;;  %v8136_v1 = vmul.f32 %v9256_v42, %v9244_v44  ;;  %v8137_v46 = vmul.f32 %v9256_v42, %v9246_v24  ;;  %v12463_v24 = vld [vmem:[%s12933_s9] sm:$0x3] }
 0x9d7   :  { %v8090_v57 = vrot.slane %v12463_v24, %v12916_v45  ;;  %v8094_v30 = vrot.slane %v12463_v24, %v12915_v43 }
 0x9d8   :  { %v9258_v23 = vpop.eup %9257  ;;  %7933 = vadd.xlane.f32.xlu1 %v7932_v21  ;;  %7949 = vadd.xlane.f32.xlu0 %v7948_v59  ;;  %v8143_v49 = vmul.f32 %v8136_v1, %v7939_v31  ;;  %v8144_v36 = vmul.f32 %v8137_v46, %v7943_v3  ;;  %v8138_v50 = vmul.f32 %v8136_v1, %v7923_v58 }
 0x9d9   :  { %v8139_v9 = vmul.f32 %v8137_v46, %v7927_v12  ;;  %v8233_v18 = vmul.f32 %v9258_v23, %v9248_v10  ;;  %v8234_v38 = vmul.f32 %v9258_v23, %v9250_v48  ;;  %v12465_v10 = vunpack.c.l.s4 %v9301_v55 }
 0x9da   :  { %v8145_v61 = vadd.f32 %v8144_v36, %v8143_v49 }
 0x9db   :  { %v8140_v39 = vadd.f32 %v8139_v9, %v8138_v50  ;;  %v8240_v53 = vmul.f32 %v8233_v18, %v7939_v31  ;;  %v8241_v7 = vmul.f32 %v8234_v38, %v7943_v3  ;;  %v8235_v33 = vmul.f32 %v8233_v18, %v7923_v58 }
 0x9dc   :  { %8049 = vadd.xlane.f32.xlu0 %v8048_v2  ;;  %8044 = vadd.xlane.f32.xlu1 %v8043_v5  ;;  %v8236_v11 = vmul.f32 %v8234_v38, %v7927_v12 }
 0x9dd   :  { %v8242_v15 = vadd.f32 %v8241_v7, %v8240_v53 }
 0x9de   :  { %v8237_v27 = vadd.f32 %v8236_v11, %v8235_v33 }
 0x9e0   :  { %8146 = vadd.xlane.f32.xlu0 %v8145_v61  ;;  %8141 = vadd.xlane.f32.xlu1 %v8140_v39 }
 0x9e4   :  { %8243 = vadd.xlane.f32.xlu0 %v8242_v15  ;;  %8238 = vadd.xlane.f32.xlu1 %v8237_v27 }
 0xa61   :  { %v7934_v62 = vpop.xlane.xlu1 %7933  ;;  %v7950_v51 = vpop.xlane.xlu0 %7949 }
 0xa62   :  { %v7953_v40 = vmul.f32 %v12434_v26, %v7934_v62  ;;  %v7954_v22 = vmul.f32 %v12439_v14, %v7934_v62  ;;  %v7969_v60 = vmul.f32 %v12444_v13, %v7950_v51  ;;  %v7970_v44 = vmul.f32 %v12449_v56, %v7950_v51 }
 0xa64   :  { %v7955_v48 = vrot.slane %v7953_v40, 4  ;;  %v7961_v54 = vrot.slane %v7954_v22, 4  ;;  %v7971_v47 = vrot.slane %v7969_v60, 4  ;;  %v7977_v28 = vrot.slane %v7970_v44, 4 }
 0xa65   :  { %v8045_v16 = vpop.xlane.xlu1 %8044  ;;  %v8050_v58 = vpop.xlane.xlu0 %8049 }
 0xa66   :  { %v7956_v12 = vadd.f32 %v7955_v48, %v7953_v40  ;;  %v7962_v31 = vadd.f32 %v7961_v54, %v7954_v22  ;;  %v7972_v3 = vadd.f32 %v7971_v47, %v7969_v60  ;;  %v7978_v37 = vadd.f32 %v7977_v28, %v7970_v44 }
 0xa67   :  { %v8053_v8 = vmul.f32 %v8045_v16, %v12434_v26  ;;  %v8054_v20 = vmul.f32 %v8045_v16, %v12439_v14  ;;  %v8069_v34 = vmul.f32 %v8050_v58, %v12444_v13  ;;  %v8070_v32 = vmul.f32 %v8050_v58, %v12449_v56 }
 0xa68   :  { %v7957_v35 = vrot.slane %v7956_v12, 2  ;;  %v7963_v25 = vrot.slane %v7962_v31, 2  ;;  %v7973_v6 = vrot.slane %v7972_v3, 2  ;;  %v7979_v4 = vrot.slane %v7978_v37, 2 }
 0xa69   :  { %v8055_v42 = vrot.slane %v8053_v8, 4  ;;  %v8061_v0 = vrot.slane %v8054_v20, 4  ;;  %v8071_v19 = vrot.slane %v8069_v34, 4  ;;  %v8077_v52 = vrot.slane %v8070_v32, 4  ;;  %v8142_v53 = vpop.xlane.xlu1 %8141  ;;  %v8147_v55 = vpop.xlane.xlu0 %8146 }
 0xa6a   :  { %v7958_v29 = vadd.f32 %v7957_v35, %v7956_v12  ;;  %v7964_v21 = vadd.f32 %v7963_v25, %v7962_v31  ;;  %v7974_v59 = vadd.f32 %v7973_v6, %v7972_v3  ;;  %v7980_v1 = vadd.f32 %v7979_v4, %v7978_v37 }
 0xa6b   :  { %v8056_v46 = vadd.f32 %v8055_v42, %v8053_v8  ;;  %v8062_v23 = vadd.f32 %v8061_v0, %v8054_v20  ;;  %v8072_v49 = vadd.f32 %v8071_v19, %v8069_v34  ;;  %v8078_v36 = vadd.f32 %v8077_v52, %v8070_v32 }
 0xa6c   :  { %v7959_v50 = vrot.slane %v7958_v29, 1  ;;  %v7965_v9 = vrot.slane %v7964_v21, 1  ;;  %v7975_v2 = vrot.slane %v7974_v59, 1  ;;  %v7981_v5 = vrot.slane %v7980_v1, 1 }
 0xa6d   :  { %v8057_v18 = vrot.slane %v8056_v46, 2  ;;  %v8063_v38 = vrot.slane %v8062_v23, 2  ;;  %v8073_v61 = vrot.slane %v8072_v49, 2  ;;  %v8079_v39 = vrot.slane %v8078_v36, 2  ;;  %v8239_v34 = vpop.xlane.xlu1 %8238  ;;  %v8244_v52 = vpop.xlane.xlu0 %8243 }
 0xa6e   :  { %v7960_v7 = vadd.f32 %v7959_v50, %v7958_v29  ;;  %v7966_v33 = vadd.f32 %v7965_v9, %v7964_v21  ;;  %v7976_v11 = vadd.f32 %v7975_v2, %v7974_v59  ;;  %v7982_v15 = vadd.f32 %v7981_v5, %v7980_v1 }
 0xa6f   :  { %v8058_v27 = vadd.f32 %v8057_v18, %v8056_v46  ;;  %v8064_v62 = vadd.f32 %v8063_v38, %v8062_v23  ;;  %v8074_v51 = vadd.f32 %v8073_v61, %v8072_v49  ;;  %v8080_v40 = vadd.f32 %v8079_v39, %v8078_v36 }
 0xa70   :  { %v7983_v22 = vadd.f32 %v7976_v11, %v7960_v7  ;;  %v7984_v63 = vadd.f32 %v7982_v15, %v7966_v33  ;;  %v8150_v60 = vmul.f32 %v8142_v53, %v12434_v26  ;;  %v8151_v44 = vmul.f32 %v8142_v53, %v12439_v14  ;;  %v8182_v53 = vld [vmem:[%s12933_s9] sm:$0x3] }
 0xa71   :  { %v8059_v48 = vrot.slane %v8058_v27, 1  ;;  %v8065_v54 = vrot.slane %v8064_v62, 1  ;;  %v8075_v47 = vrot.slane %v8074_v51, 1  ;;  %v8081_v28 = vrot.slane %v8080_v40, 1 }
 0xa72   :  { %v7997_v16 = vadd.f32 %v7990_v41, %v7983_v22  ;;  %v7998_v58 = vadd.f32 %v7994_v17, %v7984_v63  ;;  %v8152_v12 = vrot.slane %v8150_v60, 4  ;;  %v8158_v31 = vrot.slane %v8151_v44, 4 }
 0xa73   :  { %v8060_v3 = vadd.f32 %v8059_v48, %v8058_v27  ;;  %v8066_v37 = vadd.f32 %v8065_v54, %v8064_v62  ;;  %v8076_v8 = vadd.f32 %v8075_v47, %v8074_v51  ;;  %v8082_v20 = vadd.f32 %v8081_v28, %v8080_v40 }
 0xa74   :  { %9259 = vtanh.f32 %v7997_v16  ;;  %v8153_v32 = vadd.f32 %v8152_v12, %v8150_v60  ;;  %v8159_v35 = vadd.f32 %v8158_v31, %v8151_v44  ;;  %v8166_v25 = vmul.f32 %v8147_v55, %v12444_v13  ;;  %v12934_v60 = vld [vmem:[#allocation5_spill] sm:$0xff] }
 0xa75   :  { %9261 = vtanh.f32 %v7998_v58  ;;  %v8083_v6 = vadd.f32 %v8076_v8, %v8060_v3  ;;  %v8084_v4 = vadd.f32 %v8082_v20, %v8066_v37  ;;  %v8167_v42 = vmul.f32 %v8147_v55, %v12449_v56  ;;  %v8279_v37 = vld [vmem:[%s12933_s9] sm:$0x3] }
 0xa76   :  { %v8154_v0 = vrot.slane %v8153_v32, 2  ;;  %v8160_v41 = vrot.slane %v8159_v35, 2  ;;  %v8168_v17 = vrot.slane %v8166_v25, 4  ;;  %v8247_v19 = vmul.f32 %v8239_v34, %v12434_v26 }
 0xa77   :  { %v8097_v29 = vadd.f32 %v8090_v57, %v8083_v6  ;;  %v8098_v21 = vadd.f32 %v8094_v30, %v8084_v4  ;;  %v8174_v59 = vrot.slane %v8167_v42, 4  ;;  %v8248_v1 = vmul.f32 %v8239_v34, %v12439_v14 }
 0xa78   :  { %v8155_v46 = vadd.f32 %v8154_v0, %v8153_v32  ;;  %v8161_v23 = vadd.f32 %v8160_v41, %v8159_v35  ;;  %v8169_v49 = vadd.f32 %v8168_v17, %v8166_v25  ;;  %v8249_v36 = vrot.slane %v8247_v19, 4 }
 0xa79   :  { %9263 = vtanh.f32 %v8097_v29  ;;  %v8175_v50 = vadd.f32 %v8174_v59, %v8167_v42  ;;  %v8255_v9 = vrot.slane %v8248_v1, 4  ;;  %v8263_v26 = vmul.f32 %v8244_v52, %v12444_v13 }
 0xa7a   :  { %9265 = vtanh.f32 %v8098_v21  ;;  %v8156_v2 = vrot.slane %v8155_v46, 1  ;;  %v8162_v5 = vrot.slane %v8161_v23, 1  ;;  %v8170_v57 = vrot.slane %v8169_v49, 2 }
 0xa7b   :  { %v8176_v18 = vrot.slane %v8175_v50, 2  ;;  %v8250_v38 = vadd.f32 %v8249_v36, %v8247_v19  ;;  %v8256_v24 = vadd.f32 %v8255_v9, %v8248_v1  ;;  %v8264_v30 = vmul.f32 %v8244_v52, %v12449_v56 }
 0xa7c   :  { %v8006_v14 = vunpack.c.0.s8 %v12465_v10  ;;  %v8171_v61 = vadd.f32 %v8170_v57, %v8169_v49  ;;  %v8265_v39 = vrot.slane %v8263_v26, 4  ;;  %v8157_v15 = vadd.f32 %v8156_v2, %v8155_v46 }
 0xa7d   :  { %v8177_v7 = vadd.f32 %v8176_v18, %v8175_v50  ;;  %v8251_v33 = vrot.slane %v8250_v38, 2  ;;  %v8257_v13 = vrot.slane %v8256_v24, 2  ;;  %v8271_v11 = vrot.slane %v8264_v30, 4 }
 0xa7e   :  { %v8163_v27 = vadd.f32 %v8162_v5, %v8161_v23  ;;  %v8172_v62 = vrot.slane %v8171_v61, 1  ;;  %v8266_v51 = vadd.f32 %v8265_v39, %v8263_v26  ;;  %v8009_v10 = vsub.s32 %v8006_v14, %v12934_v60 }
 0xa7f   :  { %v8178_v40 = vrot.slane %v8177_v7, 1  ;;  %v8252_v22 = vadd.f32 %v8251_v33, %v8250_v38  ;;  %v8258_v63 = vadd.f32 %v8257_v13, %v8256_v24  ;;  %v8272_v56 = vadd.f32 %v8271_v11, %v8264_v30 }
 0xa80   :  { %v8187_v44 = vrot.slane %v8182_v53, %v12916_v45  ;;  %v8173_v55 = vadd.f32 %v8172_v62, %v8171_v61  ;;  %v8267_v48 = vrot.slane %v8266_v51, 2  ;;  %v8191_v47 = vrot.slane %v8182_v53, %v12915_v43 }
 0xa81   :  { %v9260_v54 = vpop.eup %9259  ;;  %v8179_v28 = vadd.f32 %v8178_v40, %v8177_v7  ;;  %v8253_v16 = vrot.slane %v8252_v22, 1  ;;  %v8273_v58 = vrot.slane %v8272_v56, 2  ;;  %v8259_v3 = vrot.slane %v8258_v63, 1 }
 0xa82   :  { %v9262_v12 = vpop.eup %9261  ;;  %v8180_v31 = vadd.f32 %v8173_v55, %v8157_v15  ;;  %v8268_v8 = vadd.f32 %v8267_v48, %v8266_v51  ;;  %v12935_v4 = vlaneseq  ;;  %v8284_v17 = vrot.slane %v8279_v37, %v12916_v45 }
 0xa83   :  { %v8003_v20 = vcombine.low %v9260_v54, %v9262_v12  ;;  %v8181_v34 = vadd.f32 %v8179_v28, %v8163_v27  ;;  %v8254_v35 = vadd.f32 %v8253_v16, %v8252_v22  ;;  %v8274_v6 = vadd.f32 %v8273_v58, %v8272_v56 }
 0xa84   :  { %v8194_v32 = vadd.f32 %v8187_v44, %v8180_v31  ;;  %v8269_v25 = vrot.slane %v8268_v8, 1  ;;  %vm12504_vm14 = vcmp.lt.s32.totalorder %v12935_v4, 256  ;;  %v8260_v52 = vadd.f32 %v8259_v3, %v8258_v63 }
 0xa85   :  { %v8010_v0 = vrot.slane %v8003_v20, %v8009_v10  ;;  %v8195_v41 = vadd.f32 %v8191_v47, %v8181_v34  ;;  %v8275_v21 = vrot.slane %v8274_v6, 1  ;;  %v8288_v23 = vrot.slane %v8279_v37, %v12915_v43 }
 0xa86   :  { %v9264_v19 = vpop.eup %9263  ;;  %9267 = vtanh.f32 %v8194_v32  ;;  %v8270_v29 = vadd.f32 %v8269_v25, %v8268_v8 }
 0xa87   :  { %v9266_v59 = vpop.eup %9265  ;;  %v8017_v1 = vrot.slane %v8010_v0, %v8009_v10  ;;  %9269 = vtanh.f32 %v8195_v41  ;;  %v8276_v49 = vadd.f32 %v8275_v21, %v8274_v6 }
 0xa88   :  { %v8103_v46 = vcombine.low %v9264_v19, %v9266_v59  ;;  %v8277_v36 = vadd.f32 %v8270_v29, %v8254_v35 }
 0xa89   :  { %8023 = vst.msk [vmem:[%s12938_s17] ss:$4 sm:$0x3] %vm12504_vm14, %v8017_v1  ;;  %v8278_v50 = vadd.f32 %v8276_v49, %v8260_v52 }
 0xa8a   :  { %v8110_v45 = vrot.slane %v8103_v46, %v8009_v10  ;;  %v8291_v9 = vadd.f32 %v8284_v17, %v8277_v36 }
 0xa8b   :  { %v8292_v2 = vadd.f32 %v8288_v23, %v8278_v50 }
 0xa8c   :  { %v8117_v26 = vrot.slane %v8110_v45, %v8009_v10  ;;  %9271 = vtanh.f32 %v8291_v9 }
 0xa8d   :  { %9273 = vtanh.f32 %v8292_v2 }
 0xa8e   :  { %8933 = vst.msk [vmem:[%s12938_s17 + $0x1] ss:$4 sm:$0x3] %vm12504_vm14, %v8117_v26 }
 0xa93   :  { %v9268_v43 = vpop.eup %9267 }
 0xa94   :  { %v9270_v5 = vpop.eup %9269 }
 0xa95   :  { %v8200_v57 = vcombine.low %v9268_v43, %v9270_v5 }
 0xa97   :  { %v8207_v18 = vrot.slane %v8200_v57, %v8009_v10 }
 0xa99   :  { %v9272_v38 = vpop.eup %9271  ;;  %v8214_v24 = vrot.slane %v8207_v18, %v8009_v10 }
 0xa9a   :  { %v9274_v30 = vpop.eup %9273 }
 0xa9b   :  { %8934 = vst.msk [vmem:[%s12938_s17 + $0x2] ss:$4 sm:$0x3] %vm12504_vm14, %v8214_v24  ;;  %v8297_v14 = vcombine.low %v9272_v38, %v9274_v30 }
 0xa9d   :  { %v8304_v61 = vrot.slane %v8297_v14, %v8009_v10 }
 0xa9f   :  { %v8311_v39 = vrot.slane %v8304_v61, %v8009_v10 }
 0xaa1   :  { %8935 = vst.msk [vmem:[%s12938_s17 + $0x3] ss:$4 sm:$0x3] %vm12504_vm14, %v8311_v39 }

</bundles_post_ra>
